<compile_context>
chip_gen: v7x
topology: tpu7x:2x2x1
jax: 0.10.0
libtpu: 0.0.40
codegen_flags: <defaults>
</compile_context>

<pallas_src>
import numpy as np

import jax
import jax.numpy as jnp
from jax.experimental import pallas as pl
from jax.experimental.pallas import tpu as pltpu

BN_EPS = 1e-5
CDT = jnp.bfloat16          # MXU operand dtype (accumulation is always f32)


# ---------------------------------------------------------------------------
# Wrapper-side constant plumbing: BN folding + 0/1 tap-selector matrices.
# ---------------------------------------------------------------------------
def bn_fold(bn):
    scale = bn["gamma"] * jax.lax.rsqrt(bn["var"] + BN_EPS)
    shift = bn["beta"] - bn["mean"] * scale
    return scale.reshape(1, -1), shift.reshape(1, -1)


def _tap_selectors(H, W, k, stride, pad):
    """(k*k, Ho*Wo, H*W) 0/1 matrices: per-tap row gather encoding stride + padding."""
    Ho = (H + 2 * pad - k) // stride + 1
    Wo = (W + 2 * pad - k) // stride + 1
    T = np.zeros((k * k, Ho * Wo, H * W), np.float32)
    for ky in range(k):
        for kx in range(k):
            t = ky * k + kx
            for yo in range(Ho):
                yi = yo * stride + ky - pad
                if yi < 0 or yi >= H:
                    continue
                for xo in range(Wo):
                    xi = xo * stride + kx - pad
                    if 0 <= xi < W:
                        T[t, yo * Wo + xo, yi * W + xi] = 1.0
    return T


def pack_params(params, in_hw):
    """Fold BN into weights, build selectors, cast MXU operands to bf16.

    Returns (packed, proj_flags, meta); `packed` is the exact positional argument
    order consumed by the kernel after the x_cols input.
    """
    packed, proj_flags = [], []

    # conv1 (5x5 / stride 2 / pad 2, 1->32) as one GEMM; BN scale folded in.
    sc1, sh1 = bn_fold(params["bn1"])
    kh, kw, _, c1 = params["conv1_w"].shape
    kk = kh * kw
    k1_pad = -(-kk // 8) * 8                       # pad K 25 -> 32 (sublane aligned)
    w1 = params["conv1_w"].reshape(kk, c1) * sc1
    w1 = jnp.pad(w1, ((0, k1_pad - kk), (0, 0)))
    packed += [w1.astype(CDT), sh1]

    h1 = (in_hw + 2 * 2 - kh) // 2 + 1             # conv1 output spatial (16)
    hp = (h1 + 2 * 1 - 3) // 2 + 1                 # maxpool output spatial (8)
    packed.append(jnp.asarray(_tap_selectors(h1, h1, 3, 2, 1), CDT))   # maxpool taps

    spatial = hp
    for blk in params["layer1"] + params["layer2"] + params["layer3"]:
        stride = blk["stride"]
        hin = spatial
        hout = (hin + 2 * 1 - 3) // stride + 1
        spatial = hout
        cin, cout = blk["w1"].shape[2], blk["w1"].shape[3]
        s1, b1 = bn_fold(blk["bn1"])
        s2, b2 = bn_fold(blk["bn2"])
        packed.append(jnp.asarray(_tap_selectors(hin, hin, 3, stride, 1), CDT))
        packed.append(jnp.asarray(_tap_selectors(hout, hout, 3, 1, 1), CDT))
        packed.append((blk["w1"].reshape(9, cin, cout) * s1).astype(CDT))
        packed.append(b1)
        packed.append((blk["w2"].reshape(9, cout, cout) * s2).astype(CDT))
        packed.append(b2)
        has_proj = "wd" in blk
        proj_flags.append(has_proj)
        if has_proj:
            sd, bd = bn_fold(blk["bnd"])
            packed.append(jnp.asarray(_tap_selectors(hin, hin, 1, stride, 0)[0], CDT))
            packed.append((blk["wd"].reshape(cin, cout) * sd).astype(CDT))
            packed.append(bd)

    packed.append(params["fc1_w"].astype(CDT))
    packed.append(params["fc1_b"].astype(jnp.float32))
    packed.append(params["fc2_w"].astype(CDT))
    packed.append(params["fc2_b"].astype(jnp.float32))

    meta = {"m1": h1 * h1, "k1": k1_pad, "conv1_k": kh, "conv1_stride": 2, "conv1_pad": 2}
    return packed, proj_flags, meta


def conv1_im2col(x_nhwc, k, stride, pad, k_pad):
    """Input-layer patch extraction (wrapper-side; see TODO at top)."""
    B, H, W, C = x_nhwc.shape
    xp = jnp.pad(x_nhwc, ((0, 0), (pad, pad), (pad, pad), (0, 0)))
    Ho = (H + 2 * pad - k) // stride + 1
    Wo = (W + 2 * pad - k) // stride + 1
    cols = []
    for ky in range(k):
        for kx in range(k):
            cols.append(xp[:, ky:ky + stride * (Ho - 1) + 1:stride,
                           kx:kx + stride * (Wo - 1) + 1:stride, :])
    p = jnp.stack(cols, axis=3).reshape(B, Ho * Wo, k * k * C)
    if k_pad > k * k * C:
        p = jnp.pad(p, ((0, 0), (0, 0), (0, k_pad - k * k * C)))
    return p


# ---------------------------------------------------------------------------
# The single fused kernel: whole network for one image per grid step.
# ---------------------------------------------------------------------------
def make_kernel(proj_flags):
    bf16, f32 = jnp.bfloat16, jnp.float32

    def kernel(*refs):
        o_ref = refs[-1]
        it = iter(refs[:-1])
        nxt = lambda: next(it)  # noqa: E731

        def tap_conv(x_b, t_ref, w_ref):
            # in-kernel im2col: sum over taps of (row gather) @ (per-tap, BN-folded weight)
            acc = None
            for k in range(t_ref.shape[0]):
                g = jnp.dot(t_ref[k], x_b, preferred_element_type=f32).astype(bf16)
                y = jnp.dot(g, w_ref[k], preferred_element_type=f32)
                acc = y if acc is None else acc + y
            return acc

        # conv1 + BN + ReLU (BN scale pre-folded into the GEMM weight columns)
        xc = nxt()[0].astype(bf16)                                     # (M1, K1)
        w1_ref, b1_ref = nxt(), nxt()
        y = jnp.dot(xc, w1_ref[...], preferred_element_type=f32) + b1_ref[...]
        y = jnp.maximum(y, 0.0).astype(bf16)

        # fused 3x3 / stride-2 maxpool: window gathers + elementwise max
        # (inputs are post-ReLU >= 0, so the zero contribution of padded taps is a no-op)
        p_ref = nxt()
        x = None
        for k in range(p_ref.shape[0]):
            g = jnp.dot(p_ref[k], y, preferred_element_type=f32)
            x = g if x is None else jnp.maximum(x, g)

        # residual blocks: conv+BN+ReLU, conv+BN, shortcut, add, ReLU -- all fused
        for has_proj in proj_flags:
            t1_ref, t2_ref = nxt(), nxt()
            w1b_ref, s1b_ref, w2b_ref, s2b_ref = nxt(), nxt(), nxt(), nxt()
            if has_proj:
                sp_ref, wd_ref, sd_ref = nxt(), nxt(), nxt()
            xb = x.astype(bf16)
            h = jnp.maximum(tap_conv(xb, t1_ref, w1b_ref) + s1b_ref[...], 0.0).astype(bf16)
            g = tap_conv(h, t2_ref, w2b_ref) + s2b_ref[...]
            if has_proj:   # 1x1/stride downsample + BN fused into the same kernel
                xs = jnp.dot(sp_ref[...], xb, preferred_element_type=f32).astype(bf16)
                r = jnp.dot(xs, wd_ref[...], preferred_element_type=f32) + sd_ref[...]
            else:
                r = x
            x = jnp.maximum(g + r, 0.0)                                # f32

        # head: global average pool + fc1 + ReLU + fc2 (fused, no HBM round trip)
        wf1_ref, bf1_ref, wf2_ref, bf2_ref = nxt(), nxt(), nxt(), nxt()
        feat = jnp.mean(x, axis=0, keepdims=True).astype(bf16)         # (1, C)
        h = jnp.dot(feat, wf1_ref[...], preferred_element_type=f32) + bf1_ref[...]
        h = jnp.maximum(h, 0.0).astype(bf16)
        out = jnp.dot(h, wf2_ref[...], preferred_element_type=f32) + bf2_ref[...]

        assert next(it, None) is None, "kernel argument packing mismatch"
        o_ref[0] = out.astype(o_ref.dtype)

    return kernel


def build_lightresnet_forward(params, in_hw, num_classes):
    packed, proj_flags, meta = pack_params(params, in_hw)
    kernel = make_kernel(proj_flags)

    def _const_spec(a):
        ndim = a.ndim
        return pl.BlockSpec(tuple(a.shape), lambda i: (0,) * ndim)

    w_specs = [_const_spec(a) for a in packed]
    m1, k1 = meta["m1"], meta["k1"]

    def forward(x_nchw):
        x = jnp.transpose(x_nchw, (0, 2, 3, 1))                        # NCHW -> NHWC
        cols = conv1_im2col(x, meta["conv1_k"], meta["conv1_stride"],
                            meta["conv1_pad"], k1)                     # (B, M1, K1) f32
        B = cols.shape[0]
        out = pl.pallas_call(
            kernel,
            out_shape=jax.ShapeDtypeStruct((B, 1, num_classes), jnp.float32),
            grid=(B,),
            in_specs=[pl.BlockSpec((1, m1, k1), lambda i: (i, 0, 0))] + w_specs,
            out_specs=pl.BlockSpec((1, 1, num_classes), lambda i: (i, 0, 0)),
            compiler_params=pltpu.CompilerParams(
                dimension_semantics=("parallel",),      # megacore sharding on v7x
                vmem_limit_bytes=32 * 1024 * 1024,
            ),
        )(cols, *packed)
        return out.reshape(B, num_classes)

    return forward


# ---------------------------------------------------------------------------
# Pure-JAX reference (mirrors the PyTorch forward) for correctness checking.
# ---------------------------------------------------------------------------
def _ref_conv(x, w_hwio, stride, pad):
    return jax.lax.conv_general_dilated(
        x, w_hwio, (stride, stride), ((pad, pad), (pad, pad)),
        dimension_numbers=("NHWC", "HWIO", "NHWC"),
        precision=jax.lax.Precision.HIGHEST)


def _ref_bn(x, bn):
    return (x - bn["mean"]) * jax.lax.rsqrt(bn["var"] + BN_EPS) * bn["gamma"] + bn["beta"]


def _ref_block(x, p):
    stride = p["stride"]
    h = jnp.maximum(_ref_bn(_ref_conv(x, p["w1"], stride, 1), p["bn1"]), 0.0)
    h = _ref_bn(_ref_conv(h, p["w2"], 1, 1), p["bn2"])
    if "wd" in p:
        sc = _ref_bn(_ref_conv(x, p["wd"], stride, 0), p["bnd"])
    else:
        sc = x
    return jnp.maximum(h + sc, 0.0)


def reference_forward(x_nchw, params):
    x = jnp.transpose(x_nchw, (0, 2, 3, 1))
    x = jnp.maximum(_ref_bn(_ref_conv(x, params["conv1_w"], 2, 2), params["bn1"]), 0.0)
    x = jax.lax.reduce_window(x, -jnp.inf, jax.lax.max,
                              (1, 3, 3, 1), (1, 2, 2, 1),
                              ((0, 0), (1, 1), (1, 1), (0, 0)))
    for blk in params["layer1"] + params["layer2"] + params["layer3"]:
        x = _ref_block(x, blk)
    x = jnp.mean(x, axis=(1, 2))                       # adaptive avg pool (1,1) + flatten
    h = jnp.maximum(jnp.dot(x, params["fc1_w"], precision=jax.lax.Precision.HIGHEST)
                    + params["fc1_b"], 0.0)
    return jnp.dot(h, params["fc2_w"], precision=jax.lax.Precision.HIGHEST) + params["fc2_b"]


# ---------------------------------------------------------------------------
# Deterministic parameter construction
# ---------------------------------------------------------------------------
def _he(key, shape):
    fan_in = shape[0] * shape[1] * shape[2] if len(shape) == 4 else shape[0]
    return (jnp.sqrt(2.0 / fan_in) * jax.random.normal(key, shape)).astype(jnp.float32)


def _make_bn(key, c):
    k1, k2, k3, k4 = jax.random.split(key, 4)
    return {"gamma": (1.0 + 0.1 * jax.random.normal(k1, (c,))).astype(jnp.float32),
            "beta": (0.1 * jax.random.normal(k2, (c,))).astype(jnp.float32),
            "mean": (0.1 * jax.random.normal(k3, (c,))).astype(jnp.float32),
            "var": jax.random.uniform(k4, (c,), minval=0.5, maxval=1.5).astype(jnp.float32)}


def _make_block(key, cin, cout, stride):
    ks = jax.random.split(key, 6)
    p = {"stride": stride,
         "w1": _he(ks[0], (3, 3, cin, cout)),
         "bn1": _make_bn(ks[1], cout),
         "w2": _he(ks[2], (3, 3, cout, cout)),
         "bn2": _make_bn(ks[3], cout)}
    if stride != 1 or cin != cout:
        p["wd"] = _he(ks[4], (1, 1, cin, cout))
        p["bnd"] = _make_bn(ks[5], cout)
    return p


def make_params(key, num_blocks=(1, 1, 1), num_classes=1, feature_size=64):
    keys = jax.random.split(key, 16)
    params = {"conv1_w": _he(keys[0], (5, 5, 1, 32)), "bn1": _make_bn(keys[1], 32)}
    in_c, ki = 32, 2
    for li, (out_c, stride) in enumerate([(32, 1), (64, 2), (128, 2)], start=1):
        blocks = []
        for s in [stride] + [1] * (num_blocks[li - 1] - 1):
            blocks.append(_make_block(keys[ki], in_c, out_c, s))
            in_c = out_c
            ki += 1
        params[f"layer{li}"] = blocks
    params["fc1_w"] = _he(keys[ki], (128, feature_size)); ki += 1
    params["fc1_b"] = (0.01 * jax.random.normal(keys[ki], (1, feature_size))).astype(jnp.float32); ki += 1
    params["fc2_w"] = _he(keys[ki], (feature_size, num_classes)); ki += 1
    params["fc2_b"] = jnp.zeros((1, num_classes), jnp.float32)
    return params


# ---------------------------------------------------------------------------
if __name__ == "__main__":
    # batch=2, 1 input channel, 32x32 image, num_blocks=[1,1,1], feature_size=64,
    # num_classes=1  (matches LightResNet's forward).
    B, H, W = 2, 32, 32
    key = jax.random.PRNGKey(0)
    k_x, k_p = jax.random.split(key)
    x = jax.random.normal(k_x, (B, 1, H, W), dtype=jnp.float32)
    params = make_params(k_p, num_blocks=(1, 1, 1), num_classes=1, feature_size=64)

    fwd = jax.jit(build_lightresnet_forward(params, in_hw=H, num_classes=1))
    out = jax.block_until_ready(fwd(x))

    ref = reference_forward(x, params)
    assert out.shape == (B, 1), out.shape
    # bf16 MXU operands (f32 accumulation) vs. an f32/HIGHEST reference -> relaxed tolerance.
    err = float(jnp.max(jnp.abs(out - ref)))
    scale = float(jnp.max(jnp.abs(ref)))
    assert err <= 5e-2 * (1.0 + scale), f"max abs err {err} (ref scale {scale})"
    print("KERNEL_OK")
</pallas_src>

<mosaic_0001>
module attributes {stable_mosaic.version = 11 : i64} {
  func.func @kernel(%arg0: i32, %arg1: memref<1x256x32xf32, #tpu.memory_space<vmem>>, %arg2: memref<32x32xbf16, #tpu.memory_space<vmem>>, %arg3: memref<1x32xf32, #tpu.memory_space<vmem>>, %arg4: memref<9x64x256xbf16, #tpu.memory_space<vmem>>, %arg5: memref<9x64x64xbf16, #tpu.memory_space<vmem>>, %arg6: memref<9x64x64xbf16, #tpu.memory_space<vmem>>, %arg7: memref<9x32x32xbf16, #tpu.memory_space<vmem>>, %arg8: memref<1x32xf32, #tpu.memory_space<vmem>>, %arg9: memref<9x32x32xbf16, #tpu.memory_space<vmem>>, %arg10: memref<1x32xf32, #tpu.memory_space<vmem>>, %arg11: memref<9x16x64xbf16, #tpu.memory_space<vmem>>, %arg12: memref<9x16x16xbf16, #tpu.memory_space<vmem>>, %arg13: memref<9x32x64xbf16, #tpu.memory_space<vmem>>, %arg14: memref<1x64xf32, #tpu.memory_space<vmem>>, %arg15: memref<9x64x64xbf16, #tpu.memory_space<vmem>>, %arg16: memref<1x64xf32, #tpu.memory_space<vmem>>, %arg17: memref<16x64xbf16, #tpu.memory_space<vmem>>, %arg18: memref<32x64xbf16, #tpu.memory_space<vmem>>, %arg19: memref<1x64xf32, #tpu.memory_space<vmem>>, %arg20: memref<9x4x16xbf16, #tpu.memory_space<vmem>>, %arg21: memref<9x4x4xbf16, #tpu.memory_space<vmem>>, %arg22: memref<9x64x128xbf16, #tpu.memory_space<vmem>>, %arg23: memref<1x128xf32, #tpu.memory_space<vmem>>, %arg24: memref<9x128x128xbf16, #tpu.memory_space<vmem>>, %arg25: memref<1x128xf32, #tpu.memory_space<vmem>>, %arg26: memref<4x16xbf16, #tpu.memory_space<vmem>>, %arg27: memref<64x128xbf16, #tpu.memory_space<vmem>>, %arg28: memref<1x128xf32, #tpu.memory_space<vmem>>, %arg29: memref<128x64xbf16, #tpu.memory_space<vmem>>, %arg30: memref<1x64xf32, #tpu.memory_space<vmem>>, %arg31: memref<64x1xbf16, #tpu.memory_space<vmem>>, %arg32: memref<1x1xf32, #tpu.memory_space<vmem>>, %arg33: memref<1x1x1xf32, #tpu.memory_space<vmem>>) attributes {dimension_semantics = [#tpu.dimension_semantics<parallel>], iteration_bounds = array<i64: 2>, scalar_prefetch = 0 : i64, scratch_operands = 0 : i64, tpu.core_type = #tpu.core_type<tc>, window_params = [{transform_indices = @transform_0, window_bounds = array<i64: 1, 256, 32>}, {pipeline_mode = #tpu.pipeline_mode<synchronous>, transform_indices = @transform_1, window_bounds = array<i64: 32, 32>}, {pipeline_mode = #tpu.pipeline_mode<synchronous>, transform_indices = @transform_2, window_bounds = array<i64: 1, 32>}, {pipeline_mode = #tpu.pipeline_mode<synchronous>, transform_indices = @transform_3, window_bounds = array<i64: 9, 64, 256>}, {pipeline_mode = #tpu.pipeline_mode<synchronous>, transform_indices = @transform_4, window_bounds = array<i64: 9, 64, 64>}, {pipeline_mode = #tpu.pipeline_mode<synchronous>, transform_indices = @transform_5, window_bounds = array<i64: 9, 64, 64>}, {pipeline_mode = #tpu.pipeline_mode<synchronous>, transform_indices = @transform_6, window_bounds = array<i64: 9, 32, 32>}, {pipeline_mode = #tpu.pipeline_mode<synchronous>, transform_indices = @transform_7, window_bounds = array<i64: 1, 32>}, {pipeline_mode = #tpu.pipeline_mode<synchronous>, transform_indices = @transform_8, window_bounds = array<i64: 9, 32, 32>}, {pipeline_mode = #tpu.pipeline_mode<synchronous>, transform_indices = @transform_9, window_bounds = array<i64: 1, 32>}, {pipeline_mode = #tpu.pipeline_mode<synchronous>, transform_indices = @transform_10, window_bounds = array<i64: 9, 16, 64>}, {pipeline_mode = #tpu.pipeline_mode<synchronous>, transform_indices = @transform_11, window_bounds = array<i64: 9, 16, 16>}, {pipeline_mode = #tpu.pipeline_mode<synchronous>, transform_indices = @transform_12, window_bounds = array<i64: 9, 32, 64>}, {pipeline_mode = #tpu.pipeline_mode<synchronous>, transform_indices = @transform_13, window_bounds = array<i64: 1, 64>}, {pipeline_mode = #tpu.pipeline_mode<synchronous>, transform_indices = @transform_14, window_bounds = array<i64: 9, 64, 64>}, {pipeline_mode = #tpu.pipeline_mode<synchronous>, transform_indices = @transform_15, window_bounds = array<i64: 1, 64>}, {pipeline_mode = #tpu.pipeline_mode<synchronous>, transform_indices = @transform_16, window_bounds = array<i64: 16, 64>}, {pipeline_mode = #tpu.pipeline_mode<synchronous>, transform_indices = @transform_17, window_bounds = array<i64: 32, 64>}, {pipeline_mode = #tpu.pipeline_mode<synchronous>, transform_indices = @transform_18, window_bounds = array<i64: 1, 64>}, {pipeline_mode = #tpu.pipeline_mode<synchronous>, transform_indices = @transform_19, window_bounds = array<i64: 9, 4, 16>}, {pipeline_mode = #tpu.pipeline_mode<synchronous>, transform_indices = @transform_20, window_bounds = array<i64: 9, 4, 4>}, {pipeline_mode = #tpu.pipeline_mode<synchronous>, transform_indices = @transform_21, window_bounds = array<i64: 9, 64, 128>}, {pipeline_mode = #tpu.pipeline_mode<synchronous>, transform_indices = @transform_22, window_bounds = array<i64: 1, 128>}, {pipeline_mode = #tpu.pipeline_mode<synchronous>, transform_indices = @transform_23, window_bounds = array<i64: 9, 128, 128>}, {pipeline_mode = #tpu.pipeline_mode<synchronous>, transform_indices = @transform_24, window_bounds = array<i64: 1, 128>}, {pipeline_mode = #tpu.pipeline_mode<synchronous>, transform_indices = @transform_25, window_bounds = array<i64: 4, 16>}, {pipeline_mode = #tpu.pipeline_mode<synchronous>, transform_indices = @transform_26, window_bounds = array<i64: 64, 128>}, {pipeline_mode = #tpu.pipeline_mode<synchronous>, transform_indices = @transform_27, window_bounds = array<i64: 1, 128>}, {pipeline_mode = #tpu.pipeline_mode<synchronous>, transform_indices = @transform_28, window_bounds = array<i64: 128, 64>}, {pipeline_mode = #tpu.pipeline_mode<synchronous>, transform_indices = @transform_29, window_bounds = array<i64: 1, 64>}, {pipeline_mode = #tpu.pipeline_mode<synchronous>, transform_indices = @transform_30, window_bounds = array<i64: 64, 1>}, {pipeline_mode = #tpu.pipeline_mode<synchronous>, transform_indices = @transform_31, window_bounds = array<i64: 1, 1>}, {transform_indices = @transform_32, window_bounds = array<i64: 1, 1, 1>}]} {
    %c0 = arith.constant 0 : index
    %c0_0 = arith.constant 0 : index
    %c0_1 = arith.constant 0 : index
    %0 = vector.load %arg1[%c0, %c0_0, %c0_1] : memref<1x256x32xf32, #tpu.memory_space<vmem>>, vector<1x256x32xf32>
    %1 = vector.shape_cast %0 : vector<1x256x32xf32> to vector<256x32xf32>
    %2 = arith.truncf %1 : vector<256x32xf32> to vector<256x32xbf16>
    %c0_2 = arith.constant 0 : index
    %c0_3 = arith.constant 0 : index
    %3 = vector.load %arg2[%c0_2, %c0_3] : memref<32x32xbf16, #tpu.memory_space<vmem>>, vector<32x32xbf16>
    %cst = arith.constant dense<0.000000e+00> : vector<256x32xf32>
    %4 = tpu.matmul %2, %3, %cst {dimension_numbers = #tpu.dot_dimension_numbers<[1], [0], [0], [1], [0, 0, 1, 1], [], []>} : vector<256x32xbf16>, vector<32x32xbf16>, vector<256x32xf32> -> vector<256x32xf32>
    %c0_4 = arith.constant 0 : index
    %c0_5 = arith.constant 0 : index
    %5 = vector.load %arg3[%c0_4, %c0_5] : memref<1x32xf32, #tpu.memory_space<vmem>>, vector<1x32xf32>
    %6 = vector.broadcast %5 : vector<1x32xf32> to vector<256x32xf32>
    %7 = arith.addf %4, %6 : vector<256x32xf32>
    %cst_6 = arith.constant 0.000000e+00 : f32
    %8 = vector.broadcast %cst_6 : f32 to vector<256x32xf32>
    %9 = arith.maximumf %7, %8 : vector<256x32xf32>
    %10 = arith.truncf %9 : vector<256x32xf32> to vector<256x32xbf16>
    %c0_7 = arith.constant 0 : index
    %c0_8 = arith.constant 0 : index
    %c0_9 = arith.constant 0 : index
    %11 = vector.load %arg4[%c0_7, %c0_8, %c0_9] : memref<9x64x256xbf16, #tpu.memory_space<vmem>>, vector<1x64x256xbf16>
    %12 = vector.shape_cast %11 : vector<1x64x256xbf16> to vector<64x256xbf16>
    %cst_10 = arith.constant dense<0.000000e+00> : vector<64x32xf32>
    %13 = tpu.matmul %12, %10, %cst_10 {dimension_numbers = #tpu.dot_dimension_numbers<[1], [0], [0], [1], [0, 0, 1, 1], [], []>} : vector<64x256xbf16>, vector<256x32xbf16>, vector<64x32xf32> -> vector<64x32xf32>
    %c1 = arith.constant 1 : index
    %c0_11 = arith.constant 0 : index
    %c0_12 = arith.constant 0 : index
    %14 = vector.load %arg4[%c1, %c0_11, %c0_12] : memref<9x64x256xbf16, #tpu.memory_space<vmem>>, vector<1x64x256xbf16>
    %15 = vector.shape_cast %14 : vector<1x64x256xbf16> to vector<64x256xbf16>
    %cst_13 = arith.constant dense<0.000000e+00> : vector<64x32xf32>
    %16 = tpu.matmul %15, %10, %cst_13 {dimension_numbers = #tpu.dot_dimension_numbers<[1], [0], [0], [1], [0, 0, 1, 1], [], []>} : vector<64x256xbf16>, vector<256x32xbf16>, vector<64x32xf32> -> vector<64x32xf32>
    %17 = arith.maximumf %13, %16 : vector<64x32xf32>
    %c2 = arith.constant 2 : index
    %c0_14 = arith.constant 0 : index
    %c0_15 = arith.constant 0 : index
    %18 = vector.load %arg4[%c2, %c0_14, %c0_15] : memref<9x64x256xbf16, #tpu.memory_space<vmem>>, vector<1x64x256xbf16>
    %19 = vector.shape_cast %18 : vector<1x64x256xbf16> to vector<64x256xbf16>
    %cst_16 = arith.constant dense<0.000000e+00> : vector<64x32xf32>
    %20 = tpu.matmul %19, %10, %cst_16 {dimension_numbers = #tpu.dot_dimension_numbers<[1], [0], [0], [1], [0, 0, 1, 1], [], []>} : vector<64x256xbf16>, vector<256x32xbf16>, vector<64x32xf32> -> vector<64x32xf32>
    %21 = arith.maximumf %17, %20 : vector<64x32xf32>
    %c3 = arith.constant 3 : index
    %c0_17 = arith.constant 0 : index
    %c0_18 = arith.constant 0 : index
    %22 = vector.load %arg4[%c3, %c0_17, %c0_18] : memref<9x64x256xbf16, #tpu.memory_space<vmem>>, vector<1x64x256xbf16>
    %23 = vector.shape_cast %22 : vector<1x64x256xbf16> to vector<64x256xbf16>
    %cst_19 = arith.constant dense<0.000000e+00> : vector<64x32xf32>
    %24 = tpu.matmul %23, %10, %cst_19 {dimension_numbers = #tpu.dot_dimension_numbers<[1], [0], [0], [1], [0, 0, 1, 1], [], []>} : vector<64x256xbf16>, vector<256x32xbf16>, vector<64x32xf32> -> vector<64x32xf32>
    %25 = arith.maximumf %21, %24 : vector<64x32xf32>
    %c4 = arith.constant 4 : index
    %c0_20 = arith.constant 0 : index
    %c0_21 = arith.constant 0 : index
    %26 = vector.load %arg4[%c4, %c0_20, %c0_21] : memref<9x64x256xbf16, #tpu.memory_space<vmem>>, vector<1x64x256xbf16>
    %27 = vector.shape_cast %26 : vector<1x64x256xbf16> to vector<64x256xbf16>
    %cst_22 = arith.constant dense<0.000000e+00> : vector<64x32xf32>
    %28 = tpu.matmul %27, %10, %cst_22 {dimension_numbers = #tpu.dot_dimension_numbers<[1], [0], [0], [1], [0, 0, 1, 1], [], []>} : vector<64x256xbf16>, vector<256x32xbf16>, vector<64x32xf32> -> vector<64x32xf32>
    %29 = arith.maximumf %25, %28 : vector<64x32xf32>
    %c5 = arith.constant 5 : index
    %c0_23 = arith.constant 0 : index
    %c0_24 = arith.constant 0 : index
    %30 = vector.load %arg4[%c5, %c0_23, %c0_24] : memref<9x64x256xbf16, #tpu.memory_space<vmem>>, vector<1x64x256xbf16>
    %31 = vector.shape_cast %30 : vector<1x64x256xbf16> to vector<64x256xbf16>
    %cst_25 = arith.constant dense<0.000000e+00> : vector<64x32xf32>
    %32 = tpu.matmul %31, %10, %cst_25 {dimension_numbers = #tpu.dot_dimension_numbers<[1], [0], [0], [1], [0, 0, 1, 1], [], []>} : vector<64x256xbf16>, vector<256x32xbf16>, vector<64x32xf32> -> vector<64x32xf32>
    %33 = arith.maximumf %29, %32 : vector<64x32xf32>
    %c6 = arith.constant 6 : index
    %c0_26 = arith.constant 0 : index
    %c0_27 = arith.constant 0 : index
    %34 = vector.load %arg4[%c6, %c0_26, %c0_27] : memref<9x64x256xbf16, #tpu.memory_space<vmem>>, vector<1x64x256xbf16>
    %35 = vector.shape_cast %34 : vector<1x64x256xbf16> to vector<64x256xbf16>
    %cst_28 = arith.constant dense<0.000000e+00> : vector<64x32xf32>
    %36 = tpu.matmul %35, %10, %cst_28 {dimension_numbers = #tpu.dot_dimension_numbers<[1], [0], [0], [1], [0, 0, 1, 1], [], []>} : vector<64x256xbf16>, vector<256x32xbf16>, vector<64x32xf32> -> vector<64x32xf32>
    %37 = arith.maximumf %33, %36 : vector<64x32xf32>
    %c7 = arith.constant 7 : index
    %c0_29 = arith.constant 0 : index
    %c0_30 = arith.constant 0 : index
    %38 = vector.load %arg4[%c7, %c0_29, %c0_30] : memref<9x64x256xbf16, #tpu.memory_space<vmem>>, vector<1x64x256xbf16>
    %39 = vector.shape_cast %38 : vector<1x64x256xbf16> to vector<64x256xbf16>
    %cst_31 = arith.constant dense<0.000000e+00> : vector<64x32xf32>
    %40 = tpu.matmul %39, %10, %cst_31 {dimension_numbers = #tpu.dot_dimension_numbers<[1], [0], [0], [1], [0, 0, 1, 1], [], []>} : vector<64x256xbf16>, vector<256x32xbf16>, vector<64x32xf32> -> vector<64x32xf32>
    %41 = arith.maximumf %37, %40 : vector<64x32xf32>
    %c8 = arith.constant 8 : index
    %c0_32 = arith.constant 0 : index
    %c0_33 = arith.constant 0 : index
    %42 = vector.load %arg4[%c8, %c0_32, %c0_33] : memref<9x64x256xbf16, #tpu.memory_space<vmem>>, vector<1x64x256xbf16>
    %43 = vector.shape_cast %42 : vector<1x64x256xbf16> to vector<64x256xbf16>
    %cst_34 = arith.constant dense<0.000000e+00> : vector<64x32xf32>
    %44 = tpu.matmul %43, %10, %cst_34 {dimension_numbers = #tpu.dot_dimension_numbers<[1], [0], [0], [1], [0, 0, 1, 1], [], []>} : vector<64x256xbf16>, vector<256x32xbf16>, vector<64x32xf32> -> vector<64x32xf32>
    %45 = arith.maximumf %41, %44 : vector<64x32xf32>
    %46 = arith.truncf %45 : vector<64x32xf32> to vector<64x32xbf16>
    %c0_35 = arith.constant 0 : index
    %c0_36 = arith.constant 0 : index
    %c0_37 = arith.constant 0 : index
    %47 = vector.load %arg5[%c0_35, %c0_36, %c0_37] : memref<9x64x64xbf16, #tpu.memory_space<vmem>>, vector<1x64x64xbf16>
    %48 = vector.shape_cast %47 : vector<1x64x64xbf16> to vector<64x64xbf16>
    %cst_38 = arith.constant dense<0.000000e+00> : vector<64x32xf32>
    %49 = tpu.matmul %48, %46, %cst_38 {dimension_numbers = #tpu.dot_dimension_numbers<[1], [0], [0], [1], [0, 0, 1, 1], [], []>} : vector<64x64xbf16>, vector<64x32xbf16>, vector<64x32xf32> -> vector<64x32xf32>
    %50 = arith.truncf %49 : vector<64x32xf32> to vector<64x32xbf16>
    %c0_39 = arith.constant 0 : index
    %c0_40 = arith.constant 0 : index
    %c0_41 = arith.constant 0 : index
    %51 = vector.load %arg7[%c0_39, %c0_40, %c0_41] : memref<9x32x32xbf16, #tpu.memory_space<vmem>>, vector<1x32x32xbf16>
    %52 = vector.shape_cast %51 : vector<1x32x32xbf16> to vector<32x32xbf16>
    %cst_42 = arith.constant dense<0.000000e+00> : vector<64x32xf32>
    %53 = tpu.matmul %50, %52, %cst_42 {dimension_numbers = #tpu.dot_dimension_numbers<[1], [0], [0], [1], [0, 0, 1, 1], [], []>} : vector<64x32xbf16>, vector<32x32xbf16>, vector<64x32xf32> -> vector<64x32xf32>
    %c1_43 = arith.constant 1 : index
    %c0_44 = arith.constant 0 : index
    %c0_45 = arith.constant 0 : index
    %54 = vector.load %arg5[%c1_43, %c0_44, %c0_45] : memref<9x64x64xbf16, #tpu.memory_space<vmem>>, vector<1x64x64xbf16>
    %55 = vector.shape_cast %54 : vector<1x64x64xbf16> to vector<64x64xbf16>
    %cst_46 = arith.constant dense<0.000000e+00> : vector<64x32xf32>
    %56 = tpu.matmul %55, %46, %cst_46 {dimension_numbers = #tpu.dot_dimension_numbers<[1], [0], [0], [1], [0, 0, 1, 1], [], []>} : vector<64x64xbf16>, vector<64x32xbf16>, vector<64x32xf32> -> vector<64x32xf32>
    %57 = arith.truncf %56 : vector<64x32xf32> to vector<64x32xbf16>
    %c1_47 = arith.constant 1 : index
    %c0_48 = arith.constant 0 : index
    %c0_49 = arith.constant 0 : index
    %58 = vector.load %arg7[%c1_47, %c0_48, %c0_49] : memref<9x32x32xbf16, #tpu.memory_space<vmem>>, vector<1x32x32xbf16>
    %59 = vector.shape_cast %58 : vector<1x32x32xbf16> to vector<32x32xbf16>
    %cst_50 = arith.constant dense<0.000000e+00> : vector<64x32xf32>
    %60 = tpu.matmul %57, %59, %cst_50 {dimension_numbers = #tpu.dot_dimension_numbers<[1], [0], [0], [1], [0, 0, 1, 1], [], []>} : vector<64x32xbf16>, vector<32x32xbf16>, vector<64x32xf32> -> vector<64x32xf32>
    %61 = arith.addf %53, %60 : vector<64x32xf32>
    %c2_51 = arith.constant 2 : index
    %c0_52 = arith.constant 0 : index
    %c0_53 = arith.constant 0 : index
    %62 = vector.load %arg5[%c2_51, %c0_52, %c0_53] : memref<9x64x64xbf16, #tpu.memory_space<vmem>>, vector<1x64x64xbf16>
    %63 = vector.shape_cast %62 : vector<1x64x64xbf16> to vector<64x64xbf16>
    %cst_54 = arith.constant dense<0.000000e+00> : vector<64x32xf32>
    %64 = tpu.matmul %63, %46, %cst_54 {dimension_numbers = #tpu.dot_dimension_numbers<[1], [0], [0], [1], [0, 0, 1, 1], [], []>} : vector<64x64xbf16>, vector<64x32xbf16>, vector<64x32xf32> -> vector<64x32xf32>
    %65 = arith.truncf %64 : vector<64x32xf32> to vector<64x32xbf16>
    %c2_55 = arith.constant 2 : index
    %c0_56 = arith.constant 0 : index
    %c0_57 = arith.constant 0 : index
    %66 = vector.load %arg7[%c2_55, %c0_56, %c0_57] : memref<9x32x32xbf16, #tpu.memory_space<vmem>>, vector<1x32x32xbf16>
    %67 = vector.shape_cast %66 : vector<1x32x32xbf16> to vector<32x32xbf16>
    %cst_58 = arith.constant dense<0.000000e+00> : vector<64x32xf32>
    %68 = tpu.matmul %65, %67, %cst_58 {dimension_numbers = #tpu.dot_dimension_numbers<[1], [0], [0], [1], [0, 0, 1, 1], [], []>} : vector<64x32xbf16>, vector<32x32xbf16>, vector<64x32xf32> -> vector<64x32xf32>
    %69 = arith.addf %61, %68 : vector<64x32xf32>
    %c3_59 = arith.constant 3 : index
    %c0_60 = arith.constant 0 : index
    %c0_61 = arith.constant 0 : index
    %70 = vector.load %arg5[%c3_59, %c0_60, %c0_61] : memref<9x64x64xbf16, #tpu.memory_space<vmem>>, vector<1x64x64xbf16>
    %71 = vector.shape_cast %70 : vector<1x64x64xbf16> to vector<64x64xbf16>
    %cst_62 = arith.constant dense<0.000000e+00> : vector<64x32xf32>
    %72 = tpu.matmul %71, %46, %cst_62 {dimension_numbers = #tpu.dot_dimension_numbers<[1], [0], [0], [1], [0, 0, 1, 1], [], []>} : vector<64x64xbf16>, vector<64x32xbf16>, vector<64x32xf32> -> vector<64x32xf32>
    %73 = arith.truncf %72 : vector<64x32xf32> to vector<64x32xbf16>
    %c3_63 = arith.constant 3 : index
    %c0_64 = arith.constant 0 : index
    %c0_65 = arith.constant 0 : index
    %74 = vector.load %arg7[%c3_63, %c0_64, %c0_65] : memref<9x32x32xbf16, #tpu.memory_space<vmem>>, vector<1x32x32xbf16>
    %75 = vector.shape_cast %74 : vector<1x32x32xbf16> to vector<32x32xbf16>
    %cst_66 = arith.constant dense<0.000000e+00> : vector<64x32xf32>
    %76 = tpu.matmul %73, %75, %cst_66 {dimension_numbers = #tpu.dot_dimension_numbers<[1], [0], [0], [1], [0, 0, 1, 1], [], []>} : vector<64x32xbf16>, vector<32x32xbf16>, vector<64x32xf32> -> vector<64x32xf32>
    %77 = arith.addf %69, %76 : vector<64x32xf32>
    %c4_67 = arith.constant 4 : index
    %c0_68 = arith.constant 0 : index
    %c0_69 = arith.constant 0 : index
    %78 = vector.load %arg5[%c4_67, %c0_68, %c0_69] : memref<9x64x64xbf16, #tpu.memory_space<vmem>>, vector<1x64x64xbf16>
    %79 = vector.shape_cast %78 : vector<1x64x64xbf16> to vector<64x64xbf16>
    %cst_70 = arith.constant dense<0.000000e+00> : vector<64x32xf32>
    %80 = tpu.matmul %79, %46, %cst_70 {dimension_numbers = #tpu.dot_dimension_numbers<[1], [0], [0], [1], [0, 0, 1, 1], [], []>} : vector<64x64xbf16>, vector<64x32xbf16>, vector<64x32xf32> -> vector<64x32xf32>
    %81 = arith.truncf %80 : vector<64x32xf32> to vector<64x32xbf16>
    %c4_71 = arith.constant 4 : index
    %c0_72 = arith.constant 0 : index
    %c0_73 = arith.constant 0 : index
    %82 = vector.load %arg7[%c4_71, %c0_72, %c0_73] : memref<9x32x32xbf16, #tpu.memory_space<vmem>>, vector<1x32x32xbf16>
    %83 = vector.shape_cast %82 : vector<1x32x32xbf16> to vector<32x32xbf16>
    %cst_74 = arith.constant dense<0.000000e+00> : vector<64x32xf32>
    %84 = tpu.matmul %81, %83, %cst_74 {dimension_numbers = #tpu.dot_dimension_numbers<[1], [0], [0], [1], [0, 0, 1, 1], [], []>} : vector<64x32xbf16>, vector<32x32xbf16>, vector<64x32xf32> -> vector<64x32xf32>
    %85 = arith.addf %77, %84 : vector<64x32xf32>
    %c5_75 = arith.constant 5 : index
    %c0_76 = arith.constant 0 : index
    %c0_77 = arith.constant 0 : index
    %86 = vector.load %arg5[%c5_75, %c0_76, %c0_77] : memref<9x64x64xbf16, #tpu.memory_space<vmem>>, vector<1x64x64xbf16>
    %87 = vector.shape_cast %86 : vector<1x64x64xbf16> to vector<64x64xbf16>
    %cst_78 = arith.constant dense<0.000000e+00> : vector<64x32xf32>
    %88 = tpu.matmul %87, %46, %cst_78 {dimension_numbers = #tpu.dot_dimension_numbers<[1], [0], [0], [1], [0, 0, 1, 1], [], []>} : vector<64x64xbf16>, vector<64x32xbf16>, vector<64x32xf32> -> vector<64x32xf32>
    %89 = arith.truncf %88 : vector<64x32xf32> to vector<64x32xbf16>
    %c5_79 = arith.constant 5 : index
    %c0_80 = arith.constant 0 : index
    %c0_81 = arith.constant 0 : index
    %90 = vector.load %arg7[%c5_79, %c0_80, %c0_81] : memref<9x32x32xbf16, #tpu.memory_space<vmem>>, vector<1x32x32xbf16>
    %91 = vector.shape_cast %90 : vector<1x32x32xbf16> to vector<32x32xbf16>
    %cst_82 = arith.constant dense<0.000000e+00> : vector<64x32xf32>
    %92 = tpu.matmul %89, %91, %cst_82 {dimension_numbers = #tpu.dot_dimension_numbers<[1], [0], [0], [1], [0, 0, 1, 1], [], []>} : vector<64x32xbf16>, vector<32x32xbf16>, vector<64x32xf32> -> vector<64x32xf32>
    %93 = arith.addf %85, %92 : vector<64x32xf32>
    %c6_83 = arith.constant 6 : index
    %c0_84 = arith.constant 0 : index
    %c0_85 = arith.constant 0 : index
    %94 = vector.load %arg5[%c6_83, %c0_84, %c0_85] : memref<9x64x64xbf16, #tpu.memory_space<vmem>>, vector<1x64x64xbf16>
    %95 = vector.shape_cast %94 : vector<1x64x64xbf16> to vector<64x64xbf16>
    %cst_86 = arith.constant dense<0.000000e+00> : vector<64x32xf32>
    %96 = tpu.matmul %95, %46, %cst_86 {dimension_numbers = #tpu.dot_dimension_numbers<[1], [0], [0], [1], [0, 0, 1, 1], [], []>} : vector<64x64xbf16>, vector<64x32xbf16>, vector<64x32xf32> -> vector<64x32xf32>
    %97 = arith.truncf %96 : vector<64x32xf32> to vector<64x32xbf16>
    %c6_87 = arith.constant 6 : index
    %c0_88 = arith.constant 0 : index
    %c0_89 = arith.constant 0 : index
    %98 = vector.load %arg7[%c6_87, %c0_88, %c0_89] : memref<9x32x32xbf16, #tpu.memory_space<vmem>>, vector<1x32x32xbf16>
    %99 = vector.shape_cast %98 : vector<1x32x32xbf16> to vector<32x32xbf16>
    %cst_90 = arith.constant dense<0.000000e+00> : vector<64x32xf32>
    %100 = tpu.matmul %97, %99, %cst_90 {dimension_numbers = #tpu.dot_dimension_numbers<[1], [0], [0], [1], [0, 0, 1, 1], [], []>} : vector<64x32xbf16>, vector<32x32xbf16>, vector<64x32xf32> -> vector<64x32xf32>
    %101 = arith.addf %93, %100 : vector<64x32xf32>
    %c7_91 = arith.constant 7 : index
    %c0_92 = arith.constant 0 : index
    %c0_93 = arith.constant 0 : index
    %102 = vector.load %arg5[%c7_91, %c0_92, %c0_93] : memref<9x64x64xbf16, #tpu.memory_space<vmem>>, vector<1x64x64xbf16>
    %103 = vector.shape_cast %102 : vector<1x64x64xbf16> to vector<64x64xbf16>
    %cst_94 = arith.constant dense<0.000000e+00> : vector<64x32xf32>
    %104 = tpu.matmul %103, %46, %cst_94 {dimension_numbers = #tpu.dot_dimension_numbers<[1], [0], [0], [1], [0, 0, 1, 1], [], []>} : vector<64x64xbf16>, vector<64x32xbf16>, vector<64x32xf32> -> vector<64x32xf32>
    %105 = arith.truncf %104 : vector<64x32xf32> to vector<64x32xbf16>
    %c7_95 = arith.constant 7 : index
    %c0_96 = arith.constant 0 : index
    %c0_97 = arith.constant 0 : index
    %106 = vector.load %arg7[%c7_95, %c0_96, %c0_97] : memref<9x32x32xbf16, #tpu.memory_space<vmem>>, vector<1x32x32xbf16>
    %107 = vector.shape_cast %106 : vector<1x32x32xbf16> to vector<32x32xbf16>
    %cst_98 = arith.constant dense<0.000000e+00> : vector<64x32xf32>
    %108 = tpu.matmul %105, %107, %cst_98 {dimension_numbers = #tpu.dot_dimension_numbers<[1], [0], [0], [1], [0, 0, 1, 1], [], []>} : vector<64x32xbf16>, vector<32x32xbf16>, vector<64x32xf32> -> vector<64x32xf32>
    %109 = arith.addf %101, %108 : vector<64x32xf32>
    %c8_99 = arith.constant 8 : index
    %c0_100 = arith.constant 0 : index
    %c0_101 = arith.constant 0 : index
    %110 = vector.load %arg5[%c8_99, %c0_100, %c0_101] : memref<9x64x64xbf16, #tpu.memory_space<vmem>>, vector<1x64x64xbf16>
    %111 = vector.shape_cast %110 : vector<1x64x64xbf16> to vector<64x64xbf16>
    %cst_102 = arith.constant dense<0.000000e+00> : vector<64x32xf32>
    %112 = tpu.matmul %111, %46, %cst_102 {dimension_numbers = #tpu.dot_dimension_numbers<[1], [0], [0], [1], [0, 0, 1, 1], [], []>} : vector<64x64xbf16>, vector<64x32xbf16>, vector<64x32xf32> -> vector<64x32xf32>
    %113 = arith.truncf %112 : vector<64x32xf32> to vector<64x32xbf16>
    %c8_103 = arith.constant 8 : index
    %c0_104 = arith.constant 0 : index
    %c0_105 = arith.constant 0 : index
    %114 = vector.load %arg7[%c8_103, %c0_104, %c0_105] : memref<9x32x32xbf16, #tpu.memory_space<vmem>>, vector<1x32x32xbf16>
    %115 = vector.shape_cast %114 : vector<1x32x32xbf16> to vector<32x32xbf16>
    %cst_106 = arith.constant dense<0.000000e+00> : vector<64x32xf32>
    %116 = tpu.matmul %113, %115, %cst_106 {dimension_numbers = #tpu.dot_dimension_numbers<[1], [0], [0], [1], [0, 0, 1, 1], [], []>} : vector<64x32xbf16>, vector<32x32xbf16>, vector<64x32xf32> -> vector<64x32xf32>
    %117 = arith.addf %109, %116 : vector<64x32xf32>
    %c0_107 = arith.constant 0 : index
    %c0_108 = arith.constant 0 : index
    %118 = vector.load %arg8[%c0_107, %c0_108] : memref<1x32xf32, #tpu.memory_space<vmem>>, vector<1x32xf32>
    %119 = vector.broadcast %118 : vector<1x32xf32> to vector<64x32xf32>
    %120 = arith.addf %117, %119 : vector<64x32xf32>
    %cst_109 = arith.constant 0.000000e+00 : f32
    %121 = vector.broadcast %cst_109 : f32 to vector<64x32xf32>
    %122 = arith.maximumf %120, %121 : vector<64x32xf32>
    %123 = arith.truncf %122 : vector<64x32xf32> to vector<64x32xbf16>
    %c0_110 = arith.constant 0 : index
    %c0_111 = arith.constant 0 : index
    %c0_112 = arith.constant 0 : index
    %124 = vector.load %arg6[%c0_110, %c0_111, %c0_112] : memref<9x64x64xbf16, #tpu.memory_space<vmem>>, vector<1x64x64xbf16>
    %125 = vector.shape_cast %124 : vector<1x64x64xbf16> to vector<64x64xbf16>
    %cst_113 = arith.constant dense<0.000000e+00> : vector<64x32xf32>
    %126 = tpu.matmul %125, %123, %cst_113 {dimension_numbers = #tpu.dot_dimension_numbers<[1], [0], [0], [1], [0, 0, 1, 1], [], []>} : vector<64x64xbf16>, vector<64x32xbf16>, vector<64x32xf32> -> vector<64x32xf32>
    %127 = arith.truncf %126 : vector<64x32xf32> to vector<64x32xbf16>
    %c0_114 = arith.constant 0 : index
    %c0_115 = arith.constant 0 : index
    %c0_116 = arith.constant 0 : index
    %128 = vector.load %arg9[%c0_114, %c0_115, %c0_116] : memref<9x32x32xbf16, #tpu.memory_space<vmem>>, vector<1x32x32xbf16>
    %129 = vector.shape_cast %128 : vector<1x32x32xbf16> to vector<32x32xbf16>
    %cst_117 = arith.constant dense<0.000000e+00> : vector<64x32xf32>
    %130 = tpu.matmul %127, %129, %cst_117 {dimension_numbers = #tpu.dot_dimension_numbers<[1], [0], [0], [1], [0, 0, 1, 1], [], []>} : vector<64x32xbf16>, vector<32x32xbf16>, vector<64x32xf32> -> vector<64x32xf32>
    %c1_118 = arith.constant 1 : index
    %c0_119 = arith.constant 0 : index
    %c0_120 = arith.constant 0 : index
    %131 = vector.load %arg6[%c1_118, %c0_119, %c0_120] : memref<9x64x64xbf16, #tpu.memory_space<vmem>>, vector<1x64x64xbf16>
    %132 = vector.shape_cast %131 : vector<1x64x64xbf16> to vector<64x64xbf16>
    %cst_121 = arith.constant dense<0.000000e+00> : vector<64x32xf32>
    %133 = tpu.matmul %132, %123, %cst_121 {dimension_numbers = #tpu.dot_dimension_numbers<[1], [0], [0], [1], [0, 0, 1, 1], [], []>} : vector<64x64xbf16>, vector<64x32xbf16>, vector<64x32xf32> -> vector<64x32xf32>
    %134 = arith.truncf %133 : vector<64x32xf32> to vector<64x32xbf16>
    %c1_122 = arith.constant 1 : index
    %c0_123 = arith.constant 0 : index
    %c0_124 = arith.constant 0 : index
    %135 = vector.load %arg9[%c1_122, %c0_123, %c0_124] : memref<9x32x32xbf16, #tpu.memory_space<vmem>>, vector<1x32x32xbf16>
    %136 = vector.shape_cast %135 : vector<1x32x32xbf16> to vector<32x32xbf16>
    %cst_125 = arith.constant dense<0.000000e+00> : vector<64x32xf32>
    %137 = tpu.matmul %134, %136, %cst_125 {dimension_numbers = #tpu.dot_dimension_numbers<[1], [0], [0], [1], [0, 0, 1, 1], [], []>} : vector<64x32xbf16>, vector<32x32xbf16>, vector<64x32xf32> -> vector<64x32xf32>
    %138 = arith.addf %130, %137 : vector<64x32xf32>
    %c2_126 = arith.constant 2 : index
    %c0_127 = arith.constant 0 : index
    %c0_128 = arith.constant 0 : index
    %139 = vector.load %arg6[%c2_126, %c0_127, %c0_128] : memref<9x64x64xbf16, #tpu.memory_space<vmem>>, vector<1x64x64xbf16>
    %140 = vector.shape_cast %139 : vector<1x64x64xbf16> to vector<64x64xbf16>
    %cst_129 = arith.constant dense<0.000000e+00> : vector<64x32xf32>
    %141 = tpu.matmul %140, %123, %cst_129 {dimension_numbers = #tpu.dot_dimension_numbers<[1], [0], [0], [1], [0, 0, 1, 1], [], []>} : vector<64x64xbf16>, vector<64x32xbf16>, vector<64x32xf32> -> vector<64x32xf32>
    %142 = arith.truncf %141 : vector<64x32xf32> to vector<64x32xbf16>
    %c2_130 = arith.constant 2 : index
    %c0_131 = arith.constant 0 : index
    %c0_132 = arith.constant 0 : index
    %143 = vector.load %arg9[%c2_130, %c0_131, %c0_132] : memref<9x32x32xbf16, #tpu.memory_space<vmem>>, vector<1x32x32xbf16>
    %144 = vector.shape_cast %143 : vector<1x32x32xbf16> to vector<32x32xbf16>
    %cst_133 = arith.constant dense<0.000000e+00> : vector<64x32xf32>
    %145 = tpu.matmul %142, %144, %cst_133 {dimension_numbers = #tpu.dot_dimension_numbers<[1], [0], [0], [1], [0, 0, 1, 1], [], []>} : vector<64x32xbf16>, vector<32x32xbf16>, vector<64x32xf32> -> vector<64x32xf32>
    %146 = arith.addf %138, %145 : vector<64x32xf32>
    %c3_134 = arith.constant 3 : index
    %c0_135 = arith.constant 0 : index
    %c0_136 = arith.constant 0 : index
    %147 = vector.load %arg6[%c3_134, %c0_135, %c0_136] : memref<9x64x64xbf16, #tpu.memory_space<vmem>>, vector<1x64x64xbf16>
    %148 = vector.shape_cast %147 : vector<1x64x64xbf16> to vector<64x64xbf16>
    %cst_137 = arith.constant dense<0.000000e+00> : vector<64x32xf32>
    %149 = tpu.matmul %148, %123, %cst_137 {dimension_numbers = #tpu.dot_dimension_numbers<[1], [0], [0], [1], [0, 0, 1, 1], [], []>} : vector<64x64xbf16>, vector<64x32xbf16>, vector<64x32xf32> -> vector<64x32xf32>
    %150 = arith.truncf %149 : vector<64x32xf32> to vector<64x32xbf16>
    %c3_138 = arith.constant 3 : index
    %c0_139 = arith.constant 0 : index
    %c0_140 = arith.constant 0 : index
    %151 = vector.load %arg9[%c3_138, %c0_139, %c0_140] : memref<9x32x32xbf16, #tpu.memory_space<vmem>>, vector<1x32x32xbf16>
    %152 = vector.shape_cast %151 : vector<1x32x32xbf16> to vector<32x32xbf16>
    %cst_141 = arith.constant dense<0.000000e+00> : vector<64x32xf32>
    %153 = tpu.matmul %150, %152, %cst_141 {dimension_numbers = #tpu.dot_dimension_numbers<[1], [0], [0], [1], [0, 0, 1, 1], [], []>} : vector<64x32xbf16>, vector<32x32xbf16>, vector<64x32xf32> -> vector<64x32xf32>
    %154 = arith.addf %146, %153 : vector<64x32xf32>
    %c4_142 = arith.constant 4 : index
    %c0_143 = arith.constant 0 : index
    %c0_144 = arith.constant 0 : index
    %155 = vector.load %arg6[%c4_142, %c0_143, %c0_144] : memref<9x64x64xbf16, #tpu.memory_space<vmem>>, vector<1x64x64xbf16>
    %156 = vector.shape_cast %155 : vector<1x64x64xbf16> to vector<64x64xbf16>
    %cst_145 = arith.constant dense<0.000000e+00> : vector<64x32xf32>
    %157 = tpu.matmul %156, %123, %cst_145 {dimension_numbers = #tpu.dot_dimension_numbers<[1], [0], [0], [1], [0, 0, 1, 1], [], []>} : vector<64x64xbf16>, vector<64x32xbf16>, vector<64x32xf32> -> vector<64x32xf32>
    %158 = arith.truncf %157 : vector<64x32xf32> to vector<64x32xbf16>
    %c4_146 = arith.constant 4 : index
    %c0_147 = arith.constant 0 : index
    %c0_148 = arith.constant 0 : index
    %159 = vector.load %arg9[%c4_146, %c0_147, %c0_148] : memref<9x32x32xbf16, #tpu.memory_space<vmem>>, vector<1x32x32xbf16>
    %160 = vector.shape_cast %159 : vector<1x32x32xbf16> to vector<32x32xbf16>
    %cst_149 = arith.constant dense<0.000000e+00> : vector<64x32xf32>
    %161 = tpu.matmul %158, %160, %cst_149 {dimension_numbers = #tpu.dot_dimension_numbers<[1], [0], [0], [1], [0, 0, 1, 1], [], []>} : vector<64x32xbf16>, vector<32x32xbf16>, vector<64x32xf32> -> vector<64x32xf32>
    %162 = arith.addf %154, %161 : vector<64x32xf32>
    %c5_150 = arith.constant 5 : index
    %c0_151 = arith.constant 0 : index
    %c0_152 = arith.constant 0 : index
    %163 = vector.load %arg6[%c5_150, %c0_151, %c0_152] : memref<9x64x64xbf16, #tpu.memory_space<vmem>>, vector<1x64x64xbf16>
    %164 = vector.shape_cast %163 : vector<1x64x64xbf16> to vector<64x64xbf16>
    %cst_153 = arith.constant dense<0.000000e+00> : vector<64x32xf32>
    %165 = tpu.matmul %164, %123, %cst_153 {dimension_numbers = #tpu.dot_dimension_numbers<[1], [0], [0], [1], [0, 0, 1, 1], [], []>} : vector<64x64xbf16>, vector<64x32xbf16>, vector<64x32xf32> -> vector<64x32xf32>
    %166 = arith.truncf %165 : vector<64x32xf32> to vector<64x32xbf16>
    %c5_154 = arith.constant 5 : index
    %c0_155 = arith.constant 0 : index
    %c0_156 = arith.constant 0 : index
    %167 = vector.load %arg9[%c5_154, %c0_155, %c0_156] : memref<9x32x32xbf16, #tpu.memory_space<vmem>>, vector<1x32x32xbf16>
    %168 = vector.shape_cast %167 : vector<1x32x32xbf16> to vector<32x32xbf16>
    %cst_157 = arith.constant dense<0.000000e+00> : vector<64x32xf32>
    %169 = tpu.matmul %166, %168, %cst_157 {dimension_numbers = #tpu.dot_dimension_numbers<[1], [0], [0], [1], [0, 0, 1, 1], [], []>} : vector<64x32xbf16>, vector<32x32xbf16>, vector<64x32xf32> -> vector<64x32xf32>
    %170 = arith.addf %162, %169 : vector<64x32xf32>
    %c6_158 = arith.constant 6 : index
    %c0_159 = arith.constant 0 : index
    %c0_160 = arith.constant 0 : index
    %171 = vector.load %arg6[%c6_158, %c0_159, %c0_160] : memref<9x64x64xbf16, #tpu.memory_space<vmem>>, vector<1x64x64xbf16>
    %172 = vector.shape_cast %171 : vector<1x64x64xbf16> to vector<64x64xbf16>
    %cst_161 = arith.constant dense<0.000000e+00> : vector<64x32xf32>
    %173 = tpu.matmul %172, %123, %cst_161 {dimension_numbers = #tpu.dot_dimension_numbers<[1], [0], [0], [1], [0, 0, 1, 1], [], []>} : vector<64x64xbf16>, vector<64x32xbf16>, vector<64x32xf32> -> vector<64x32xf32>
    %174 = arith.truncf %173 : vector<64x32xf32> to vector<64x32xbf16>
    %c6_162 = arith.constant 6 : index
    %c0_163 = arith.constant 0 : index
    %c0_164 = arith.constant 0 : index
    %175 = vector.load %arg9[%c6_162, %c0_163, %c0_164] : memref<9x32x32xbf16, #tpu.memory_space<vmem>>, vector<1x32x32xbf16>
    %176 = vector.shape_cast %175 : vector<1x32x32xbf16> to vector<32x32xbf16>
    %cst_165 = arith.constant dense<0.000000e+00> : vector<64x32xf32>
    %177 = tpu.matmul %174, %176, %cst_165 {dimension_numbers = #tpu.dot_dimension_numbers<[1], [0], [0], [1], [0, 0, 1, 1], [], []>} : vector<64x32xbf16>, vector<32x32xbf16>, vector<64x32xf32> -> vector<64x32xf32>
    %178 = arith.addf %170, %177 : vector<64x32xf32>
    %c7_166 = arith.constant 7 : index
    %c0_167 = arith.constant 0 : index
    %c0_168 = arith.constant 0 : index
    %179 = vector.load %arg6[%c7_166, %c0_167, %c0_168] : memref<9x64x64xbf16, #tpu.memory_space<vmem>>, vector<1x64x64xbf16>
    %180 = vector.shape_cast %179 : vector<1x64x64xbf16> to vector<64x64xbf16>
    %cst_169 = arith.constant dense<0.000000e+00> : vector<64x32xf32>
    %181 = tpu.matmul %180, %123, %cst_169 {dimension_numbers = #tpu.dot_dimension_numbers<[1], [0], [0], [1], [0, 0, 1, 1], [], []>} : vector<64x64xbf16>, vector<64x32xbf16>, vector<64x32xf32> -> vector<64x32xf32>
    %182 = arith.truncf %181 : vector<64x32xf32> to vector<64x32xbf16>
    %c7_170 = arith.constant 7 : index
    %c0_171 = arith.constant 0 : index
    %c0_172 = arith.constant 0 : index
    %183 = vector.load %arg9[%c7_170, %c0_171, %c0_172] : memref<9x32x32xbf16, #tpu.memory_space<vmem>>, vector<1x32x32xbf16>
    %184 = vector.shape_cast %183 : vector<1x32x32xbf16> to vector<32x32xbf16>
    %cst_173 = arith.constant dense<0.000000e+00> : vector<64x32xf32>
    %185 = tpu.matmul %182, %184, %cst_173 {dimension_numbers = #tpu.dot_dimension_numbers<[1], [0], [0], [1], [0, 0, 1, 1], [], []>} : vector<64x32xbf16>, vector<32x32xbf16>, vector<64x32xf32> -> vector<64x32xf32>
    %186 = arith.addf %178, %185 : vector<64x32xf32>
    %c8_174 = arith.constant 8 : index
    %c0_175 = arith.constant 0 : index
    %c0_176 = arith.constant 0 : index
    %187 = vector.load %arg6[%c8_174, %c0_175, %c0_176] : memref<9x64x64xbf16, #tpu.memory_space<vmem>>, vector<1x64x64xbf16>
    %188 = vector.shape_cast %187 : vector<1x64x64xbf16> to vector<64x64xbf16>
    %cst_177 = arith.constant dense<0.000000e+00> : vector<64x32xf32>
    %189 = tpu.matmul %188, %123, %cst_177 {dimension_numbers = #tpu.dot_dimension_numbers<[1], [0], [0], [1], [0, 0, 1, 1], [], []>} : vector<64x64xbf16>, vector<64x32xbf16>, vector<64x32xf32> -> vector<64x32xf32>
    %190 = arith.truncf %189 : vector<64x32xf32> to vector<64x32xbf16>
    %c8_178 = arith.constant 8 : index
    %c0_179 = arith.constant 0 : index
    %c0_180 = arith.constant 0 : index
    %191 = vector.load %arg9[%c8_178, %c0_179, %c0_180] : memref<9x32x32xbf16, #tpu.memory_space<vmem>>, vector<1x32x32xbf16>
    %192 = vector.shape_cast %191 : vector<1x32x32xbf16> to vector<32x32xbf16>
    %cst_181 = arith.constant dense<0.000000e+00> : vector<64x32xf32>
    %193 = tpu.matmul %190, %192, %cst_181 {dimension_numbers = #tpu.dot_dimension_numbers<[1], [0], [0], [1], [0, 0, 1, 1], [], []>} : vector<64x32xbf16>, vector<32x32xbf16>, vector<64x32xf32> -> vector<64x32xf32>
    %194 = arith.addf %186, %193 : vector<64x32xf32>
    %c0_182 = arith.constant 0 : index
    %c0_183 = arith.constant 0 : index
    %195 = vector.load %arg10[%c0_182, %c0_183] : memref<1x32xf32, #tpu.memory_space<vmem>>, vector<1x32xf32>
    %196 = vector.broadcast %195 : vector<1x32xf32> to vector<64x32xf32>
    %197 = arith.addf %194, %196 : vector<64x32xf32>
    %198 = arith.addf %197, %45 : vector<64x32xf32>
    %cst_184 = arith.constant 0.000000e+00 : f32
    %199 = vector.broadcast %cst_184 : f32 to vector<64x32xf32>
    %200 = arith.maximumf %198, %199 : vector<64x32xf32>
    %201 = arith.truncf %200 : vector<64x32xf32> to vector<64x32xbf16>
    %c0_185 = arith.constant 0 : index
    %c0_186 = arith.constant 0 : index
    %c0_187 = arith.constant 0 : index
    %202 = vector.load %arg11[%c0_185, %c0_186, %c0_187] : memref<9x16x64xbf16, #tpu.memory_space<vmem>>, vector<1x16x64xbf16>
    %203 = vector.shape_cast %202 : vector<1x16x64xbf16> to vector<16x64xbf16>
    %cst_188 = arith.constant dense<0.000000e+00> : vector<16x32xf32>
    %204 = tpu.matmul %203, %201, %cst_188 {dimension_numbers = #tpu.dot_dimension_numbers<[1], [0], [0], [1], [0, 0, 1, 1], [], []>} : vector<16x64xbf16>, vector<64x32xbf16>, vector<16x32xf32> -> vector<16x32xf32>
    %205 = arith.truncf %204 : vector<16x32xf32> to vector<16x32xbf16>
    %c0_189 = arith.constant 0 : index
    %c0_190 = arith.constant 0 : index
    %c0_191 = arith.constant 0 : index
    %206 = vector.load %arg13[%c0_189, %c0_190, %c0_191] : memref<9x32x64xbf16, #tpu.memory_space<vmem>>, vector<1x32x64xbf16>
    %207 = vector.shape_cast %206 : vector<1x32x64xbf16> to vector<32x64xbf16>
    %cst_192 = arith.constant dense<0.000000e+00> : vector<16x64xf32>
    %208 = tpu.matmul %205, %207, %cst_192 {dimension_numbers = #tpu.dot_dimension_numbers<[1], [0], [0], [1], [0, 0, 1, 1], [], []>} : vector<16x32xbf16>, vector<32x64xbf16>, vector<16x64xf32> -> vector<16x64xf32>
    %c1_193 = arith.constant 1 : index
    %c0_194 = arith.constant 0 : index
    %c0_195 = arith.constant 0 : index
    %209 = vector.load %arg11[%c1_193, %c0_194, %c0_195] : memref<9x16x64xbf16, #tpu.memory_space<vmem>>, vector<1x16x64xbf16>
    %210 = vector.shape_cast %209 : vector<1x16x64xbf16> to vector<16x64xbf16>
    %cst_196 = arith.constant dense<0.000000e+00> : vector<16x32xf32>
    %211 = tpu.matmul %210, %201, %cst_196 {dimension_numbers = #tpu.dot_dimension_numbers<[1], [0], [0], [1], [0, 0, 1, 1], [], []>} : vector<16x64xbf16>, vector<64x32xbf16>, vector<16x32xf32> -> vector<16x32xf32>
    %212 = arith.truncf %211 : vector<16x32xf32> to vector<16x32xbf16>
    %c1_197 = arith.constant 1 : index
    %c0_198 = arith.constant 0 : index
    %c0_199 = arith.constant 0 : index
    %213 = vector.load %arg13[%c1_197, %c0_198, %c0_199] : memref<9x32x64xbf16, #tpu.memory_space<vmem>>, vector<1x32x64xbf16>
    %214 = vector.shape_cast %213 : vector<1x32x64xbf16> to vector<32x64xbf16>
    %cst_200 = arith.constant dense<0.000000e+00> : vector<16x64xf32>
    %215 = tpu.matmul %212, %214, %cst_200 {dimension_numbers = #tpu.dot_dimension_numbers<[1], [0], [0], [1], [0, 0, 1, 1], [], []>} : vector<16x32xbf16>, vector<32x64xbf16>, vector<16x64xf32> -> vector<16x64xf32>
    %216 = arith.addf %208, %215 : vector<16x64xf32>
    %c2_201 = arith.constant 2 : index
    %c0_202 = arith.constant 0 : index
    %c0_203 = arith.constant 0 : index
    %217 = vector.load %arg11[%c2_201, %c0_202, %c0_203] : memref<9x16x64xbf16, #tpu.memory_space<vmem>>, vector<1x16x64xbf16>
    %218 = vector.shape_cast %217 : vector<1x16x64xbf16> to vector<16x64xbf16>
    %cst_204 = arith.constant dense<0.000000e+00> : vector<16x32xf32>
    %219 = tpu.matmul %218, %201, %cst_204 {dimension_numbers = #tpu.dot_dimension_numbers<[1], [0], [0], [1], [0, 0, 1, 1], [], []>} : vector<16x64xbf16>, vector<64x32xbf16>, vector<16x32xf32> -> vector<16x32xf32>
    %220 = arith.truncf %219 : vector<16x32xf32> to vector<16x32xbf16>
    %c2_205 = arith.constant 2 : index
    %c0_206 = arith.constant 0 : index
    %c0_207 = arith.constant 0 : index
    %221 = vector.load %arg13[%c2_205, %c0_206, %c0_207] : memref<9x32x64xbf16, #tpu.memory_space<vmem>>, vector<1x32x64xbf16>
    %222 = vector.shape_cast %221 : vector<1x32x64xbf16> to vector<32x64xbf16>
    %cst_208 = arith.constant dense<0.000000e+00> : vector<16x64xf32>
    %223 = tpu.matmul %220, %222, %cst_208 {dimension_numbers = #tpu.dot_dimension_numbers<[1], [0], [0], [1], [0, 0, 1, 1], [], []>} : vector<16x32xbf16>, vector<32x64xbf16>, vector<16x64xf32> -> vector<16x64xf32>
    %224 = arith.addf %216, %223 : vector<16x64xf32>
    %c3_209 = arith.constant 3 : index
    %c0_210 = arith.constant 0 : index
    %c0_211 = arith.constant 0 : index
    %225 = vector.load %arg11[%c3_209, %c0_210, %c0_211] : memref<9x16x64xbf16, #tpu.memory_space<vmem>>, vector<1x16x64xbf16>
    %226 = vector.shape_cast %225 : vector<1x16x64xbf16> to vector<16x64xbf16>
    %cst_212 = arith.constant dense<0.000000e+00> : vector<16x32xf32>
    %227 = tpu.matmul %226, %201, %cst_212 {dimension_numbers = #tpu.dot_dimension_numbers<[1], [0], [0], [1], [0, 0, 1, 1], [], []>} : vector<16x64xbf16>, vector<64x32xbf16>, vector<16x32xf32> -> vector<16x32xf32>
    %228 = arith.truncf %227 : vector<16x32xf32> to vector<16x32xbf16>
    %c3_213 = arith.constant 3 : index
    %c0_214 = arith.constant 0 : index
    %c0_215 = arith.constant 0 : index
    %229 = vector.load %arg13[%c3_213, %c0_214, %c0_215] : memref<9x32x64xbf16, #tpu.memory_space<vmem>>, vector<1x32x64xbf16>
    %230 = vector.shape_cast %229 : vector<1x32x64xbf16> to vector<32x64xbf16>
    %cst_216 = arith.constant dense<0.000000e+00> : vector<16x64xf32>
    %231 = tpu.matmul %228, %230, %cst_216 {dimension_numbers = #tpu.dot_dimension_numbers<[1], [0], [0], [1], [0, 0, 1, 1], [], []>} : vector<16x32xbf16>, vector<32x64xbf16>, vector<16x64xf32> -> vector<16x64xf32>
    %232 = arith.addf %224, %231 : vector<16x64xf32>
    %c4_217 = arith.constant 4 : index
    %c0_218 = arith.constant 0 : index
    %c0_219 = arith.constant 0 : index
    %233 = vector.load %arg11[%c4_217, %c0_218, %c0_219] : memref<9x16x64xbf16, #tpu.memory_space<vmem>>, vector<1x16x64xbf16>
    %234 = vector.shape_cast %233 : vector<1x16x64xbf16> to vector<16x64xbf16>
    %cst_220 = arith.constant dense<0.000000e+00> : vector<16x32xf32>
    %235 = tpu.matmul %234, %201, %cst_220 {dimension_numbers = #tpu.dot_dimension_numbers<[1], [0], [0], [1], [0, 0, 1, 1], [], []>} : vector<16x64xbf16>, vector<64x32xbf16>, vector<16x32xf32> -> vector<16x32xf32>
    %236 = arith.truncf %235 : vector<16x32xf32> to vector<16x32xbf16>
    %c4_221 = arith.constant 4 : index
    %c0_222 = arith.constant 0 : index
    %c0_223 = arith.constant 0 : index
    %237 = vector.load %arg13[%c4_221, %c0_222, %c0_223] : memref<9x32x64xbf16, #tpu.memory_space<vmem>>, vector<1x32x64xbf16>
    %238 = vector.shape_cast %237 : vector<1x32x64xbf16> to vector<32x64xbf16>
    %cst_224 = arith.constant dense<0.000000e+00> : vector<16x64xf32>
    %239 = tpu.matmul %236, %238, %cst_224 {dimension_numbers = #tpu.dot_dimension_numbers<[1], [0], [0], [1], [0, 0, 1, 1], [], []>} : vector<16x32xbf16>, vector<32x64xbf16>, vector<16x64xf32> -> vector<16x64xf32>
    %240 = arith.addf %232, %239 : vector<16x64xf32>
    %c5_225 = arith.constant 5 : index
    %c0_226 = arith.constant 0 : index
    %c0_227 = arith.constant 0 : index
    %241 = vector.load %arg11[%c5_225, %c0_226, %c0_227] : memref<9x16x64xbf16, #tpu.memory_space<vmem>>, vector<1x16x64xbf16>
    %242 = vector.shape_cast %241 : vector<1x16x64xbf16> to vector<16x64xbf16>
    %cst_228 = arith.constant dense<0.000000e+00> : vector<16x32xf32>
    %243 = tpu.matmul %242, %201, %cst_228 {dimension_numbers = #tpu.dot_dimension_numbers<[1], [0], [0], [1], [0, 0, 1, 1], [], []>} : vector<16x64xbf16>, vector<64x32xbf16>, vector<16x32xf32> -> vector<16x32xf32>
    %244 = arith.truncf %243 : vector<16x32xf32> to vector<16x32xbf16>
    %c5_229 = arith.constant 5 : index
    %c0_230 = arith.constant 0 : index
    %c0_231 = arith.constant 0 : index
    %245 = vector.load %arg13[%c5_229, %c0_230, %c0_231] : memref<9x32x64xbf16, #tpu.memory_space<vmem>>, vector<1x32x64xbf16>
    %246 = vector.shape_cast %245 : vector<1x32x64xbf16> to vector<32x64xbf16>
    %cst_232 = arith.constant dense<0.000000e+00> : vector<16x64xf32>
    %247 = tpu.matmul %244, %246, %cst_232 {dimension_numbers = #tpu.dot_dimension_numbers<[1], [0], [0], [1], [0, 0, 1, 1], [], []>} : vector<16x32xbf16>, vector<32x64xbf16>, vector<16x64xf32> -> vector<16x64xf32>
    %248 = arith.addf %240, %247 : vector<16x64xf32>
    %c6_233 = arith.constant 6 : index
    %c0_234 = arith.constant 0 : index
    %c0_235 = arith.constant 0 : index
    %249 = vector.load %arg11[%c6_233, %c0_234, %c0_235] : memref<9x16x64xbf16, #tpu.memory_space<vmem>>, vector<1x16x64xbf16>
    %250 = vector.shape_cast %249 : vector<1x16x64xbf16> to vector<16x64xbf16>
    %cst_236 = arith.constant dense<0.000000e+00> : vector<16x32xf32>
    %251 = tpu.matmul %250, %201, %cst_236 {dimension_numbers = #tpu.dot_dimension_numbers<[1], [0], [0], [1], [0, 0, 1, 1], [], []>} : vector<16x64xbf16>, vector<64x32xbf16>, vector<16x32xf32> -> vector<16x32xf32>
    %252 = arith.truncf %251 : vector<16x32xf32> to vector<16x32xbf16>
    %c6_237 = arith.constant 6 : index
    %c0_238 = arith.constant 0 : index
    %c0_239 = arith.constant 0 : index
    %253 = vector.load %arg13[%c6_237, %c0_238, %c0_239] : memref<9x32x64xbf16, #tpu.memory_space<vmem>>, vector<1x32x64xbf16>
    %254 = vector.shape_cast %253 : vector<1x32x64xbf16> to vector<32x64xbf16>
    %cst_240 = arith.constant dense<0.000000e+00> : vector<16x64xf32>
    %255 = tpu.matmul %252, %254, %cst_240 {dimension_numbers = #tpu.dot_dimension_numbers<[1], [0], [0], [1], [0, 0, 1, 1], [], []>} : vector<16x32xbf16>, vector<32x64xbf16>, vector<16x64xf32> -> vector<16x64xf32>
    %256 = arith.addf %248, %255 : vector<16x64xf32>
    %c7_241 = arith.constant 7 : index
    %c0_242 = arith.constant 0 : index
    %c0_243 = arith.constant 0 : index
    %257 = vector.load %arg11[%c7_241, %c0_242, %c0_243] : memref<9x16x64xbf16, #tpu.memory_space<vmem>>, vector<1x16x64xbf16>
    %258 = vector.shape_cast %257 : vector<1x16x64xbf16> to vector<16x64xbf16>
    %cst_244 = arith.constant dense<0.000000e+00> : vector<16x32xf32>
    %259 = tpu.matmul %258, %201, %cst_244 {dimension_numbers = #tpu.dot_dimension_numbers<[1], [0], [0], [1], [0, 0, 1, 1], [], []>} : vector<16x64xbf16>, vector<64x32xbf16>, vector<16x32xf32> -> vector<16x32xf32>
    %260 = arith.truncf %259 : vector<16x32xf32> to vector<16x32xbf16>
    %c7_245 = arith.constant 7 : index
    %c0_246 = arith.constant 0 : index
    %c0_247 = arith.constant 0 : index
    %261 = vector.load %arg13[%c7_245, %c0_246, %c0_247] : memref<9x32x64xbf16, #tpu.memory_space<vmem>>, vector<1x32x64xbf16>
    %262 = vector.shape_cast %261 : vector<1x32x64xbf16> to vector<32x64xbf16>
    %cst_248 = arith.constant dense<0.000000e+00> : vector<16x64xf32>
    %263 = tpu.matmul %260, %262, %cst_248 {dimension_numbers = #tpu.dot_dimension_numbers<[1], [0], [0], [1], [0, 0, 1, 1], [], []>} : vector<16x32xbf16>, vector<32x64xbf16>, vector<16x64xf32> -> vector<16x64xf32>
    %264 = arith.addf %256, %263 : vector<16x64xf32>
    %c8_249 = arith.constant 8 : index
    %c0_250 = arith.constant 0 : index
    %c0_251 = arith.constant 0 : index
    %265 = vector.load %arg11[%c8_249, %c0_250, %c0_251] : memref<9x16x64xbf16, #tpu.memory_space<vmem>>, vector<1x16x64xbf16>
    %266 = vector.shape_cast %265 : vector<1x16x64xbf16> to vector<16x64xbf16>
    %cst_252 = arith.constant dense<0.000000e+00> : vector<16x32xf32>
    %267 = tpu.matmul %266, %201, %cst_252 {dimension_numbers = #tpu.dot_dimension_numbers<[1], [0], [0], [1], [0, 0, 1, 1], [], []>} : vector<16x64xbf16>, vector<64x32xbf16>, vector<16x32xf32> -> vector<16x32xf32>
    %268 = arith.truncf %267 : vector<16x32xf32> to vector<16x32xbf16>
    %c8_253 = arith.constant 8 : index
    %c0_254 = arith.constant 0 : index
    %c0_255 = arith.constant 0 : index
    %269 = vector.load %arg13[%c8_253, %c0_254, %c0_255] : memref<9x32x64xbf16, #tpu.memory_space<vmem>>, vector<1x32x64xbf16>
    %270 = vector.shape_cast %269 : vector<1x32x64xbf16> to vector<32x64xbf16>
    %cst_256 = arith.constant dense<0.000000e+00> : vector<16x64xf32>
    %271 = tpu.matmul %268, %270, %cst_256 {dimension_numbers = #tpu.dot_dimension_numbers<[1], [0], [0], [1], [0, 0, 1, 1], [], []>} : vector<16x32xbf16>, vector<32x64xbf16>, vector<16x64xf32> -> vector<16x64xf32>
    %272 = arith.addf %264, %271 : vector<16x64xf32>
    %c0_257 = arith.constant 0 : index
    %c0_258 = arith.constant 0 : index
    %273 = vector.load %arg14[%c0_257, %c0_258] : memref<1x64xf32, #tpu.memory_space<vmem>>, vector<1x64xf32>
    %274 = vector.broadcast %273 : vector<1x64xf32> to vector<16x64xf32>
    %275 = arith.addf %272, %274 : vector<16x64xf32>
    %cst_259 = arith.constant 0.000000e+00 : f32
    %276 = vector.broadcast %cst_259 : f32 to vector<16x64xf32>
    %277 = arith.maximumf %275, %276 : vector<16x64xf32>
    %278 = arith.truncf %277 : vector<16x64xf32> to vector<16x64xbf16>
    %c0_260 = arith.constant 0 : index
    %c0_261 = arith.constant 0 : index
    %c0_262 = arith.constant 0 : index
    %279 = vector.load %arg12[%c0_260, %c0_261, %c0_262] : memref<9x16x16xbf16, #tpu.memory_space<vmem>>, vector<1x16x16xbf16>
    %280 = vector.shape_cast %279 : vector<1x16x16xbf16> to vector<16x16xbf16>
    %cst_263 = arith.constant dense<0.000000e+00> : vector<16x64xf32>
    %281 = tpu.matmul %280, %278, %cst_263 {dimension_numbers = #tpu.dot_dimension_numbers<[1], [0], [0], [1], [0, 0, 1, 1], [], []>} : vector<16x16xbf16>, vector<16x64xbf16>, vector<16x64xf32> -> vector<16x64xf32>
    %282 = arith.truncf %281 : vector<16x64xf32> to vector<16x64xbf16>
    %c0_264 = arith.constant 0 : index
    %c0_265 = arith.constant 0 : index
    %c0_266 = arith.constant 0 : index
    %283 = vector.load %arg15[%c0_264, %c0_265, %c0_266] : memref<9x64x64xbf16, #tpu.memory_space<vmem>>, vector<1x64x64xbf16>
    %284 = vector.shape_cast %283 : vector<1x64x64xbf16> to vector<64x64xbf16>
    %cst_267 = arith.constant dense<0.000000e+00> : vector<16x64xf32>
    %285 = tpu.matmul %282, %284, %cst_267 {dimension_numbers = #tpu.dot_dimension_numbers<[1], [0], [0], [1], [0, 0, 1, 1], [], []>} : vector<16x64xbf16>, vector<64x64xbf16>, vector<16x64xf32> -> vector<16x64xf32>
    %c1_268 = arith.constant 1 : index
    %c0_269 = arith.constant 0 : index
    %c0_270 = arith.constant 0 : index
    %286 = vector.load %arg12[%c1_268, %c0_269, %c0_270] : memref<9x16x16xbf16, #tpu.memory_space<vmem>>, vector<1x16x16xbf16>
    %287 = vector.shape_cast %286 : vector<1x16x16xbf16> to vector<16x16xbf16>
    %cst_271 = arith.constant dense<0.000000e+00> : vector<16x64xf32>
    %288 = tpu.matmul %287, %278, %cst_271 {dimension_numbers = #tpu.dot_dimension_numbers<[1], [0], [0], [1], [0, 0, 1, 1], [], []>} : vector<16x16xbf16>, vector<16x64xbf16>, vector<16x64xf32> -> vector<16x64xf32>
    %289 = arith.truncf %288 : vector<16x64xf32> to vector<16x64xbf16>
    %c1_272 = arith.constant 1 : index
    %c0_273 = arith.constant 0 : index
    %c0_274 = arith.constant 0 : index
    %290 = vector.load %arg15[%c1_272, %c0_273, %c0_274] : memref<9x64x64xbf16, #tpu.memory_space<vmem>>, vector<1x64x64xbf16>
    %291 = vector.shape_cast %290 : vector<1x64x64xbf16> to vector<64x64xbf16>
    %cst_275 = arith.constant dense<0.000000e+00> : vector<16x64xf32>
    %292 = tpu.matmul %289, %291, %cst_275 {dimension_numbers = #tpu.dot_dimension_numbers<[1], [0], [0], [1], [0, 0, 1, 1], [], []>} : vector<16x64xbf16>, vector<64x64xbf16>, vector<16x64xf32> -> vector<16x64xf32>
    %293 = arith.addf %285, %292 : vector<16x64xf32>
    %c2_276 = arith.constant 2 : index
    %c0_277 = arith.constant 0 : index
    %c0_278 = arith.constant 0 : index
    %294 = vector.load %arg12[%c2_276, %c0_277, %c0_278] : memref<9x16x16xbf16, #tpu.memory_space<vmem>>, vector<1x16x16xbf16>
    %295 = vector.shape_cast %294 : vector<1x16x16xbf16> to vector<16x16xbf16>
    %cst_279 = arith.constant dense<0.000000e+00> : vector<16x64xf32>
    %296 = tpu.matmul %295, %278, %cst_279 {dimension_numbers = #tpu.dot_dimension_numbers<[1], [0], [0], [1], [0, 0, 1, 1], [], []>} : vector<16x16xbf16>, vector<16x64xbf16>, vector<16x64xf32> -> vector<16x64xf32>
    %297 = arith.truncf %296 : vector<16x64xf32> to vector<16x64xbf16>
    %c2_280 = arith.constant 2 : index
    %c0_281 = arith.constant 0 : index
    %c0_282 = arith.constant 0 : index
    %298 = vector.load %arg15[%c2_280, %c0_281, %c0_282] : memref<9x64x64xbf16, #tpu.memory_space<vmem>>, vector<1x64x64xbf16>
    %299 = vector.shape_cast %298 : vector<1x64x64xbf16> to vector<64x64xbf16>
    %cst_283 = arith.constant dense<0.000000e+00> : vector<16x64xf32>
    %300 = tpu.matmul %297, %299, %cst_283 {dimension_numbers = #tpu.dot_dimension_numbers<[1], [0], [0], [1], [0, 0, 1, 1], [], []>} : vector<16x64xbf16>, vector<64x64xbf16>, vector<16x64xf32> -> vector<16x64xf32>
    %301 = arith.addf %293, %300 : vector<16x64xf32>
    %c3_284 = arith.constant 3 : index
    %c0_285 = arith.constant 0 : index
    %c0_286 = arith.constant 0 : index
    %302 = vector.load %arg12[%c3_284, %c0_285, %c0_286] : memref<9x16x16xbf16, #tpu.memory_space<vmem>>, vector<1x16x16xbf16>
    %303 = vector.shape_cast %302 : vector<1x16x16xbf16> to vector<16x16xbf16>
    %cst_287 = arith.constant dense<0.000000e+00> : vector<16x64xf32>
    %304 = tpu.matmul %303, %278, %cst_287 {dimension_numbers = #tpu.dot_dimension_numbers<[1], [0], [0], [1], [0, 0, 1, 1], [], []>} : vector<16x16xbf16>, vector<16x64xbf16>, vector<16x64xf32> -> vector<16x64xf32>
    %305 = arith.truncf %304 : vector<16x64xf32> to vector<16x64xbf16>
    %c3_288 = arith.constant 3 : index
    %c0_289 = arith.constant 0 : index
    %c0_290 = arith.constant 0 : index
    %306 = vector.load %arg15[%c3_288, %c0_289, %c0_290] : memref<9x64x64xbf16, #tpu.memory_space<vmem>>, vector<1x64x64xbf16>
    %307 = vector.shape_cast %306 : vector<1x64x64xbf16> to vector<64x64xbf16>
    %cst_291 = arith.constant dense<0.000000e+00> : vector<16x64xf32>
    %308 = tpu.matmul %305, %307, %cst_291 {dimension_numbers = #tpu.dot_dimension_numbers<[1], [0], [0], [1], [0, 0, 1, 1], [], []>} : vector<16x64xbf16>, vector<64x64xbf16>, vector<16x64xf32> -> vector<16x64xf32>
    %309 = arith.addf %301, %308 : vector<16x64xf32>
    %c4_292 = arith.constant 4 : index
    %c0_293 = arith.constant 0 : index
    %c0_294 = arith.constant 0 : index
    %310 = vector.load %arg12[%c4_292, %c0_293, %c0_294] : memref<9x16x16xbf16, #tpu.memory_space<vmem>>, vector<1x16x16xbf16>
    %311 = vector.shape_cast %310 : vector<1x16x16xbf16> to vector<16x16xbf16>
    %cst_295 = arith.constant dense<0.000000e+00> : vector<16x64xf32>
    %312 = tpu.matmul %311, %278, %cst_295 {dimension_numbers = #tpu.dot_dimension_numbers<[1], [0], [0], [1], [0, 0, 1, 1], [], []>} : vector<16x16xbf16>, vector<16x64xbf16>, vector<16x64xf32> -> vector<16x64xf32>
    %313 = arith.truncf %312 : vector<16x64xf32> to vector<16x64xbf16>
    %c4_296 = arith.constant 4 : index
    %c0_297 = arith.constant 0 : index
    %c0_298 = arith.constant 0 : index
    %314 = vector.load %arg15[%c4_296, %c0_297, %c0_298] : memref<9x64x64xbf16, #tpu.memory_space<vmem>>, vector<1x64x64xbf16>
    %315 = vector.shape_cast %314 : vector<1x64x64xbf16> to vector<64x64xbf16>
    %cst_299 = arith.constant dense<0.000000e+00> : vector<16x64xf32>
    %316 = tpu.matmul %313, %315, %cst_299 {dimension_numbers = #tpu.dot_dimension_numbers<[1], [0], [0], [1], [0, 0, 1, 1], [], []>} : vector<16x64xbf16>, vector<64x64xbf16>, vector<16x64xf32> -> vector<16x64xf32>
    %317 = arith.addf %309, %316 : vector<16x64xf32>
    %c5_300 = arith.constant 5 : index
    %c0_301 = arith.constant 0 : index
    %c0_302 = arith.constant 0 : index
    %318 = vector.load %arg12[%c5_300, %c0_301, %c0_302] : memref<9x16x16xbf16, #tpu.memory_space<vmem>>, vector<1x16x16xbf16>
    %319 = vector.shape_cast %318 : vector<1x16x16xbf16> to vector<16x16xbf16>
    %cst_303 = arith.constant dense<0.000000e+00> : vector<16x64xf32>
    %320 = tpu.matmul %319, %278, %cst_303 {dimension_numbers = #tpu.dot_dimension_numbers<[1], [0], [0], [1], [0, 0, 1, 1], [], []>} : vector<16x16xbf16>, vector<16x64xbf16>, vector<16x64xf32> -> vector<16x64xf32>
    %321 = arith.truncf %320 : vector<16x64xf32> to vector<16x64xbf16>
    %c5_304 = arith.constant 5 : index
    %c0_305 = arith.constant 0 : index
    %c0_306 = arith.constant 0 : index
    %322 = vector.load %arg15[%c5_304, %c0_305, %c0_306] : memref<9x64x64xbf16, #tpu.memory_space<vmem>>, vector<1x64x64xbf16>
    %323 = vector.shape_cast %322 : vector<1x64x64xbf16> to vector<64x64xbf16>
    %cst_307 = arith.constant dense<0.000000e+00> : vector<16x64xf32>
    %324 = tpu.matmul %321, %323, %cst_307 {dimension_numbers = #tpu.dot_dimension_numbers<[1], [0], [0], [1], [0, 0, 1, 1], [], []>} : vector<16x64xbf16>, vector<64x64xbf16>, vector<16x64xf32> -> vector<16x64xf32>
    %325 = arith.addf %317, %324 : vector<16x64xf32>
    %c6_308 = arith.constant 6 : index
    %c0_309 = arith.constant 0 : index
    %c0_310 = arith.constant 0 : index
    %326 = vector.load %arg12[%c6_308, %c0_309, %c0_310] : memref<9x16x16xbf16, #tpu.memory_space<vmem>>, vector<1x16x16xbf16>
    %327 = vector.shape_cast %326 : vector<1x16x16xbf16> to vector<16x16xbf16>
    %cst_311 = arith.constant dense<0.000000e+00> : vector<16x64xf32>
    %328 = tpu.matmul %327, %278, %cst_311 {dimension_numbers = #tpu.dot_dimension_numbers<[1], [0], [0], [1], [0, 0, 1, 1], [], []>} : vector<16x16xbf16>, vector<16x64xbf16>, vector<16x64xf32> -> vector<16x64xf32>
    %329 = arith.truncf %328 : vector<16x64xf32> to vector<16x64xbf16>
    %c6_312 = arith.constant 6 : index
    %c0_313 = arith.constant 0 : index
    %c0_314 = arith.constant 0 : index
    %330 = vector.load %arg15[%c6_312, %c0_313, %c0_314] : memref<9x64x64xbf16, #tpu.memory_space<vmem>>, vector<1x64x64xbf16>
    %331 = vector.shape_cast %330 : vector<1x64x64xbf16> to vector<64x64xbf16>
    %cst_315 = arith.constant dense<0.000000e+00> : vector<16x64xf32>
    %332 = tpu.matmul %329, %331, %cst_315 {dimension_numbers = #tpu.dot_dimension_numbers<[1], [0], [0], [1], [0, 0, 1, 1], [], []>} : vector<16x64xbf16>, vector<64x64xbf16>, vector<16x64xf32> -> vector<16x64xf32>
    %333 = arith.addf %325, %332 : vector<16x64xf32>
    %c7_316 = arith.constant 7 : index
    %c0_317 = arith.constant 0 : index
    %c0_318 = arith.constant 0 : index
    %334 = vector.load %arg12[%c7_316, %c0_317, %c0_318] : memref<9x16x16xbf16, #tpu.memory_space<vmem>>, vector<1x16x16xbf16>
    %335 = vector.shape_cast %334 : vector<1x16x16xbf16> to vector<16x16xbf16>
    %cst_319 = arith.constant dense<0.000000e+00> : vector<16x64xf32>
    %336 = tpu.matmul %335, %278, %cst_319 {dimension_numbers = #tpu.dot_dimension_numbers<[1], [0], [0], [1], [0, 0, 1, 1], [], []>} : vector<16x16xbf16>, vector<16x64xbf16>, vector<16x64xf32> -> vector<16x64xf32>
    %337 = arith.truncf %336 : vector<16x64xf32> to vector<16x64xbf16>
    %c7_320 = arith.constant 7 : index
    %c0_321 = arith.constant 0 : index
    %c0_322 = arith.constant 0 : index
    %338 = vector.load %arg15[%c7_320, %c0_321, %c0_322] : memref<9x64x64xbf16, #tpu.memory_space<vmem>>, vector<1x64x64xbf16>
    %339 = vector.shape_cast %338 : vector<1x64x64xbf16> to vector<64x64xbf16>
    %cst_323 = arith.constant dense<0.000000e+00> : vector<16x64xf32>
    %340 = tpu.matmul %337, %339, %cst_323 {dimension_numbers = #tpu.dot_dimension_numbers<[1], [0], [0], [1], [0, 0, 1, 1], [], []>} : vector<16x64xbf16>, vector<64x64xbf16>, vector<16x64xf32> -> vector<16x64xf32>
    %341 = arith.addf %333, %340 : vector<16x64xf32>
    %c8_324 = arith.constant 8 : index
    %c0_325 = arith.constant 0 : index
    %c0_326 = arith.constant 0 : index
    %342 = vector.load %arg12[%c8_324, %c0_325, %c0_326] : memref<9x16x16xbf16, #tpu.memory_space<vmem>>, vector<1x16x16xbf16>
    %343 = vector.shape_cast %342 : vector<1x16x16xbf16> to vector<16x16xbf16>
    %cst_327 = arith.constant dense<0.000000e+00> : vector<16x64xf32>
    %344 = tpu.matmul %343, %278, %cst_327 {dimension_numbers = #tpu.dot_dimension_numbers<[1], [0], [0], [1], [0, 0, 1, 1], [], []>} : vector<16x16xbf16>, vector<16x64xbf16>, vector<16x64xf32> -> vector<16x64xf32>
    %345 = arith.truncf %344 : vector<16x64xf32> to vector<16x64xbf16>
    %c8_328 = arith.constant 8 : index
    %c0_329 = arith.constant 0 : index
    %c0_330 = arith.constant 0 : index
    %346 = vector.load %arg15[%c8_328, %c0_329, %c0_330] : memref<9x64x64xbf16, #tpu.memory_space<vmem>>, vector<1x64x64xbf16>
    %347 = vector.shape_cast %346 : vector<1x64x64xbf16> to vector<64x64xbf16>
    %cst_331 = arith.constant dense<0.000000e+00> : vector<16x64xf32>
    %348 = tpu.matmul %345, %347, %cst_331 {dimension_numbers = #tpu.dot_dimension_numbers<[1], [0], [0], [1], [0, 0, 1, 1], [], []>} : vector<16x64xbf16>, vector<64x64xbf16>, vector<16x64xf32> -> vector<16x64xf32>
    %349 = arith.addf %341, %348 : vector<16x64xf32>
    %c0_332 = arith.constant 0 : index
    %c0_333 = arith.constant 0 : index
    %350 = vector.load %arg16[%c0_332, %c0_333] : memref<1x64xf32, #tpu.memory_space<vmem>>, vector<1x64xf32>
    %351 = vector.broadcast %350 : vector<1x64xf32> to vector<16x64xf32>
    %352 = arith.addf %349, %351 : vector<16x64xf32>
    %c0_334 = arith.constant 0 : index
    %c0_335 = arith.constant 0 : index
    %353 = vector.load %arg17[%c0_334, %c0_335] : memref<16x64xbf16, #tpu.memory_space<vmem>>, vector<16x64xbf16>
    %cst_336 = arith.constant dense<0.000000e+00> : vector<16x32xf32>
    %354 = tpu.matmul %353, %201, %cst_336 {dimension_numbers = #tpu.dot_dimension_numbers<[1], [0], [0], [1], [0, 0, 1, 1], [], []>} : vector<16x64xbf16>, vector<64x32xbf16>, vector<16x32xf32> -> vector<16x32xf32>
    %355 = arith.truncf %354 : vector<16x32xf32> to vector<16x32xbf16>
    %c0_337 = arith.constant 0 : index
    %c0_338 = arith.constant 0 : index
    %356 = vector.load %arg18[%c0_337, %c0_338] : memref<32x64xbf16, #tpu.memory_space<vmem>>, vector<32x64xbf16>
    %cst_339 = arith.constant dense<0.000000e+00> : vector<16x64xf32>
    %357 = tpu.matmul %355, %356, %cst_339 {dimension_numbers = #tpu.dot_dimension_numbers<[1], [0], [0], [1], [0, 0, 1, 1], [], []>} : vector<16x32xbf16>, vector<32x64xbf16>, vector<16x64xf32> -> vector<16x64xf32>
    %c0_340 = arith.constant 0 : index
    %c0_341 = arith.constant 0 : index
    %358 = vector.load %arg19[%c0_340, %c0_341] : memref<1x64xf32, #tpu.memory_space<vmem>>, vector<1x64xf32>
    %359 = vector.broadcast %358 : vector<1x64xf32> to vector<16x64xf32>
    %360 = arith.addf %357, %359 : vector<16x64xf32>
    %361 = arith.addf %352, %360 : vector<16x64xf32>
    %cst_342 = arith.constant 0.000000e+00 : f32
    %362 = vector.broadcast %cst_342 : f32 to vector<16x64xf32>
    %363 = arith.maximumf %361, %362 : vector<16x64xf32>
    %364 = arith.truncf %363 : vector<16x64xf32> to vector<16x64xbf16>
    %c0_343 = arith.constant 0 : index
    %c0_344 = arith.constant 0 : index
    %c0_345 = arith.constant 0 : index
    %365 = vector.load %arg20[%c0_343, %c0_344, %c0_345] : memref<9x4x16xbf16, #tpu.memory_space<vmem>>, vector<1x4x16xbf16>
    %366 = vector.shape_cast %365 : vector<1x4x16xbf16> to vector<4x16xbf16>
    %cst_346 = arith.constant dense<0.000000e+00> : vector<4x64xf32>
    %367 = tpu.matmul %366, %364, %cst_346 {dimension_numbers = #tpu.dot_dimension_numbers<[1], [0], [0], [1], [0, 0, 1, 1], [], []>} : vector<4x16xbf16>, vector<16x64xbf16>, vector<4x64xf32> -> vector<4x64xf32>
    %368 = arith.truncf %367 : vector<4x64xf32> to vector<4x64xbf16>
    %c0_347 = arith.constant 0 : index
    %c0_348 = arith.constant 0 : index
    %c0_349 = arith.constant 0 : index
    %369 = vector.load %arg22[%c0_347, %c0_348, %c0_349] : memref<9x64x128xbf16, #tpu.memory_space<vmem>>, vector<1x64x128xbf16>
    %370 = vector.shape_cast %369 : vector<1x64x128xbf16> to vector<64x128xbf16>
    %cst_350 = arith.constant dense<0.000000e+00> : vector<4x128xf32>
    %371 = tpu.matmul %368, %370, %cst_350 {dimension_numbers = #tpu.dot_dimension_numbers<[1], [0], [0], [1], [0, 0, 1, 1], [], []>} : vector<4x64xbf16>, vector<64x128xbf16>, vector<4x128xf32> -> vector<4x128xf32>
    %c1_351 = arith.constant 1 : index
    %c0_352 = arith.constant 0 : index
    %c0_353 = arith.constant 0 : index
    %372 = vector.load %arg20[%c1_351, %c0_352, %c0_353] : memref<9x4x16xbf16, #tpu.memory_space<vmem>>, vector<1x4x16xbf16>
    %373 = vector.shape_cast %372 : vector<1x4x16xbf16> to vector<4x16xbf16>
    %cst_354 = arith.constant dense<0.000000e+00> : vector<4x64xf32>
    %374 = tpu.matmul %373, %364, %cst_354 {dimension_numbers = #tpu.dot_dimension_numbers<[1], [0], [0], [1], [0, 0, 1, 1], [], []>} : vector<4x16xbf16>, vector<16x64xbf16>, vector<4x64xf32> -> vector<4x64xf32>
    %375 = arith.truncf %374 : vector<4x64xf32> to vector<4x64xbf16>
    %c1_355 = arith.constant 1 : index
    %c0_356 = arith.constant 0 : index
    %c0_357 = arith.constant 0 : index
    %376 = vector.load %arg22[%c1_355, %c0_356, %c0_357] : memref<9x64x128xbf16, #tpu.memory_space<vmem>>, vector<1x64x128xbf16>
    %377 = vector.shape_cast %376 : vector<1x64x128xbf16> to vector<64x128xbf16>
    %cst_358 = arith.constant dense<0.000000e+00> : vector<4x128xf32>
    %378 = tpu.matmul %375, %377, %cst_358 {dimension_numbers = #tpu.dot_dimension_numbers<[1], [0], [0], [1], [0, 0, 1, 1], [], []>} : vector<4x64xbf16>, vector<64x128xbf16>, vector<4x128xf32> -> vector<4x128xf32>
    %379 = arith.addf %371, %378 : vector<4x128xf32>
    %c2_359 = arith.constant 2 : index
    %c0_360 = arith.constant 0 : index
    %c0_361 = arith.constant 0 : index
    %380 = vector.load %arg20[%c2_359, %c0_360, %c0_361] : memref<9x4x16xbf16, #tpu.memory_space<vmem>>, vector<1x4x16xbf16>
    %381 = vector.shape_cast %380 : vector<1x4x16xbf16> to vector<4x16xbf16>
    %cst_362 = arith.constant dense<0.000000e+00> : vector<4x64xf32>
    %382 = tpu.matmul %381, %364, %cst_362 {dimension_numbers = #tpu.dot_dimension_numbers<[1], [0], [0], [1], [0, 0, 1, 1], [], []>} : vector<4x16xbf16>, vector<16x64xbf16>, vector<4x64xf32> -> vector<4x64xf32>
    %383 = arith.truncf %382 : vector<4x64xf32> to vector<4x64xbf16>
    %c2_363 = arith.constant 2 : index
    %c0_364 = arith.constant 0 : index
    %c0_365 = arith.constant 0 : index
    %384 = vector.load %arg22[%c2_363, %c0_364, %c0_365] : memref<9x64x128xbf16, #tpu.memory_space<vmem>>, vector<1x64x128xbf16>
    %385 = vector.shape_cast %384 : vector<1x64x128xbf16> to vector<64x128xbf16>
    %cst_366 = arith.constant dense<0.000000e+00> : vector<4x128xf32>
    %386 = tpu.matmul %383, %385, %cst_366 {dimension_numbers = #tpu.dot_dimension_numbers<[1], [0], [0], [1], [0, 0, 1, 1], [], []>} : vector<4x64xbf16>, vector<64x128xbf16>, vector<4x128xf32> -> vector<4x128xf32>
    %387 = arith.addf %379, %386 : vector<4x128xf32>
    %c3_367 = arith.constant 3 : index
    %c0_368 = arith.constant 0 : index
    %c0_369 = arith.constant 0 : index
    %388 = vector.load %arg20[%c3_367, %c0_368, %c0_369] : memref<9x4x16xbf16, #tpu.memory_space<vmem>>, vector<1x4x16xbf16>
    %389 = vector.shape_cast %388 : vector<1x4x16xbf16> to vector<4x16xbf16>
    %cst_370 = arith.constant dense<0.000000e+00> : vector<4x64xf32>
    %390 = tpu.matmul %389, %364, %cst_370 {dimension_numbers = #tpu.dot_dimension_numbers<[1], [0], [0], [1], [0, 0, 1, 1], [], []>} : vector<4x16xbf16>, vector<16x64xbf16>, vector<4x64xf32> -> vector<4x64xf32>
    %391 = arith.truncf %390 : vector<4x64xf32> to vector<4x64xbf16>
    %c3_371 = arith.constant 3 : index
    %c0_372 = arith.constant 0 : index
    %c0_373 = arith.constant 0 : index
    %392 = vector.load %arg22[%c3_371, %c0_372, %c0_373] : memref<9x64x128xbf16, #tpu.memory_space<vmem>>, vector<1x64x128xbf16>
    %393 = vector.shape_cast %392 : vector<1x64x128xbf16> to vector<64x128xbf16>
    %cst_374 = arith.constant dense<0.000000e+00> : vector<4x128xf32>
    %394 = tpu.matmul %391, %393, %cst_374 {dimension_numbers = #tpu.dot_dimension_numbers<[1], [0], [0], [1], [0, 0, 1, 1], [], []>} : vector<4x64xbf16>, vector<64x128xbf16>, vector<4x128xf32> -> vector<4x128xf32>
    %395 = arith.addf %387, %394 : vector<4x128xf32>
    %c4_375 = arith.constant 4 : index
    %c0_376 = arith.constant 0 : index
    %c0_377 = arith.constant 0 : index
    %396 = vector.load %arg20[%c4_375, %c0_376, %c0_377] : memref<9x4x16xbf16, #tpu.memory_space<vmem>>, vector<1x4x16xbf16>
    %397 = vector.shape_cast %396 : vector<1x4x16xbf16> to vector<4x16xbf16>
    %cst_378 = arith.constant dense<0.000000e+00> : vector<4x64xf32>
    %398 = tpu.matmul %397, %364, %cst_378 {dimension_numbers = #tpu.dot_dimension_numbers<[1], [0], [0], [1], [0, 0, 1, 1], [], []>} : vector<4x16xbf16>, vector<16x64xbf16>, vector<4x64xf32> -> vector<4x64xf32>
    %399 = arith.truncf %398 : vector<4x64xf32> to vector<4x64xbf16>
    %c4_379 = arith.constant 4 : index
    %c0_380 = arith.constant 0 : index
    %c0_381 = arith.constant 0 : index
    %400 = vector.load %arg22[%c4_379, %c0_380, %c0_381] : memref<9x64x128xbf16, #tpu.memory_space<vmem>>, vector<1x64x128xbf16>
    %401 = vector.shape_cast %400 : vector<1x64x128xbf16> to vector<64x128xbf16>
    %cst_382 = arith.constant dense<0.000000e+00> : vector<4x128xf32>
    %402 = tpu.matmul %399, %401, %cst_382 {dimension_numbers = #tpu.dot_dimension_numbers<[1], [0], [0], [1], [0, 0, 1, 1], [], []>} : vector<4x64xbf16>, vector<64x128xbf16>, vector<4x128xf32> -> vector<4x128xf32>
    %403 = arith.addf %395, %402 : vector<4x128xf32>
    %c5_383 = arith.constant 5 : index
    %c0_384 = arith.constant 0 : index
    %c0_385 = arith.constant 0 : index
    %404 = vector.load %arg20[%c5_383, %c0_384, %c0_385] : memref<9x4x16xbf16, #tpu.memory_space<vmem>>, vector<1x4x16xbf16>
    %405 = vector.shape_cast %404 : vector<1x4x16xbf16> to vector<4x16xbf16>
    %cst_386 = arith.constant dense<0.000000e+00> : vector<4x64xf32>
    %406 = tpu.matmul %405, %364, %cst_386 {dimension_numbers = #tpu.dot_dimension_numbers<[1], [0], [0], [1], [0, 0, 1, 1], [], []>} : vector<4x16xbf16>, vector<16x64xbf16>, vector<4x64xf32> -> vector<4x64xf32>
    %407 = arith.truncf %406 : vector<4x64xf32> to vector<4x64xbf16>
    %c5_387 = arith.constant 5 : index
    %c0_388 = arith.constant 0 : index
    %c0_389 = arith.constant 0 : index
    %408 = vector.load %arg22[%c5_387, %c0_388, %c0_389] : memref<9x64x128xbf16, #tpu.memory_space<vmem>>, vector<1x64x128xbf16>
    %409 = vector.shape_cast %408 : vector<1x64x128xbf16> to vector<64x128xbf16>
    %cst_390 = arith.constant dense<0.000000e+00> : vector<4x128xf32>
    %410 = tpu.matmul %407, %409, %cst_390 {dimension_numbers = #tpu.dot_dimension_numbers<[1], [0], [0], [1], [0, 0, 1, 1], [], []>} : vector<4x64xbf16>, vector<64x128xbf16>, vector<4x128xf32> -> vector<4x128xf32>
    %411 = arith.addf %403, %410 : vector<4x128xf32>
    %c6_391 = arith.constant 6 : index
    %c0_392 = arith.constant 0 : index
    %c0_393 = arith.constant 0 : index
    %412 = vector.load %arg20[%c6_391, %c0_392, %c0_393] : memref<9x4x16xbf16, #tpu.memory_space<vmem>>, vector<1x4x16xbf16>
    %413 = vector.shape_cast %412 : vector<1x4x16xbf16> to vector<4x16xbf16>
    %cst_394 = arith.constant dense<0.000000e+00> : vector<4x64xf32>
    %414 = tpu.matmul %413, %364, %cst_394 {dimension_numbers = #tpu.dot_dimension_numbers<[1], [0], [0], [1], [0, 0, 1, 1], [], []>} : vector<4x16xbf16>, vector<16x64xbf16>, vector<4x64xf32> -> vector<4x64xf32>
    %415 = arith.truncf %414 : vector<4x64xf32> to vector<4x64xbf16>
    %c6_395 = arith.constant 6 : index
    %c0_396 = arith.constant 0 : index
    %c0_397 = arith.constant 0 : index
    %416 = vector.load %arg22[%c6_395, %c0_396, %c0_397] : memref<9x64x128xbf16, #tpu.memory_space<vmem>>, vector<1x64x128xbf16>
    %417 = vector.shape_cast %416 : vector<1x64x128xbf16> to vector<64x128xbf16>
    %cst_398 = arith.constant dense<0.000000e+00> : vector<4x128xf32>
    %418 = tpu.matmul %415, %417, %cst_398 {dimension_numbers = #tpu.dot_dimension_numbers<[1], [0], [0], [1], [0, 0, 1, 1], [], []>} : vector<4x64xbf16>, vector<64x128xbf16>, vector<4x128xf32> -> vector<4x128xf32>
    %419 = arith.addf %411, %418 : vector<4x128xf32>
    %c7_399 = arith.constant 7 : index
    %c0_400 = arith.constant 0 : index
    %c0_401 = arith.constant 0 : index
    %420 = vector.load %arg20[%c7_399, %c0_400, %c0_401] : memref<9x4x16xbf16, #tpu.memory_space<vmem>>, vector<1x4x16xbf16>
    %421 = vector.shape_cast %420 : vector<1x4x16xbf16> to vector<4x16xbf16>
    %cst_402 = arith.constant dense<0.000000e+00> : vector<4x64xf32>
    %422 = tpu.matmul %421, %364, %cst_402 {dimension_numbers = #tpu.dot_dimension_numbers<[1], [0], [0], [1], [0, 0, 1, 1], [], []>} : vector<4x16xbf16>, vector<16x64xbf16>, vector<4x64xf32> -> vector<4x64xf32>
    %423 = arith.truncf %422 : vector<4x64xf32> to vector<4x64xbf16>
    %c7_403 = arith.constant 7 : index
    %c0_404 = arith.constant 0 : index
    %c0_405 = arith.constant 0 : index
    %424 = vector.load %arg22[%c7_403, %c0_404, %c0_405] : memref<9x64x128xbf16, #tpu.memory_space<vmem>>, vector<1x64x128xbf16>
    %425 = vector.shape_cast %424 : vector<1x64x128xbf16> to vector<64x128xbf16>
    %cst_406 = arith.constant dense<0.000000e+00> : vector<4x128xf32>
    %426 = tpu.matmul %423, %425, %cst_406 {dimension_numbers = #tpu.dot_dimension_numbers<[1], [0], [0], [1], [0, 0, 1, 1], [], []>} : vector<4x64xbf16>, vector<64x128xbf16>, vector<4x128xf32> -> vector<4x128xf32>
    %427 = arith.addf %419, %426 : vector<4x128xf32>
    %c8_407 = arith.constant 8 : index
    %c0_408 = arith.constant 0 : index
    %c0_409 = arith.constant 0 : index
    %428 = vector.load %arg20[%c8_407, %c0_408, %c0_409] : memref<9x4x16xbf16, #tpu.memory_space<vmem>>, vector<1x4x16xbf16>
    %429 = vector.shape_cast %428 : vector<1x4x16xbf16> to vector<4x16xbf16>
    %cst_410 = arith.constant dense<0.000000e+00> : vector<4x64xf32>
    %430 = tpu.matmul %429, %364, %cst_410 {dimension_numbers = #tpu.dot_dimension_numbers<[1], [0], [0], [1], [0, 0, 1, 1], [], []>} : vector<4x16xbf16>, vector<16x64xbf16>, vector<4x64xf32> -> vector<4x64xf32>
    %431 = arith.truncf %430 : vector<4x64xf32> to vector<4x64xbf16>
    %c8_411 = arith.constant 8 : index
    %c0_412 = arith.constant 0 : index
    %c0_413 = arith.constant 0 : index
    %432 = vector.load %arg22[%c8_411, %c0_412, %c0_413] : memref<9x64x128xbf16, #tpu.memory_space<vmem>>, vector<1x64x128xbf16>
    %433 = vector.shape_cast %432 : vector<1x64x128xbf16> to vector<64x128xbf16>
    %cst_414 = arith.constant dense<0.000000e+00> : vector<4x128xf32>
    %434 = tpu.matmul %431, %433, %cst_414 {dimension_numbers = #tpu.dot_dimension_numbers<[1], [0], [0], [1], [0, 0, 1, 1], [], []>} : vector<4x64xbf16>, vector<64x128xbf16>, vector<4x128xf32> -> vector<4x128xf32>
    %435 = arith.addf %427, %434 : vector<4x128xf32>
    %c0_415 = arith.constant 0 : index
    %c0_416 = arith.constant 0 : index
    %436 = vector.load %arg23[%c0_415, %c0_416] : memref<1x128xf32, #tpu.memory_space<vmem>>, vector<1x128xf32>
    %437 = vector.broadcast %436 : vector<1x128xf32> to vector<4x128xf32>
    %438 = arith.addf %435, %437 : vector<4x128xf32>
    %cst_417 = arith.constant 0.000000e+00 : f32
    %439 = vector.broadcast %cst_417 : f32 to vector<4x128xf32>
    %440 = arith.maximumf %438, %439 : vector<4x128xf32>
    %441 = arith.truncf %440 : vector<4x128xf32> to vector<4x128xbf16>
    %c0_418 = arith.constant 0 : index
    %c0_419 = arith.constant 0 : index
    %c0_420 = arith.constant 0 : index
    %442 = vector.load %arg21[%c0_418, %c0_419, %c0_420] : memref<9x4x4xbf16, #tpu.memory_space<vmem>>, vector<1x4x4xbf16>
    %443 = vector.shape_cast %442 : vector<1x4x4xbf16> to vector<4x4xbf16>
    %cst_421 = arith.constant dense<0.000000e+00> : vector<4x128xf32>
    %444 = tpu.matmul %443, %441, %cst_421 {dimension_numbers = #tpu.dot_dimension_numbers<[1], [0], [0], [1], [0, 0, 1, 1], [], []>} : vector<4x4xbf16>, vector<4x128xbf16>, vector<4x128xf32> -> vector<4x128xf32>
    %445 = arith.truncf %444 : vector<4x128xf32> to vector<4x128xbf16>
    %c0_422 = arith.constant 0 : index
    %c0_423 = arith.constant 0 : index
    %c0_424 = arith.constant 0 : index
    %446 = vector.load %arg24[%c0_422, %c0_423, %c0_424] : memref<9x128x128xbf16, #tpu.memory_space<vmem>>, vector<1x128x128xbf16>
    %447 = vector.shape_cast %446 : vector<1x128x128xbf16> to vector<128x128xbf16>
    %cst_425 = arith.constant dense<0.000000e+00> : vector<4x128xf32>
    %448 = tpu.matmul %445, %447, %cst_425 {dimension_numbers = #tpu.dot_dimension_numbers<[1], [0], [0], [1], [0, 0, 1, 1], [], []>} : vector<4x128xbf16>, vector<128x128xbf16>, vector<4x128xf32> -> vector<4x128xf32>
    %c1_426 = arith.constant 1 : index
    %c0_427 = arith.constant 0 : index
    %c0_428 = arith.constant 0 : index
    %449 = vector.load %arg21[%c1_426, %c0_427, %c0_428] : memref<9x4x4xbf16, #tpu.memory_space<vmem>>, vector<1x4x4xbf16>
    %450 = vector.shape_cast %449 : vector<1x4x4xbf16> to vector<4x4xbf16>
    %cst_429 = arith.constant dense<0.000000e+00> : vector<4x128xf32>
    %451 = tpu.matmul %450, %441, %cst_429 {dimension_numbers = #tpu.dot_dimension_numbers<[1], [0], [0], [1], [0, 0, 1, 1], [], []>} : vector<4x4xbf16>, vector<4x128xbf16>, vector<4x128xf32> -> vector<4x128xf32>
    %452 = arith.truncf %451 : vector<4x128xf32> to vector<4x128xbf16>
    %c1_430 = arith.constant 1 : index
    %c0_431 = arith.constant 0 : index
    %c0_432 = arith.constant 0 : index
    %453 = vector.load %arg24[%c1_430, %c0_431, %c0_432] : memref<9x128x128xbf16, #tpu.memory_space<vmem>>, vector<1x128x128xbf16>
    %454 = vector.shape_cast %453 : vector<1x128x128xbf16> to vector<128x128xbf16>
    %cst_433 = arith.constant dense<0.000000e+00> : vector<4x128xf32>
    %455 = tpu.matmul %452, %454, %cst_433 {dimension_numbers = #tpu.dot_dimension_numbers<[1], [0], [0], [1], [0, 0, 1, 1], [], []>} : vector<4x128xbf16>, vector<128x128xbf16>, vector<4x128xf32> -> vector<4x128xf32>
    %456 = arith.addf %448, %455 : vector<4x128xf32>
    %c2_434 = arith.constant 2 : index
    %c0_435 = arith.constant 0 : index
    %c0_436 = arith.constant 0 : index
    %457 = vector.load %arg21[%c2_434, %c0_435, %c0_436] : memref<9x4x4xbf16, #tpu.memory_space<vmem>>, vector<1x4x4xbf16>
    %458 = vector.shape_cast %457 : vector<1x4x4xbf16> to vector<4x4xbf16>
    %cst_437 = arith.constant dense<0.000000e+00> : vector<4x128xf32>
    %459 = tpu.matmul %458, %441, %cst_437 {dimension_numbers = #tpu.dot_dimension_numbers<[1], [0], [0], [1], [0, 0, 1, 1], [], []>} : vector<4x4xbf16>, vector<4x128xbf16>, vector<4x128xf32> -> vector<4x128xf32>
    %460 = arith.truncf %459 : vector<4x128xf32> to vector<4x128xbf16>
    %c2_438 = arith.constant 2 : index
    %c0_439 = arith.constant 0 : index
    %c0_440 = arith.constant 0 : index
    %461 = vector.load %arg24[%c2_438, %c0_439, %c0_440] : memref<9x128x128xbf16, #tpu.memory_space<vmem>>, vector<1x128x128xbf16>
    %462 = vector.shape_cast %461 : vector<1x128x128xbf16> to vector<128x128xbf16>
    %cst_441 = arith.constant dense<0.000000e+00> : vector<4x128xf32>
    %463 = tpu.matmul %460, %462, %cst_441 {dimension_numbers = #tpu.dot_dimension_numbers<[1], [0], [0], [1], [0, 0, 1, 1], [], []>} : vector<4x128xbf16>, vector<128x128xbf16>, vector<4x128xf32> -> vector<4x128xf32>
    %464 = arith.addf %456, %463 : vector<4x128xf32>
    %c3_442 = arith.constant 3 : index
    %c0_443 = arith.constant 0 : index
    %c0_444 = arith.constant 0 : index
    %465 = vector.load %arg21[%c3_442, %c0_443, %c0_444] : memref<9x4x4xbf16, #tpu.memory_space<vmem>>, vector<1x4x4xbf16>
    %466 = vector.shape_cast %465 : vector<1x4x4xbf16> to vector<4x4xbf16>
    %cst_445 = arith.constant dense<0.000000e+00> : vector<4x128xf32>
    %467 = tpu.matmul %466, %441, %cst_445 {dimension_numbers = #tpu.dot_dimension_numbers<[1], [0], [0], [1], [0, 0, 1, 1], [], []>} : vector<4x4xbf16>, vector<4x128xbf16>, vector<4x128xf32> -> vector<4x128xf32>
    %468 = arith.truncf %467 : vector<4x128xf32> to vector<4x128xbf16>
    %c3_446 = arith.constant 3 : index
    %c0_447 = arith.constant 0 : index
    %c0_448 = arith.constant 0 : index
    %469 = vector.load %arg24[%c3_446, %c0_447, %c0_448] : memref<9x128x128xbf16, #tpu.memory_space<vmem>>, vector<1x128x128xbf16>
    %470 = vector.shape_cast %469 : vector<1x128x128xbf16> to vector<128x128xbf16>
    %cst_449 = arith.constant dense<0.000000e+00> : vector<4x128xf32>
    %471 = tpu.matmul %468, %470, %cst_449 {dimension_numbers = #tpu.dot_dimension_numbers<[1], [0], [0], [1], [0, 0, 1, 1], [], []>} : vector<4x128xbf16>, vector<128x128xbf16>, vector<4x128xf32> -> vector<4x128xf32>
    %472 = arith.addf %464, %471 : vector<4x128xf32>
    %c4_450 = arith.constant 4 : index
    %c0_451 = arith.constant 0 : index
    %c0_452 = arith.constant 0 : index
    %473 = vector.load %arg21[%c4_450, %c0_451, %c0_452] : memref<9x4x4xbf16, #tpu.memory_space<vmem>>, vector<1x4x4xbf16>
    %474 = vector.shape_cast %473 : vector<1x4x4xbf16> to vector<4x4xbf16>
    %cst_453 = arith.constant dense<0.000000e+00> : vector<4x128xf32>
    %475 = tpu.matmul %474, %441, %cst_453 {dimension_numbers = #tpu.dot_dimension_numbers<[1], [0], [0], [1], [0, 0, 1, 1], [], []>} : vector<4x4xbf16>, vector<4x128xbf16>, vector<4x128xf32> -> vector<4x128xf32>
    %476 = arith.truncf %475 : vector<4x128xf32> to vector<4x128xbf16>
    %c4_454 = arith.constant 4 : index
    %c0_455 = arith.constant 0 : index
    %c0_456 = arith.constant 0 : index
    %477 = vector.load %arg24[%c4_454, %c0_455, %c0_456] : memref<9x128x128xbf16, #tpu.memory_space<vmem>>, vector<1x128x128xbf16>
    %478 = vector.shape_cast %477 : vector<1x128x128xbf16> to vector<128x128xbf16>
    %cst_457 = arith.constant dense<0.000000e+00> : vector<4x128xf32>
    %479 = tpu.matmul %476, %478, %cst_457 {dimension_numbers = #tpu.dot_dimension_numbers<[1], [0], [0], [1], [0, 0, 1, 1], [], []>} : vector<4x128xbf16>, vector<128x128xbf16>, vector<4x128xf32> -> vector<4x128xf32>
    %480 = arith.addf %472, %479 : vector<4x128xf32>
    %c5_458 = arith.constant 5 : index
    %c0_459 = arith.constant 0 : index
    %c0_460 = arith.constant 0 : index
    %481 = vector.load %arg21[%c5_458, %c0_459, %c0_460] : memref<9x4x4xbf16, #tpu.memory_space<vmem>>, vector<1x4x4xbf16>
    %482 = vector.shape_cast %481 : vector<1x4x4xbf16> to vector<4x4xbf16>
    %cst_461 = arith.constant dense<0.000000e+00> : vector<4x128xf32>
    %483 = tpu.matmul %482, %441, %cst_461 {dimension_numbers = #tpu.dot_dimension_numbers<[1], [0], [0], [1], [0, 0, 1, 1], [], []>} : vector<4x4xbf16>, vector<4x128xbf16>, vector<4x128xf32> -> vector<4x128xf32>
    %484 = arith.truncf %483 : vector<4x128xf32> to vector<4x128xbf16>
    %c5_462 = arith.constant 5 : index
    %c0_463 = arith.constant 0 : index
    %c0_464 = arith.constant 0 : index
    %485 = vector.load %arg24[%c5_462, %c0_463, %c0_464] : memref<9x128x128xbf16, #tpu.memory_space<vmem>>, vector<1x128x128xbf16>
    %486 = vector.shape_cast %485 : vector<1x128x128xbf16> to vector<128x128xbf16>
    %cst_465 = arith.constant dense<0.000000e+00> : vector<4x128xf32>
    %487 = tpu.matmul %484, %486, %cst_465 {dimension_numbers = #tpu.dot_dimension_numbers<[1], [0], [0], [1], [0, 0, 1, 1], [], []>} : vector<4x128xbf16>, vector<128x128xbf16>, vector<4x128xf32> -> vector<4x128xf32>
    %488 = arith.addf %480, %487 : vector<4x128xf32>
    %c6_466 = arith.constant 6 : index
    %c0_467 = arith.constant 0 : index
    %c0_468 = arith.constant 0 : index
    %489 = vector.load %arg21[%c6_466, %c0_467, %c0_468] : memref<9x4x4xbf16, #tpu.memory_space<vmem>>, vector<1x4x4xbf16>
    %490 = vector.shape_cast %489 : vector<1x4x4xbf16> to vector<4x4xbf16>
    %cst_469 = arith.constant dense<0.000000e+00> : vector<4x128xf32>
    %491 = tpu.matmul %490, %441, %cst_469 {dimension_numbers = #tpu.dot_dimension_numbers<[1], [0], [0], [1], [0, 0, 1, 1], [], []>} : vector<4x4xbf16>, vector<4x128xbf16>, vector<4x128xf32> -> vector<4x128xf32>
    %492 = arith.truncf %491 : vector<4x128xf32> to vector<4x128xbf16>
    %c6_470 = arith.constant 6 : index
    %c0_471 = arith.constant 0 : index
    %c0_472 = arith.constant 0 : index
    %493 = vector.load %arg24[%c6_470, %c0_471, %c0_472] : memref<9x128x128xbf16, #tpu.memory_space<vmem>>, vector<1x128x128xbf16>
    %494 = vector.shape_cast %493 : vector<1x128x128xbf16> to vector<128x128xbf16>
    %cst_473 = arith.constant dense<0.000000e+00> : vector<4x128xf32>
    %495 = tpu.matmul %492, %494, %cst_473 {dimension_numbers = #tpu.dot_dimension_numbers<[1], [0], [0], [1], [0, 0, 1, 1], [], []>} : vector<4x128xbf16>, vector<128x128xbf16>, vector<4x128xf32> -> vector<4x128xf32>
    %496 = arith.addf %488, %495 : vector<4x128xf32>
    %c7_474 = arith.constant 7 : index
    %c0_475 = arith.constant 0 : index
    %c0_476 = arith.constant 0 : index
    %497 = vector.load %arg21[%c7_474, %c0_475, %c0_476] : memref<9x4x4xbf16, #tpu.memory_space<vmem>>, vector<1x4x4xbf16>
    %498 = vector.shape_cast %497 : vector<1x4x4xbf16> to vector<4x4xbf16>
    %cst_477 = arith.constant dense<0.000000e+00> : vector<4x128xf32>
    %499 = tpu.matmul %498, %441, %cst_477 {dimension_numbers = #tpu.dot_dimension_numbers<[1], [0], [0], [1], [0, 0, 1, 1], [], []>} : vector<4x4xbf16>, vector<4x128xbf16>, vector<4x128xf32> -> vector<4x128xf32>
    %500 = arith.truncf %499 : vector<4x128xf32> to vector<4x128xbf16>
    %c7_478 = arith.constant 7 : index
    %c0_479 = arith.constant 0 : index
    %c0_480 = arith.constant 0 : index
    %501 = vector.load %arg24[%c7_478, %c0_479, %c0_480] : memref<9x128x128xbf16, #tpu.memory_space<vmem>>, vector<1x128x128xbf16>
    %502 = vector.shape_cast %501 : vector<1x128x128xbf16> to vector<128x128xbf16>
    %cst_481 = arith.constant dense<0.000000e+00> : vector<4x128xf32>
    %503 = tpu.matmul %500, %502, %cst_481 {dimension_numbers = #tpu.dot_dimension_numbers<[1], [0], [0], [1], [0, 0, 1, 1], [], []>} : vector<4x128xbf16>, vector<128x128xbf16>, vector<4x128xf32> -> vector<4x128xf32>
    %504 = arith.addf %496, %503 : vector<4x128xf32>
    %c8_482 = arith.constant 8 : index
    %c0_483 = arith.constant 0 : index
    %c0_484 = arith.constant 0 : index
    %505 = vector.load %arg21[%c8_482, %c0_483, %c0_484] : memref<9x4x4xbf16, #tpu.memory_space<vmem>>, vector<1x4x4xbf16>
    %506 = vector.shape_cast %505 : vector<1x4x4xbf16> to vector<4x4xbf16>
    %cst_485 = arith.constant dense<0.000000e+00> : vector<4x128xf32>
    %507 = tpu.matmul %506, %441, %cst_485 {dimension_numbers = #tpu.dot_dimension_numbers<[1], [0], [0], [1], [0, 0, 1, 1], [], []>} : vector<4x4xbf16>, vector<4x128xbf16>, vector<4x128xf32> -> vector<4x128xf32>
    %508 = arith.truncf %507 : vector<4x128xf32> to vector<4x128xbf16>
    %c8_486 = arith.constant 8 : index
    %c0_487 = arith.constant 0 : index
    %c0_488 = arith.constant 0 : index
    %509 = vector.load %arg24[%c8_486, %c0_487, %c0_488] : memref<9x128x128xbf16, #tpu.memory_space<vmem>>, vector<1x128x128xbf16>
    %510 = vector.shape_cast %509 : vector<1x128x128xbf16> to vector<128x128xbf16>
    %cst_489 = arith.constant dense<0.000000e+00> : vector<4x128xf32>
    %511 = tpu.matmul %508, %510, %cst_489 {dimension_numbers = #tpu.dot_dimension_numbers<[1], [0], [0], [1], [0, 0, 1, 1], [], []>} : vector<4x128xbf16>, vector<128x128xbf16>, vector<4x128xf32> -> vector<4x128xf32>
    %512 = arith.addf %504, %511 : vector<4x128xf32>
    %c0_490 = arith.constant 0 : index
    %c0_491 = arith.constant 0 : index
    %513 = vector.load %arg25[%c0_490, %c0_491] : memref<1x128xf32, #tpu.memory_space<vmem>>, vector<1x128xf32>
    %514 = vector.broadcast %513 : vector<1x128xf32> to vector<4x128xf32>
    %515 = arith.addf %512, %514 : vector<4x128xf32>
    %c0_492 = arith.constant 0 : index
    %c0_493 = arith.constant 0 : index
    %516 = vector.load %arg26[%c0_492, %c0_493] : memref<4x16xbf16, #tpu.memory_space<vmem>>, vector<4x16xbf16>
    %cst_494 = arith.constant dense<0.000000e+00> : vector<4x64xf32>
    %517 = tpu.matmul %516, %364, %cst_494 {dimension_numbers = #tpu.dot_dimension_numbers<[1], [0], [0], [1], [0, 0, 1, 1], [], []>} : vector<4x16xbf16>, vector<16x64xbf16>, vector<4x64xf32> -> vector<4x64xf32>
    %518 = arith.truncf %517 : vector<4x64xf32> to vector<4x64xbf16>
    %c0_495 = arith.constant 0 : index
    %c0_496 = arith.constant 0 : index
    %519 = vector.load %arg27[%c0_495, %c0_496] : memref<64x128xbf16, #tpu.memory_space<vmem>>, vector<64x128xbf16>
    %cst_497 = arith.constant dense<0.000000e+00> : vector<4x128xf32>
    %520 = tpu.matmul %518, %519, %cst_497 {dimension_numbers = #tpu.dot_dimension_numbers<[1], [0], [0], [1], [0, 0, 1, 1], [], []>} : vector<4x64xbf16>, vector<64x128xbf16>, vector<4x128xf32> -> vector<4x128xf32>
    %c0_498 = arith.constant 0 : index
    %c0_499 = arith.constant 0 : index
    %521 = vector.load %arg28[%c0_498, %c0_499] : memref<1x128xf32, #tpu.memory_space<vmem>>, vector<1x128xf32>
    %522 = vector.broadcast %521 : vector<1x128xf32> to vector<4x128xf32>
    %523 = arith.addf %520, %522 : vector<4x128xf32>
    %524 = arith.addf %515, %523 : vector<4x128xf32>
    %cst_500 = arith.constant 0.000000e+00 : f32
    %525 = vector.broadcast %cst_500 : f32 to vector<4x128xf32>
    %526 = arith.maximumf %524, %525 : vector<4x128xf32>
    %cst_501 = arith.constant dense<0.000000e+00> : vector<128xf32>
    %527 = vector.multi_reduction <add>, %526, %cst_501 [0] : vector<4x128xf32> to vector<128xf32>
    %528 = vector.shape_cast %527 : vector<128xf32> to vector<1x128xf32>
    %cst_502 = arith.constant 4.000000e+00 : f32
    %529 = vector.broadcast %cst_502 : f32 to vector<1x128xf32>
    %530 = arith.divf %528, %529 : vector<1x128xf32>
    %531 = arith.truncf %530 : vector<1x128xf32> to vector<1x128xbf16>
    %c0_503 = arith.constant 0 : index
    %c0_504 = arith.constant 0 : index
    %532 = vector.load %arg29[%c0_503, %c0_504] : memref<128x64xbf16, #tpu.memory_space<vmem>>, vector<128x64xbf16>
    %cst_505 = arith.constant dense<0.000000e+00> : vector<1x64xf32>
    %533 = tpu.matmul %531, %532, %cst_505 {dimension_numbers = #tpu.dot_dimension_numbers<[1], [0], [0], [1], [0, 0, 1, 1], [], []>} : vector<1x128xbf16>, vector<128x64xbf16>, vector<1x64xf32> -> vector<1x64xf32>
    %c0_506 = arith.constant 0 : index
    %c0_507 = arith.constant 0 : index
    %534 = vector.load %arg30[%c0_506, %c0_507] : memref<1x64xf32, #tpu.memory_space<vmem>>, vector<1x64xf32>
    %535 = arith.addf %533, %534 : vector<1x64xf32>
    %cst_508 = arith.constant 0.000000e+00 : f32
    %536 = vector.broadcast %cst_508 : f32 to vector<1x64xf32>
    %537 = arith.maximumf %535, %536 : vector<1x64xf32>
    %538 = arith.truncf %537 : vector<1x64xf32> to vector<1x64xbf16>
    %c0_509 = arith.constant 0 : index
    %c0_510 = arith.constant 0 : index
    %539 = vector.load %arg31[%c0_509, %c0_510] : memref<64x1xbf16, #tpu.memory_space<vmem>>, vector<64x1xbf16>
    %cst_511 = arith.constant dense<0.000000e+00> : vector<1x1xf32>
    %540 = tpu.matmul %538, %539, %cst_511 {dimension_numbers = #tpu.dot_dimension_numbers<[1], [0], [0], [1], [0, 0, 1, 1], [], []>} : vector<1x64xbf16>, vector<64x1xbf16>, vector<1x1xf32> -> vector<1x1xf32>
    %c0_512 = arith.constant 0 : index
    %c0_513 = arith.constant 0 : index
    %541 = vector.load %arg32[%c0_512, %c0_513] : memref<1x1xf32, #tpu.memory_space<vmem>>, vector<1x1xf32>
    %542 = arith.addf %540, %541 : vector<1x1xf32>
    %c0_514 = arith.constant 0 : index
    %c0_515 = arith.constant 0 : index
    %c0_516 = arith.constant 0 : index
    %543 = vector.load %arg33[%c0_514, %c0_515, %c0_516] : memref<1x1x1xf32, #tpu.memory_space<vmem>>, vector<1x1x1xf32>
    %544 = vector.shape_cast %543 : vector<1x1x1xf32> to vector<1x1xf32>
    %545 = vector.shape_cast %542 : vector<1x1xf32> to vector<1x1x1xf32>
    tpu.vector_store %arg33[%c0_514, %c0_515, %c0_516], %545 {strides = array<i32>} : memref<1x1x1xf32, #tpu.memory_space<vmem>>, vector<1x1x1xf32>,
    return
  }
  func.func @transform_0(%arg0: i32) -> (i32, i32, i32) {
    %c0_i32 = arith.constant 0 : i32
    %c0_i32_0 = arith.constant 0 : i32
    %c0_i32_1 = arith.constant 0 : i32
    return %arg0, %c0_i32, %c0_i32_0 : i32, i32, i32
  }
  func.func @transform_1(%arg0: i32) -> (i32, i32) {
    %c0_i32 = arith.constant 0 : i32
    %c0_i32_0 = arith.constant 0 : i32
    %c0_i32_1 = arith.constant 0 : i32
    return %c0_i32, %c0_i32_0 : i32, i32
  }
  func.func @transform_2(%arg0: i32) -> (i32, i32) {
    %c0_i32 = arith.constant 0 : i32
    %c0_i32_0 = arith.constant 0 : i32
    %c0_i32_1 = arith.constant 0 : i32
    return %c0_i32, %c0_i32_0 : i32, i32
  }
  func.func @transform_3(%arg0: i32) -> (i32, i32, i32) {
    %c0_i32 = arith.constant 0 : i32
    %c0_i32_0 = arith.constant 0 : i32
    %c0_i32_1 = arith.constant 0 : i32
    %c0_i32_2 = arith.constant 0 : i32
    return %c0_i32, %c0_i32_0, %c0_i32_1 : i32, i32, i32
  }
  func.func @transform_4(%arg0: i32) -> (i32, i32, i32) {
    %c0_i32 = arith.constant 0 : i32
    %c0_i32_0 = arith.constant 0 : i32
    %c0_i32_1 = arith.constant 0 : i32
    %c0_i32_2 = arith.constant 0 : i32
    return %c0_i32, %c0_i32_0, %c0_i32_1 : i32, i32, i32
  }
  func.func @transform_5(%arg0: i32) -> (i32, i32, i32) {
    %c0_i32 = arith.constant 0 : i32
    %c0_i32_0 = arith.constant 0 : i32
    %c0_i32_1 = arith.constant 0 : i32
    %c0_i32_2 = arith.constant 0 : i32
    return %c0_i32, %c0_i32_0, %c0_i32_1 : i32, i32, i32
  }
  func.func @transform_6(%arg0: i32) -> (i32, i32, i32) {
    %c0_i32 = arith.constant 0 : i32
    %c0_i32_0 = arith.constant 0 : i32
    %c0_i32_1 = arith.constant 0 : i32
    %c0_i32_2 = arith.constant 0 : i32
    return %c0_i32, %c0_i32_0, %c0_i32_1 : i32, i32, i32
  }
  func.func @transform_7(%arg0: i32) -> (i32, i32) {
    %c0_i32 = arith.constant 0 : i32
    %c0_i32_0 = arith.constant 0 : i32
    %c0_i32_1 = arith.constant 0 : i32
    return %c0_i32, %c0_i32_0 : i32, i32
  }
  func.func @transform_8(%arg0: i32) -> (i32, i32, i32) {
    %c0_i32 = arith.constant 0 : i32
    %c0_i32_0 = arith.constant 0 : i32
    %c0_i32_1 = arith.constant 0 : i32
    %c0_i32_2 = arith.constant 0 : i32
    return %c0_i32, %c0_i32_0, %c0_i32_1 : i32, i32, i32
  }
  func.func @transform_9(%arg0: i32) -> (i32, i32) {
    %c0_i32 = arith.constant 0 : i32
    %c0_i32_0 = arith.constant 0 : i32
    %c0_i32_1 = arith.constant 0 : i32
    return %c0_i32, %c0_i32_0 : i32, i32
  }
  func.func @transform_10(%arg0: i32) -> (i32, i32, i32) {
    %c0_i32 = arith.constant 0 : i32
    %c0_i32_0 = arith.constant 0 : i32
    %c0_i32_1 = arith.constant 0 : i32
    %c0_i32_2 = arith.constant 0 : i32
    return %c0_i32, %c0_i32_0, %c0_i32_1 : i32, i32, i32
  }
  func.func @transform_11(%arg0: i32) -> (i32, i32, i32) {
    %c0_i32 = arith.constant 0 : i32
    %c0_i32_0 = arith.constant 0 : i32
    %c0_i32_1 = arith.constant 0 : i32
    %c0_i32_2 = arith.constant 0 : i32
    return %c0_i32, %c0_i32_0, %c0_i32_1 : i32, i32, i32
  }
  func.func @transform_12(%arg0: i32) -> (i32, i32, i32) {
    %c0_i32 = arith.constant 0 : i32
    %c0_i32_0 = arith.constant 0 : i32
    %c0_i32_1 = arith.constant 0 : i32
    %c0_i32_2 = arith.constant 0 : i32
    return %c0_i32, %c0_i32_0, %c0_i32_1 : i32, i32, i32
  }
  func.func @transform_13(%arg0: i32) -> (i32, i32) {
    %c0_i32 = arith.constant 0 : i32
    %c0_i32_0 = arith.constant 0 : i32
    %c0_i32_1 = arith.constant 0 : i32
    return %c0_i32, %c0_i32_0 : i32, i32
  }
  func.func @transform_14(%arg0: i32) -> (i32, i32, i32) {
    %c0_i32 = arith.constant 0 : i32
    %c0_i32_0 = arith.constant 0 : i32
    %c0_i32_1 = arith.constant 0 : i32
    %c0_i32_2 = arith.constant 0 : i32
    return %c0_i32, %c0_i32_0, %c0_i32_1 : i32, i32, i32
  }
  func.func @transform_15(%arg0: i32) -> (i32, i32) {
    %c0_i32 = arith.constant 0 : i32
    %c0_i32_0 = arith.constant 0 : i32
    %c0_i32_1 = arith.constant 0 : i32
    return %c0_i32, %c0_i32_0 : i32, i32
  }
  func.func @transform_16(%arg0: i32) -> (i32, i32) {
    %c0_i32 = arith.constant 0 : i32
    %c0_i32_0 = arith.constant 0 : i32
    %c0_i32_1 = arith.constant 0 : i32
    return %c0_i32, %c0_i32_0 : i32, i32
  }
  func.func @transform_17(%arg0: i32) -> (i32, i32) {
    %c0_i32 = arith.constant 0 : i32
    %c0_i32_0 = arith.constant 0 : i32
    %c0_i32_1 = arith.constant 0 : i32
    return %c0_i32, %c0_i32_0 : i32, i32
  }
  func.func @transform_18(%arg0: i32) -> (i32, i32) {
    %c0_i32 = arith.constant 0 : i32
    %c0_i32_0 = arith.constant 0 : i32
    %c0_i32_1 = arith.constant 0 : i32
    return %c0_i32, %c0_i32_0 : i32, i32
  }
  func.func @transform_19(%arg0: i32) -> (i32, i32, i32) {
    %c0_i32 = arith.constant 0 : i32
    %c0_i32_0 = arith.constant 0 : i32
    %c0_i32_1 = arith.constant 0 : i32
    %c0_i32_2 = arith.constant 0 : i32
    return %c0_i32, %c0_i32_0, %c0_i32_1 : i32, i32, i32
  }
  func.func @transform_20(%arg0: i32) -> (i32, i32, i32) {
    %c0_i32 = arith.constant 0 : i32
    %c0_i32_0 = arith.constant 0 : i32
    %c0_i32_1 = arith.constant 0 : i32
    %c0_i32_2 = arith.constant 0 : i32
    return %c0_i32, %c0_i32_0, %c0_i32_1 : i32, i32, i32
  }
  func.func @transform_21(%arg0: i32) -> (i32, i32, i32) {
    %c0_i32 = arith.constant 0 : i32
    %c0_i32_0 = arith.constant 0 : i32
    %c0_i32_1 = arith.constant 0 : i32
    %c0_i32_2 = arith.constant 0 : i32
    return %c0_i32, %c0_i32_0, %c0_i32_1 : i32, i32, i32
  }
  func.func @transform_22(%arg0: i32) -> (i32, i32) {
    %c0_i32 = arith.constant 0 : i32
    %c0_i32_0 = arith.constant 0 : i32
    %c0_i32_1 = arith.constant 0 : i32
    return %c0_i32, %c0_i32_0 : i32, i32
  }
  func.func @transform_23(%arg0: i32) -> (i32, i32, i32) {
    %c0_i32 = arith.constant 0 : i32
    %c0_i32_0 = arith.constant 0 : i32
    %c0_i32_1 = arith.constant 0 : i32
    %c0_i32_2 = arith.constant 0 : i32
    return %c0_i32, %c0_i32_0, %c0_i32_1 : i32, i32, i32
  }
  func.func @transform_24(%arg0: i32) -> (i32, i32) {
    %c0_i32 = arith.constant 0 : i32
    %c0_i32_0 = arith.constant 0 : i32
    %c0_i32_1 = arith.constant 0 : i32
    return %c0_i32, %c0_i32_0 : i32, i32
  }
  func.func @transform_25(%arg0: i32) -> (i32, i32) {
    %c0_i32 = arith.constant 0 : i32
    %c0_i32_0 = arith.constant 0 : i32
    %c0_i32_1 = arith.constant 0 : i32
    return %c0_i32, %c0_i32_0 : i32, i32
  }
  func.func @transform_26(%arg0: i32) -> (i32, i32) {
    %c0_i32 = arith.constant 0 : i32
    %c0_i32_0 = arith.constant 0 : i32
    %c0_i32_1 = arith.constant 0 : i32
    return %c0_i32, %c0_i32_0 : i32, i32
  }
  func.func @transform_27(%arg0: i32) -> (i32, i32) {
    %c0_i32 = arith.constant 0 : i32
    %c0_i32_0 = arith.constant 0 : i32
    %c0_i32_1 = arith.constant 0 : i32
    return %c0_i32, %c0_i32_0 : i32, i32
  }
  func.func @transform_28(%arg0: i32) -> (i32, i32) {
    %c0_i32 = arith.constant 0 : i32
    %c0_i32_0 = arith.constant 0 : i32
    %c0_i32_1 = arith.constant 0 : i32
    return %c0_i32, %c0_i32_0 : i32, i32
  }
  func.func @transform_29(%arg0: i32) -> (i32, i32) {
    %c0_i32 = arith.constant 0 : i32
    %c0_i32_0 = arith.constant 0 : i32
    %c0_i32_1 = arith.constant 0 : i32
    return %c0_i32, %c0_i32_0 : i32, i32
  }
  func.func @transform_30(%arg0: i32) -> (i32, i32) {
    %c0_i32 = arith.constant 0 : i32
    %c0_i32_0 = arith.constant 0 : i32
    %c0_i32_1 = arith.constant 0 : i32
    return %c0_i32, %c0_i32_0 : i32, i32
  }
  func.func @transform_31(%arg0: i32) -> (i32, i32) {
    %c0_i32 = arith.constant 0 : i32
    %c0_i32_0 = arith.constant 0 : i32
    %c0_i32_1 = arith.constant 0 : i32
    return %c0_i32, %c0_i32_0 : i32, i32
  }
  func.func @transform_32(%arg0: i32) -> (i32, i32, i32) {
    %c0_i32 = arith.constant 0 : i32
    %c0_i32_0 = arith.constant 0 : i32
    %c0_i32_1 = arith.constant 0 : i32
    return %arg0, %c0_i32, %c0_i32_0 : i32, i32, i32
  }
}

</mosaic_0001>

<bundles_post_ra>
// kernel: forward.1
= control target key start
LH: loop header
LB: loop body
LE: loop exit
PB: predicated region body
PF: predicated region fallthrough
CT: control target
= control target key end

     0   :  { %s15712_s6 = smov 1   ;;  %s15713_s10 = smov 2   ;;  %s17639_s0 = inlined_call_operand.smem [shape: u32[33], index: -1, kind: input, shape index: {}] }
   0x1   :  { %s15754_s5 = sld [smem:[%s17639_s0]]   ;;  %s15714_s14 = smov 3  }
   0x2   :  { %s15759_s9 = sld [smem:[%s17639_s0 + %s15712_s6]]   ;;  %s15715_s18 = smov 4  }
   0x3   :  { %s15764_s13 = sld [smem:[%s17639_s0 + %s15713_s10]]   ;;  %s15716_s22 = smov 5  }
   0x4   :  { %s15769_s17 = sld [smem:[%s17639_s0 + %s15714_s14]]   ;;  %s15717_s26 = smov 6  }
   0x5   :  { %s15774_s21 = sld [smem:[%s17639_s0 + %s15715_s18]]   ;;  %s15718_s30 = smov 7  }
   0x6   :  { %s15779_s25 = sld [smem:[%s17639_s0 + %s15716_s22]]   ;;  %s15719_s4 = smov 8  }
   0x7   :  { %s15784_s29 = sld [smem:[%s17639_s0 + %s15717_s26]]   ;;  %s15720_s10 = smov 9  }
   0x8   :  { %s15789_s3 = sld [smem:[%s17639_s0 + %s15718_s30]]   ;;  %s15721_s15 = smov 10  }
   0x9   :  { %s15794_s8 = sld [smem:[%s17639_s0 + %s15719_s4]]   ;;  %s15722_s20 = smov 11  }
   0xa   :  { %s15799_s14 = sld [smem:[%s17639_s0 + %s15720_s10]]   ;;  %s15723_s26 = smov 12  }
   0xb   :  { %s15804_s19 = sld [smem:[%s17639_s0 + %s15721_s15]]   ;;  %s15724_s1 = smov 13  }
   0xc   :  { %s15809_s24 = sld [smem:[%s17639_s0 + %s15722_s20]]   ;;  %s15725_s7 = smov 14  }
   0xd   :  { %s15814_s30 = sld [smem:[%s17639_s0 + %s15723_s26]]   ;;  %s15726_s15 = smov 15  }
   0xe   :  { %s15819_s6 = sld [smem:[%s17639_s0 + %s15724_s1]]   ;;  %s15727_s22 = smov 16  }
   0xf   :  { %s15824_s12 = sld [smem:[%s17639_s0 + %s15725_s7]]   ;;  %s15728_s28 = smov 17  }
  0x10   :  { %s15829_s20 = sld [smem:[%s17639_s0 + %s15726_s15]]   ;;  %s15729_s7 = smov 18  }
  0x11   :  { %s15834_s27 = sld [smem:[%s17639_s0 + %s15727_s22]]   ;;  %s15730_s15 = smov 19  }
  0x12   :  { %s15839_s4 = sld [smem:[%s17639_s0 + %s15728_s28]]   ;;  %s15731_s22 = smov 20  }
  0x13   :  { %s15732_s28 = smov 21   ;;  %s15743_s23 = smov 32  }
  0x15   :  { %17648 = sst [smem:[#allocation3_spill]] %s15824_s12 }
  0x16   :  { %17649 = sst [smem:[#allocation4_spill]] %s15829_s20 }
  0x17   :  { %17650 = sst [smem:[#allocation5_spill]] %s15834_s27 }
  0x18   :  { %17651 = sst [smem:[#allocation6_spill]] %s15839_s4 }
  0x19   :  { %s15844_s12 = sld [smem:[%s17639_s0 + %s15729_s7]]   ;;  %s15733_s7 = smov 22  }
  0x1a   :  { %s15849_s20 = sld [smem:[%s17639_s0 + %s15730_s15]]   ;;  %s15734_s15 = smov 23  }
  0x1b   :  { %s15854_s27 = sld [smem:[%s17639_s0 + %s15731_s22]]   ;;  %s15735_s22 = smov 24  }
  0x1c   :  { %s15859_s4 = sld [smem:[%s17639_s0 + %s15732_s28]]   ;;  %s15736_s28 = smov 25  }
  0x1f   :  { %17652 = sst [smem:[#allocation7_spill]] %s15844_s12 }
  0x20   :  { %17653 = sst [smem:[#allocation8_spill]] %s15849_s20 }
  0x21   :  { %17654 = sst [smem:[#allocation9_spill]] %s15854_s27 }
  0x22   :  { %17655 = sst [smem:[#allocation10_spill]] %s15859_s4 }
  0x23   :  { %s15864_s12 = sld [smem:[%s17639_s0 + %s15733_s7]]   ;;  %s15737_s7 = smov 26  }
  0x24   :  { %s15869_s20 = sld [smem:[%s17639_s0 + %s15734_s15]]   ;;  %s15738_s15 = smov 27  }
  0x25   :  { %s15874_s27 = sld [smem:[%s17639_s0 + %s15735_s22]]   ;;  %s15739_s22 = smov 28  }
  0x26   :  { %s15879_s4 = sld [smem:[%s17639_s0 + %s15736_s28]]   ;;  %s15740_s28 = smov 29  }
  0x29   :  { %17656 = sst [smem:[#allocation11_spill]] %s15864_s12 }
  0x2a   :  { %17657 = sst [smem:[#allocation12_spill]] %s15869_s20 }
  0x2b   :  { %17658 = sst [smem:[#allocation13_spill]] %s15874_s27 }
  0x2c   :  { %17659 = sst [smem:[#allocation14_spill]] %s15879_s4 }
  0x2d   :  { %s15884_s12 = sld [smem:[%s17639_s0 + %s15737_s7]]   ;;  %s15741_s7 = smov 30  }
  0x2e   :  { %s15889_s20 = sld [smem:[%s17639_s0 + %s15738_s15]]   ;;  %s15742_s15 = smov 31  }
  0x2f   :  { %s15894_s27 = sld [smem:[%s17639_s0 + %s15739_s22]]  }
  0x30   :  { %s15899_s4 = sld [smem:[%s17639_s0 + %s15740_s28]]   ;;  %s15914_s28 = smov 0  }
  0x33   :  { %17660 = sst [smem:[#allocation15_spill]] %s15884_s12 }
  0x34   :  { %17661 = sst [smem:[#allocation16_spill]] %s15889_s20 }
  0x35   :  { %17662 = sst [smem:[#allocation17_spill]] %s15894_s27 }
  0x36   :  { %s15904_s12 = sld [smem:[%s17639_s0 + %s15741_s7]]  }
  0x37   :  { %s11509_s20 = sld [smem:[%s17639_s0 + %s15742_s15]]  }
  0x38   :  { %s15912_s27 = sld [smem:[%s17639_s0 + %s15743_s23]]  }
  0x3d   :  { %v70_v0 = vstv %s11509_s20 }
  0x3e   :  { %71 = vst [vmem:[#allocation2] sm:$0x1] %v70_v0 }
  0x3f LB: > { %s11511_s1 = sadd.s32 4294967295, %s15710_s28   ;;  %p11515_p0 = scmp.ge.s32.totalorder %s15710_s28, 1  ;;  %s15710_s28 = sphi %s15914_s28, %s77_s28  }
  0x40   : > { %p897_p1 = scmp.lt.s32.totalorder %s15710_s28, 3 }
  0x42   : > { %p898_p2 = pnand %p11515_p0, %p897_p1 }
  0x43   : > { %v15287_v1 = vld [vmem:[%s15759_s9] sm:$0xff] (!%p898_p2)   ;;  %p977_p3 = scmp.lt.s32.totalorder (!%p898_p2), %s11511_s1, 1  ;;  %v15288_v2 = vld [vmem:[%s15759_s9 + $0x8] sm:$0xff] (!%p898_p2)   ;;  %vm1057_vm0 = vcmask (!%p898_p2), 261120   ;;  %vm2436_vm1 = vcmask (!%p898_p2), 523264   ;;  %vm15745_vm2 = vmmov (!%p898_p2), 0  }
  0x44   : > { %901 = sbr.rel (%p898_p2) target bundleno = 7124 (0x1bd4), region = 148  ;;  %13687 = vmatprep.subr.bf16.mxu0 (!%p898_p2), %v15287_v1  ;;  %15035 = vmatprep.subr.bf16.mxu1 (!%p898_p2), %v15287_v1  ;;  %v15291_v51 = vld [vmem:[%s15769_s17 + $0x4] ss:$8 sps:$4 sm:$0xff] (!%p898_p2)   ;;  %v15981_v53 = vld [vmem:[%s15764_s13] ss:$0 sm:$0xff] (!%p898_p2)  ;;  %s17663_s2 = sld [smem:[#allocation3_spill]] (!%p898_p2) }
  0x45   : > { %13688 = vmatpush3.bf16.msra.mxu0 (!%p898_p2), %v15287_v1  ;;  %15037 = vmatpush3.bf16.msra.mxu1 (!%p898_p2), %v15287_v1  ;;  %v15294_v52 = vld [vmem:[%s15769_s17 + $0x184] ss:$8 sps:$4 sm:$0xff] (!%p898_p2)   ;;  %vm7308_vm3 = vcmask (!%p898_p2), 130048   ;;  %s17664_s7 = sld [smem:[#allocation5_spill]] (!%p898_p2)  ;;  %s17665_s10 = sld [smem:[#allocation6_spill]] (!%p898_p2)  ;;  %vm9735_vm4 = vcmask (!%p898_p2), 1041408  }
  0x46   : > { %13689 = vmatprep.subr.bf16.mxu0 (!%p898_p2), %v15288_v2  ;;  %15036 = vmatprep.subr.bf16.mxu1 (!%p898_p2), %v15288_v2  ;;  %s17666_s11 = sld [smem:[#allocation4_spill]] (!%p898_p2)  ;;  %s17667_s15 = sld [smem:[#allocation7_spill]] (!%p898_p2)  ;;  %vm9731_vm5 = vcmask (!%p898_p2), 31744   ;;  %vm11236_vm6 = vcmask (!%p898_p2), 1043456   ;;  %vm11430_vm7 = vcmask (!%p898_p2), 0  }
  0x47   : > { %s17668_s16 = sld [smem:[#allocation8_spill]] (!%p898_p2)  ;;  %s17669_s18 = sld [smem:[#allocation10_spill]] (!%p898_p2) }
  0x48   : > { %s17670_s23 = sld [smem:[#allocation12_spill]] (!%p898_p2)  ;;  %s17671_s22 = sld [smem:[#allocation11_spill]] (!%p898_p2) }
  0x49   : > { %13690 = vmatpush3.bf16.msra.mxu0 (!%p898_p2), %v15288_v2  ;;  %15038 = vmatpush3.bf16.msra.mxu1 (!%p898_p2), %v15288_v2  ;;  %s17672_s26 = sld [smem:[#allocation9_spill]] (!%p898_p2) }
  0x4b   : > { %s17679_s1 = smov (!%p977_p3, %s11511_s1), 1 }
  0x4c   : > { %s12730_s0 = sshll.u32 %s17679_s1, 8 }
  0x4d   : > { %s15928_s20 = scalar_lea.vmem %s15754_s5, %s12730_s0  ;;  %s17673_s0 = sld [smem:[#allocation14_spill]] }
  0x4e   : > { %v986_v3 = vld [vmem:[%s15928_s20] sm:$0xff]  ;;  %v987_v4 = vld [vmem:[%s15928_s20 + $0x8] sm:$0xff]  ;;  %v988_v8 = vld [vmem:[%s15928_s20 + $0x10] sm:$0xff] }
  0x4f   : > { %v1002_v5 = vld [vmem:[%s15928_s20 + $0x80] sm:$0xff]  ;;  %v1018_v6 = vpack.c.bf16 %v987_v4, %v986_v3  ;;  %v1003_v7 = vld [vmem:[%s15928_s20 + $0x88] sm:$0xff]  ;;  %v989_v9 = vld [vmem:[%s15928_s20 + $0x18] sm:$0xff] }
  0x50   : > { %v1026_v10 = vpack.c.bf16 %v1003_v7, %v1002_v5  ;;  %v1019_v11 = vpack.c.bf16 %v989_v9, %v988_v8  ;;  %v1004_v12 = vld [vmem:[%s15928_s20 + $0x90] sm:$0xff]  ;;  %v1005_v13 = vld [vmem:[%s15928_s20 + $0x98] sm:$0xff]  ;;  %v990_v14 = vld [vmem:[%s15928_s20 + $0x20] sm:$0xff] }
  0x51   : > { %13691 = vmatprep.mubr.msk.bf16.mxu0 %vm1057_vm0, %v1018_v6  ;;  %v1027_v15 = vpack.c.bf16 %v1005_v13, %v1004_v12  ;;  %v991_v16 = vld [vmem:[%s15928_s20 + $0x28] sm:$0xff]  ;;  %v1006_v17 = vld [vmem:[%s15928_s20 + $0xa0] sm:$0xff]  ;;  %v992_v21 = vld [vmem:[%s15928_s20 + $0x30] sm:$0xff] }
  0x52   : > { %v1007_v18 = vld [vmem:[%s15928_s20 + $0xa8] sm:$0xff]  ;;  %13707 = vmatprep.mubr.msk.bf16.mxu1 %vm1057_vm0, %v1026_v10  ;;  %13692 = vmatmul.mubr.msk.bf16.vlgmr.msra.gmra.mrb[0].mxu0 %vm1057_vm0, %v1019_v11  ;;  %v1020_v19 = vpack.c.bf16 %v991_v16, %v990_v14  ;;  %v993_v22 = vld [vmem:[%s15928_s20 + $0x38] sm:$0xff]  ;;  %v1008_v23 = vld [vmem:[%s15928_s20 + $0xb0] sm:$0xff] }
  0x53   : > { %v1028_v20 = vpack.c.bf16 %v1007_v18, %v1006_v17  ;;  %13708 = vmatmul.mubr.msk.bf16.vlgmr.msra.gmra.mrb[0].mxu1 %vm1057_vm0, %v1027_v15  ;;  %v1009_v24 = vld [vmem:[%s15928_s20 + $0xb8] sm:$0xff]  ;;  %v994_v25 = vld [vmem:[%s15928_s20 + $0x40] sm:$0xff]  ;;  %v995_v26 = vld [vmem:[%s15928_s20 + $0x48] sm:$0xff]  ;;  %v1021_v29 = vpack.c.bf16 %v993_v22, %v992_v21 }
  0x54   : > { %13695 = vmatprep.mubr.msk.bf16.mxu0 %vm1057_vm0, %v1020_v19  ;;  %v1010_v27 = vld [vmem:[%s15928_s20 + $0xc0] sm:$0xff]  ;;  %v1011_v28 = vld [vmem:[%s15928_s20 + $0xc8] sm:$0xff]  ;;  %v1029_v30 = vpack.c.bf16 %v1009_v24, %v1008_v23  ;;  %v1022_v31 = vpack.c.bf16 %v995_v26, %v994_v25  ;;  %v996_v33 = vld [vmem:[%s15928_s20 + $0x50] sm:$0xff] }
  0x55   : > { %13711 = vmatprep.mubr.msk.bf16.mxu1 %vm1057_vm0, %v1028_v20  ;;  %v1030_v32 = vpack.c.bf16 %v1011_v28, %v1010_v27  ;;  %v997_v34 = vld [vmem:[%s15928_s20 + $0x58] sm:$0xff]  ;;  %v1012_v35 = vld [vmem:[%s15928_s20 + $0xd0] sm:$0xff]  ;;  %v998_v37 = vld [vmem:[%s15928_s20 + $0x60] sm:$0xff] }
  0x56   : > { %v1013_v36 = vld [vmem:[%s15928_s20 + $0xd8] sm:$0xff]  ;;  %v999_v38 = vld [vmem:[%s15928_s20 + $0x68] sm:$0xff]  ;;  %v1014_v39 = vld [vmem:[%s15928_s20 + $0xe0] sm:$0xff]  ;;  %v1023_v41 = vpack.c.bf16 %v997_v34, %v996_v33 }
  0x57   : > { %v1015_v40 = vld [vmem:[%s15928_s20 + $0xe8] sm:$0xff]  ;;  %v1031_v42 = vpack.c.bf16 %v1013_v36, %v1012_v35  ;;  %v1024_v43 = vpack.c.bf16 %v999_v38, %v998_v37  ;;  %v1000_v45 = vld [vmem:[%s15928_s20 + $0x70] sm:$0xff]  ;;  %v1001_v46 = vld [vmem:[%s15928_s20 + $0x78] sm:$0xff] }
  0x58   : > { %v1032_v44 = vpack.c.bf16 %v1015_v40, %v1014_v39  ;;  %v1016_v47 = vld [vmem:[%s15928_s20 + $0xf0] sm:$0xff]  ;;  %v1017_v48 = vld [vmem:[%s15928_s20 + $0xf8] sm:$0xff]  ;;  %v1025_v49 = vpack.c.bf16 %v1001_v46, %v1000_v45  ;;  %s17674_s20 = sld [smem:[#allocation17_spill]] }
  0x59   : > { %v1033_v50 = vpack.c.bf16 %v1017_v48, %v1016_v47 }
  0x5a   : > { %13696 = vmatmul.mubr.msk.bf16.gmra.mrb[4].mxu0 %vm1057_vm0, %v1021_v29 }
  0x5b   : > { %13712 = vmatmul.mubr.msk.bf16.gmra.mrb[4].mxu1 %vm1057_vm0, %v1029_v30  ;;  %13699 = vmatprep.mubr.msk.bf16.mxu0 %vm1057_vm0, %v1022_v31 }
  0x5c   : > { %13715 = vmatprep.mubr.msk.bf16.mxu1 %vm1057_vm0, %v1030_v32 }
  0x62   : > { %13700 = vmatmul.mubr.msk.bf16.gmra.mrb[8].mxu0 %vm1057_vm0, %v1023_v41 }
  0x63   : > { %13716 = vmatmul.mubr.msk.bf16.gmra.mrb[8].mxu1 %vm1057_vm0, %v1031_v42  ;;  %13703 = vmatprep.mubr.msk.bf16.mxu0 %vm1057_vm0, %v1024_v43 }
  0x64   : > { %13719 = vmatprep.mubr.msk.bf16.mxu1 %vm1057_vm0, %v1032_v44 }
  0x6a   : > { %13704 = vmatmul.mubr.msk.bf16.gmra.mrb[12].mxu0 %vm1057_vm0, %v1025_v49 }
  0x6b   : > { %13720 = vmatmul.mubr.msk.bf16.gmra.mrb[12].mxu1 %vm1057_vm0, %v1033_v50  ;;  %2119 = vmatprep.mubr.bf16.mxu0 %v15294_v52 }
  0x6c   : > { %1395 = vmatprep.mubr.bf16.mxu1 %v15291_v51 }
 0x125   : > { %v13693_v54 = vpop.f32.mrb[0].mxu0 }
 0x126   : > { %v1149_v55 = vadd.f32 %v13693_v54, %v15981_v53  ;;  %v13709_v56 = vpop.f32.mrb[0].mxu1  ;;  %v1140_v57 = vpop.f32.mrb[1].mxu0 }
 0x127   : > { %v1213_v58 = vadd.f32 %v13709_v56, %v15981_v53  ;;  %v1141_v59 = vadd.f32 %v15981_v53, %v1140_v57  ;;  %v1204_v60 = vpop.f32.mrb[1].mxu1  ;;  %v13694_v61 = vpop.f32.mrb[2].mxu0 }
 0x128   : > { %v1269_v62 = vmax.f32 %v1149_v55, 0.0  ;;  %v1205_v63 = vadd.f32 %v15981_v53, %v1204_v60  ;;  %v1152_v0 = vadd.f32 %v13694_v61, %v15981_v53  ;;  %v13710_v1 = vpop.f32.mrb[2].mxu1  ;;  %v1143_v2 = vpop.f32.mrb[3].mxu0 }
 0x129   : > { %v1285_v3 = vmax.f32 %v1213_v58, 0.0  ;;  %v1216_v4 = vadd.f32 %v13710_v1, %v15981_v53  ;;  %v1144_v5 = vadd.f32 %v15981_v53, %v1143_v2  ;;  %v1207_v6 = vpop.f32.mrb[3].mxu1  ;;  %v1267_v7 = vmax.f32 %v1141_v59, 0.0 }
 0x12a   : > { %v1270_v8 = vmax.f32 %v1152_v0, 0.0  ;;  %v1208_v9 = vadd.f32 %v15981_v53, %v1207_v6  ;;  %v1283_v12 = vmax.f32 %v1205_v63, 0.0 }
 0x12b   : > { %v1286_v10 = vmax.f32 %v1216_v4, 0.0  ;;  %v1268_v11 = vmax.f32 %v1144_v5, 0.0 }
 0x12c   : > { %v15991_v13 = vpack.c.bf16 %v1270_v8, %v1269_v62  ;;  %v1284_v14 = vmax.f32 %v1208_v9, 0.0 }
 0x12d   : > { %v15993_v15 = vpack.c.bf16 %v1286_v10, %v1285_v3  ;;  %v15995_v16 = vpack.c.bf16 %v1268_v11, %v1267_v7  ;;  %v13697_v17 = vpop.f32.mrb[4].mxu0 }
 0x12e   : > { %v15997_v18 = vpack.c.bf16 %v1284_v14, %v1283_v12  ;;  %v1165_v19 = vadd.f32 %v13697_v17, %v15981_v53  ;;  %v13713_v20 = vpop.f32.mrb[4].mxu1  ;;  %v1156_v21 = vpop.f32.mrb[5].mxu0 }
 0x12f   : > { %v1229_v22 = vadd.f32 %v13713_v20, %v15981_v53  ;;  %v1157_v23 = vadd.f32 %v15981_v53, %v1156_v21  ;;  %v1220_v24 = vpop.f32.mrb[5].mxu1  ;;  %v13698_v25 = vpop.f32.mrb[6].mxu0 }
 0x130   : > { %v1273_v26 = vmax.f32 %v1165_v19, 0.0  ;;  %v1221_v27 = vadd.f32 %v15981_v53, %v1220_v24  ;;  %v1168_v28 = vadd.f32 %v13698_v25, %v15981_v53  ;;  %v13714_v29 = vpop.f32.mrb[6].mxu1  ;;  %12749 = vmatprep.subr.bf16.mxu1 %v15997_v18  ;;  %12989 = vmatprep.subr.bf16.mxu0 %v15997_v18  ;;  %v1159_v30 = vpop.f32.mrb[7].mxu0 }
 0x131   : > { %v1289_v31 = vmax.f32 %v1229_v22, 0.0  ;;  %v1232_v32 = vadd.f32 %v13714_v29, %v15981_v53  ;;  %v1160_v33 = vadd.f32 %v15981_v53, %v1159_v30  ;;  %v1223_v34 = vpop.f32.mrb[7].mxu1  ;;  %12750 = vmatpush3.bf16.msra.mxu1 %v15995_v16  ;;  %12990 = vmatpush3.bf16.msra.mxu0 %v15995_v16  ;;  %v1271_v35 = vmax.f32 %v1157_v23, 0.0 }
 0x132   : > { %v1274_v36 = vmax.f32 %v1168_v28, 0.0  ;;  %v1224_v37 = vadd.f32 %v15981_v53, %v1223_v34  ;;  %12751 = vmatprep.subr.bf16.mxu1 %v15993_v15  ;;  %12991 = vmatprep.subr.bf16.mxu0 %v15993_v15  ;;  %v1287_v40 = vmax.f32 %v1221_v27, 0.0 }
 0x133   : > { %v1290_v38 = vmax.f32 %v1232_v32, 0.0  ;;  %v1272_v39 = vmax.f32 %v1160_v33, 0.0 }
 0x134   : > { %v16013_v41 = vpack.c.bf16 %v1274_v36, %v1273_v26  ;;  %v1288_v42 = vmax.f32 %v1224_v37, 0.0 }
 0x135   : > { %v16015_v43 = vpack.c.bf16 %v1290_v38, %v1289_v31  ;;  %v16017_v44 = vpack.c.bf16 %v1272_v39, %v1271_v35  ;;  %12752 = vmatpush3.bf16.msra.mxu1 %v15991_v13  ;;  %12992 = vmatpush3.bf16.msra.mxu0 %v15991_v13  ;;  %v13701_v45 = vpop.f32.mrb[8].mxu0 }
 0x136   : > { %v16021_v46 = vpack.c.bf16 %v1288_v42, %v1287_v40  ;;  %v1181_v47 = vadd.f32 %v13701_v45, %v15981_v53  ;;  %v13717_v48 = vpop.f32.mrb[8].mxu1  ;;  %v1172_v49 = vpop.f32.mrb[9].mxu0  ;;  %v15289_v45 = vld [vmem:[%s15769_s17] ss:$8 sps:$4 sm:$0xff]  }
 0x137   : > { %v1245_v50 = vadd.f32 %v13717_v48, %v15981_v53  ;;  %v1173_v51 = vadd.f32 %v15981_v53, %v1172_v49  ;;  %v1236_v52 = vpop.f32.mrb[9].mxu1  ;;  %v13702_v54 = vpop.f32.mrb[10].mxu0  ;;  %v15295_v48 = vld [vmem:[%s15769_s17 + $0x14] ss:$8 sps:$4 sm:$0xff]   ;;  %v15297_v49 = vld [vmem:[%s15769_s17 + $0x10] ss:$8 sps:$4 sm:$0xff]  }
 0x138   : > { %v1277_v55 = vmax.f32 %v1181_v47, 0.0  ;;  %v1237_v56 = vadd.f32 %v15981_v53, %v1236_v52  ;;  %v1184_v57 = vadd.f32 %v13702_v54, %v15981_v53  ;;  %v13718_v58 = vpop.f32.mrb[10].mxu1  ;;  %12753 = vmatprep.subr.bf16.mxu1 %v16021_v46  ;;  %12993 = vmatprep.subr.bf16.mxu0 %v16021_v46  ;;  %v1175_v59 = vpop.f32.mrb[11].mxu0  ;;  %v15292_v47 = vld [vmem:[%s15769_s17 + $0x180] ss:$8 sps:$4 sm:$0xff]  }
 0x139   : > { %v1293_v60 = vmax.f32 %v1245_v50, 0.0  ;;  %v1248_v61 = vadd.f32 %v13718_v58, %v15981_v53  ;;  %v1176_v62 = vadd.f32 %v15981_v53, %v1175_v59  ;;  %v1239_v63 = vpop.f32.mrb[11].mxu1  ;;  %12754 = vmatpush3.bf16.msra.mxu1 %v16017_v44  ;;  %12994 = vmatpush3.bf16.msra.mxu0 %v16017_v44  ;;  %v1275_v0 = vmax.f32 %v1173_v51, 0.0  ;;  %v15298_v50 = vld [vmem:[%s15769_s17 + $0x24] ss:$8 sps:$4 sm:$0xff]  }
 0x13a   : > { %v1278_v1 = vmax.f32 %v1184_v57, 0.0  ;;  %v1240_v2 = vadd.f32 %v15981_v53, %v1239_v63  ;;  %12755 = vmatprep.subr.bf16.mxu1 %v16015_v43  ;;  %12995 = vmatprep.subr.bf16.mxu0 %v16015_v43  ;;  %v1291_v5 = vmax.f32 %v1237_v56, 0.0  ;;  %v15300_v51 = vld [vmem:[%s15769_s17 + $0x20] ss:$8 sps:$4 sm:$0xff]   ;;  %v15301_v52 = vld [vmem:[%s15769_s17 + $0x34] ss:$8 sps:$4 sm:$0xff]  }
 0x13b   : > { %v1294_v3 = vmax.f32 %v1248_v61, 0.0  ;;  %v1276_v4 = vmax.f32 %v1176_v62, 0.0  ;;  %v15303_v54 = vld [vmem:[%s15769_s17 + $0x30] ss:$8 sps:$4 sm:$0xff]   ;;  %v15304_v56 = vld [vmem:[%s15769_s17 + $0x40] ss:$8 sps:$4 sm:$0xff]  }
 0x13c   : > { %v16037_v6 = vpack.c.bf16 %v1278_v1, %v1277_v55  ;;  %v1292_v7 = vmax.f32 %v1240_v2, 0.0  ;;  %v15306_v55 = vld [vmem:[%s15769_s17 + $0x44] ss:$8 sps:$4 sm:$0xff]   ;;  %v15307_v57 = vld [vmem:[%s15769_s17 + $0x54] ss:$8 sps:$4 sm:$0xff]  }
 0x13d   : > { %v16039_v8 = vpack.c.bf16 %v1294_v3, %v1293_v60  ;;  %v16041_v9 = vpack.c.bf16 %v1276_v4, %v1275_v0  ;;  %12756 = vmatpush3.bf16.msra.mxu1 %v16013_v41  ;;  %12996 = vmatpush3.bf16.msra.mxu0 %v16013_v41  ;;  %v13705_v10 = vpop.f32.mrb[12].mxu0  ;;  %v15309_v58 = vld [vmem:[%s15769_s17 + $0x50] ss:$8 sps:$4 sm:$0xff]   ;;  %v15355_v59 = vld [vmem:[%s15769_s17 + $0x194] ss:$8 sps:$4 sm:$0xff]  }
 0x13e   : > { %v16045_v11 = vpack.c.bf16 %v1292_v7, %v1291_v5  ;;  %v1197_v12 = vadd.f32 %v13705_v10, %v15981_v53  ;;  %v13721_v14 = vpop.f32.mrb[12].mxu1  ;;  %v1188_v17 = vpop.f32.mrb[13].mxu0  ;;  %v15310_v60 = vld [vmem:[%s15769_s17 + $0x64] ss:$8 sps:$4 sm:$0xff]   ;;  %v15359_v61 = vld [vmem:[%s15769_s17 + $0x190] ss:$8 sps:$4 sm:$0xff]  }
 0x13f   : > { %v1261_v19 = vadd.f32 %v13721_v14, %v15981_v53  ;;  %v1189_v20 = vadd.f32 %v15981_v53, %v1188_v17  ;;  %v1252_v21 = vpop.f32.mrb[13].mxu1  ;;  %v13706_v22 = vpop.f32.mrb[14].mxu0  ;;  %v15312_v62 = vld [vmem:[%s15769_s17 + $0x60] ss:$8 sps:$4 sm:$0xff]   ;;  %v15361_v63 = vld [vmem:[%s15769_s17 + $0x1a4] ss:$8 sps:$4 sm:$0xff]  }
 0x140   : > { %v1281_v23 = vmax.f32 %v1197_v12, 0.0  ;;  %v1253_v24 = vadd.f32 %v15981_v53, %v1252_v21  ;;  %v1200_v25 = vadd.f32 %v13706_v22, %v15981_v53  ;;  %v13722_v26 = vpop.f32.mrb[14].mxu1  ;;  %12757 = vmatprep.subr.bf16.mxu1 %v16045_v11  ;;  %12997 = vmatprep.subr.bf16.mxu0 %v16045_v11  ;;  %v1191_v27 = vpop.f32.mrb[15].mxu0  ;;  %v15313_v0 = vld [vmem:[%s15769_s17 + $0x74] ss:$8 sps:$4 sm:$0xff]  }
 0x141   : > { %v1297_v28 = vmax.f32 %v1261_v19, 0.0  ;;  %v1264_v29 = vadd.f32 %v13722_v26, %v15981_v53  ;;  %v1192_v30 = vadd.f32 %v15981_v53, %v1191_v27  ;;  %v1255_v31 = vpop.f32.mrb[15].mxu1  ;;  %12758 = vmatpush3.bf16.msra.mxu1 %v16041_v9  ;;  %12998 = vmatpush3.bf16.msra.mxu0 %v16041_v9  ;;  %v1279_v32 = vmax.f32 %v1189_v20, 0.0  ;;  %v15365_v1 = vld [vmem:[%s15769_s17 + $0x1a0] ss:$8 sps:$4 sm:$0xff]  }
 0x142   : > { %v1282_v33 = vmax.f32 %v1200_v25, 0.0  ;;  %v1256_v34 = vadd.f32 %v15981_v53, %v1255_v31  ;;  %12759 = vmatprep.subr.bf16.mxu1 %v16039_v8  ;;  %12999 = vmatprep.subr.bf16.mxu0 %v16039_v8  ;;  %v1295_v37 = vmax.f32 %v1253_v24, 0.0  ;;  %v15315_v2 = vld [vmem:[%s15769_s17 + $0x70] ss:$8 sps:$4 sm:$0xff]   ;;  %v15367_v3 = vld [vmem:[%s15769_s17 + $0x1b4] ss:$8 sps:$4 sm:$0xff]  }
 0x143   : > { %v1298_v35 = vmax.f32 %v1264_v29, 0.0  ;;  %v1280_v36 = vmax.f32 %v1192_v30, 0.0  ;;  %v15318_v4 = vld [vmem:[%s15769_s17 + $0x84] ss:$8 sps:$4 sm:$0xff]   ;;  %v15371_v5 = vld [vmem:[%s15769_s17 + $0x1b0] ss:$8 sps:$4 sm:$0xff]  }
 0x144   : > { %v16061_v38 = vpack.c.bf16 %v1282_v33, %v1281_v23  ;;  %v1296_v39 = vmax.f32 %v1256_v34, 0.0  ;;  %v15316_v7 = vld [vmem:[%s15769_s17 + $0x80] ss:$8 sps:$4 sm:$0xff]   ;;  %v15375_v10 = vld [vmem:[%s15769_s17 + $0x204] ss:$8 sps:$4 sm:$0xff]  }
 0x145   : > { %v16063_v40 = vpack.c.bf16 %v1298_v35, %v1297_v28  ;;  %v16065_v42 = vpack.c.bf16 %v1280_v36, %v1279_v32  ;;  %12760 = vmatpush3.bf16.msra.mxu1 %v16037_v6  ;;  %13000 = vmatpush3.bf16.msra.mxu0 %v16037_v6  ;;  %v15319_v12 = vld [vmem:[%s15769_s17 + $0x94] ss:$8 sps:$4 sm:$0xff]   ;;  %v15373_v14 = vld [vmem:[%s15769_s17 + $0x200] ss:$8 sps:$4 sm:$0xff]   ;;  %v15383_v19 = vld [vmem:[%s15769_s17 + $0x210] ss:$8 sps:$4 sm:$0xff]  }
 0x146   : > { %v16069_v53 = vpack.c.bf16 %v1296_v39, %v1295_v37  ;;  %v15379_v17 = vld [vmem:[%s15769_s17 + $0x214] ss:$8 sps:$4 sm:$0xff]   ;;  %v15321_v20 = vld [vmem:[%s15769_s17 + $0x90] ss:$8 sps:$4 sm:$0xff]   ;;  %v15322_v21 = vld [vmem:[%s15769_s17 + $0xa4] ss:$8 sps:$4 sm:$0xff]  }
 0x147   : > { %v15385_v22 = vld [vmem:[%s15769_s17 + $0x224] ss:$8 sps:$4 sm:$0xff]   ;;  %v15389_v23 = vld [vmem:[%s15769_s17 + $0x220] ss:$8 sps:$4 sm:$0xff]   ;;  %v15325_v25 = vld [vmem:[%s15769_s17 + $0xb4] ss:$8 sps:$4 sm:$0xff]  }
 0x148   : > { %12761 = vmatprep.subr.bf16.mxu1 %v16069_v53  ;;  %13001 = vmatprep.subr.bf16.mxu0 %v16069_v53  ;;  %v15324_v24 = vld [vmem:[%s15769_s17 + $0xa0] ss:$8 sps:$4 sm:$0xff]   ;;  %v15327_v26 = vld [vmem:[%s15769_s17 + $0xb0] ss:$8 sps:$4 sm:$0xff]   ;;  %v15391_v27 = vld [vmem:[%s15769_s17 + $0x234] ss:$8 sps:$4 sm:$0xff]  }
 0x149   : > { %12762 = vmatpush3.bf16.msra.mxu1 %v16065_v42  ;;  %13002 = vmatpush3.bf16.msra.mxu0 %v16065_v42  ;;  %v15330_v28 = vld [vmem:[%s15769_s17 + $0xc4] ss:$8 sps:$4 sm:$0xff]   ;;  %v15395_v29 = vld [vmem:[%s15769_s17 + $0x230] ss:$8 sps:$4 sm:$0xff]   ;;  %v15328_v30 = vld [vmem:[%s15769_s17 + $0xc0] ss:$8 sps:$4 sm:$0xff]  }
 0x14a   : > { %12763 = vmatprep.subr.bf16.mxu1 %v16063_v40  ;;  %13003 = vmatprep.subr.bf16.mxu0 %v16063_v40  ;;  %v15331_v31 = vld [vmem:[%s15769_s17 + $0xd4] ss:$8 sps:$4 sm:$0xff]   ;;  %v15333_v32 = vld [vmem:[%s15769_s17 + $0xd0] ss:$8 sps:$4 sm:$0xff]   ;;  %v15334_v33 = vld [vmem:[%s15769_s17 + $0xe4] ss:$8 sps:$4 sm:$0xff]  }
 0x14b   : > { %v15336_v34 = vld [vmem:[%s15769_s17 + $0xe0] ss:$8 sps:$4 sm:$0xff]   ;;  %v15337_v35 = vld [vmem:[%s15769_s17 + $0xf4] ss:$8 sps:$4 sm:$0xff]   ;;  %v15339_v36 = vld [vmem:[%s15769_s17 + $0xf0] ss:$8 sps:$4 sm:$0xff]  }
 0x14c   : > { %v15342_v37 = vld [vmem:[%s15769_s17 + $0x104] ss:$8 sps:$4 sm:$0xff]   ;;  %v15340_v39 = vld [vmem:[%s15769_s17 + $0x100] ss:$8 sps:$4 sm:$0xff]  }
 0x14d   : > { %12764 = vmatpush3.bf16.msra.mxu1 %v16061_v38  ;;  %13004 = vmatpush3.bf16.msra.mxu0 %v16061_v38 }
 0x14e   : > { %12789 = vmatprep.subr.bf16.mxu1 %v15997_v18  ;;  %13069 = vmatprep.subr.bf16.mxu0 %v15997_v18 }
 0x150   : > { %1396 = vmatmul.mubr.bf16.vlgmr.msra.gmra.mrb[16].mxu1 %v15289_v45  ;;  %2120 = vmatmul.mubr.bf16.vlgmr.msra.gmra.mrb[16].mxu0 %v15292_v47  ;;  %v15343_v45 = vld [vmem:[%s15769_s17 + $0x114] ss:$8 sps:$4 sm:$0xff]   ;;  %v15345_v47 = vld [vmem:[%s15769_s17 + $0x110] ss:$8 sps:$4 sm:$0xff]  }
 0x151   : > { %12790 = vmatpush3.bf16.msra.mxu1 %v15995_v16  ;;  %13070 = vmatpush3.bf16.msra.mxu0 %v15995_v16 }
 0x152   : > { %12791 = vmatprep.subr.bf16.mxu1 %v15993_v15  ;;  %13071 = vmatprep.subr.bf16.mxu0 %v15993_v15 }
 0x153   : > { %1403 = vmatprep.mubr.bf16.mxu1 %v15295_v48  ;;  %2127 = vmatprep.mubr.bf16.mxu0 %v15355_v59  ;;  %v15346_v48 = vld [vmem:[%s15769_s17 + $0x124] ss:$8 sps:$4 sm:$0xff]  }
 0x155   : > { %12792 = vmatpush3.bf16.msra.mxu1 %v15991_v13  ;;  %13072 = vmatpush3.bf16.msra.mxu0 %v15991_v13 }
 0x156   : > { %12793 = vmatprep.subr.bf16.mxu1 %v16021_v46  ;;  %13073 = vmatprep.subr.bf16.mxu0 %v16021_v46 }
 0x158   : > { %1404 = vmatmul.mubr.bf16.gmra.mrb[20].mxu1 %v15297_v49  ;;  %2128 = vmatmul.mubr.bf16.gmra.mrb[20].mxu0 %v15359_v61  ;;  %v15348_v49 = vld [vmem:[%s15769_s17 + $0x120] ss:$8 sps:$4 sm:$0xff]  }
 0x159   : > { %12794 = vmatpush3.bf16.msra.mxu1 %v16017_v44  ;;  %13074 = vmatpush3.bf16.msra.mxu0 %v16017_v44 }
 0x15a   : > { %12795 = vmatprep.subr.bf16.mxu1 %v16015_v43  ;;  %13075 = vmatprep.subr.bf16.mxu0 %v16015_v43 }
 0x15b   : > { %1411 = vmatprep.mubr.bf16.mxu1 %v15298_v50  ;;  %2135 = vmatprep.mubr.bf16.mxu0 %v15361_v63  ;;  %v15349_v50 = vld [vmem:[%s15769_s17 + $0x134] ss:$8 sps:$4 sm:$0xff]  }
 0x15d   : > { %12796 = vmatpush3.bf16.msra.mxu1 %v16013_v41  ;;  %13076 = vmatpush3.bf16.msra.mxu0 %v16013_v41 }
 0x15e   : > { %12797 = vmatprep.subr.bf16.mxu1 %v16045_v11  ;;  %13077 = vmatprep.subr.bf16.mxu0 %v16045_v11 }
 0x160   : > { %1412 = vmatmul.mubr.bf16.gmra.mrb[24].mxu1 %v15300_v51  ;;  %2136 = vmatmul.mubr.bf16.gmra.mrb[24].mxu0 %v15365_v1  ;;  %v15351_v51 = vld [vmem:[%s15769_s17 + $0x130] ss:$8 sps:$4 sm:$0xff]  }
 0x161   : > { %12798 = vmatpush3.bf16.msra.mxu1 %v16041_v9  ;;  %13078 = vmatpush3.bf16.msra.mxu0 %v16041_v9 }
 0x162   : > { %12799 = vmatprep.subr.bf16.mxu1 %v16039_v8  ;;  %13079 = vmatprep.subr.bf16.mxu0 %v16039_v8 }
 0x163   : > { %1419 = vmatprep.mubr.bf16.mxu1 %v15301_v52  ;;  %2143 = vmatprep.mubr.bf16.mxu0 %v15367_v3  ;;  %v15354_v52 = vld [vmem:[%s15769_s17 + $0x144] ss:$8 sps:$4 sm:$0xff]  }
 0x165   : > { %12800 = vmatpush3.bf16.msra.mxu1 %v16037_v6  ;;  %13080 = vmatpush3.bf16.msra.mxu0 %v16037_v6 }
 0x166   : > { %12801 = vmatprep.subr.bf16.mxu1 %v16069_v53  ;;  %13081 = vmatprep.subr.bf16.mxu0 %v16069_v53 }
 0x168   : > { %1420 = vmatmul.mubr.bf16.gmra.mrb[28].mxu1 %v15303_v54  ;;  %2144 = vmatmul.mubr.bf16.gmra.mrb[28].mxu0 %v15371_v5  ;;  %v15352_v54 = vld [vmem:[%s15769_s17 + $0x140] ss:$8 sps:$4 sm:$0xff]  }
 0x169   : > { %12802 = vmatpush3.bf16.msra.mxu1 %v16065_v42  ;;  %13082 = vmatpush3.bf16.msra.mxu0 %v16065_v42 }
 0x16a   : > { %12803 = vmatprep.subr.bf16.mxu1 %v16063_v40  ;;  %13083 = vmatprep.subr.bf16.mxu0 %v16063_v40 }
 0x16b   : > { %1509 = vmatprep.mubr.bf16.mxu1 %v15306_v55  ;;  %2363 = vmatprep.mubr.bf16.mxu0 %v15375_v10  ;;  %v15357_v55 = vld [vmem:[%s15769_s17 + $0x154] ss:$8 sps:$4 sm:$0xff]  }
 0x16d   : > { %12804 = vmatpush3.bf16.msra.mxu1 %v16061_v38  ;;  %13084 = vmatpush3.bf16.msra.mxu0 %v16061_v38 }
 0x16e   : > { %12829 = vmatprep.subr.bf16.mxu1 %v15997_v18 }
 0x170   : > { %1510 = vmatmul.mubr.bf16.vlgmr.msra.gmra.mrb[32].mxu1 %v15304_v56  ;;  %2364 = vmatmul.mubr.bf16.vlgmr.msra.gmra.mrb[32].mxu0 %v15373_v14  ;;  %v15360_v56 = vld [vmem:[%s15769_s17 + $0x150] ss:$8 sps:$4 sm:$0xff]  }
 0x171   : > { %12830 = vmatpush3.bf16.msra.mxu1 %v15995_v16  ;;  %1517 = vmatprep.mubr.bf16.mxu1 %v15307_v57  ;;  %v15363_v57 = vld [vmem:[%s15769_s17 + $0x164] ss:$8 sps:$4 sm:$0xff]  }
 0x172   : > { %12831 = vmatprep.subr.bf16.mxu1 %v15993_v15  ;;  %2371 = vmatprep.mubr.bf16.mxu0 %v15379_v17 }
 0x175   : > { %12832 = vmatpush3.bf16.msra.mxu1 %v15991_v13 }
 0x176   : > { %12833 = vmatprep.subr.bf16.mxu1 %v16021_v46 }
 0x178   : > { %1518 = vmatmul.mubr.bf16.gmra.mrb[36].mxu1 %v15309_v58  ;;  %2372 = vmatmul.mubr.bf16.gmra.mrb[36].mxu0 %v15383_v19 }
 0x179   : > { %12834 = vmatpush3.bf16.msra.mxu1 %v16017_v44  ;;  %1525 = vmatprep.mubr.bf16.mxu1 %v15310_v60 }
 0x17a   : > { %12835 = vmatprep.subr.bf16.mxu1 %v16015_v43  ;;  %2379 = vmatprep.mubr.bf16.mxu0 %v15385_v22 }
 0x17d   : > { %12836 = vmatpush3.bf16.msra.mxu1 %v16013_v41 }
 0x17e   : > { %12837 = vmatprep.subr.bf16.mxu1 %v16045_v11 }
 0x180   : > { %1526 = vmatmul.mubr.bf16.gmra.mrb[40].mxu1 %v15312_v62  ;;  %2380 = vmatmul.mubr.bf16.gmra.mrb[40].mxu0 %v15389_v23 }
 0x181   : > { %12838 = vmatpush3.bf16.msra.mxu1 %v16041_v9  ;;  %1533 = vmatprep.mubr.bf16.mxu1 %v15313_v0 }
 0x182   : > { %12839 = vmatprep.subr.bf16.mxu1 %v16039_v8  ;;  %2387 = vmatprep.mubr.bf16.mxu0 %v15391_v27 }
 0x185   : > { %12840 = vmatpush3.bf16.msra.mxu1 %v16037_v6 }
 0x186   : > { %12841 = vmatprep.subr.bf16.mxu1 %v16069_v53 }
 0x188   : > { %1534 = vmatmul.mubr.bf16.gmra.mrb[44].mxu1 %v15315_v2  ;;  %2388 = vmatmul.mubr.bf16.gmra.mrb[44].mxu0 %v15395_v29 }
 0x189   : > { %12842 = vmatpush3.bf16.msra.mxu1 %v16065_v42  ;;  %1631 = vmatprep.mubr.bf16.mxu1 %v15318_v4 }
 0x18a   : > { %12843 = vmatprep.subr.bf16.mxu1 %v16063_v40 }
 0x18d   : > { %12844 = vmatpush3.bf16.msra.mxu1 %v16061_v38 }
 0x18e   : > { %12869 = vmatprep.subr.bf16.mxu1 %v15997_v18 }
 0x190   : > { %1632 = vmatmul.mubr.bf16.vlgmr.msra.gmra.mrb[48].mxu1 %v15316_v7 }
 0x191   : > { %12870 = vmatpush3.bf16.msra.mxu1 %v15995_v16  ;;  %1639 = vmatprep.mubr.bf16.mxu1 %v15319_v12 }
 0x192   : > { %12871 = vmatprep.subr.bf16.mxu1 %v15993_v15 }
 0x195   : > { %12872 = vmatpush3.bf16.msra.mxu1 %v15991_v13 }
 0x196   : > { %12873 = vmatprep.subr.bf16.mxu1 %v16021_v46 }
 0x198   : > { %1640 = vmatmul.mubr.bf16.gmra.mrb[52].mxu1 %v15321_v20 }
 0x199   : > { %12874 = vmatpush3.bf16.msra.mxu1 %v16017_v44  ;;  %1647 = vmatprep.mubr.bf16.mxu1 %v15322_v21 }
 0x19a   : > { %12875 = vmatprep.subr.bf16.mxu1 %v16015_v43 }
 0x19d   : > { %12876 = vmatpush3.bf16.msra.mxu1 %v16013_v41 }
 0x19e   : > { %12877 = vmatprep.subr.bf16.mxu1 %v16045_v11 }
 0x1a0   : > { %1648 = vmatmul.mubr.bf16.gmra.mrb[56].mxu1 %v15324_v24 }
 0x1a1   : > { %12878 = vmatpush3.bf16.msra.mxu1 %v16041_v9  ;;  %1655 = vmatprep.mubr.bf16.mxu1 %v15325_v25 }
 0x1a2   : > { %12879 = vmatprep.subr.bf16.mxu1 %v16039_v8 }
 0x1a5   : > { %12880 = vmatpush3.bf16.msra.mxu1 %v16037_v6 }
 0x1a6   : > { %12881 = vmatprep.subr.bf16.mxu1 %v16069_v53 }
 0x1a8   : > { %1656 = vmatmul.mubr.bf16.gmra.mrb[60].mxu1 %v15327_v26 }
 0x1a9   : > { %12882 = vmatpush3.bf16.msra.mxu1 %v16065_v42  ;;  %1753 = vmatprep.mubr.bf16.mxu1 %v15330_v28 }
 0x1aa   : > { %12883 = vmatprep.subr.bf16.mxu1 %v16063_v40 }
 0x1ad   : > { %12884 = vmatpush3.bf16.msra.mxu1 %v16061_v38 }
 0x1ae   : > { %12909 = vmatprep.subr.bf16.mxu1 %v15997_v18 }
 0x1b0   : > { %1754 = vmatmul.mubr.bf16.vlgmr.msra.gmra.mrb[64].mxu1 %v15328_v30 }
 0x1b1   : > { %12910 = vmatpush3.bf16.msra.mxu1 %v15995_v16  ;;  %1761 = vmatprep.mubr.bf16.mxu1 %v15331_v31 }
 0x1b2   : > { %12911 = vmatprep.subr.bf16.mxu1 %v15993_v15 }
 0x1b5   : > { %12912 = vmatpush3.bf16.msra.mxu1 %v15991_v13 }
 0x1b6   : > { %12913 = vmatprep.subr.bf16.mxu1 %v16021_v46 }
 0x1b8   : > { %1762 = vmatmul.mubr.bf16.gmra.mrb[68].mxu1 %v15333_v32 }
 0x1b9   : > { %12914 = vmatpush3.bf16.msra.mxu1 %v16017_v44  ;;  %1769 = vmatprep.mubr.bf16.mxu1 %v15334_v33 }
 0x1ba   : > { %12915 = vmatprep.subr.bf16.mxu1 %v16015_v43 }
 0x1bd   : > { %12916 = vmatpush3.bf16.msra.mxu1 %v16013_v41 }
 0x1be   : > { %12917 = vmatprep.subr.bf16.mxu1 %v16045_v11 }
 0x1c0   : > { %1770 = vmatmul.mubr.bf16.gmra.mrb[72].mxu1 %v15336_v34 }
 0x1c1   : > { %12918 = vmatpush3.bf16.msra.mxu1 %v16041_v9  ;;  %1777 = vmatprep.mubr.bf16.mxu1 %v15337_v35 }
 0x1c2   : > { %12919 = vmatprep.subr.bf16.mxu1 %v16039_v8 }
 0x1c5   : > { %12920 = vmatpush3.bf16.msra.mxu1 %v16037_v6 }
 0x1c6   : > { %12921 = vmatprep.subr.bf16.mxu1 %v16069_v53 }
 0x1c8   : > { %1778 = vmatmul.mubr.bf16.gmra.mrb[76].mxu1 %v15339_v36 }
 0x1c9   : > { %12922 = vmatpush3.bf16.msra.mxu1 %v16065_v42  ;;  %1875 = vmatprep.mubr.bf16.mxu1 %v15342_v37 }
 0x1ca   : > { %12923 = vmatprep.subr.bf16.mxu1 %v16063_v40 }
 0x1cd   : > { %12924 = vmatpush3.bf16.msra.mxu1 %v16061_v38 }
 0x1ce   : > { %12949 = vmatprep.subr.bf16.mxu1 %v15997_v18 }
 0x1d0   : > { %1876 = vmatmul.mubr.bf16.vlgmr.msra.gmra.mrb[80].mxu1 %v15340_v39 }
 0x1d1   : > { %12950 = vmatpush3.bf16.msra.mxu1 %v15995_v16  ;;  %1883 = vmatprep.mubr.bf16.mxu1 %v15343_v45 }
 0x1d2   : > { %12951 = vmatprep.subr.bf16.mxu1 %v15993_v15 }
 0x1d5   : > { %12952 = vmatpush3.bf16.msra.mxu1 %v15991_v13 }
 0x1d6   : > { %12953 = vmatprep.subr.bf16.mxu1 %v16021_v46 }
 0x1d8   : > { %1884 = vmatmul.mubr.bf16.gmra.mrb[84].mxu1 %v15345_v47 }
 0x1d9   : > { %12954 = vmatpush3.bf16.msra.mxu1 %v16017_v44  ;;  %1891 = vmatprep.mubr.bf16.mxu1 %v15346_v48 }
 0x1da   : > { %12955 = vmatprep.subr.bf16.mxu1 %v16015_v43 }
 0x1dd   : > { %12956 = vmatpush3.bf16.msra.mxu1 %v16013_v41 }
 0x1de   : > { %12957 = vmatprep.subr.bf16.mxu1 %v16045_v11 }
 0x1e0   : > { %1892 = vmatmul.mubr.bf16.gmra.mrb[88].mxu1 %v15348_v49 }
 0x1e1   : > { %12958 = vmatpush3.bf16.msra.mxu1 %v16041_v9  ;;  %1899 = vmatprep.mubr.bf16.mxu1 %v15349_v50 }
 0x1e2   : > { %12959 = vmatprep.subr.bf16.mxu1 %v16039_v8 }
 0x1e5   : > { %12960 = vmatpush3.bf16.msra.mxu1 %v16037_v6 }
 0x1e6   : > { %12961 = vmatprep.subr.bf16.mxu1 %v16069_v53 }
 0x1e8   : > { %1900 = vmatmul.mubr.bf16.gmra.mrb[92].mxu1 %v15351_v51 }
 0x1e9   : > { %12962 = vmatpush3.bf16.msra.mxu1 %v16065_v42  ;;  %1997 = vmatprep.mubr.bf16.mxu1 %v15354_v52 }
 0x1ea   : > { %12963 = vmatprep.subr.bf16.mxu1 %v16063_v40 }
 0x1ed   : > { %12964 = vmatpush3.bf16.msra.mxu1 %v16061_v38 }
 0x1ee   : > { %13029 = vmatprep.subr.bf16.mxu1 %v15997_v18  ;;  %v15366_v18 = vld [vmem:[%s15769_s17 + $0x160] ss:$8 sps:$4 sm:$0xff]  }
 0x1f0   : > { %1998 = vmatmul.mubr.bf16.vlgmr.msra.gmra.mrb[96].mxu1 %v15352_v54 }
 0x1f1   : > { %13030 = vmatpush3.bf16.msra.mxu1 %v15995_v16  ;;  %2005 = vmatprep.mubr.bf16.mxu1 %v15357_v55  ;;  %v15369_v16 = vld [vmem:[%s15769_s17 + $0x174] ss:$8 sps:$4 sm:$0xff]  }
 0x1f2   : > { %13031 = vmatprep.subr.bf16.mxu1 %v15993_v15  ;;  %v15378_v15 = vld [vmem:[%s15769_s17 + $0x1c4] ss:$8 sps:$4 sm:$0xff]  }
 0x1f5   : > { %13032 = vmatpush3.bf16.msra.mxu1 %v15991_v13  ;;  %v15372_v13 = vld [vmem:[%s15769_s17 + $0x170] ss:$8 sps:$4 sm:$0xff]  }
 0x1f6   : > { %13033 = vmatprep.subr.bf16.mxu1 %v16021_v46  ;;  %v15387_v46 = vld [vmem:[%s15769_s17 + $0x1e4] ss:$8 sps:$4 sm:$0xff]  }
 0x1f8   : > { %2006 = vmatmul.mubr.bf16.gmra.mrb[100].mxu1 %v15360_v56 }
 0x1f9   : > { %13034 = vmatpush3.bf16.msra.mxu1 %v16017_v44  ;;  %2013 = vmatprep.mubr.bf16.mxu1 %v15363_v57  ;;  %v15384_v44 = vld [vmem:[%s15769_s17 + $0x1d0] ss:$8 sps:$4 sm:$0xff]  }
 0x1fa   : > { %13035 = vmatprep.subr.bf16.mxu1 %v16015_v43  ;;  %v15381_v43 = vld [vmem:[%s15769_s17 + $0x1d4] ss:$8 sps:$4 sm:$0xff]  }
 0x1fd   : > { %13036 = vmatpush3.bf16.msra.mxu1 %v16013_v41  ;;  %v15376_v41 = vld [vmem:[%s15769_s17 + $0x1c0] ss:$8 sps:$4 sm:$0xff]  }
 0x1fe   : > { %13037 = vmatprep.subr.bf16.mxu1 %v16045_v11 }
 0x200   : > { %2014 = vmatmul.mubr.bf16.gmra.mrb[104].mxu1 %v15366_v18 }
 0x201   : > { %13038 = vmatpush3.bf16.msra.mxu1 %v16041_v9  ;;  %2021 = vmatprep.mubr.bf16.mxu1 %v15369_v16 }
 0x202   : > { %13039 = vmatprep.subr.bf16.mxu1 %v16039_v8  ;;  %v15393_v8 = vld [vmem:[%s15769_s17 + $0x1f4] ss:$8 sps:$4 sm:$0xff]  }
 0x205   : > { %13040 = vmatpush3.bf16.msra.mxu1 %v16037_v6  ;;  %v15390_v6 = vld [vmem:[%s15769_s17 + $0x1e0] ss:$8 sps:$4 sm:$0xff]  }
 0x206   : > { %13041 = vmatprep.subr.bf16.mxu1 %v16069_v53 }
 0x208   : > { %2022 = vmatmul.mubr.bf16.gmra.mrb[108].mxu1 %v15372_v13 }
 0x209   : > { %13042 = vmatpush3.bf16.msra.mxu1 %v16065_v42  ;;  %2241 = vmatprep.mubr.bf16.mxu1 %v15378_v15  ;;  %v15396_v42 = vld [vmem:[%s15769_s17 + $0x1f0] ss:$8 sps:$4 sm:$0xff]  }
 0x20a   : > { %13043 = vmatprep.subr.bf16.mxu1 %v16063_v40 }
 0x20d   : > { %13044 = vmatpush3.bf16.msra.mxu1 %v16061_v38 }
 0x210   : > { %2242 = vmatmul.mubr.bf16.vlgmr.msra.gmra.mrb[112].mxu1 %v15376_v41 }
 0x211   : > { %2249 = vmatprep.mubr.bf16.mxu1 %v15381_v43 }
 0x218   : > { %2250 = vmatmul.mubr.bf16.gmra.mrb[116].mxu1 %v15384_v44 }
 0x219   : > { %2257 = vmatprep.mubr.bf16.mxu1 %v15387_v46 }
 0x220   : > { %2258 = vmatmul.mubr.bf16.gmra.mrb[120].mxu1 %v15390_v6 }
 0x221   : > { %2265 = vmatprep.mubr.bf16.mxu1 %v15393_v8 }
 0x223   : > { %v12765_v9 = vpop.f32.mrb[16].mxu1  ;;  %v13005_v21 = vpop.f32.mrb[16].mxu0 }
 0x224   : > { %v12766_v11 = vpop.f32.mrb[17].mxu1  ;;  %v13006_v23 = vpop.f32.mrb[17].mxu0 }
 0x225   : > { %v16261_v53 = vadd.f32 %v12766_v11, %v12765_v9  ;;  %v12768_v40 = vpop.f32.mrb[18].mxu1  ;;  %v16277_v25 = vadd.f32 %v13006_v23, %v13005_v21  ;;  %v13008_v26 = vpop.f32.mrb[18].mxu0 }
 0x226   : > { %v12769_v58 = vpop.f32.mrb[19].mxu1  ;;  %v13009_v29 = vpop.f32.mrb[19].mxu0 }
 0x227   : > { %v16263_v59 = vadd.f32 %v12769_v58, %v12768_v40  ;;  %v16279_v31 = vadd.f32 %v13009_v29, %v13008_v26 }
 0x228   : > { %2266 = vmatmul.mubr.bf16.gmra.mrb[124].mxu1 %v15396_v42 }
 0x22b   : > { %v12771_v38 = vpop.f32.mrb[20].mxu1  ;;  %v13011_v35 = vpop.f32.mrb[20].mxu0 }
 0x22c   : > { %v12772_v60 = vpop.f32.mrb[21].mxu1  ;;  %v13012_v37 = vpop.f32.mrb[21].mxu0 }
 0x22d   : > { %v16265_v61 = vadd.f32 %v12772_v60, %v12771_v38  ;;  %v12774_v62 = vpop.f32.mrb[22].mxu1  ;;  %v16283_v45 = vadd.f32 %v13012_v37, %v13011_v35  ;;  %v13014_v47 = vpop.f32.mrb[22].mxu0 }
 0x22e   : > { %v12775_v63 = vpop.f32.mrb[23].mxu1  ;;  %v13015_v50 = vpop.f32.mrb[23].mxu0 }
 0x22f   : > { %v16267_v0 = vadd.f32 %v12775_v63, %v12774_v62  ;;  %v16285_v52 = vadd.f32 %v13015_v50, %v13014_v47 }
 0x233   : > { %v12777_v1 = vpop.f32.mrb[24].mxu1  ;;  %v13017_v57 = vpop.f32.mrb[24].mxu0 }
 0x234   : > { %v12778_v2 = vpop.f32.mrb[25].mxu1  ;;  %v13018_v16 = vpop.f32.mrb[25].mxu0 }
 0x235   : > { %v16269_v3 = vadd.f32 %v12778_v2, %v12777_v1  ;;  %v12780_v4 = vpop.f32.mrb[26].mxu1  ;;  %v16289_v15 = vadd.f32 %v13018_v16, %v13017_v57  ;;  %v13020_v41 = vpop.f32.mrb[26].mxu0 }
 0x236   : > { %v12781_v5 = vpop.f32.mrb[27].mxu1  ;;  %v13021_v46 = vpop.f32.mrb[27].mxu0 }
 0x237   : > { %v16271_v7 = vadd.f32 %v12781_v5, %v12780_v4  ;;  %v16291_v8 = vadd.f32 %v13021_v46, %v13020_v41 }
 0x23b   : > { %v12783_v10 = vpop.f32.mrb[28].mxu1 }
 0x23c   : > { %v12784_v12 = vpop.f32.mrb[29].mxu1 }
 0x23d   : > { %v16273_v14 = vadd.f32 %v12784_v12, %v12783_v10  ;;  %v12786_v17 = vpop.f32.mrb[30].mxu1 }
 0x23e   : > { %v12787_v19 = vpop.f32.mrb[31].mxu1 }
 0x23f   : > { %v16275_v20 = vadd.f32 %v12787_v19, %v12786_v17 }
 0x243   : > { %v12805_v22 = vpop.f32.mrb[32].mxu1 }
 0x244   : > { %v12806_v24 = vpop.f32.mrb[33].mxu1 }
 0x245   : > { %v12807_v27 = vadd.f32 %v12806_v24, %v12805_v22  ;;  %v12808_v28 = vpop.f32.mrb[34].mxu1 }
 0x246   : > { %v12809_v30 = vpop.f32.mrb[35].mxu1 }
 0x247   : > { %v1542_v32 = vmax.f32 %v16261_v53, %v12807_v27  ;;  %v12810_v33 = vadd.f32 %v12809_v30, %v12808_v28  ;;  %v13023_v53 = vpop.f32.mrb[28].mxu0 }
 0x248   : > { %v13024_v58 = vpop.f32.mrb[29].mxu0 }
 0x249   : > { %v1543_v34 = vmax.f32 %v16263_v59, %v12810_v33  ;;  %v16295_v38 = vadd.f32 %v13024_v58, %v13023_v53  ;;  %v13026_v60 = vpop.f32.mrb[30].mxu0 }
 0x24a   : > { %v13027_v63 = vpop.f32.mrb[31].mxu0 }
 0x24b   : > { %v12811_v36 = vpop.f32.mrb[36].mxu1  ;;  %v16297_v1 = vadd.f32 %v13027_v63, %v13026_v60  ;;  %v13085_v5 = vpop.f32.mrb[32].mxu0 }
 0x24c   : > { %v12812_v39 = vpop.f32.mrb[37].mxu1  ;;  %v13086_v10 = vpop.f32.mrb[33].mxu0 }
 0x24d   : > { %v12813_v48 = vadd.f32 %v12812_v39, %v12811_v36  ;;  %v12814_v49 = vpop.f32.mrb[38].mxu1  ;;  %v16301_v17 = vadd.f32 %v13086_v10, %v13085_v5  ;;  %v13088_v19 = vpop.f32.mrb[34].mxu0 }
 0x24e   : > { %v12815_v51 = vpop.f32.mrb[39].mxu1  ;;  %v13089_v23 = vpop.f32.mrb[35].mxu0 }
 0x24f   : > { %v1544_v54 = vmax.f32 %v16265_v61, %v12813_v48  ;;  %v12816_v55 = vadd.f32 %v12815_v51, %v12814_v49  ;;  %v16303_v26 = vadd.f32 %v13089_v23, %v13088_v19  ;;  %v13091_v29 = vpop.f32.mrb[36].mxu0 }
 0x250   : > { %v13092_v30 = vpop.f32.mrb[37].mxu0 }
 0x251   : > { %v1545_v56 = vmax.f32 %v16267_v0, %v12816_v55  ;;  %v13094_v35 = vpop.f32.mrb[38].mxu0  ;;  %v16309_v39 = vadd.f32 %v13092_v30, %v13091_v29 }
 0x252   : > { %v13095_v47 = vpop.f32.mrb[39].mxu0 }
 0x253   : > { %v12817_v18 = vpop.f32.mrb[40].mxu1  ;;  %v16311_v49 = vadd.f32 %v13095_v47, %v13094_v35 }
 0x254   : > { %v12818_v13 = vpop.f32.mrb[41].mxu1 }
 0x255   : > { %v12819_v43 = vadd.f32 %v12818_v13, %v12817_v18  ;;  %v12820_v44 = vpop.f32.mrb[42].mxu1 }
 0x256   : > { %v12821_v6 = vpop.f32.mrb[43].mxu1 }
 0x257   : > { %v1546_v9 = vmax.f32 %v16269_v3, %v12819_v43  ;;  %v12822_v11 = vadd.f32 %v12821_v6, %v12820_v44 }
 0x259   : > { %v1547_v42 = vmax.f32 %v16271_v7, %v12822_v11 }
 0x25b   : > { %v12823_v40 = vpop.f32.mrb[44].mxu1 }
 0x25c   : > { %v12824_v59 = vpop.f32.mrb[45].mxu1 }
 0x25d   : > { %v12825_v61 = vadd.f32 %v12824_v59, %v12823_v40  ;;  %v12826_v62 = vpop.f32.mrb[46].mxu1 }
 0x25e   : > { %v12827_v0 = vpop.f32.mrb[47].mxu1 }
 0x25f   : > { %v1548_v2 = vmax.f32 %v16273_v14, %v12825_v61  ;;  %v12828_v4 = vadd.f32 %v12827_v0, %v12826_v62 }
 0x261   : > { %v1549_v3 = vmax.f32 %v16275_v20, %v12828_v4 }
 0x263   : > { %v12845_v7 = vpop.f32.mrb[48].mxu1 }
 0x264   : > { %v12846_v12 = vpop.f32.mrb[49].mxu1 }
 0x265   : > { %v12847_v21 = vadd.f32 %v12846_v12, %v12845_v7  ;;  %v12848_v22 = vpop.f32.mrb[50].mxu1 }
 0x266   : > { %v12849_v24 = vpop.f32.mrb[51].mxu1 }
 0x267   : > { %v16305_v27 = vmax.f32 %v1542_v32, %v12847_v21  ;;  %v12850_v28 = vadd.f32 %v12849_v24, %v12848_v22 }
 0x269   : > { %v16307_v14 = vmax.f32 %v1543_v34, %v12850_v28  ;;  %v13097_v34 = vpop.f32.mrb[40].mxu0  ;;  %v15397_v28 = vld [vmem:[%s15774_s21 + $0x20] sm:$0xff]  }
 0x26a   : > { %v13098_v57 = vpop.f32.mrb[41].mxu0  ;;  %13747 = vmatprep.mubr.msk.bf16.mxu0 %vm2436_vm1, %v15397_v28 }
 0x26b   : > { %v12851_v20 = vpop.f32.mrb[52].mxu1  ;;  %v13100_v16 = vpop.f32.mrb[42].mxu0  ;;  %v16317_v43 = vadd.f32 %v13098_v57, %v13097_v34  ;;  %v15401_v34 = vld [vmem:[%s15774_s21] sm:$0xff]  }
 0x26c   : > { %v12852_v33 = vpop.f32.mrb[53].mxu1  ;;  %v13101_v44 = vpop.f32.mrb[43].mxu0  ;;  %13731 = vmatprep.mubr.msk.bf16.mxu1 %vm2436_vm1, %v15401_v34 }
 0x26d   : > { %v12853_v36 = vadd.f32 %v12852_v33, %v12851_v20  ;;  %v12854_v37 = vpop.f32.mrb[54].mxu1  ;;  %v16319_v6 = vadd.f32 %v13101_v44, %v13100_v16 }
 0x26e   : > { %v12855_v48 = vpop.f32.mrb[55].mxu1 }
 0x26f   : > { %v16313_v50 = vmax.f32 %v1544_v54, %v12853_v36  ;;  %v12856_v32 = vadd.f32 %v12855_v48, %v12854_v37 }
 0x271   : > { %v16315_v51 = vmax.f32 %v1545_v56, %v12856_v32  ;;  %v13103_v56 = vpop.f32.mrb[44].mxu0 }
 0x272   : > { %v13104_v58 = vpop.f32.mrb[45].mxu0 }
 0x273   : > { %v12857_v55 = vpop.f32.mrb[56].mxu1  ;;  %v13106_v60 = vpop.f32.mrb[46].mxu0  ;;  %v16325_v63 = vadd.f32 %v13104_v58, %v13103_v56 }
 0x274   : > { %v12858_v18 = vpop.f32.mrb[57].mxu1  ;;  %v13107_v0 = vpop.f32.mrb[47].mxu0 }
 0x275   : > { %v12859_v13 = vadd.f32 %v12858_v18, %v12857_v55  ;;  %v12860_v41 = vpop.f32.mrb[58].mxu1  ;;  %v16327_v5 = vadd.f32 %v13107_v0, %v13106_v60 }
 0x276   : > { %v12861_v46 = vpop.f32.mrb[59].mxu1 }
 0x277   : > { %v16321_v11 = vmax.f32 %v1546_v9, %v12859_v13  ;;  %v12862_v54 = vadd.f32 %v12861_v46, %v12860_v41 }
 0x279   : > { %v16323_v53 = vmax.f32 %v1547_v42, %v12862_v54 }
 0x27b   : > { %v12863_v40 = vpop.f32.mrb[60].mxu1 }
 0x27c   : > { %v12864_v59 = vpop.f32.mrb[61].mxu1 }
 0x27d   : > { %v12865_v61 = vadd.f32 %v12864_v59, %v12863_v40  ;;  %v12866_v62 = vpop.f32.mrb[62].mxu1 }
 0x27e   : > { %v12867_v4 = vpop.f32.mrb[63].mxu1 }
 0x27f   : > { %v16329_v7 = vmax.f32 %v1548_v2, %v12865_v61  ;;  %v12868_v9 = vadd.f32 %v12867_v4, %v12866_v62 }
 0x281   : > { %v16331_v10 = vmax.f32 %v1549_v3, %v12868_v9 }
 0x283   : > { %v12885_v42 = vpop.f32.mrb[64].mxu1 }
 0x284   : > { %v12886_v12 = vpop.f32.mrb[65].mxu1 }
 0x285   : > { %v12887_v19 = vadd.f32 %v12886_v12, %v12885_v42  ;;  %v12888_v21 = vpop.f32.mrb[66].mxu1 }
 0x286   : > { %v12889_v22 = vpop.f32.mrb[67].mxu1 }
 0x287   : > { %v1786_v23 = vmax.f32 %v16305_v27, %v12887_v19  ;;  %v12890_v24 = vadd.f32 %v12889_v22, %v12888_v21 }
 0x289   : > { %v1787_v29 = vmax.f32 %v16307_v14, %v12890_v24 }
 0x28b   : > { %v12891_v2 = vpop.f32.mrb[68].mxu1 }
 0x28c   : > { %v12892_v20 = vpop.f32.mrb[69].mxu1 }
 0x28d   : > { %v12893_v30 = vadd.f32 %v12892_v20, %v12891_v2  ;;  %v12894_v3 = vpop.f32.mrb[70].mxu1 }
 0x28e   : > { %v12895_v33 = vpop.f32.mrb[71].mxu1 }
 0x28f   : > { %v1788_v35 = vmax.f32 %v16313_v50, %v12893_v30  ;;  %v12896_v36 = vadd.f32 %v12895_v33, %v12894_v3 }
 0x291   : > { %v1789_v37 = vmax.f32 %v16315_v51, %v12896_v36 }
 0x293   : > { %v12897_v47 = vpop.f32.mrb[72].mxu1 }
 0x294   : > { %v12898_v27 = vpop.f32.mrb[73].mxu1 }
 0x295   : > { %v12899_v48 = vadd.f32 %v12898_v27, %v12897_v47  ;;  %v12900_v32 = vpop.f32.mrb[74].mxu1 }
 0x296   : > { %v12901_v55 = vpop.f32.mrb[75].mxu1 }
 0x297   : > { %v1790_v14 = vmax.f32 %v16321_v11, %v12899_v48  ;;  %v12902_v57 = vadd.f32 %v12901_v55, %v12900_v32 }
 0x299   : > { %v1791_v18 = vmax.f32 %v16323_v53, %v12902_v57 }
 0x29b   : > { %v12903_v16 = vpop.f32.mrb[76].mxu1 }
 0x29c   : > { %v12904_v13 = vpop.f32.mrb[77].mxu1 }
 0x29d   : > { %v12905_v41 = vadd.f32 %v12904_v13, %v12903_v16  ;;  %v12906_v50 = vpop.f32.mrb[78].mxu1 }
 0x29e   : > { %v12907_v44 = vpop.f32.mrb[79].mxu1 }
 0x29f   : > { %v1792_v51 = vmax.f32 %v16329_v7, %v12905_v41  ;;  %v12908_v46 = vadd.f32 %v12907_v44, %v12906_v50 }
 0x2a1   : > { %v1793_v54 = vmax.f32 %v16331_v10, %v12908_v46 }
 0x2a3   : > { %v12925_v56 = vpop.f32.mrb[80].mxu1 }
 0x2a4   : > { %v12926_v40 = vpop.f32.mrb[81].mxu1 }
 0x2a5   : > { %v12927_v58 = vadd.f32 %v12926_v40, %v12925_v56  ;;  %v12928_v59 = vpop.f32.mrb[82].mxu1 }
 0x2a6   : > { %v12929_v11 = vpop.f32.mrb[83].mxu1 }
 0x2a7   : > { %v1908_v60 = vmax.f32 %v1786_v23, %v12927_v58  ;;  %v12930_v61 = vadd.f32 %v12929_v11, %v12928_v59 }
 0x2a9   : > { %v1909_v62 = vmax.f32 %v1787_v29, %v12930_v61 }
 0x2ab   : > { %v12931_v0 = vpop.f32.mrb[84].mxu1 }
 0x2ac   : > { %v12932_v53 = vpop.f32.mrb[85].mxu1 }
 0x2ad   : > { %v12933_v4 = vadd.f32 %v12932_v53, %v12931_v0  ;;  %v12934_v9 = vpop.f32.mrb[86].mxu1 }
 0x2ae   : > { %v12935_v42 = vpop.f32.mrb[87].mxu1 }
 0x2af   : > { %v1910_v12 = vmax.f32 %v1788_v35, %v12933_v4  ;;  %v12936_v19 = vadd.f32 %v12935_v42, %v12934_v9 }
 0x2b1   : > { %v1911_v21 = vmax.f32 %v1789_v37, %v12936_v19 }
 0x2b3   : > { %v12937_v7 = vpop.f32.mrb[88].mxu1 }
 0x2b4   : > { %v12938_v22 = vpop.f32.mrb[89].mxu1 }
 0x2b5   : > { %v12939_v24 = vadd.f32 %v12938_v22, %v12937_v7  ;;  %v12940_v10 = vpop.f32.mrb[90].mxu1 }
 0x2b6   : > { %v12941_v28 = vpop.f32.mrb[91].mxu1 }
 0x2b7   : > { %v1912_v2 = vmax.f32 %v1790_v14, %v12939_v24  ;;  %v12942_v20 = vadd.f32 %v12941_v28, %v12940_v10 }
 0x2b9   : > { %v1913_v30 = vmax.f32 %v1791_v18, %v12942_v20 }
 0x2bb   : > { %v12943_v3 = vpop.f32.mrb[92].mxu1 }
 0x2bc   : > { %v12944_v23 = vpop.f32.mrb[93].mxu1 }
 0x2bd   : > { %v12945_v33 = vadd.f32 %v12944_v23, %v12943_v3  ;;  %v12946_v29 = vpop.f32.mrb[94].mxu1 }
 0x2be   : > { %v12947_v36 = vpop.f32.mrb[95].mxu1 }
 0x2bf   : > { %v1914_v47 = vmax.f32 %v1792_v51, %v12945_v33  ;;  %v12948_v27 = vadd.f32 %v12947_v36, %v12946_v29 }
 0x2c1   : > { %v1915_v48 = vmax.f32 %v1793_v54, %v12948_v27 }
 0x2c3   : > { %v12965_v32 = vpop.f32.mrb[96].mxu1 }
 0x2c4   : > { %v12966_v35 = vpop.f32.mrb[97].mxu1 }
 0x2c5   : > { %v12967_v34 = vadd.f32 %v12966_v35, %v12965_v32  ;;  %v12968_v37 = vpop.f32.mrb[98].mxu1 }
 0x2c6   : > { %v12969_v55 = vpop.f32.mrb[99].mxu1 }
 0x2c7   : > { %v2030_v57 = vmax.f32 %v1908_v60, %v12967_v34  ;;  %v12970_v16 = vadd.f32 %v12969_v55, %v12968_v37 }
 0x2c9   : > { %v2031_v13 = vmax.f32 %v1909_v62, %v12970_v16  ;;  %v2152_v14 = vmax.f32 %v2030_v57, %v16277_v25 }
 0x2cb   : > { %v12971_v41 = vpop.f32.mrb[100].mxu1  ;;  %v2153_v18 = vmax.f32 %v2031_v13, %v16279_v31 }
 0x2cc   : > { %v12972_v50 = vpop.f32.mrb[101].mxu1 }
 0x2cd   : > { %v12973_v44 = vadd.f32 %v12972_v50, %v12971_v41  ;;  %v12974_v46 = vpop.f32.mrb[102].mxu1 }
 0x2ce   : > { %v12975_v56 = vpop.f32.mrb[103].mxu1 }
 0x2cf   : > { %v2032_v51 = vmax.f32 %v1910_v12, %v12973_v44  ;;  %v12976_v40 = vadd.f32 %v12975_v56, %v12974_v46 }
 0x2d1   : > { %v2033_v54 = vmax.f32 %v1911_v21, %v12976_v40  ;;  %v2154_v58 = vmax.f32 %v2032_v51, %v16283_v45 }
 0x2d3   : > { %v12977_v59 = vpop.f32.mrb[104].mxu1  ;;  %v2155_v11 = vmax.f32 %v2033_v54, %v16285_v52 }
 0x2d4   : > { %v12978_v60 = vpop.f32.mrb[105].mxu1 }
 0x2d5   : > { %v12979_v61 = vadd.f32 %v12978_v60, %v12977_v59  ;;  %v12980_v62 = vpop.f32.mrb[106].mxu1 }
 0x2d6   : > { %v12981_v0 = vpop.f32.mrb[107].mxu1 }
 0x2d7   : > { %v2034_v25 = vmax.f32 %v1912_v2, %v12979_v61  ;;  %v12982_v53 = vadd.f32 %v12981_v0, %v12980_v62  ;;  %v15433_v61 = vld [vmem:[%s15784_s29 + $0x10] sm:$0xff]   ;;  %v15398_v62 = vld [vmem:[%s15774_s21 + $0x28] sm:$0xff]  }
 0x2d8   : > { %v15402_v0 = vld [vmem:[%s15774_s21 + $0x8] sm:$0xff]  }
 0x2d9   : > { %v2035_v4 = vmax.f32 %v1913_v30, %v12982_v53  ;;  %v2156_v31 = vmax.f32 %v2034_v25, %v16289_v15  ;;  %v15400_v25 = vld [vmem:[%s15774_s21 + $0x38] sm:$0xff]  }
 0x2da   : > { %v15406_v53 = vld [vmem:[%s15774_s21 + $0x18] sm:$0xff]  }
 0x2db   : > { %v12983_v9 = vpop.f32.mrb[108].mxu1  ;;  %v2157_v42 = vmax.f32 %v2035_v4, %v16291_v8  ;;  %v15403_v4 = vld [vmem:[%s15774_s21 + $0x40] sm:$0xff]  }
 0x2dc   : > { %v12984_v12 = vpop.f32.mrb[109].mxu1 }
 0x2dd   : > { %v12985_v19 = vadd.f32 %v12984_v12, %v12983_v9  ;;  %v12986_v21 = vpop.f32.mrb[110].mxu1  ;;  %v15407_v9 = vld [vmem:[%s15774_s21 + $0x50] sm:$0xff]   ;;  %v15409_v12 = vld [vmem:[%s15774_s21 + $0x60] sm:$0xff]  }
 0x2de   : > { %v12987_v7 = vpop.f32.mrb[111].mxu1 }
 0x2df   : > { %v2036_v45 = vmax.f32 %v1914_v47, %v12985_v19  ;;  %v12988_v22 = vadd.f32 %v12987_v7, %v12986_v21  ;;  %v15410_v19 = vld [vmem:[%s15774_s21 + $0x68] sm:$0xff]   ;;  %v15411_v21 = vld [vmem:[%s15774_s21 + $0x70] sm:$0xff]   ;;  %v15412_v7 = vld [vmem:[%s15774_s21 + $0x78] sm:$0xff]  }
 0x2e1   : > { %v2037_v24 = vmax.f32 %v1915_v48, %v12988_v22  ;;  %v2158_v52 = vmax.f32 %v2036_v45, %v16295_v38  ;;  %v15413_v45 = vld [vmem:[%s15774_s21 + $0x80] sm:$0xff]   ;;  %v15414_v22 = vld [vmem:[%s15774_s21 + $0x88] sm:$0xff]  }
 0x2e3   : > { %v13045_v10 = vpop.f32.mrb[112].mxu1  ;;  %v2159_v28 = vmax.f32 %v2037_v24, %v16297_v1  ;;  %v15415_v24 = vld [vmem:[%s15774_s21 + $0x90] sm:$0xff]  }
 0x2e4   : > { %v13046_v2 = vpop.f32.mrb[113].mxu1 }
 0x2e5   : > { %v13047_v20 = vadd.f32 %v13046_v2, %v13045_v10  ;;  %v13048_v30 = vpop.f32.mrb[114].mxu1  ;;  %v15417_v10 = vld [vmem:[%s15774_s21 + $0xa0] sm:$0xff]   ;;  %v15419_v2 = vld [vmem:[%s15774_s21 + $0xb0] sm:$0xff]  }
 0x2e6   : > { %v13049_v3 = vpop.f32.mrb[115].mxu1 }
 0x2e7   : > { %v2274_v15 = vmax.f32 %v2152_v14, %v13047_v20  ;;  %v13050_v23 = vadd.f32 %v13049_v3, %v13048_v30  ;;  %v15420_v20 = vld [vmem:[%s15774_s21 + $0xb8] sm:$0xff]   ;;  %v15421_v30 = vld [vmem:[%s15774_s21 + $0xc0] sm:$0xff]   ;;  %v15422_v3 = vld [vmem:[%s15774_s21 + $0xc8] sm:$0xff]  }
 0x2e9   : > { %v16354_v8 = vmax.f32 %v2274_v15, %v16301_v17  ;;  %v2275_v33 = vmax.f32 %v2153_v18, %v13050_v23  ;;  %v15423_v15 = vld [vmem:[%s15774_s21 + $0xd0] sm:$0xff]   ;;  %v15424_v23 = vld [vmem:[%s15774_s21 + $0xd8] sm:$0xff]  }
 0x2eb   : > { %v16357_v29 = vmax.f32 %v2275_v33, %v16303_v26  ;;  %v13051_v36 = vpop.f32.mrb[116].mxu1  ;;  %v15434_v33 = vld [vmem:[%s15784_s29 + $0x18] sm:$0xff]  }
 0x2ec   : > { %v13052_v47 = vpop.f32.mrb[117].mxu1 }
 0x2ed   : > { %v16361_v38 = vpack.c.bf16 %v16357_v29, %v16354_v8  ;;  %v13053_v1 = vadd.f32 %v13052_v47, %v13051_v36  ;;  %v13054_v27 = vpop.f32.mrb[118].mxu1  ;;  %v15425_v36 = vld [vmem:[%s15774_s21 + $0xe0] sm:$0xff]   ;;  %v15426_v47 = vld [vmem:[%s15774_s21 + $0xe8] sm:$0xff]  }
 0x2ee   : > { %v13055_v48 = vpop.f32.mrb[119].mxu1 }
 0x2ef   : > { %v2276_v32 = vmax.f32 %v2154_v58, %v13053_v1  ;;  %v13056_v35 = vadd.f32 %v13055_v48, %v13054_v27  ;;  %13723 = vmatprep.subr.bf16.mxu1 %v16361_v38  ;;  %13739 = vmatprep.subr.bf16.mxu0 %v16361_v38  ;;  %v15427_v1 = vld [vmem:[%s15774_s21 + $0xf0] sm:$0xff]   ;;  %v15435_v27 = vld [vmem:[%s15784_s29] sm:$0xff]   ;;  %v15428_v48 = vld [vmem:[%s15774_s21 + $0xf8] sm:$0xff]  }
 0x2f0   : > { %13724 = vmatpush3.bf16.msra.mxu1 %v16361_v38  ;;  %13740 = vmatpush3.bf16.msra.mxu0 %v16361_v38 }
 0x2f1   : > { %v16368_v17 = vmax.f32 %v2276_v32, %v16309_v39  ;;  %v2277_v26 = vmax.f32 %v2155_v11, %v13056_v35  ;;  %v15429_v32 = vld [vmem:[%s15774_s21 + $0x100] sm:$0xff]   ;;  %v15431_v35 = vld [vmem:[%s15774_s21 + $0x110] sm:$0xff]  }
 0x2f3   : > { %v16371_v34 = vmax.f32 %v2277_v26, %v16311_v49  ;;  %v13057_v37 = vpop.f32.mrb[120].mxu1  ;;  %v15432_v26 = vld [vmem:[%s15774_s21 + $0x118] sm:$0xff]  }
 0x2f4   : > { %v13058_v55 = vpop.f32.mrb[121].mxu1 }
 0x2f5   : > { %v16375_v57 = vpack.c.bf16 %v16371_v34, %v16368_v17  ;;  %v13059_v16 = vadd.f32 %v13058_v55, %v13057_v37  ;;  %v13060_v13 = vpop.f32.mrb[122].mxu1 }
 0x2f6   : > { %v13061_v14 = vpop.f32.mrb[123].mxu1 }
 0x2f7   : > { %v2278_v41 = vmax.f32 %v2156_v31, %v13059_v16  ;;  %v13062_v18 = vadd.f32 %v13061_v14, %v13060_v13  ;;  %13725 = vmatprep.subr.bf16.mxu1 %v16375_v57  ;;  %13741 = vmatprep.subr.bf16.mxu0 %v16375_v57  ;;  %v15404_v31 = vld [vmem:[%s15774_s21 + $0x48] sm:$0xff]  }
 0x2f8   : > { %13726 = vmatpush3.bf16.msra.mxu1 %v16375_v57  ;;  %13742 = vmatpush3.bf16.msra.mxu0 %v16375_v57 }
 0x2f9   : > { %v16382_v39 = vmax.f32 %v2278_v41, %v16317_v43  ;;  %v2279_v49 = vmax.f32 %v2157_v42, %v13062_v18  ;;  %v15408_v42 = vld [vmem:[%s15774_s21 + $0x58] sm:$0xff]  }
 0x2fb   : > { %v16385_v50 = vmax.f32 %v2279_v49, %v16319_v6  ;;  %v13063_v44 = vpop.f32.mrb[124].mxu1 }
 0x2fc   : > { %v13064_v46 = vpop.f32.mrb[125].mxu1 }
 0x2fd   : > { %v16389_v56 = vpack.c.bf16 %v16385_v50, %v16382_v39  ;;  %v13065_v51 = vadd.f32 %v13064_v46, %v13063_v44  ;;  %v13066_v40 = vpop.f32.mrb[126].mxu1 }
 0x2fe   : > { %v13067_v54 = vpop.f32.mrb[127].mxu1 }
 0x2ff   : > { %v2280_v58 = vmax.f32 %v2158_v52, %v13065_v51  ;;  %v13068_v59 = vadd.f32 %v13067_v54, %v13066_v40  ;;  %13727 = vmatprep.subr.bf16.mxu1 %v16389_v56  ;;  %13743 = vmatprep.subr.bf16.mxu0 %v16389_v56  ;;  %v15416_v52 = vld [vmem:[%s15774_s21 + $0x98] sm:$0xff]   ;;  %v15436_v51 = vld [vmem:[%s15784_s29 + $0x8] sm:$0xff]  }
 0x300   : > { %13728 = vmatpush3.bf16.msra.mxu1 %v16389_v56  ;;  %13744 = vmatpush3.bf16.msra.mxu0 %v16389_v56 }
 0x301   : > { %v16396_v43 = vmax.f32 %v2280_v58, %v16325_v63  ;;  %v2281_v6 = vmax.f32 %v2159_v28, %v13068_v59  ;;  %v15399_v63 = vld [vmem:[%s15774_s21 + $0x30] sm:$0xff]   ;;  %v15418_v28 = vld [vmem:[%s15774_s21 + $0xa8] sm:$0xff]  }
 0x303   : > { %v16399_v11 = vmax.f32 %v2281_v6, %v16327_v5  ;;  %v15405_v5 = vld [vmem:[%s15774_s21 + $0x10] sm:$0xff]   ;;  %v15437_v6 = vld [vmem:[%s15784_s29 + $0x20] sm:$0xff]  }
 0x305   : > { %v16403_v60 = vpack.c.bf16 %v16399_v11, %v16396_v43 }
 0x307   : > { %13729 = vmatprep.subr.bf16.mxu1 %v16403_v60  ;;  %13745 = vmatprep.subr.bf16.mxu0 %v16403_v60 }
 0x308   : > { %13730 = vmatpush3.bf16.msra.mxu1 %v16403_v60  ;;  %13746 = vmatpush3.bf16.msra.mxu0 %v16403_v60 }
 0x309   : > { %13779 = vmatprep.subr.bf16.mxu0 %v16361_v38  ;;  %13755 = vmatprep.subr.bf16.mxu1 %v15433_v61 }
 0x30b   : > { %13748 = vmatmul.mubr.msk.bf16.vlgmr.msra.gmra.mrb[48].mxu0 %vm2436_vm1, %v15398_v62  ;;  %13732 = vmatmul.mubr.msk.bf16.vlgmr.msra.gmra.mrb[128].mxu1 %vm2436_vm1, %v15402_v0 }
 0x30c   : > { %13780 = vmatpush3.bf16.msra.mxu0 %v16361_v38  ;;  %13751 = vmatprep.mubr.msk.bf16.mxu0 %vm2436_vm1, %v15399_v63 }
 0x30d   : > { %13781 = vmatprep.subr.bf16.mxu0 %v16375_v57  ;;  %13735 = vmatprep.mubr.msk.bf16.mxu1 %vm2436_vm1, %v15405_v5 }
 0x30e   : > { %13756 = vmatpush3.bf16.msra.mxu1 %v15433_v61 }
 0x30f   : > { %13757 = vmatprep.subr.bf16.mxu1 %v15434_v33 }
 0x310   : > { %13782 = vmatpush3.bf16.msra.mxu0 %v16375_v57 }
 0x311   : > { %13783 = vmatprep.subr.bf16.mxu0 %v16389_v56 }
 0x312   : > { %13758 = vmatpush3.bf16.msra.mxu1 %v15434_v33  ;;  %v15440_v33 = vld [vmem:[%s15784_s29 + $0x38] sm:$0xff]  }
 0x313   : > { %13752 = vmatmul.mubr.msk.bf16.gmra.mrb[52].mxu0 %vm2436_vm1, %v15400_v25  ;;  %13736 = vmatmul.mubr.msk.bf16.gmra.mrb[132].mxu1 %vm2436_vm1, %v15406_v53 }
 0x314   : > { %13784 = vmatpush3.bf16.msra.mxu0 %v16389_v56  ;;  %13787 = vmatprep.mubr.msk.bf16.mxu0 %vm2436_vm1, %v15403_v4 }
 0x315   : > { %13785 = vmatprep.subr.bf16.mxu0 %v16403_v60  ;;  %13767 = vmatprep.subr.bf16.mxu1 %v15435_v27 }
 0x318   : > { %13786 = vmatpush3.bf16.msra.mxu0 %v16403_v60 }
 0x319   : > { %13807 = vmatprep.subr.bf16.mxu0 %v16361_v38 }
 0x31b   : > { %13788 = vmatmul.mubr.msk.bf16.vlgmr.msra.gmra.mrb[56].mxu0 %vm2436_vm1, %v15404_v31 }
 0x31c   : > { %13808 = vmatpush3.bf16.msra.mxu0 %v16361_v38  ;;  %13791 = vmatprep.mubr.msk.bf16.mxu0 %vm2436_vm1, %v15407_v9 }
 0x31d   : > { %13809 = vmatprep.subr.bf16.mxu0 %v16375_v57 }
 0x320   : > { %13810 = vmatpush3.bf16.msra.mxu0 %v16375_v57 }
 0x321   : > { %13811 = vmatprep.subr.bf16.mxu0 %v16389_v56 }
 0x323   : > { %13792 = vmatmul.mubr.msk.bf16.gmra.mrb[60].mxu0 %vm2436_vm1, %v15408_v42 }
 0x324   : > { %13812 = vmatpush3.bf16.msra.mxu0 %v16389_v56  ;;  %13815 = vmatprep.mubr.msk.bf16.mxu0 %vm2436_vm1, %v15409_v12 }
 0x325   : > { %13813 = vmatprep.subr.bf16.mxu0 %v16403_v60 }
 0x328   : > { %13814 = vmatpush3.bf16.msra.mxu0 %v16403_v60 }
 0x329   : > { %13835 = vmatprep.subr.bf16.mxu0 %v16361_v38 }
 0x32b   : > { %13816 = vmatmul.mubr.msk.bf16.vlgmr.msra.gmra.mrb[64].mxu0 %vm2436_vm1, %v15410_v19 }
 0x32c   : > { %13836 = vmatpush3.bf16.msra.mxu0 %v16361_v38  ;;  %13819 = vmatprep.mubr.msk.bf16.mxu0 %vm2436_vm1, %v15411_v21  ;;  %v15438_v21 = vld [vmem:[%s15784_s29 + $0x28] sm:$0xff]  }
 0x32d   : > { %13837 = vmatprep.subr.bf16.mxu0 %v16375_v57 }
 0x330   : > { %13838 = vmatpush3.bf16.msra.mxu0 %v16375_v57 }
 0x331   : > { %13839 = vmatprep.subr.bf16.mxu0 %v16389_v56 }
 0x333   : > { %13820 = vmatmul.mubr.msk.bf16.gmra.mrb[68].mxu0 %vm2436_vm1, %v15412_v7 }
 0x334   : > { %13840 = vmatpush3.bf16.msra.mxu0 %v16389_v56  ;;  %13843 = vmatprep.mubr.msk.bf16.mxu0 %vm2436_vm1, %v15413_v45 }
 0x335   : > { %13841 = vmatprep.subr.bf16.mxu0 %v16403_v60 }
 0x338   : > { %13842 = vmatpush3.bf16.msra.mxu0 %v16403_v60 }
 0x339   : > { %13863 = vmatprep.subr.bf16.mxu0 %v16361_v38 }
 0x33b   : > { %13844 = vmatmul.mubr.msk.bf16.vlgmr.msra.gmra.mrb[72].mxu0 %vm2436_vm1, %v15414_v22  ;;  %v15439_v22 = vld [vmem:[%s15784_s29 + $0x30] sm:$0xff]  }
 0x33c   : > { %13864 = vmatpush3.bf16.msra.mxu0 %v16361_v38  ;;  %13847 = vmatprep.mubr.msk.bf16.mxu0 %vm2436_vm1, %v15415_v24 }
 0x33d   : > { %13865 = vmatprep.subr.bf16.mxu0 %v16375_v57 }
 0x340   : > { %13866 = vmatpush3.bf16.msra.mxu0 %v16375_v57 }
 0x341   : > { %13867 = vmatprep.subr.bf16.mxu0 %v16389_v56 }
 0x343   : > { %13848 = vmatmul.mubr.msk.bf16.gmra.mrb[76].mxu0 %vm2436_vm1, %v15416_v52 }
 0x344   : > { %13868 = vmatpush3.bf16.msra.mxu0 %v16389_v56  ;;  %13871 = vmatprep.mubr.msk.bf16.mxu0 %vm2436_vm1, %v15417_v10 }
 0x345   : > { %13869 = vmatprep.subr.bf16.mxu0 %v16403_v60 }
 0x348   : > { %13870 = vmatpush3.bf16.msra.mxu0 %v16403_v60 }
 0x349   : > { %13891 = vmatprep.subr.bf16.mxu0 %v16361_v38 }
 0x34b   : > { %13872 = vmatmul.mubr.msk.bf16.vlgmr.msra.gmra.mrb[80].mxu0 %vm2436_vm1, %v15418_v28 }
 0x34c   : > { %13892 = vmatpush3.bf16.msra.mxu0 %v16361_v38  ;;  %13875 = vmatprep.mubr.msk.bf16.mxu0 %vm2436_vm1, %v15419_v2 }
 0x34d   : > { %13893 = vmatprep.subr.bf16.mxu0 %v16375_v57 }
 0x350   : > { %13894 = vmatpush3.bf16.msra.mxu0 %v16375_v57 }
 0x351   : > { %13895 = vmatprep.subr.bf16.mxu0 %v16389_v56 }
 0x353   : > { %13876 = vmatmul.mubr.msk.bf16.gmra.mrb[84].mxu0 %vm2436_vm1, %v15420_v20 }
 0x354   : > { %13896 = vmatpush3.bf16.msra.mxu0 %v16389_v56  ;;  %13899 = vmatprep.mubr.msk.bf16.mxu0 %vm2436_vm1, %v15421_v30 }
 0x355   : > { %13897 = vmatprep.subr.bf16.mxu0 %v16403_v60 }
 0x358   : > { %13898 = vmatpush3.bf16.msra.mxu0 %v16403_v60 }
 0x359   : > { %13919 = vmatprep.subr.bf16.mxu0 %v16361_v38 }
 0x35b   : > { %13900 = vmatmul.mubr.msk.bf16.vlgmr.msra.gmra.mrb[88].mxu0 %vm2436_vm1, %v15422_v3 }
 0x35c   : > { %13920 = vmatpush3.bf16.msra.mxu0 %v16361_v38  ;;  %13903 = vmatprep.mubr.msk.bf16.mxu0 %vm2436_vm1, %v15423_v15 }
 0x35d   : > { %13921 = vmatprep.subr.bf16.mxu0 %v16375_v57 }
 0x360   : > { %13922 = vmatpush3.bf16.msra.mxu0 %v16375_v57 }
 0x361   : > { %13923 = vmatprep.subr.bf16.mxu0 %v16389_v56 }
 0x363   : > { %13904 = vmatmul.mubr.msk.bf16.gmra.mrb[92].mxu0 %vm2436_vm1, %v15424_v23 }
 0x364   : > { %13924 = vmatpush3.bf16.msra.mxu0 %v16389_v56  ;;  %13927 = vmatprep.mubr.msk.bf16.mxu0 %vm2436_vm1, %v15425_v36 }
 0x365   : > { %13925 = vmatprep.subr.bf16.mxu0 %v16403_v60 }
 0x368   : > { %13926 = vmatpush3.bf16.msra.mxu0 %v16403_v60 }
 0x369   : > { %13947 = vmatprep.subr.bf16.mxu0 %v16361_v38 }
 0x36b   : > { %13928 = vmatmul.mubr.msk.bf16.vlgmr.msra.gmra.mrb[96].mxu0 %vm2436_vm1, %v15426_v47 }
 0x36c   : > { %13948 = vmatpush3.bf16.msra.mxu0 %v16361_v38  ;;  %13931 = vmatprep.mubr.msk.bf16.mxu0 %vm2436_vm1, %v15427_v1  ;;  %v15430_v38 = vld [vmem:[%s15774_s21 + $0x108] sm:$0xff]   ;;  %v15441_v1 = vld [vmem:[%s15784_s29 + $0x40] sm:$0xff]  }
 0x36d   : > { %13949 = vmatprep.subr.bf16.mxu0 %v16375_v57 }
 0x370   : > { %13950 = vmatpush3.bf16.msra.mxu0 %v16375_v57 }
 0x371   : > { %13951 = vmatprep.subr.bf16.mxu0 %v16389_v56 }
 0x373   : > { %13932 = vmatmul.mubr.msk.bf16.gmra.mrb[100].mxu0 %vm2436_vm1, %v15428_v48 }
 0x374   : > { %13952 = vmatpush3.bf16.msra.mxu0 %v16389_v56  ;;  %13955 = vmatprep.mubr.msk.bf16.mxu0 %vm2436_vm1, %v15429_v32 }
 0x375   : > { %13953 = vmatprep.subr.bf16.mxu0 %v16403_v60 }
 0x378   : > { %13954 = vmatpush3.bf16.msra.mxu0 %v16403_v60 }
 0x37b   : > { %13956 = vmatmul.mubr.msk.bf16.vlgmr.msra.gmra.mrb[104].mxu0 %vm2436_vm1, %v15430_v38 }
 0x37c   : > { %13959 = vmatprep.mubr.msk.bf16.mxu0 %vm2436_vm1, %v15431_v35 }
 0x383   : > { %13960 = vmatmul.mubr.msk.bf16.gmra.mrb[108].mxu0 %vm2436_vm1, %v15432_v26 }
 0x3de   : > { %v13749_v37 = vpop.f32.mrb[48].mxu0  ;;  %v13733_v55 = vpop.f32.mrb[128].mxu1 }
 0x3df   : > { %v2597_v57 = vpop.f32.mrb[49].mxu0  ;;  %v2483_v16 = vpop.f32.mrb[129].mxu1 }
 0x3e0   : > { %v13750_v13 = vpop.f32.mrb[50].mxu0  ;;  %v13734_v14 = vpop.f32.mrb[130].mxu1 }
 0x3e1   : > { %v2629_v41 = vpack.c.bf16 %v13750_v13, %v13749_v37  ;;  %v2600_v18 = vpop.f32.mrb[51].mxu0  ;;  %v2515_v49 = vpack.c.bf16 %v13734_v14, %v13733_v55  ;;  %v2486_v44 = vpop.f32.mrb[131].mxu1  ;;  %v15442_v13 = vld [vmem:[%s15784_s29 + $0x48] sm:$0xff]  }
 0x3e2   : > { %v2628_v46 = vpack.c.bf16 %v2600_v18, %v2597_v57  ;;  %v2514_v56 = vpack.c.bf16 %v2486_v44, %v2483_v16  ;;  %v15443_v18 = vld [vmem:[%s15784_s29 + $0x50] sm:$0xff]  }
 0x3e4   : > { %13759 = vmatprep.mubr.msk.bf16.mxu1 %vm1057_vm0, %v2628_v46 }
 0x3e5   : > { %13760 = vmatmul.mubr.msk.bf16.vlgmr.msra.gmra.mrb[136].mxu1 %vm1057_vm0, %v2629_v41 }
 0x3e6   : > { %v13753_v40 = vpop.f32.mrb[52].mxu0  ;;  %13768 = vmatpush3.bf16.msra.mxu1 %v15435_v27  ;;  %v13737_v54 = vpop.f32.mrb[132].mxu1 }
 0x3e7   : > { %v2613_v58 = vpop.f32.mrb[53].mxu0  ;;  %13769 = vmatprep.subr.bf16.mxu1 %v15436_v51  ;;  %v2499_v59 = vpop.f32.mrb[133].mxu1 }
 0x3e8   : > { %v13754_v60 = vpop.f32.mrb[54].mxu0  ;;  %v13738_v61 = vpop.f32.mrb[134].mxu1 }
 0x3e9   : > { %v2616_v62 = vpop.f32.mrb[55].mxu0  ;;  %v2631_v0 = vpack.c.bf16 %v13754_v60, %v13753_v40  ;;  %v2517_v63 = vpack.c.bf16 %v13738_v61, %v13737_v54  ;;  %v2502_v5 = vpop.f32.mrb[135].mxu1  ;;  %v15444_v60 = vld [vmem:[%s15784_s29 + $0x58] sm:$0xff]  }
 0x3ea   : > { %v2630_v25 = vpack.c.bf16 %v2616_v62, %v2613_v58  ;;  %13770 = vmatpush3.bf16.msra.mxu1 %v15436_v51  ;;  %v2516_v53 = vpack.c.bf16 %v2502_v5, %v2499_v59 }
 0x3eb   : > { %13795 = vmatprep.subr.bf16.mxu1 %v15437_v6 }
 0x3ec   : > { %13763 = vmatprep.mubr.msk.bf16.mxu1 %vm1057_vm0, %v2630_v25 }
 0x3ed   : > { %13764 = vmatmul.mubr.msk.bf16.gmra.mrb[140].mxu1 %vm1057_vm0, %v2631_v0  ;;  %v15445_v0 = vld [vmem:[%s15784_s29 + $0x60] sm:$0xff]  }
 0x3ee   : > { %13771 = vmatprep.mubr.msk.bf16.mxu1 %vm1057_vm0, %v2514_v56  ;;  %v13789_v4 = vpop.f32.mrb[56].mxu0 }
 0x3ef   : > { %v2890_v31 = vpop.f32.mrb[57].mxu0 }
 0x3f0   : > { %v13790_v9 = vpop.f32.mrb[58].mxu0 }
 0x3f1   : > { %v2922_v42 = vpack.c.bf16 %v13790_v9, %v13789_v4  ;;  %v2893_v12 = vpop.f32.mrb[59].mxu0 }
 0x3f2   : > { %v2921_v19 = vpack.c.bf16 %v2893_v12, %v2890_v31 }
 0x3f5   : > { %13772 = vmatmul.mubr.msk.bf16.vlgmr.msra.gmra.mrb[136].mxu1 %vm1057_vm0, %v2515_v49 }
 0x3f6   : > { %13775 = vmatprep.mubr.msk.bf16.mxu1 %vm1057_vm0, %v2516_v53  ;;  %13796 = vmatpush3.bf16.msra.mxu1 %v15437_v6  ;;  %v13793_v7 = vpop.f32.mrb[60].mxu0 }
 0x3f7   : > { %13797 = vmatprep.subr.bf16.mxu1 %v15438_v21  ;;  %v2906_v45 = vpop.f32.mrb[61].mxu0 }
 0x3f8   : > { %v13794_v24 = vpop.f32.mrb[62].mxu0 }
 0x3f9   : > { %v2924_v52 = vpack.c.bf16 %v13794_v24, %v13793_v7  ;;  %v2909_v10 = vpop.f32.mrb[63].mxu0 }
 0x3fa   : > { %13798 = vmatpush3.bf16.msra.mxu1 %v15438_v21  ;;  %v2923_v28 = vpack.c.bf16 %v2909_v10, %v2906_v45  ;;  %v15446_v21 = vld [vmem:[%s15784_s29 + $0x68] sm:$0xff]  }
 0x3fb   : > { %13823 = vmatprep.subr.bf16.mxu1 %v15439_v22 }
 0x3fd   : > { %13776 = vmatmul.mubr.msk.bf16.gmra.mrb[140].mxu1 %vm1057_vm0, %v2517_v63 }
 0x3fe   : > { %13799 = vmatprep.mubr.msk.bf16.mxu1 %vm1057_vm0, %v2921_v19  ;;  %v13817_v2 = vpop.f32.mrb[64].mxu0 }
 0x3ff   : > { %v3102_v20 = vpop.f32.mrb[65].mxu0 }
 0x400   : > { %v13818_v30 = vpop.f32.mrb[66].mxu0 }
 0x401   : > { %v3134_v3 = vpack.c.bf16 %v13818_v30, %v13817_v2  ;;  %v3105_v15 = vpop.f32.mrb[67].mxu0 }
 0x402   : > { %v3133_v23 = vpack.c.bf16 %v3105_v15, %v3102_v20 }
 0x405   : > { %13800 = vmatmul.mubr.msk.bf16.vlgmr.msra.gmra.mrb[136].mxu1 %vm1057_vm0, %v2922_v42 }
 0x406   : > { %13803 = vmatprep.mubr.msk.bf16.mxu1 %vm1057_vm0, %v2923_v28  ;;  %13824 = vmatpush3.bf16.msra.mxu1 %v15439_v22  ;;  %v13821_v36 = vpop.f32.mrb[68].mxu0  ;;  %v15447_v22 = vld [vmem:[%s15784_s29 + $0x70] sm:$0xff]  }
 0x407   : > { %13825 = vmatprep.subr.bf16.mxu1 %v15440_v33  ;;  %v3118_v47 = vpop.f32.mrb[69].mxu0 }
 0x408   : > { %v13822_v27 = vpop.f32.mrb[70].mxu0 }
 0x409   : > { %v3136_v48 = vpack.c.bf16 %v13822_v27, %v13821_v36  ;;  %v3121_v32 = vpop.f32.mrb[71].mxu0 }
 0x40a   : > { %13826 = vmatpush3.bf16.msra.mxu1 %v15440_v33  ;;  %v3135_v38 = vpack.c.bf16 %v3121_v32, %v3118_v47  ;;  %v15448_v33 = vld [vmem:[%s15784_s29 + $0x78] sm:$0xff]  }
 0x40b   : > { %13851 = vmatprep.subr.bf16.mxu1 %v15441_v1 }
 0x40d   : > { %13804 = vmatmul.mubr.msk.bf16.gmra.mrb[140].mxu1 %vm1057_vm0, %v2924_v52 }
 0x40e   : > { %13827 = vmatprep.mubr.msk.bf16.mxu1 %vm1057_vm0, %v3133_v23  ;;  %v13845_v35 = vpop.f32.mrb[72].mxu0 }
 0x40f   : > { %v3314_v26 = vpop.f32.mrb[73].mxu0 }
 0x410   : > { %v13846_v37 = vpop.f32.mrb[74].mxu0 }
 0x411   : > { %v3346_v55 = vpack.c.bf16 %v13846_v37, %v13845_v35  ;;  %v3317_v57 = vpop.f32.mrb[75].mxu0 }
 0x412   : > { %v3345_v16 = vpack.c.bf16 %v3317_v57, %v3314_v26 }
 0x415   : > { %13828 = vmatmul.mubr.msk.bf16.vlgmr.msra.gmra.mrb[136].mxu1 %vm1057_vm0, %v3134_v3 }
 0x416   : > { %13831 = vmatprep.mubr.msk.bf16.mxu1 %vm1057_vm0, %v3135_v38  ;;  %13852 = vmatpush3.bf16.msra.mxu1 %v15441_v1  ;;  %v13849_v14 = vpop.f32.mrb[76].mxu0  ;;  %v15449_v1 = vld [vmem:[%s15784_s29 + $0x80] sm:$0xff]  }
 0x417   : > { %13853 = vmatprep.subr.bf16.mxu1 %v15442_v13  ;;  %v3330_v41 = vpop.f32.mrb[77].mxu0 }
 0x418   : > { %v13850_v49 = vpop.f32.mrb[78].mxu0 }
 0x419   : > { %v3348_v44 = vpack.c.bf16 %v13850_v49, %v13849_v14  ;;  %v3333_v46 = vpop.f32.mrb[79].mxu0 }
 0x41a   : > { %13854 = vmatpush3.bf16.msra.mxu1 %v15442_v13  ;;  %v3347_v56 = vpack.c.bf16 %v3333_v46, %v3330_v41  ;;  %v15450_v13 = vld [vmem:[%s15784_s29 + $0x88] sm:$0xff]  }
 0x41b   : > { %13879 = vmatprep.subr.bf16.mxu1 %v15443_v18 }
 0x41d   : > { %13832 = vmatmul.mubr.msk.bf16.gmra.mrb[140].mxu1 %vm1057_vm0, %v3136_v48 }
 0x41e   : > { %13855 = vmatprep.mubr.msk.bf16.mxu1 %vm1057_vm0, %v3345_v16  ;;  %v13873_v51 = vpop.f32.mrb[80].mxu0 }
 0x41f   : > { %v3526_v40 = vpop.f32.mrb[81].mxu0 }
 0x420   : > { %v13874_v54 = vpop.f32.mrb[82].mxu0 }
 0x421   : > { %v3558_v58 = vpack.c.bf16 %v13874_v54, %v13873_v51  ;;  %v3529_v59 = vpop.f32.mrb[83].mxu0  ;;  %v11895_v51 = vld [vmem:[%s15789_s3] ss:$0 sm:$0xff] }
 0x422   : > { %v3557_v6 = vpack.c.bf16 %v3529_v59, %v3526_v40 }
 0x425   : > { %13856 = vmatmul.mubr.msk.bf16.vlgmr.msra.gmra.mrb[136].mxu1 %vm1057_vm0, %v3346_v55 }
 0x426   : > { %13859 = vmatprep.mubr.msk.bf16.mxu1 %vm1057_vm0, %v3347_v56  ;;  %13880 = vmatpush3.bf16.msra.mxu1 %v15443_v18  ;;  %v13877_v61 = vpop.f32.mrb[84].mxu0  ;;  %v15451_v56 = vld [vmem:[%s15779_s25] sm:$0xff]  }
 0x427   : > { %13881 = vmatprep.subr.bf16.mxu1 %v15444_v60  ;;  %v3542_v62 = vpop.f32.mrb[85].mxu0  ;;  %13983 = vmatprep.mubr.msk.bf16.mxu0 %vm2436_vm1, %v15451_v56  ;;  %v15487_v56 = vld [vmem:[%s15794_s8 + $0x10] sm:$0xff]  }
 0x428   : > { %v13878_v63 = vpop.f32.mrb[86].mxu0 }
 0x429   : > { %v3560_v5 = vpack.c.bf16 %v13878_v63, %v13877_v61  ;;  %v3545_v25 = vpop.f32.mrb[87].mxu0 }
 0x42a   : > { %13882 = vmatpush3.bf16.msra.mxu1 %v15444_v60  ;;  %v3559_v53 = vpack.c.bf16 %v3545_v25, %v3542_v62 }
 0x42b   : > { %13907 = vmatprep.subr.bf16.mxu1 %v15445_v0 }
 0x42d   : > { %13860 = vmatmul.mubr.msk.bf16.gmra.mrb[140].mxu1 %vm1057_vm0, %v3348_v44 }
 0x42e   : > { %13883 = vmatprep.mubr.msk.bf16.mxu1 %vm1057_vm0, %v3557_v6  ;;  %v13901_v4 = vpop.f32.mrb[88].mxu0 }
 0x42f   : > { %v3738_v31 = vpop.f32.mrb[89].mxu0 }
 0x430   : > { %v13902_v9 = vpop.f32.mrb[90].mxu0 }
 0x431   : > { %v3770_v42 = vpack.c.bf16 %v13902_v9, %v13901_v4  ;;  %v3741_v12 = vpop.f32.mrb[91].mxu0 }
 0x432   : > { %v3769_v19 = vpack.c.bf16 %v3741_v12, %v3738_v31 }
 0x435   : > { %13884 = vmatmul.mubr.msk.bf16.vlgmr.msra.gmra.mrb[136].mxu1 %vm1057_vm0, %v3558_v58 }
 0x436   : > { %13887 = vmatprep.mubr.msk.bf16.mxu1 %vm1057_vm0, %v3559_v53  ;;  %13908 = vmatpush3.bf16.msra.mxu1 %v15445_v0  ;;  %v13905_v7 = vpop.f32.mrb[92].mxu0 }
 0x437   : > { %13909 = vmatprep.subr.bf16.mxu1 %v15446_v21  ;;  %v3754_v45 = vpop.f32.mrb[93].mxu0 }
 0x438   : > { %v13906_v24 = vpop.f32.mrb[94].mxu0 }
 0x439   : > { %v3772_v52 = vpack.c.bf16 %v13906_v24, %v13905_v7  ;;  %v3757_v10 = vpop.f32.mrb[95].mxu0 }
 0x43a   : > { %13910 = vmatpush3.bf16.msra.mxu1 %v15446_v21  ;;  %v3771_v28 = vpack.c.bf16 %v3757_v10, %v3754_v45 }
 0x43b   : > { %13935 = vmatprep.subr.bf16.mxu1 %v15447_v22 }
 0x43d   : > { %13888 = vmatmul.mubr.msk.bf16.gmra.mrb[140].mxu1 %vm1057_vm0, %v3560_v5 }
 0x43e   : > { %13911 = vmatprep.mubr.msk.bf16.mxu1 %vm1057_vm0, %v3769_v19  ;;  %v13929_v2 = vpop.f32.mrb[96].mxu0 }
 0x43f   : > { %v3950_v20 = vpop.f32.mrb[97].mxu0 }
 0x440   : > { %v13930_v30 = vpop.f32.mrb[98].mxu0 }
 0x441   : > { %v3982_v3 = vpack.c.bf16 %v13930_v30, %v13929_v2  ;;  %v3953_v15 = vpop.f32.mrb[99].mxu0  ;;  %v15453_v30 = vld [vmem:[%s15779_s25 + $0x10] sm:$0xff]  }
 0x442   : > { %v3981_v23 = vpack.c.bf16 %v3953_v15, %v3950_v20  ;;  %v15452_v20 = vld [vmem:[%s15779_s25 + $0x8] sm:$0xff]   ;;  %v15455_v15 = vld [vmem:[%s15779_s25 + $0x20] sm:$0xff]  }
 0x445   : > { %13912 = vmatmul.mubr.msk.bf16.vlgmr.msra.gmra.mrb[136].mxu1 %vm1057_vm0, %v3770_v42 }
 0x446   : > { %13915 = vmatprep.mubr.msk.bf16.mxu1 %vm1057_vm0, %v3771_v28  ;;  %13936 = vmatpush3.bf16.msra.mxu1 %v15447_v22  ;;  %v13933_v36 = vpop.f32.mrb[100].mxu0 }
 0x447   : > { %13937 = vmatprep.subr.bf16.mxu1 %v15448_v33  ;;  %v3966_v47 = vpop.f32.mrb[101].mxu0 }
 0x448   : > { %v13934_v27 = vpop.f32.mrb[102].mxu0 }
 0x449   : > { %v3984_v48 = vpack.c.bf16 %v13934_v27, %v13933_v36  ;;  %v3969_v32 = vpop.f32.mrb[103].mxu0  ;;  %v15458_v36 = vld [vmem:[%s15779_s25 + $0x38] sm:$0xff]   ;;  %v15461_v27 = vld [vmem:[%s15779_s25 + $0x50] sm:$0xff]  }
 0x44a   : > { %13938 = vmatpush3.bf16.msra.mxu1 %v15448_v33  ;;  %v3983_v38 = vpack.c.bf16 %v3969_v32, %v3966_v47  ;;  %v15457_v33 = vld [vmem:[%s15779_s25 + $0x30] sm:$0xff]   ;;  %v15459_v47 = vld [vmem:[%s15779_s25 + $0x40] sm:$0xff]  }
 0x44b   : > { %13963 = vmatprep.subr.bf16.mxu1 %v15449_v1  ;;  %v15463_v32 = vld [vmem:[%s15779_s25 + $0x60] sm:$0xff]  }
 0x44d   : > { %13916 = vmatmul.mubr.msk.bf16.gmra.mrb[140].mxu1 %vm1057_vm0, %v3772_v52 }
 0x44e   : > { %13939 = vmatprep.mubr.msk.bf16.mxu1 %vm1057_vm0, %v3981_v23  ;;  %v13957_v35 = vpop.f32.mrb[104].mxu0  ;;  %v15456_v23 = vld [vmem:[%s15779_s25 + $0x28] sm:$0xff]  }
 0x44f   : > { %v4162_v26 = vpop.f32.mrb[105].mxu0 }
 0x450   : > { %v13958_v37 = vpop.f32.mrb[106].mxu0 }
 0x451   : > { %v4194_v55 = vpack.c.bf16 %v13958_v37, %v13957_v35  ;;  %v4165_v57 = vpop.f32.mrb[107].mxu0  ;;  %v15465_v35 = vld [vmem:[%s15779_s25 + $0x70] sm:$0xff]   ;;  %v15467_v37 = vld [vmem:[%s15779_s25 + $0x80] sm:$0xff]  }
 0x452   : > { %v4193_v16 = vpack.c.bf16 %v4165_v57, %v4162_v26  ;;  %v15466_v26 = vld [vmem:[%s15779_s25 + $0x78] sm:$0xff]   ;;  %v15469_v57 = vld [vmem:[%s15779_s25 + $0x90] sm:$0xff]  }
 0x455   : > { %13940 = vmatmul.mubr.msk.bf16.vlgmr.msra.gmra.mrb[136].mxu1 %vm1057_vm0, %v3982_v3  ;;  %v15454_v3 = vld [vmem:[%s15779_s25 + $0x18] sm:$0xff]  }
 0x456   : > { %13943 = vmatprep.mubr.msk.bf16.mxu1 %vm1057_vm0, %v3983_v38  ;;  %13964 = vmatpush3.bf16.msra.mxu1 %v15449_v1  ;;  %v13961_v14 = vpop.f32.mrb[108].mxu0  ;;  %v15460_v1 = vld [vmem:[%s15779_s25 + $0x48] sm:$0xff]  }
 0x457   : > { %13965 = vmatprep.subr.bf16.mxu1 %v15450_v13  ;;  %v4178_v41 = vpop.f32.mrb[109].mxu0  ;;  %v15464_v38 = vld [vmem:[%s15779_s25 + $0x68] sm:$0xff]  }
 0x458   : > { %v13962_v18 = vpop.f32.mrb[110].mxu0 }
 0x459   : > { %v4196_v49 = vpack.c.bf16 %v13962_v18, %v13961_v14  ;;  %v4181_v44 = vpop.f32.mrb[111].mxu0  ;;  %v15472_v14 = vld [vmem:[%s15779_s25 + $0xa8] sm:$0xff]   ;;  %v15474_v18 = vld [vmem:[%s15779_s25 + $0xb8] sm:$0xff]  }
 0x45a   : > { %13966 = vmatpush3.bf16.msra.mxu1 %v15450_v13  ;;  %v4195_v46 = vpack.c.bf16 %v4181_v44, %v4178_v41  ;;  %v15471_v13 = vld [vmem:[%s15779_s25 + $0xa0] sm:$0xff]   ;;  %v15473_v41 = vld [vmem:[%s15779_s25 + $0xb0] sm:$0xff]   ;;  %v15476_v44 = vld [vmem:[%s15779_s25 + $0xc8] sm:$0xff]  }
 0x45b   : > { %14007 = vmatprep.subr.bf16.mxu1 %v15487_v56 }
 0x45d   : > { %13944 = vmatmul.mubr.msk.bf16.gmra.mrb[140].mxu1 %vm1057_vm0, %v3984_v48  ;;  %v15462_v48 = vld [vmem:[%s15779_s25 + $0x58] sm:$0xff]  }
 0x45e   : > { %13967 = vmatprep.mubr.msk.bf16.mxu1 %vm1057_vm0, %v4193_v16  ;;  %v15470_v16 = vld [vmem:[%s15779_s25 + $0x98] sm:$0xff]  }
 0x465   : > { %13968 = vmatmul.mubr.msk.bf16.vlgmr.msra.gmra.mrb[136].mxu1 %vm1057_vm0, %v4194_v55  ;;  %v15468_v55 = vld [vmem:[%s15779_s25 + $0x88] sm:$0xff]  }
 0x466   : > { %13971 = vmatprep.mubr.msk.bf16.mxu1 %vm1057_vm0, %v4195_v46  ;;  %v15477_v46 = vld [vmem:[%s15779_s25 + $0xd0] sm:$0xff]   ;;  %14008 = vmatpush3.bf16.msra.mxu1 %v15487_v56 }
 0x46d   : > { %13972 = vmatmul.mubr.msk.bf16.gmra.mrb[140].mxu1 %vm1057_vm0, %v4196_v49  ;;  %v15475_v49 = vld [vmem:[%s15779_s25 + $0xc0] sm:$0xff]  }
 0x538   : > { %v13969_v40 = vpop.f32.mrb[136].mxu1 }
 0x539   : > { %v4308_v54 = vadd.f32 %v13969_v40, %v11895_v51  ;;  %v4260_v58 = vpop.f32.mrb[137].mxu1  ;;  %v15488_v40 = vld [vmem:[%s15794_s8 + $0x18] sm:$0xff]  }
 0x53a   : > { %v4306_v59 = vadd.f32 %v11895_v51, %v4260_v58  ;;  %v13970_v6 = vpop.f32.mrb[138].mxu1  ;;  %14009 = vmatprep.subr.bf16.mxu1 %v15488_v40  ;;  %v15480_v58 = vld [vmem:[%s15779_s25 + $0xe8] sm:$0xff]  }
 0x53b   : > { %v4309_v60 = vadd.f32 %v13970_v6, %v11895_v51  ;;  %v4263_v61 = vpop.f32.mrb[139].mxu1  ;;  %v4316_v0 = vmax.f32 %v4308_v54, 0.0  ;;  %v15479_v54 = vld [vmem:[%s15779_s25 + $0xe0] sm:$0xff]   ;;  %14010 = vmatpush3.bf16.msra.mxu1 %v15488_v40  ;;  %v15494_v40 = vld [vmem:[%s15794_s8 + $0x38] sm:$0xff]  }
 0x53c   : > { %v4307_v62 = vadd.f32 %v11895_v51, %v4263_v61  ;;  %v4314_v5 = vmax.f32 %v4306_v59, 0.0  ;;  %v15481_v59 = vld [vmem:[%s15779_s25 + $0xf0] sm:$0xff]   ;;  %v15489_v6 = vld [vmem:[%s15794_s8] sm:$0xff]  }
 0x53d   : > { %v4317_v63 = vmax.f32 %v4309_v60, 0.0  ;;  %14019 = vmatprep.subr.bf16.mxu1 %v15489_v6  ;;  %v15482_v60 = vld [vmem:[%s15779_s25 + $0xf8] sm:$0xff]   ;;  %v15483_v61 = vld [vmem:[%s15779_s25 + $0x100] sm:$0xff]  }
 0x53e   : > { %v4315_v25 = vmax.f32 %v4307_v62, 0.0  ;;  %v15484_v62 = vld [vmem:[%s15779_s25 + $0x108] sm:$0xff]  }
 0x53f   : > { %v16590_v53 = vpack.c.bf16 %v4317_v63, %v4316_v0  ;;  %v15485_v0 = vld [vmem:[%s15779_s25 + $0x110] sm:$0xff]   ;;  %v15486_v63 = vld [vmem:[%s15779_s25 + $0x118] sm:$0xff]  }
 0x540   : > { %v16592_v4 = vpack.c.bf16 %v4315_v25, %v4314_v5  ;;  %v13973_v31 = vpop.f32.mrb[140].mxu1 }
 0x541   : > { %v4312_v9 = vadd.f32 %v13973_v31, %v11895_v51  ;;  %v4276_v42 = vpop.f32.mrb[141].mxu1 }
 0x542   : > { %v4310_v12 = vadd.f32 %v11895_v51, %v4276_v42  ;;  %v13974_v19 = vpop.f32.mrb[142].mxu1  ;;  %13975 = vmatprep.subr.bf16.mxu0 %v16592_v4 }
 0x543   : > { %v4313_v21 = vadd.f32 %v13974_v19, %v11895_v51  ;;  %v4279_v7 = vpop.f32.mrb[143].mxu1  ;;  %13976 = vmatpush3.bf16.msra.mxu0 %v16592_v4  ;;  %v4320_v22 = vmax.f32 %v4312_v9, 0.0 }
 0x544   : > { %v4311_v45 = vadd.f32 %v11895_v51, %v4279_v7  ;;  %13977 = vmatprep.subr.bf16.mxu0 %v16590_v53  ;;  %v4318_v52 = vmax.f32 %v4310_v12, 0.0  ;;  %v15478_v51 = vld [vmem:[%s15779_s25 + $0xd8] sm:$0xff]  }
 0x545   : > { %v4321_v24 = vmax.f32 %v4313_v21, 0.0 }
 0x546   : > { %v4319_v10 = vmax.f32 %v4311_v45, 0.0 }
 0x547   : > { %v16597_v28 = vpack.c.bf16 %v4321_v24, %v4320_v22  ;;  %13978 = vmatpush3.bf16.msra.mxu0 %v16590_v53 }
 0x548   : > { %v16600_v2 = vpack.c.bf16 %v4319_v10, %v4318_v52 }
 0x54a   : > { %13979 = vmatprep.subr.bf16.mxu0 %v16600_v2 }
 0x54b   : > { %13980 = vmatpush3.bf16.msra.mxu0 %v16600_v2 }
 0x54c   : > { %13981 = vmatprep.subr.bf16.mxu0 %v16597_v28 }
 0x54f   : > { %13982 = vmatpush3.bf16.msra.mxu0 %v16597_v28 }
 0x550   : > { %13991 = vmatprep.subr.bf16.mxu0 %v16592_v4 }
 0x552   : > { %13984 = vmatmul.mubr.msk.bf16.vlgmr.msra.gmra.mrb[112].mxu0 %vm2436_vm1, %v15452_v20  ;;  %v15490_v20 = vld [vmem:[%s15794_s8 + $0x8] sm:$0xff]  }
 0x553   : > { %13992 = vmatpush3.bf16.msra.mxu0 %v16592_v4  ;;  %13987 = vmatprep.mubr.msk.bf16.mxu0 %vm2436_vm1, %v15453_v30 }
 0x554   : > { %13993 = vmatprep.subr.bf16.mxu0 %v16590_v53 }
 0x557   : > { %13994 = vmatpush3.bf16.msra.mxu0 %v16590_v53 }
 0x558   : > { %13995 = vmatprep.subr.bf16.mxu0 %v16600_v2 }
 0x55a   : > { %13988 = vmatmul.mubr.msk.bf16.gmra.mrb[116].mxu0 %vm2436_vm1, %v15454_v3 }
 0x55b   : > { %13996 = vmatpush3.bf16.msra.mxu0 %v16600_v2  ;;  %13999 = vmatprep.mubr.msk.bf16.mxu0 %vm2436_vm1, %v15455_v15  ;;  %v15491_v15 = vld [vmem:[%s15794_s8 + $0x20] sm:$0xff]  }
 0x55c   : > { %13997 = vmatprep.subr.bf16.mxu0 %v16597_v28 }
 0x55f   : > { %13998 = vmatpush3.bf16.msra.mxu0 %v16597_v28 }
 0x560   : > { %14031 = vmatprep.subr.bf16.mxu0 %v16592_v4 }
 0x562   : > { %14000 = vmatmul.mubr.msk.bf16.vlgmr.msra.gmra.mrb[120].mxu0 %vm2436_vm1, %v15456_v23 }
 0x563   : > { %14032 = vmatpush3.bf16.msra.mxu0 %v16592_v4  ;;  %14003 = vmatprep.mubr.msk.bf16.mxu0 %vm2436_vm1, %v15457_v33 }
 0x564   : > { %14033 = vmatprep.subr.bf16.mxu0 %v16590_v53 }
 0x567   : > { %14034 = vmatpush3.bf16.msra.mxu0 %v16590_v53 }
 0x568   : > { %14035 = vmatprep.subr.bf16.mxu0 %v16600_v2 }
 0x56a   : > { %14004 = vmatmul.mubr.msk.bf16.gmra.mrb[124].mxu0 %vm2436_vm1, %v15458_v36 }
 0x56b   : > { %14036 = vmatpush3.bf16.msra.mxu0 %v16600_v2  ;;  %14039 = vmatprep.mubr.msk.bf16.mxu0 %vm2436_vm1, %v15459_v47 }
 0x56c   : > { %14037 = vmatprep.subr.bf16.mxu0 %v16597_v28 }
 0x56f   : > { %14038 = vmatpush3.bf16.msra.mxu0 %v16597_v28 }
 0x570   : > { %14059 = vmatprep.subr.bf16.mxu0 %v16592_v4 }
 0x572   : > { %14040 = vmatmul.mubr.msk.bf16.vlgmr.msra.gmra.mrb[128].mxu0 %vm2436_vm1, %v15460_v1 }
 0x573   : > { %14060 = vmatpush3.bf16.msra.mxu0 %v16592_v4  ;;  %14043 = vmatprep.mubr.msk.bf16.mxu0 %vm2436_vm1, %v15461_v27 }
 0x574   : > { %14061 = vmatprep.subr.bf16.mxu0 %v16590_v53 }
 0x577   : > { %14062 = vmatpush3.bf16.msra.mxu0 %v16590_v53 }
 0x578   : > { %14063 = vmatprep.subr.bf16.mxu0 %v16600_v2 }
 0x57a   : > { %14044 = vmatmul.mubr.msk.bf16.gmra.mrb[132].mxu0 %vm2436_vm1, %v15462_v48 }
 0x57b   : > { %14064 = vmatpush3.bf16.msra.mxu0 %v16600_v2  ;;  %14067 = vmatprep.mubr.msk.bf16.mxu0 %vm2436_vm1, %v15463_v32 }
 0x57c   : > { %14065 = vmatprep.subr.bf16.mxu0 %v16597_v28 }
 0x57f   : > { %14066 = vmatpush3.bf16.msra.mxu0 %v16597_v28 }
 0x580   : > { %14087 = vmatprep.subr.bf16.mxu0 %v16592_v4 }
 0x582   : > { %14068 = vmatmul.mubr.msk.bf16.vlgmr.msra.gmra.mrb[136].mxu0 %vm2436_vm1, %v15464_v38 }
 0x583   : > { %14088 = vmatpush3.bf16.msra.mxu0 %v16592_v4  ;;  %14071 = vmatprep.mubr.msk.bf16.mxu0 %vm2436_vm1, %v15465_v35 }
 0x584   : > { %14089 = vmatprep.subr.bf16.mxu0 %v16590_v53 }
 0x587   : > { %14090 = vmatpush3.bf16.msra.mxu0 %v16590_v53 }
 0x588   : > { %14091 = vmatprep.subr.bf16.mxu0 %v16600_v2 }
 0x58a   : > { %14072 = vmatmul.mubr.msk.bf16.gmra.mrb[140].mxu0 %vm2436_vm1, %v15466_v26  ;;  %v15492_v26 = vld [vmem:[%s15794_s8 + $0x28] sm:$0xff]  }
 0x58b   : > { %14092 = vmatpush3.bf16.msra.mxu0 %v16600_v2  ;;  %14095 = vmatprep.mubr.msk.bf16.mxu0 %vm2436_vm1, %v15467_v37 }
 0x58c   : > { %14093 = vmatprep.subr.bf16.mxu0 %v16597_v28 }
 0x58f   : > { %14094 = vmatpush3.bf16.msra.mxu0 %v16597_v28 }
 0x590   : > { %14115 = vmatprep.subr.bf16.mxu0 %v16592_v4 }
 0x592   : > { %14096 = vmatmul.mubr.msk.bf16.vlgmr.msra.gmra.mrb[144].mxu0 %vm2436_vm1, %v15468_v55 }
 0x593   : > { %14116 = vmatpush3.bf16.msra.mxu0 %v16592_v4  ;;  %14099 = vmatprep.mubr.msk.bf16.mxu0 %vm2436_vm1, %v15469_v57  ;;  %v15493_v57 = vld [vmem:[%s15794_s8 + $0x30] sm:$0xff]  }
 0x594   : > { %14117 = vmatprep.subr.bf16.mxu0 %v16590_v53 }
 0x597   : > { %14118 = vmatpush3.bf16.msra.mxu0 %v16590_v53 }
 0x598   : > { %14119 = vmatprep.subr.bf16.mxu0 %v16600_v2 }
 0x59a   : > { %14100 = vmatmul.mubr.msk.bf16.gmra.mrb[148].mxu0 %vm2436_vm1, %v15470_v16 }
 0x59b   : > { %14120 = vmatpush3.bf16.msra.mxu0 %v16600_v2  ;;  %14123 = vmatprep.mubr.msk.bf16.mxu0 %vm2436_vm1, %v15471_v13 }
 0x59c   : > { %14121 = vmatprep.subr.bf16.mxu0 %v16597_v28 }
 0x59f   : > { %14122 = vmatpush3.bf16.msra.mxu0 %v16597_v28 }
 0x5a0   : > { %14143 = vmatprep.subr.bf16.mxu0 %v16592_v4 }
 0x5a2   : > { %14124 = vmatmul.mubr.msk.bf16.vlgmr.msra.gmra.mrb[152].mxu0 %vm2436_vm1, %v15472_v14 }
 0x5a3   : > { %14144 = vmatpush3.bf16.msra.mxu0 %v16592_v4  ;;  %14127 = vmatprep.mubr.msk.bf16.mxu0 %vm2436_vm1, %v15473_v41 }
 0x5a4   : > { %14145 = vmatprep.subr.bf16.mxu0 %v16590_v53 }
 0x5a7   : > { %14146 = vmatpush3.bf16.msra.mxu0 %v16590_v53 }
 0x5a8   : > { %14147 = vmatprep.subr.bf16.mxu0 %v16600_v2 }
 0x5aa   : > { %14128 = vmatmul.mubr.msk.bf16.gmra.mrb[156].mxu0 %vm2436_vm1, %v15474_v18 }
 0x5ab   : > { %14148 = vmatpush3.bf16.msra.mxu0 %v16600_v2  ;;  %14151 = vmatprep.mubr.msk.bf16.mxu0 %vm2436_vm1, %v15475_v49 }
 0x5ac   : > { %14149 = vmatprep.subr.bf16.mxu0 %v16597_v28 }
 0x5af   : > { %14150 = vmatpush3.bf16.msra.mxu0 %v16597_v28 }
 0x5b0   : > { %14171 = vmatprep.subr.bf16.mxu0 %v16592_v4 }
 0x5b2   : > { %14152 = vmatmul.mubr.msk.bf16.vlgmr.msra.gmra.mrb[160].mxu0 %vm2436_vm1, %v15476_v44 }
 0x5b3   : > { %14172 = vmatpush3.bf16.msra.mxu0 %v16592_v4  ;;  %14155 = vmatprep.mubr.msk.bf16.mxu0 %vm2436_vm1, %v15477_v46 }
 0x5b4   : > { %14173 = vmatprep.subr.bf16.mxu0 %v16590_v53 }
 0x5b7   : > { %14174 = vmatpush3.bf16.msra.mxu0 %v16590_v53 }
 0x5b8   : > { %14175 = vmatprep.subr.bf16.mxu0 %v16600_v2 }
 0x5ba   : > { %14156 = vmatmul.mubr.msk.bf16.gmra.mrb[164].mxu0 %vm2436_vm1, %v15478_v51 }
 0x5bb   : > { %14176 = vmatpush3.bf16.msra.mxu0 %v16600_v2  ;;  %14179 = vmatprep.mubr.msk.bf16.mxu0 %vm2436_vm1, %v15479_v54 }
 0x5bc   : > { %14177 = vmatprep.subr.bf16.mxu0 %v16597_v28 }
 0x5bf   : > { %14178 = vmatpush3.bf16.msra.mxu0 %v16597_v28 }
 0x5c0   : > { %14199 = vmatprep.subr.bf16.mxu0 %v16592_v4 }
 0x5c2   : > { %14180 = vmatmul.mubr.msk.bf16.vlgmr.msra.gmra.mrb[168].mxu0 %vm2436_vm1, %v15480_v58 }
 0x5c3   : > { %14200 = vmatpush3.bf16.msra.mxu0 %v16592_v4  ;;  %14183 = vmatprep.mubr.msk.bf16.mxu0 %vm2436_vm1, %v15481_v59  ;;  %v15495_v59 = vld [vmem:[%s15794_s8 + $0x40] sm:$0xff]  }
 0x5c4   : > { %14201 = vmatprep.subr.bf16.mxu0 %v16590_v53 }
 0x5c7   : > { %14202 = vmatpush3.bf16.msra.mxu0 %v16590_v53 }
 0x5c8   : > { %14203 = vmatprep.subr.bf16.mxu0 %v16600_v2 }
 0x5ca   : > { %14184 = vmatmul.mubr.msk.bf16.gmra.mrb[172].mxu0 %vm2436_vm1, %v15482_v60 }
 0x5cb   : > { %14204 = vmatpush3.bf16.msra.mxu0 %v16600_v2  ;;  %14207 = vmatprep.mubr.msk.bf16.mxu0 %vm2436_vm1, %v15483_v61 }
 0x5cc   : > { %14205 = vmatprep.subr.bf16.mxu0 %v16597_v28 }
 0x5cf   : > { %14206 = vmatpush3.bf16.msra.mxu0 %v16597_v28 }
 0x5d2   : > { %14208 = vmatmul.mubr.msk.bf16.vlgmr.msra.gmra.mrb[176].mxu0 %vm2436_vm1, %v15484_v62 }
 0x5d3   : > { %14211 = vmatprep.mubr.msk.bf16.mxu0 %vm2436_vm1, %v15485_v0 }
 0x5da   : > { %14212 = vmatmul.mubr.msk.bf16.gmra.mrb[180].mxu0 %vm2436_vm1, %v15486_v63 }
 0x625   : > { %v13985_v5 = vpop.f32.mrb[112].mxu0 }
 0x626   : > { %v4400_v25 = vpop.f32.mrb[113].mxu0 }
 0x627   : > { %v13986_v53 = vpop.f32.mrb[114].mxu0 }
 0x628   : > { %v4432_v4 = vpack.c.bf16 %v13986_v53, %v13985_v5  ;;  %v4403_v31 = vpop.f32.mrb[115].mxu0 }
 0x629   : > { %v4431_v9 = vpack.c.bf16 %v4403_v31, %v4400_v25  ;;  %v15496_v31 = vld [vmem:[%s15794_s8 + $0x48] sm:$0xff]  }
 0x62d   : > { %v13989_v42 = vpop.f32.mrb[116].mxu0 }
 0x62e   : > { %v4416_v12 = vpop.f32.mrb[117].mxu0 }
 0x62f   : > { %v13990_v19 = vpop.f32.mrb[118].mxu0 }
 0x630   : > { %v4434_v21 = vpack.c.bf16 %v13990_v19, %v13989_v42  ;;  %v4419_v7 = vpop.f32.mrb[119].mxu0 }
 0x631   : > { %v4433_v45 = vpack.c.bf16 %v4419_v7, %v4416_v12  ;;  %v15497_v12 = vld [vmem:[%s15794_s8 + $0x50] sm:$0xff]  }
 0x635   : > { %v14001_v22 = vpop.f32.mrb[120].mxu0 }
 0x636   : > { %v4514_v24 = vpop.f32.mrb[121].mxu0 }
 0x637   : > { %v14002_v52 = vpop.f32.mrb[122].mxu0 }
 0x638   : > { %v4546_v10 = vpack.c.bf16 %v14002_v52, %v14001_v22  ;;  %v4517_v28 = vpop.f32.mrb[123].mxu0 }
 0x639   : > { %v4545_v2 = vpack.c.bf16 %v4517_v28, %v4514_v24 }
 0x63b   : > { %14011 = vmatprep.mubr.msk.bf16.mxu1 %vm1057_vm0, %v4545_v2 }
 0x63c   : > { %14012 = vmatmul.mubr.msk.bf16.vlgmr.msra.gmra.mrb[144].mxu1 %vm1057_vm0, %v4546_v10 }
 0x63d   : > { %v14005_v30 = vpop.f32.mrb[124].mxu0  ;;  %14020 = vmatpush3.bf16.msra.mxu1 %v15489_v6 }
 0x63e   : > { %v4530_v3 = vpop.f32.mrb[125].mxu0  ;;  %14021 = vmatprep.subr.bf16.mxu1 %v15490_v20 }
 0x63f   : > { %v14006_v23 = vpop.f32.mrb[126].mxu0 }
 0x640   : > { %v4548_v33 = vpack.c.bf16 %v14006_v23, %v14005_v30  ;;  %v4533_v36 = vpop.f32.mrb[127].mxu0 }
 0x641   : > { %v4547_v47 = vpack.c.bf16 %v4533_v36, %v4530_v3  ;;  %14022 = vmatpush3.bf16.msra.mxu1 %v15490_v20  ;;  %v15498_v20 = vld [vmem:[%s15794_s8 + $0x58] sm:$0xff]  }
 0x642   : > { %14047 = vmatprep.subr.bf16.mxu1 %v15491_v15 }
 0x643   : > { %14015 = vmatprep.mubr.msk.bf16.mxu1 %vm1057_vm0, %v4547_v47 }
 0x644   : > { %14016 = vmatmul.mubr.msk.bf16.gmra.mrb[148].mxu1 %vm1057_vm0, %v4548_v33 }
 0x645   : > { %14023 = vmatprep.mubr.msk.bf16.mxu1 %vm1057_vm0, %v4431_v9  ;;  %v14041_v1 = vpop.f32.mrb[128].mxu0 }
 0x646   : > { %v4807_v27 = vpop.f32.mrb[129].mxu0 }
 0x647   : > { %v14042_v48 = vpop.f32.mrb[130].mxu0 }
 0x648   : > { %v4839_v32 = vpack.c.bf16 %v14042_v48, %v14041_v1  ;;  %v4810_v38 = vpop.f32.mrb[131].mxu0 }
 0x649   : > { %v4838_v35 = vpack.c.bf16 %v4810_v38, %v4807_v27 }
 0x64c   : > { %14024 = vmatmul.mubr.msk.bf16.vlgmr.msra.gmra.mrb[144].mxu1 %vm1057_vm0, %v4432_v4 }
 0x64d   : > { %14027 = vmatprep.mubr.msk.bf16.mxu1 %vm1057_vm0, %v4433_v45  ;;  %14048 = vmatpush3.bf16.msra.mxu1 %v15491_v15  ;;  %v14045_v37 = vpop.f32.mrb[132].mxu0  ;;  %v15499_v15 = vld [vmem:[%s15794_s8 + $0x60] sm:$0xff]  }
 0x64e   : > { %14049 = vmatprep.subr.bf16.mxu1 %v15492_v26  ;;  %v4823_v55 = vpop.f32.mrb[133].mxu0 }
 0x64f   : > { %v14046_v16 = vpop.f32.mrb[134].mxu0 }
 0x650   : > { %v4841_v13 = vpack.c.bf16 %v14046_v16, %v14045_v37  ;;  %v4826_v14 = vpop.f32.mrb[135].mxu0 }
 0x651   : > { %14050 = vmatpush3.bf16.msra.mxu1 %v15492_v26  ;;  %v4840_v41 = vpack.c.bf16 %v4826_v14, %v4823_v55  ;;  %v15500_v26 = vld [vmem:[%s15794_s8 + $0x68] sm:$0xff]  }
 0x652   : > { %14075 = vmatprep.subr.bf16.mxu1 %v15493_v57 }
 0x654   : > { %14028 = vmatmul.mubr.msk.bf16.gmra.mrb[148].mxu1 %vm1057_vm0, %v4434_v21 }
 0x655   : > { %14051 = vmatprep.mubr.msk.bf16.mxu1 %vm1057_vm0, %v4838_v35  ;;  %v14069_v18 = vpop.f32.mrb[136].mxu0 }
 0x656   : > { %v5019_v49 = vpop.f32.mrb[137].mxu0 }
 0x657   : > { %v14070_v44 = vpop.f32.mrb[138].mxu0 }
 0x658   : > { %v5051_v46 = vpack.c.bf16 %v14070_v44, %v14069_v18  ;;  %v5022_v56 = vpop.f32.mrb[139].mxu0 }
 0x659   : > { %v5050_v51 = vpack.c.bf16 %v5022_v56, %v5019_v49 }
 0x65c   : > { %14052 = vmatmul.mubr.msk.bf16.vlgmr.msra.gmra.mrb[144].mxu1 %vm1057_vm0, %v4839_v32 }
 0x65d   : > { %14055 = vmatprep.mubr.msk.bf16.mxu1 %vm1057_vm0, %v4840_v41  ;;  %14076 = vmatpush3.bf16.msra.mxu1 %v15493_v57  ;;  %v14073_v54 = vpop.f32.mrb[140].mxu0  ;;  %v15501_v57 = vld [vmem:[%s15794_s8 + $0x70] sm:$0xff]  }
 0x65e   : > { %14077 = vmatprep.subr.bf16.mxu1 %v15494_v40  ;;  %v5035_v58 = vpop.f32.mrb[141].mxu0 }
 0x65f   : > { %v14074_v6 = vpop.f32.mrb[142].mxu0 }
 0x660   : > { %v5053_v60 = vpack.c.bf16 %v14074_v6, %v14073_v54  ;;  %v5038_v61 = vpop.f32.mrb[143].mxu0 }
 0x661   : > { %14078 = vmatpush3.bf16.msra.mxu1 %v15494_v40  ;;  %v5052_v62 = vpack.c.bf16 %v5038_v61, %v5035_v58  ;;  %v15502_v40 = vld [vmem:[%s15794_s8 + $0x78] sm:$0xff]  }
 0x662   : > { %14103 = vmatprep.subr.bf16.mxu1 %v15495_v59 }
 0x664   : > { %14056 = vmatmul.mubr.msk.bf16.gmra.mrb[148].mxu1 %vm1057_vm0, %v4841_v13 }
 0x665   : > { %14079 = vmatprep.mubr.msk.bf16.mxu1 %vm1057_vm0, %v5050_v51  ;;  %v14097_v0 = vpop.f32.mrb[144].mxu0 }
 0x666   : > { %v5231_v63 = vpop.f32.mrb[145].mxu0 }
 0x667   : > { %v14098_v5 = vpop.f32.mrb[146].mxu0 }
 0x668   : > { %v5263_v25 = vpack.c.bf16 %v14098_v5, %v14097_v0  ;;  %v5234_v53 = vpop.f32.mrb[147].mxu0 }
 0x669   : > { %v5262_v4 = vpack.c.bf16 %v5234_v53, %v5231_v63 }
 0x66c   : > { %14080 = vmatmul.mubr.msk.bf16.vlgmr.msra.gmra.mrb[144].mxu1 %vm1057_vm0, %v5051_v46 }
 0x66d   : > { %14083 = vmatprep.mubr.msk.bf16.mxu1 %vm1057_vm0, %v5052_v62  ;;  %14104 = vmatpush3.bf16.msra.mxu1 %v15495_v59  ;;  %v14101_v9 = vpop.f32.mrb[148].mxu0  ;;  %v15503_v59 = vld [vmem:[%s15794_s8 + $0x80] sm:$0xff]  }
 0x66e   : > { %14105 = vmatprep.subr.bf16.mxu1 %v15496_v31  ;;  %v5247_v42 = vpop.f32.mrb[149].mxu0 }
 0x66f   : > { %v14102_v19 = vpop.f32.mrb[150].mxu0 }
 0x670   : > { %v5265_v21 = vpack.c.bf16 %v14102_v19, %v14101_v9  ;;  %v5250_v7 = vpop.f32.mrb[151].mxu0 }
 0x671   : > { %14106 = vmatpush3.bf16.msra.mxu1 %v15496_v31  ;;  %v5264_v45 = vpack.c.bf16 %v5250_v7, %v5247_v42  ;;  %v15504_v31 = vld [vmem:[%s15794_s8 + $0x88] sm:$0xff]  }
 0x672   : > { %14131 = vmatprep.subr.bf16.mxu1 %v15497_v12 }
 0x674   : > { %14084 = vmatmul.mubr.msk.bf16.gmra.mrb[148].mxu1 %vm1057_vm0, %v5053_v60 }
 0x675   : > { %14107 = vmatprep.mubr.msk.bf16.mxu1 %vm1057_vm0, %v5262_v4  ;;  %v14125_v22 = vpop.f32.mrb[152].mxu0 }
 0x676   : > { %v5443_v24 = vpop.f32.mrb[153].mxu0 }
 0x677   : > { %v14126_v52 = vpop.f32.mrb[154].mxu0 }
 0x678   : > { %v5475_v10 = vpack.c.bf16 %v14126_v52, %v14125_v22  ;;  %v5446_v28 = vpop.f32.mrb[155].mxu0  ;;  %v12118_v22 = vld [vmem:[%s15799_s14] ss:$0 sm:$0xff] }
 0x679   : > { %v5474_v2 = vpack.c.bf16 %v5446_v28, %v5443_v24 }
 0x67c   : > { %14108 = vmatmul.mubr.msk.bf16.vlgmr.msra.gmra.mrb[144].mxu1 %vm1057_vm0, %v5263_v25 }
 0x67d   : > { %14111 = vmatprep.mubr.msk.bf16.mxu1 %vm1057_vm0, %v5264_v45  ;;  %14132 = vmatpush3.bf16.msra.mxu1 %v15497_v12  ;;  %v14129_v30 = vpop.f32.mrb[156].mxu0  ;;  %v15744_v45 = vmov 0.0  }
 0x67e   : > { %14133 = vmatprep.subr.bf16.mxu1 %v15498_v20  ;;  %v5459_v3 = vpop.f32.mrb[157].mxu0  ;;  %14239 = vmatprep.subr.bf16.mxu0 %v15744_v45 }
 0x67f   : > { %v14130_v23 = vpop.f32.mrb[158].mxu0  ;;  %14247 = vmatprep.mubr.msk.bf16.mxu0 %vm15745_vm2, %v15744_v45 }
 0x680   : > { %v5477_v33 = vpack.c.bf16 %v14130_v23, %v14129_v30  ;;  %v5462_v36 = vpop.f32.mrb[159].mxu0 }
 0x681   : > { %14134 = vmatpush3.bf16.msra.mxu1 %v15498_v20  ;;  %v5476_v47 = vpack.c.bf16 %v5462_v36, %v5459_v3 }
 0x682   : > { %14159 = vmatprep.subr.bf16.mxu1 %v15499_v15 }
 0x684   : > { %14112 = vmatmul.mubr.msk.bf16.gmra.mrb[148].mxu1 %vm1057_vm0, %v5265_v21 }
 0x685   : > { %14135 = vmatprep.mubr.msk.bf16.mxu1 %vm1057_vm0, %v5474_v2  ;;  %v14153_v1 = vpop.f32.mrb[160].mxu0 }
 0x686   : > { %v5655_v27 = vpop.f32.mrb[161].mxu0 }
 0x687   : > { %v14154_v48 = vpop.f32.mrb[162].mxu0 }
 0x688   : > { %v5687_v32 = vpack.c.bf16 %v14154_v48, %v14153_v1  ;;  %v5658_v38 = vpop.f32.mrb[163].mxu0 }
 0x689   : > { %v5686_v35 = vpack.c.bf16 %v5658_v38, %v5655_v27 }
 0x68c   : > { %14136 = vmatmul.mubr.msk.bf16.vlgmr.msra.gmra.mrb[144].mxu1 %vm1057_vm0, %v5475_v10 }
 0x68d   : > { %14139 = vmatprep.mubr.msk.bf16.mxu1 %vm1057_vm0, %v5476_v47  ;;  %14160 = vmatpush3.bf16.msra.mxu1 %v15499_v15  ;;  %v14157_v37 = vpop.f32.mrb[164].mxu0 }
 0x68e   : > { %14161 = vmatprep.subr.bf16.mxu1 %v15500_v26  ;;  %v5671_v55 = vpop.f32.mrb[165].mxu0 }
 0x68f   : > { %v14158_v16 = vpop.f32.mrb[166].mxu0 }
 0x690   : > { %v5689_v13 = vpack.c.bf16 %v14158_v16, %v14157_v37  ;;  %v5674_v14 = vpop.f32.mrb[167].mxu0 }
 0x691   : > { %14162 = vmatpush3.bf16.msra.mxu1 %v15500_v26  ;;  %v5688_v41 = vpack.c.bf16 %v5674_v14, %v5671_v55 }
 0x692   : > { %14187 = vmatprep.subr.bf16.mxu1 %v15501_v57 }
 0x694   : > { %14140 = vmatmul.mubr.msk.bf16.gmra.mrb[148].mxu1 %vm1057_vm0, %v5477_v33 }
 0x695   : > { %14163 = vmatprep.mubr.msk.bf16.mxu1 %vm1057_vm0, %v5686_v35  ;;  %v14181_v18 = vpop.f32.mrb[168].mxu0 }
 0x696   : > { %v5867_v49 = vpop.f32.mrb[169].mxu0 }
 0x697   : > { %v14182_v44 = vpop.f32.mrb[170].mxu0 }
 0x698   : > { %v5899_v46 = vpack.c.bf16 %v14182_v44, %v14181_v18  ;;  %v5870_v56 = vpop.f32.mrb[171].mxu0  ;;  %v15506_v44 = vld [vmem:[%s15804_s19 + $0x8] sm:$0xff]  }
 0x699   : > { %v5898_v51 = vpack.c.bf16 %v5870_v56, %v5867_v49  ;;  %v15508_v56 = vld [vmem:[%s15814_s30] sm:$0xff]  }
 0x69c   : > { %14164 = vmatmul.mubr.msk.bf16.vlgmr.msra.gmra.mrb[144].mxu1 %vm1057_vm0, %v5687_v32 }
 0x69d   : > { %14167 = vmatprep.mubr.msk.bf16.mxu1 %vm1057_vm0, %v5688_v41  ;;  %14188 = vmatpush3.bf16.msra.mxu1 %v15501_v57  ;;  %v14185_v54 = vpop.f32.mrb[172].mxu0 }
 0x69e   : > { %14189 = vmatprep.subr.bf16.mxu1 %v15502_v40  ;;  %v5883_v58 = vpop.f32.mrb[173].mxu0 }
 0x69f   : > { %v14186_v6 = vpop.f32.mrb[174].mxu0 }
 0x6a0   : > { %v5901_v60 = vpack.c.bf16 %v14186_v6, %v14185_v54  ;;  %v5886_v61 = vpop.f32.mrb[175].mxu0 }
 0x6a1   : > { %14190 = vmatpush3.bf16.msra.mxu1 %v15502_v40  ;;  %v5900_v62 = vpack.c.bf16 %v5886_v61, %v5883_v58  ;;  %v15510_v40 = vld [vmem:[%s15814_s30 + $0x8] sm:$0xff]  }
 0x6a2   : > { %14215 = vmatprep.subr.bf16.mxu1 %v15503_v59 }
 0x6a4   : > { %14168 = vmatmul.mubr.msk.bf16.gmra.mrb[148].mxu1 %vm1057_vm0, %v5689_v13 }
 0x6a5   : > { %14191 = vmatprep.mubr.msk.bf16.mxu1 %vm1057_vm0, %v5898_v51  ;;  %v14209_v0 = vpop.f32.mrb[176].mxu0  ;;  %v15509_v51 = vld [vmem:[%s15814_s30 + $0x18] sm:$0xff]  }
 0x6a6   : > { %v6079_v63 = vpop.f32.mrb[177].mxu0 }
 0x6a7   : > { %v14210_v5 = vpop.f32.mrb[178].mxu0 }
 0x6a8   : > { %v6111_v25 = vpack.c.bf16 %v14210_v5, %v14209_v0  ;;  %v6082_v53 = vpop.f32.mrb[179].mxu0 }
 0x6a9   : > { %v6110_v4 = vpack.c.bf16 %v6082_v53, %v6079_v63  ;;  %v15512_v53 = vld [vmem:[%s15814_s30 + $0x20] sm:$0xff]  }
 0x6ac   : > { %14192 = vmatmul.mubr.msk.bf16.vlgmr.msra.gmra.mrb[144].mxu1 %vm1057_vm0, %v5899_v46  ;;  %v15507_v46 = vld [vmem:[%s15814_s30 + $0x10] sm:$0xff]  }
 0x6ad   : > { %14195 = vmatprep.mubr.msk.bf16.mxu1 %vm1057_vm0, %v5900_v62  ;;  %14216 = vmatpush3.bf16.msra.mxu1 %v15503_v59  ;;  %v14213_v9 = vpop.f32.mrb[180].mxu0 }
 0x6ae   : > { %14217 = vmatprep.subr.bf16.mxu1 %v15504_v31  ;;  %v6095_v42 = vpop.f32.mrb[181].mxu0 }
 0x6af   : > { %v14214_v12 = vpop.f32.mrb[182].mxu0 }
 0x6b0   : > { %v6113_v19 = vpack.c.bf16 %v14214_v12, %v14213_v9  ;;  %v6098_v21 = vpop.f32.mrb[183].mxu0 }
 0x6b1   : > { %14218 = vmatpush3.bf16.msra.mxu1 %v15504_v31  ;;  %v6112_v7 = vpack.c.bf16 %v6098_v21, %v6095_v42 }
 0x6b2   : > { %14227 = vmatprep.subr.bf16.mxu1 %v15744_v45 }
 0x6b4   : > { %14196 = vmatmul.mubr.msk.bf16.gmra.mrb[148].mxu1 %vm1057_vm0, %v5901_v60 }
 0x6b5   : > { %14219 = vmatprep.mubr.msk.bf16.mxu1 %vm1057_vm0, %v6110_v4  ;;  %v15513_v4 = vld [vmem:[%s15814_s30 + $0x28] sm:$0xff]  }
 0x6bc   : > { %14220 = vmatmul.mubr.msk.bf16.vlgmr.msra.gmra.mrb[144].mxu1 %vm1057_vm0, %v6111_v25  ;;  %v15511_v25 = vld [vmem:[%s15804_s19 + $0x10] sm:$0xff]  }
 0x6bd   : > { %14223 = vmatprep.mubr.msk.bf16.mxu1 %vm1057_vm0, %v6112_v7 }
 0x6c4   : > { %14224 = vmatmul.mubr.msk.bf16.gmra.mrb[148].mxu1 %vm1057_vm0, %v6113_v19 }
 0x6c5   : > { %14235 = vmatprep.mubr.msk.bf16.mxu1 %vm15745_vm2, %v15744_v45 }
 0x78f   : > { %v14221_v24 = vpop.f32.mrb[144].mxu1 }
 0x790   : > { %v6225_v52 = vadd.f32 %v14221_v24, %v12118_v22  ;;  %v6177_v10 = vpop.f32.mrb[145].mxu1 }
 0x791   : > { %v6223_v28 = vadd.f32 %v12118_v22, %v6177_v10  ;;  %v14222_v2 = vpop.f32.mrb[146].mxu1 }
 0x792   : > { %v6233_v20 = vadd.f32 %v6225_v52, %v16368_v17  ;;  %v6226_v30 = vadd.f32 %v14222_v2, %v12118_v22  ;;  %v6180_v3 = vpop.f32.mrb[147].mxu1 }
 0x793   : > { %v6231_v15 = vadd.f32 %v6223_v28, %v16354_v8  ;;  %v6224_v23 = vadd.f32 %v12118_v22, %v6180_v3  ;;  %v15514_v3 = vld [vmem:[%s15804_s19 + $0x18] sm:$0xff]  }
 0x794   : > { %v6234_v33 = vadd.f32 %v6226_v30, %v16371_v34  ;;  %v6241_v47 = vmax.f32 %v6233_v20, 0.0 }
 0x795   : > { %v6232_v36 = vadd.f32 %v6224_v23, %v16357_v29  ;;  %v6239_v27 = vmax.f32 %v6231_v15, 0.0  ;;  %v15515_v15 = vld [vmem:[%s15814_s30 + $0x30] sm:$0xff]   ;;  %v15516_v23 = vld [vmem:[%s15814_s30 + $0x38] sm:$0xff]  }
 0x796   : > { %v6242_v1 = vmax.f32 %v6234_v33, 0.0 }
 0x797   : > { %v6240_v48 = vmax.f32 %v6232_v36, 0.0  ;;  %v14225_v32 = vpop.f32.mrb[148].mxu1 }
 0x798   : > { %v16805_v38 = vpack.c.bf16 %v6242_v1, %v6241_v47  ;;  %v6229_v35 = vadd.f32 %v14225_v32, %v12118_v22  ;;  %v6193_v26 = vpop.f32.mrb[149].mxu1 }
 0x799   : > { %v16807_v37 = vpack.c.bf16 %v6240_v48, %v6239_v27  ;;  %v6227_v17 = vadd.f32 %v12118_v22, %v6193_v26  ;;  %v14226_v55 = vpop.f32.mrb[150].mxu1 }
 0x79a   : > { %v6237_v8 = vadd.f32 %v6229_v35, %v16396_v43  ;;  %v6230_v57 = vadd.f32 %v14226_v55, %v12118_v22  ;;  %v6196_v16 = vpop.f32.mrb[151].mxu1 }
 0x79b   : > { %v6235_v34 = vadd.f32 %v6227_v17, %v16382_v39  ;;  %v6228_v29 = vadd.f32 %v12118_v22, %v6196_v16  ;;  %14228 = vmatpush3.bf16.msra.mxu1 %v16807_v37  ;;  %14240 = vmatpush3.bf16.msra.mxu0 %v16807_v37  ;;  %v15519_v16 = vld [vmem:[%s15814_s30 + $0x48] sm:$0xff]  }
 0x79c   : > { %v6238_v13 = vadd.f32 %v6230_v57, %v16399_v11  ;;  %14229 = vmatprep.subr.bf16.mxu1 %v15744_v45  ;;  %14241 = vmatprep.subr.bf16.mxu0 %v15744_v45  ;;  %v6245_v43 = vmax.f32 %v6237_v8, 0.0  ;;  %v15517_v8 = vld [vmem:[%s15804_s19 + $0x20] sm:$0xff]  }
 0x79d   : > { %v6236_v14 = vadd.f32 %v6228_v29, %v16385_v50  ;;  %v6243_v18 = vmax.f32 %v6235_v34, 0.0  ;;  %v15505_v50 = vld [vmem:[%s15804_s19] sm:$0xff]  }
 0x79e   : > { %v6246_v41 = vmax.f32 %v6238_v13, 0.0  ;;  %v15518_v57 = vld [vmem:[%s15814_s30 + $0x40] sm:$0xff]  }
 0x79f   : > { %v6244_v39 = vmax.f32 %v6236_v14, 0.0  ;;  %14230 = vmatpush3.bf16.msra.mxu1 %v16805_v38  ;;  %14242 = vmatpush3.bf16.msra.mxu0 %v16805_v38 }
 0x7a0   : > { %v16819_v49 = vpack.c.bf16 %v6246_v41, %v6245_v43  ;;  %14231 = vmatprep.subr.bf16.mxu1 %v15744_v45  ;;  %14243 = vmatprep.subr.bf16.mxu0 %v15744_v45 }
 0x7a1   : > { %v16823_v11 = vpack.c.bf16 %v6244_v39, %v6243_v18 }
 0x7a3   : > { %14232 = vmatpush3.bf16.msra.mxu1 %v16823_v11  ;;  %14244 = vmatpush3.bf16.msra.mxu0 %v16823_v11 }
 0x7a4   : > { %14233 = vmatprep.subr.bf16.mxu1 %v15744_v45  ;;  %14245 = vmatprep.subr.bf16.mxu0 %v15744_v45 }
 0x7a7   : > { %14234 = vmatpush3.bf16.msra.mxu1 %v16819_v49  ;;  %14246 = vmatpush3.bf16.msra.mxu0 %v16819_v49 }
 0x7a8   : > { %14251 = vmatprep.subr.bf16.mxu0 %v15744_v45  ;;  %14259 = vmatprep.subr.bf16.mxu1 %v15744_v45 }
 0x7aa   : > { %14236 = vmatmul.mubr.msk.bf16.vlgmr.msra.gmra.mrb[152].mxu1 %vm2436_vm1, %v15505_v50  ;;  %14248 = vmatmul.mubr.msk.bf16.vlgmr.msra.gmra.mrb[184].mxu0 %vm2436_vm1, %v15506_v44 }
 0x7ab   : > { %14252 = vmatpush3.bf16.msra.mxu0 %v15507_v46  ;;  %14260 = vmatpush3.bf16.msra.mxu1 %v15508_v56  ;;  %v15520_v56 = vld [vmem:[%s15804_s19 + $0x28] sm:$0xff]  }
 0x7ac   : > { %14253 = vmatprep.subr.bf16.mxu0 %v15744_v45  ;;  %14261 = vmatprep.subr.bf16.mxu1 %v15744_v45 }
 0x7ad   : > { %14255 = vmatprep.mubr.msk.bf16.mxu0 %vm15745_vm2, %v15744_v45  ;;  %14263 = vmatprep.mubr.msk.bf16.mxu1 %vm15745_vm2, %v15744_v45 }
 0x7af   : > { %14254 = vmatpush3.bf16.msra.mxu0 %v15509_v51  ;;  %14262 = vmatpush3.bf16.msra.mxu1 %v15510_v40  ;;  %v15521_v51 = vld [vmem:[%s15814_s30 + $0x50] sm:$0xff]   ;;  %v15522_v40 = vld [vmem:[%s15814_s30 + $0x58] sm:$0xff]  }
 0x7b0   : > { %14267 = vmatprep.subr.bf16.mxu0 %v15744_v45  ;;  %14279 = vmatprep.subr.bf16.mxu1 %v15744_v45 }
 0x87d   : > { %v6295_v54 = vpop.f32.mrb[152].mxu1  ;;  %v6352_v58 = vpop.f32.mrb[184].mxu0 }
 0x87e   : > { %v14237_v59 = vpop.f32.mrb[153].mxu1  ;;  %v14249_v6 = vpop.f32.mrb[185].mxu0 }
 0x87f   : > { %v6298_v60 = vpop.f32.mrb[154].mxu1  ;;  %v6355_v61 = vpop.f32.mrb[186].mxu0 }
 0x880   : > { %v6302_v62 = vpack.c.bf16 %v6298_v60, %v6295_v54  ;;  %v6359_v0 = vpack.c.bf16 %v6355_v61, %v6352_v58  ;;  %v14250_v63 = vpop.f32.mrb[187].mxu0  ;;  %v14238_v5 = vpop.f32.mrb[155].mxu1 }
 0x882   : > { %14256 = vmatmul.mubr.msk.bf16.vlgmr.msra.gmra.mrb[188].mxu0 %vm1057_vm0, %v6359_v0  ;;  %14264 = vmatmul.mubr.msk.bf16.vlgmr.msra.gmra.mrb[156].mxu1 %vm1057_vm0, %v6302_v62 }
 0x883   : > { %14268 = vmatpush3.bf16.msra.mxu0 %v16807_v37  ;;  %14275 = vmatprep.mubr.msk.bf16.mxu0 %vm15745_vm2, %v15744_v45 }
 0x884   : > { %14269 = vmatprep.subr.bf16.mxu0 %v15744_v45  ;;  %14283 = vmatprep.mubr.msk.bf16.mxu1 %vm15745_vm2, %v15744_v45 }
 0x885   : > { %14280 = vmatpush3.bf16.msra.mxu1 %v15512_v53  ;;  %v15523_v53 = vld [vmem:[%s15804_s19 + $0x30] sm:$0xff]  }
 0x886   : > { %14281 = vmatprep.subr.bf16.mxu1 %v15744_v45 }
 0x887   : > { %14270 = vmatpush3.bf16.msra.mxu0 %v16805_v38 }
 0x888   : > { %14271 = vmatprep.subr.bf16.mxu0 %v15744_v45 }
 0x889   : > { %14282 = vmatpush3.bf16.msra.mxu1 %v15513_v4  ;;  %v15524_v4 = vld [vmem:[%s15814_s30 + $0x60] sm:$0xff]  }
 0x88a   : > { %14287 = vmatprep.subr.bf16.mxu1 %v15744_v45 }
 0x88b   : > { %14272 = vmatpush3.bf16.msra.mxu0 %v16823_v11 }
 0x88c   : > { %14273 = vmatprep.subr.bf16.mxu0 %v15744_v45 }
 0x88f   : > { %14274 = vmatpush3.bf16.msra.mxu0 %v16819_v49 }
 0x890   : > { %14299 = vmatprep.subr.bf16.mxu0 %v15744_v45 }
 0x892   : > { %14276 = vmatmul.mubr.msk.bf16.vlgmr.msra.gmra.mrb[192].mxu0 %vm2436_vm1, %v15511_v25 }
 0x893   : > { %14303 = vmatprep.mubr.msk.bf16.mxu0 %vm15745_vm2, %v15744_v45  ;;  %14300 = vmatpush3.bf16.msra.mxu0 %v15515_v15 }
 0x894   : > { %14301 = vmatprep.subr.bf16.mxu0 %v15744_v45 }
 0x897   : > { %14302 = vmatpush3.bf16.msra.mxu0 %v15516_v23 }
 0x898   : > { %14307 = vmatprep.subr.bf16.mxu0 %v15744_v45 }
 0x955   : > { %v6414_v31 = vpop.f32.mrb[188].mxu0  ;;  %v6470_v9 = vpop.f32.mrb[156].mxu1 }
 0x956   : > { %v6471_v42 = vadd.f32 %v6470_v9, %v6414_v31  ;;  %v14257_v12 = vpop.f32.mrb[189].mxu0  ;;  %v14265_v19 = vpop.f32.mrb[157].mxu1  ;;  %v15525_v31 = vld [vmem:[%s15814_s30 + $0x68] sm:$0xff]  }
 0x957   : > { %v6417_v21 = vpop.f32.mrb[190].mxu0  ;;  %v6473_v7 = vpop.f32.mrb[158].mxu1 }
 0x958   : > { %v6474_v22 = vadd.f32 %v6473_v7, %v6417_v21  ;;  %v14258_v24 = vpop.f32.mrb[191].mxu0  ;;  %v14266_v52 = vpop.f32.mrb[159].mxu1 }
 0x965   : > { %v6522_v10 = vpop.f32.mrb[192].mxu0 }
 0x966   : > { %v14277_v28 = vpop.f32.mrb[193].mxu0 }
 0x967   : > { %v6525_v2 = vpop.f32.mrb[194].mxu0 }
 0x968   : > { %v6529_v20 = vpack.c.bf16 %v6525_v2, %v6522_v10  ;;  %v14278_v30 = vpop.f32.mrb[195].mxu0  ;;  %v15526_v2 = vld [vmem:[%s15804_s19 + $0x38] sm:$0xff]  }
 0x969   : > { %v15528_v30 = vld [vmem:[%s15814_s30 + $0x78] sm:$0xff]  }
 0x96a   : > { %14284 = vmatmul.mubr.msk.bf16.vlgmr.msra.gmra.mrb[160].mxu1 %vm1057_vm0, %v6529_v20  ;;  %v15527_v20 = vld [vmem:[%s15814_s30 + $0x70] sm:$0xff]  }
 0x96b   : > { %14288 = vmatpush3.bf16.msra.mxu1 %v16807_v37  ;;  %14295 = vmatprep.mubr.msk.bf16.mxu1 %vm15745_vm2, %v15744_v45 }
 0x96c   : > { %14289 = vmatprep.subr.bf16.mxu1 %v15744_v45 }
 0x96f   : > { %14290 = vmatpush3.bf16.msra.mxu1 %v16805_v38 }
 0x970   : > { %14291 = vmatprep.subr.bf16.mxu1 %v15744_v45 }
 0x973   : > { %14292 = vmatpush3.bf16.msra.mxu1 %v16823_v11 }
 0x974   : > { %14293 = vmatprep.subr.bf16.mxu1 %v15744_v45 }
 0x977   : > { %14294 = vmatpush3.bf16.msra.mxu1 %v16819_v49 }
 0x978   : > { %14319 = vmatprep.subr.bf16.mxu1 %v15744_v45 }
 0x97a   : > { %14296 = vmatmul.mubr.msk.bf16.vlgmr.msra.gmra.mrb[164].mxu1 %vm2436_vm1, %v15514_v3 }
 0x97b   : > { %14323 = vmatprep.mubr.msk.bf16.mxu1 %vm15745_vm2, %v15744_v45  ;;  %14320 = vmatpush3.bf16.msra.mxu1 %v15518_v57 }
 0x97c   : > { %14321 = vmatprep.subr.bf16.mxu1 %v15744_v45 }
 0x97f   : > { %14322 = vmatpush3.bf16.msra.mxu1 %v15519_v16 }
 0x980   : > { %14327 = vmatprep.subr.bf16.mxu1 %v15744_v45 }
 0xa3d   : > { %v6584_v33 = vpop.f32.mrb[160].mxu1 }
 0xa3e   : > { %v6591_v36 = vadd.f32 %v6584_v33, %v6471_v42  ;;  %v14285_v47 = vpop.f32.mrb[161].mxu1 }
 0xa3f   : > { %v6587_v1 = vpop.f32.mrb[162].mxu1 }
 0xa40   : > { %v6592_v27 = vadd.f32 %v6587_v1, %v6474_v22  ;;  %v14286_v48 = vpop.f32.mrb[163].mxu1 }
 0xa4d   : > { %v6638_v32 = vpop.f32.mrb[164].mxu1 }
 0xa4e   : > { %v14297_v35 = vpop.f32.mrb[165].mxu1 }
 0xa4f   : > { %v6641_v26 = vpop.f32.mrb[166].mxu1 }
 0xa50   : > { %v6645_v17 = vpack.c.bf16 %v6641_v26, %v6638_v32  ;;  %v14298_v55 = vpop.f32.mrb[167].mxu1  ;;  %v15529_v26 = vld [vmem:[%s15804_s19 + $0x40] sm:$0xff]  }
 0xa51   : > { %v15531_v55 = vld [vmem:[%s15814_s30 + $0x88] sm:$0xff]  }
 0xa52   : > { %14304 = vmatmul.mubr.msk.bf16.vlgmr.msra.gmra.mrb[196].mxu0 %vm1057_vm0, %v6645_v17  ;;  %v15530_v17 = vld [vmem:[%s15814_s30 + $0x80] sm:$0xff]  }
 0xa53   : > { %14308 = vmatpush3.bf16.msra.mxu0 %v16807_v37  ;;  %14315 = vmatprep.mubr.msk.bf16.mxu0 %vm15745_vm2, %v15744_v45 }
 0xa54   : > { %14309 = vmatprep.subr.bf16.mxu0 %v15744_v45 }
 0xa57   : > { %14310 = vmatpush3.bf16.msra.mxu0 %v16805_v38 }
 0xa58   : > { %14311 = vmatprep.subr.bf16.mxu0 %v15744_v45 }
 0xa5b   : > { %14312 = vmatpush3.bf16.msra.mxu0 %v16823_v11 }
 0xa5c   : > { %14313 = vmatprep.subr.bf16.mxu0 %v15744_v45 }
 0xa5f   : > { %14314 = vmatpush3.bf16.msra.mxu0 %v16819_v49 }
 0xa60   : > { %14339 = vmatprep.subr.bf16.mxu0 %v15744_v45 }
 0xa62   : > { %14316 = vmatmul.mubr.msk.bf16.vlgmr.msra.gmra.mrb[200].mxu0 %vm2436_vm1, %v15517_v8 }
 0xa63   : > { %14343 = vmatprep.mubr.msk.bf16.mxu0 %vm15745_vm2, %v15744_v45  ;;  %14340 = vmatpush3.bf16.msra.mxu0 %v15521_v51 }
 0xa64   : > { %14341 = vmatprep.subr.bf16.mxu0 %v15744_v45 }
 0xa67   : > { %14342 = vmatpush3.bf16.msra.mxu0 %v15522_v40 }
 0xa68   : > { %14347 = vmatprep.subr.bf16.mxu0 %v15744_v45 }
 0xb25   : > { %v6700_v34 = vpop.f32.mrb[196].mxu0 }
 0xb26   : > { %v6707_v29 = vadd.f32 %v6700_v34, %v6591_v36  ;;  %v14305_v13 = vpop.f32.mrb[197].mxu0 }
 0xb27   : > { %v6703_v14 = vpop.f32.mrb[198].mxu0 }
 0xb28   : > { %v6708_v43 = vadd.f32 %v6703_v14, %v6592_v27  ;;  %v14306_v41 = vpop.f32.mrb[199].mxu0 }
 0xb35   : > { %v6754_v18 = vpop.f32.mrb[200].mxu0 }
 0xb36   : > { %v14317_v39 = vpop.f32.mrb[201].mxu0 }
 0xb37   : > { %v6757_v50 = vpop.f32.mrb[202].mxu0 }
 0xb38   : > { %v6761_v44 = vpack.c.bf16 %v6757_v50, %v6754_v18  ;;  %v14318_v46 = vpop.f32.mrb[203].mxu0 }
 0xb3a   : > { %14324 = vmatmul.mubr.msk.bf16.vlgmr.msra.gmra.mrb[168].mxu1 %vm1057_vm0, %v6761_v44  ;;  %v12212_v44 = vld [vmem:[%s15819_s6] ss:$0 sm:$0xff] }
 0xb3b   : > { %14328 = vmatpush3.bf16.msra.mxu1 %v16807_v37  ;;  %14335 = vmatprep.mubr.msk.bf16.mxu1 %vm15745_vm2, %v15744_v45 }
 0xb3c   : > { %14329 = vmatprep.subr.bf16.mxu1 %v15744_v45 }
 0xb3f   : > { %14330 = vmatpush3.bf16.msra.mxu1 %v16805_v38 }
 0xb40   : > { %14331 = vmatprep.subr.bf16.mxu1 %v15744_v45 }
 0xb43   : > { %14332 = vmatpush3.bf16.msra.mxu1 %v16823_v11 }
 0xb44   : > { %14333 = vmatprep.subr.bf16.mxu1 %v15744_v45 }
 0xb47   : > { %14334 = vmatpush3.bf16.msra.mxu1 %v16819_v49 }
 0xb48   : > { %14359 = vmatprep.subr.bf16.mxu1 %v15744_v45 }
 0xb4a   : > { %14336 = vmatmul.mubr.msk.bf16.vlgmr.msra.gmra.mrb[172].mxu1 %vm2436_vm1, %v15520_v56 }
 0xb4b   : > { %14363 = vmatprep.mubr.msk.bf16.mxu1 %vm15745_vm2, %v15744_v45  ;;  %14360 = vmatpush3.bf16.msra.mxu1 %v15524_v4  ;;  %v15535_v4 = vld [vmem:[%s15809_s24 + $0x18] sm:$0xff]  }
 0xb4c   : > { %14361 = vmatprep.subr.bf16.mxu1 %v15744_v45 }
 0xb4f   : > { %14362 = vmatpush3.bf16.msra.mxu1 %v15525_v31  ;;  %v15536_v31 = vld [vmem:[%s15809_s24 + $0x20] sm:$0xff]  }
 0xb50   : > { %14367 = vmatprep.subr.bf16.mxu1 %v15744_v45 }
 0xc0d   : > { %v6816_v54 = vpop.f32.mrb[168].mxu1 }
 0xc0e   : > { %v6823_v58 = vadd.f32 %v6816_v54, %v6707_v29  ;;  %v14325_v59 = vpop.f32.mrb[169].mxu1 }
 0xc0f   : > { %v6819_v6 = vpop.f32.mrb[170].mxu1 }
 0xc10   : > { %v6824_v60 = vadd.f32 %v6819_v6, %v6708_v43  ;;  %v14326_v61 = vpop.f32.mrb[171].mxu1 }
 0xc1d   : > { %v6870_v62 = vpop.f32.mrb[172].mxu1 }
 0xc1e   : > { %v14337_v0 = vpop.f32.mrb[173].mxu1 }
 0xc1f   : > { %v6873_v63 = vpop.f32.mrb[174].mxu1  ;;  %v15534_v0 = vld [vmem:[%s15809_s24] sm:$0xff]  }
 0xc20   : > { %v6877_v5 = vpack.c.bf16 %v6873_v63, %v6870_v62  ;;  %v14338_v25 = vpop.f32.mrb[175].mxu1  ;;  %v15532_v62 = vld [vmem:[%s15809_s24 + $0x8] sm:$0xff]   ;;  %v15542_v63 = vld [vmem:[%s17663_s2 + $0x20] sm:$0xff]  }
 0xc21   : > { %v15533_v25 = vld [vmem:[%s15809_s24 + $0x10] sm:$0xff]  }
 0xc22   : > { %14344 = vmatmul.mubr.msk.bf16.vlgmr.msra.gmra.mrb[204].mxu0 %vm1057_vm0, %v6877_v5  ;;  %v15543_v5 = vld [vmem:[%s17663_s2 + $0x28] sm:$0xff]  }
 0xc23   : > { %14348 = vmatpush3.bf16.msra.mxu0 %v16807_v37  ;;  %14355 = vmatprep.mubr.msk.bf16.mxu0 %vm15745_vm2, %v15744_v45 }
 0xc24   : > { %14349 = vmatprep.subr.bf16.mxu0 %v15744_v45 }
 0xc27   : > { %14350 = vmatpush3.bf16.msra.mxu0 %v16805_v38 }
 0xc28   : > { %14351 = vmatprep.subr.bf16.mxu0 %v15744_v45 }
 0xc2b   : > { %14352 = vmatpush3.bf16.msra.mxu0 %v16823_v11 }
 0xc2c   : > { %14353 = vmatprep.subr.bf16.mxu0 %v15744_v45 }
 0xc2f   : > { %14354 = vmatpush3.bf16.msra.mxu0 %v16819_v49 }
 0xc30   : > { %14379 = vmatprep.subr.bf16.mxu0 %v15744_v45 }
 0xc32   : > { %14356 = vmatmul.mubr.msk.bf16.vlgmr.msra.gmra.mrb[208].mxu0 %vm2436_vm1, %v15523_v53  ;;  %v15544_v53 = vld [vmem:[%s17663_s2 + $0x30] sm:$0xff]  }
 0xc33   : > { %14383 = vmatprep.mubr.msk.bf16.mxu0 %vm15745_vm2, %v15744_v45  ;;  %14380 = vmatpush3.bf16.msra.mxu0 %v15527_v20 }
 0xc34   : > { %14381 = vmatprep.subr.bf16.mxu0 %v15744_v45 }
 0xc37   : > { %14382 = vmatpush3.bf16.msra.mxu0 %v15528_v30  ;;  %v15547_v30 = vld [vmem:[%s17663_s2 + $0x8] sm:$0xff]  }
 0xc38   : > { %14387 = vmatprep.subr.bf16.mxu0 %v15744_v45 }
 0xcf5   : > { %v6932_v9 = vpop.f32.mrb[204].mxu0 }
 0xcf6   : > { %v6939_v42 = vadd.f32 %v6932_v9, %v6823_v58  ;;  %v14345_v12 = vpop.f32.mrb[205].mxu0  ;;  %v15537_v9 = vld [vmem:[%s15809_s24 + $0x28] sm:$0xff]  }
 0xcf7   : > { %v6935_v19 = vpop.f32.mrb[206].mxu0  ;;  %v15539_v12 = vld [vmem:[%s15809_s24 + $0x38] sm:$0xff]  }
 0xcf8   : > { %v6940_v21 = vadd.f32 %v6935_v19, %v6824_v60  ;;  %v14346_v7 = vpop.f32.mrb[207].mxu0  ;;  %v15540_v19 = vld [vmem:[%s15809_s24 + $0x40] sm:$0xff]  }
 0xd05   : > { %v6986_v22 = vpop.f32.mrb[208].mxu0 }
 0xd06   : > { %v14357_v24 = vpop.f32.mrb[209].mxu0 }
 0xd07   : > { %v6989_v52 = vpop.f32.mrb[210].mxu0 }
 0xd08   : > { %v6993_v10 = vpack.c.bf16 %v6989_v52, %v6986_v22  ;;  %v14358_v28 = vpop.f32.mrb[211].mxu0  ;;  %v15546_v52 = vld [vmem:[%s17663_s2] sm:$0xff]  }
 0xd0a   : > { %14364 = vmatmul.mubr.msk.bf16.vlgmr.msra.gmra.mrb[176].mxu1 %vm1057_vm0, %v6993_v10 }
 0xd0b   : > { %14368 = vmatpush3.bf16.msra.mxu1 %v16807_v37  ;;  %14375 = vmatprep.mubr.msk.bf16.mxu1 %vm15745_vm2, %v15744_v45 }
 0xd0c   : > { %14369 = vmatprep.subr.bf16.mxu1 %v15744_v45 }
 0xd0f   : > { %14370 = vmatpush3.bf16.msra.mxu1 %v16805_v38 }
 0xd10   : > { %14371 = vmatprep.subr.bf16.mxu1 %v15744_v45 }
 0xd13   : > { %14372 = vmatpush3.bf16.msra.mxu1 %v16823_v11 }
 0xd14   : > { %14373 = vmatprep.subr.bf16.mxu1 %v15744_v45 }
 0xd17   : > { %14374 = vmatpush3.bf16.msra.mxu1 %v16819_v49 }
 0xd18   : > { %14399 = vmatprep.subr.bf16.mxu1 %v15744_v45 }
 0xd1a   : > { %14376 = vmatmul.mubr.msk.bf16.vlgmr.msra.gmra.mrb[180].mxu1 %vm2436_vm1, %v15526_v2 }
 0xd1b   : > { %14403 = vmatprep.mubr.msk.bf16.mxu1 %vm15745_vm2, %v15744_v45  ;;  %14400 = vmatpush3.bf16.msra.mxu1 %v15530_v17 }
 0xd1c   : > { %14401 = vmatprep.subr.bf16.mxu1 %v15744_v45 }
 0xd1f   : > { %14402 = vmatpush3.bf16.msra.mxu1 %v15531_v55  ;;  %v15551_v55 = vld [vmem:[%s17663_s2 + $0x48] sm:$0xff]  }
 0xd20   : > { %14407 = vmatprep.subr.bf16.mxu1 %v15744_v45 }
 0xddd   : > { %v7048_v3 = vpop.f32.mrb[176].mxu1 }
 0xdde   : > { %v7055_v15 = vadd.f32 %v7048_v3, %v6939_v42  ;;  %v14365_v23 = vpop.f32.mrb[177].mxu1  ;;  %v15538_v42 = vld [vmem:[%s15809_s24 + $0x30] sm:$0xff]  }
 0xddf   : > { %v7051_v33 = vpop.f32.mrb[178].mxu1  ;;  %v15548_v23 = vld [vmem:[%s17663_s2 + $0x10] sm:$0xff]  }
 0xde0   : > { %v7056_v36 = vadd.f32 %v7051_v33, %v6940_v21  ;;  %v14366_v47 = vpop.f32.mrb[179].mxu1  ;;  %v15541_v21 = vld [vmem:[%s17664_s7] sm:$0xff]   ;;  %s17675_s7 = sld [smem:[#allocation15_spill]] }
 0xded   : > { %v7102_v1 = vpop.f32.mrb[180].mxu1 }
 0xdee   : > { %v14377_v27 = vpop.f32.mrb[181].mxu1 }
 0xdef   : > { %v7105_v48 = vpop.f32.mrb[182].mxu1 }
 0xdf0   : > { %v7109_v32 = vpack.c.bf16 %v7105_v48, %v7102_v1  ;;  %v14378_v35 = vpop.f32.mrb[183].mxu1  ;;  %v15549_v1 = vld [vmem:[%s17663_s2 + $0x18] sm:$0xff]  }
 0xdf2   : > { %14384 = vmatmul.mubr.msk.bf16.vlgmr.msra.gmra.mrb[212].mxu0 %vm1057_vm0, %v7109_v32  ;;  %v15550_v32 = vld [vmem:[%s17663_s2 + $0x40] sm:$0xff]  }
 0xdf3   : > { %14388 = vmatpush3.bf16.msra.mxu0 %v16807_v37  ;;  %14395 = vmatprep.mubr.msk.bf16.mxu0 %vm15745_vm2, %v15744_v45 }
 0xdf4   : > { %14389 = vmatprep.subr.bf16.mxu0 %v15744_v45 }
 0xdf7   : > { %14390 = vmatpush3.bf16.msra.mxu0 %v16805_v38 }
 0xdf8   : > { %14391 = vmatprep.subr.bf16.mxu0 %v15744_v45 }
 0xdfb   : > { %14392 = vmatpush3.bf16.msra.mxu0 %v16823_v11 }
 0xdfc   : > { %14393 = vmatprep.subr.bf16.mxu0 %v15744_v45 }
 0xdff   : > { %14394 = vmatpush3.bf16.msra.mxu0 %v16819_v49 }
 0xe00   : > { %14413 = vmatprep.subr.bf16.mxu0 %v15744_v45 }
 0xe02   : > { %14396 = vmatmul.mubr.msk.bf16.vlgmr.msra.gmra.mrb[216].mxu0 %vm2436_vm1, %v15529_v26 }
 0xe03   : > { %14415 = vmatprep.mubr.msk.bf16.mxu0 %vm15745_vm2, %v15744_v45 }
 0xec5   : > { %v7164_v8 = vpop.f32.mrb[212].mxu0 }
 0xec6   : > { %v7171_v57 = vadd.f32 %v7164_v8, %v7055_v15  ;;  %v14385_v16 = vpop.f32.mrb[213].mxu0 }
 0xec7   : > { %v7167_v34 = vpop.f32.mrb[214].mxu0  ;;  %v15552_v16 = vld [vmem:[%s17663_s2 + $0x50] sm:$0xff]  }
 0xec8   : > { %v7172_v29 = vadd.f32 %v7167_v34, %v7056_v36  ;;  %v14386_v13 = vpop.f32.mrb[215].mxu0 }
 0xed5   : > { %v7218_v14 = vpop.f32.mrb[216].mxu0 }
 0xed6   : > { %v14397_v43 = vpop.f32.mrb[217].mxu0 }
 0xed7   : > { %v7221_v41 = vpop.f32.mrb[218].mxu0 }
 0xed8   : > { %v7225_v18 = vpack.c.bf16 %v7221_v41, %v7218_v14  ;;  %v14398_v39 = vpop.f32.mrb[219].mxu0  ;;  %v15553_v14 = vld [vmem:[%s17663_s2 + $0x58] sm:$0xff]  }
 0xeda   : > { %14404 = vmatmul.mubr.msk.bf16.vlgmr.msra.gmra.mrb[184].mxu1 %vm1057_vm0, %v7225_v18  ;;  %v15554_v18 = vld [vmem:[%s17663_s2 + $0x60] sm:$0xff]  }
 0xedb   : > { %14409 = vmatprep.mubr.msk.bf16.mxu1 %vm15745_vm2, %v15744_v45 }
 0xfad   : > { %v7280_v50 = vpop.f32.mrb[184].mxu1 }
 0xfae   : > { %v7287_v46 = vadd.f32 %v7280_v50, %v7171_v57  ;;  %v14405_v56 = vpop.f32.mrb[185].mxu1 }
 0xfaf   : > { %v7283_v51 = vpop.f32.mrb[186].mxu1 }
 0xfb0   : > { %v7296_v40 = vadd.f32 %v12212_v44, %v7287_v46  ;;  %v7288_v54 = vadd.f32 %v7283_v51, %v7172_v29  ;;  %v14406_v58 = vpop.f32.mrb[187].mxu1  ;;  %v15555_v46 = vld [vmem:[%s17663_s2 + $0x68] sm:$0xff]  }
 0xfb2   : > { %v7297_v59 = vadd.f32 %v12212_v44, %v7288_v54  ;;  %v7298_v6 = vmax.f32 %v7296_v40, 0.0  ;;  %v15556_v40 = vld [vmem:[%s17663_s2 + $0x70] sm:$0xff]  }
 0xfb4   : > { %v7299_v60 = vmax.f32 %v7297_v59, 0.0 }
 0xfb6   : > { %v7300_v61 = vpack.c.bf16 %v7299_v60, %v7298_v6  ;;  %v15557_v6 = vld [vmem:[%s17663_s2 + $0x78] sm:$0xff]  }
 0xfb8   : > { %14408 = vmatpush3.bf16.msra.mxu1 %v7300_v61  ;;  %14414 = vmatpush3.bf16.msra.mxu0 %v7300_v61 }
 0xfb9   : > { %14443 = vmatprep.subr.bf16.mxu0 %v15744_v45  ;;  %14419 = vmatprep.subr.bf16.mxu1 %v15744_v45 }
 0xfbb   : > { %14416 = vmatmul.mubr.msk.bf16.vlgmr.msra.gmra.mrb[220].mxu0 %vm7308_vm3, %v15532_v62  ;;  %14410 = vmatmul.mubr.msk.bf16.vlgmr.msra.gmra.mrb[188].mxu1 %vm7308_vm3, %v15534_v0  ;;  %v15558_v62 = vld [vmem:[%s17663_s2 + $0x80] sm:$0xff]  }
 0xfbc   : > { %14444 = vmatpush3.bf16.msra.mxu0 %v7300_v61  ;;  %14445 = vmatprep.mubr.msk.bf16.mxu0 %vm15745_vm2, %v15744_v45 }
 0xfbd   : > { %14461 = vmatprep.subr.bf16.mxu0 %v15744_v45  ;;  %14420 = vmatpush3.bf16.msra.mxu1 %v15542_v63 }
 0xfbe   : > { %14421 = vmatprep.subr.bf16.mxu1 %v15744_v45  ;;  %14427 = vmatprep.mubr.msk.bf16.mxu1 %vm15745_vm2, %v15744_v45 }
 0xfc1   : > { %14422 = vmatpush3.bf16.msra.mxu1 %v15543_v5 }
 0xfc2   : > { %14423 = vmatprep.subr.bf16.mxu1 %v15744_v45 }
 0xfc3   : > { %14446 = vmatmul.mubr.msk.bf16.vlgmr.msra.gmra.mrb[224].mxu0 %vm7308_vm3, %v15533_v25  ;;  %v15559_v25 = vld [vmem:[%s17663_s2 + $0x88] sm:$0xff]  }
 0xfc4   : > { %14462 = vmatpush3.bf16.msra.mxu0 %v7300_v61  ;;  %14463 = vmatprep.mubr.msk.bf16.mxu0 %vm15745_vm2, %v15744_v45 }
 0xfc5   : > { %14479 = vmatprep.subr.bf16.mxu0 %v15744_v45  ;;  %14424 = vmatpush3.bf16.msra.mxu1 %v15544_v53 }
 0xfc6   : > { %14425 = vmatprep.subr.bf16.mxu1 %v15744_v45 }
 0xfcb   : > { %14464 = vmatmul.mubr.msk.bf16.vlgmr.msra.gmra.mrb[228].mxu0 %vm7308_vm3, %v15535_v4 }
 0xfcc   : > { %14480 = vmatpush3.bf16.msra.mxu0 %v7300_v61  ;;  %14481 = vmatprep.mubr.msk.bf16.mxu0 %vm15745_vm2, %v15744_v45 }
 0xfcd   : > { %14497 = vmatprep.subr.bf16.mxu0 %v15744_v45 }
 0xfd3   : > { %14482 = vmatmul.mubr.msk.bf16.vlgmr.msra.gmra.mrb[232].mxu0 %vm7308_vm3, %v15536_v31  ;;  %v15560_v31 = vld [vmem:[%s17663_s2 + $0x90] sm:$0xff]  }
 0xfd4   : > { %14498 = vmatpush3.bf16.msra.mxu0 %v7300_v61  ;;  %14499 = vmatprep.mubr.msk.bf16.mxu0 %vm15745_vm2, %v15744_v45 }
 0xfd5   : > { %14515 = vmatprep.subr.bf16.mxu0 %v15744_v45 }
 0xfdb   : > { %14500 = vmatmul.mubr.msk.bf16.vlgmr.msra.gmra.mrb[236].mxu0 %vm7308_vm3, %v15537_v9 }
 0xfdc   : > { %14516 = vmatpush3.bf16.msra.mxu0 %v7300_v61  ;;  %14517 = vmatprep.mubr.msk.bf16.mxu0 %vm15745_vm2, %v15744_v45 }
 0xfdd   : > { %14533 = vmatprep.subr.bf16.mxu0 %v15744_v45 }
 0xfe3   : > { %14518 = vmatmul.mubr.msk.bf16.vlgmr.msra.gmra.mrb[240].mxu0 %vm7308_vm3, %v15538_v42 }
 0xfe4   : > { %14534 = vmatpush3.bf16.msra.mxu0 %v7300_v61  ;;  %14535 = vmatprep.mubr.msk.bf16.mxu0 %vm15745_vm2, %v15744_v45 }
 0xfe5   : > { %14551 = vmatprep.subr.bf16.mxu0 %v15744_v45 }
 0xfeb   : > { %14536 = vmatmul.mubr.msk.bf16.vlgmr.msra.gmra.mrb[244].mxu0 %vm7308_vm3, %v15539_v12 }
 0xfec   : > { %14552 = vmatpush3.bf16.msra.mxu0 %v7300_v61  ;;  %14553 = vmatprep.mubr.msk.bf16.mxu0 %vm15745_vm2, %v15744_v45 }
 0xfed   : > { %14569 = vmatprep.subr.bf16.mxu0 %v15744_v45 }
 0xff3   : > { %14554 = vmatmul.mubr.msk.bf16.vlgmr.msra.gmra.mrb[248].mxu0 %vm7308_vm3, %v15540_v19  ;;  %v15561_v19 = vld [vmem:[%s17663_s2 + $0x98] sm:$0xff]  }
 0xff4   : > { %14570 = vmatpush3.bf16.msra.mxu0 %v16807_v37  ;;  %14577 = vmatprep.mubr.msk.bf16.mxu0 %vm15745_vm2, %v15744_v45  ;;  %v15545_v37 = vld [vmem:[%s17663_s2 + $0x38] sm:$0xff]  }
 0xff5   : > { %14571 = vmatprep.subr.bf16.mxu0 %v15744_v45  ;;  %14426 = vmatpush3.bf16.msra.mxu1 %v15545_v37  ;;  %v15563_v37 = vld [vmem:[%s17663_s2 + $0xa8] sm:$0xff]  }
 0xff6   : > { %14431 = vmatprep.subr.bf16.mxu1 %v15744_v45 }
 0xff8   : > { %14572 = vmatpush3.bf16.msra.mxu0 %v16805_v38 }
 0xff9   : > { %14573 = vmatprep.subr.bf16.mxu0 %v15744_v45 }
 0xffc   : > { %14574 = vmatpush3.bf16.msra.mxu0 %v16823_v11 }
 0xffd   : > { %14575 = vmatprep.subr.bf16.mxu0 %v15744_v45 }
0x1000   : > { %14576 = vmatpush3.bf16.msra.mxu0 %v16819_v49 }
0x1001   : > { %14589 = vmatprep.subr.bf16.mxu0 %v15744_v45 }
0x1003   : > { %14578 = vmatmul.mubr.msk.bf16.vlgmr.msra.gmra.mrb[252].mxu0 %vm2436_vm1, %v15541_v21  ;;  %v15562_v21 = vld [vmem:[%s17663_s2 + $0xa0] sm:$0xff]  }
0x1004   : > { %14591 = vmatprep.mubr.msk.bf16.mxu0 %vm15745_vm2, %v15744_v45 }
0x108e   : > { %v7407_v38 = vpop.f32.mrb[220].mxu0  ;;  %v7346_v7 = vpop.f32.mrb[188].mxu1 }
0x108f   : > { %v14417_v11 = vpop.f32.mrb[221].mxu0  ;;  %v14411_v22 = vpop.f32.mrb[189].mxu1 }
0x1090   : > { %v7410_v24 = vpop.f32.mrb[222].mxu0  ;;  %v7349_v49 = vpop.f32.mrb[190].mxu1  ;;  %v15564_v11 = vld [vmem:[%s17663_s2 + $0xb0] sm:$0xff]  }
0x1091   : > { %v7414_v10 = vpack.c.bf16 %v7410_v24, %v7407_v38  ;;  %v14418_v28 = vpop.f32.mrb[223].mxu0  ;;  %v7353_v2 = vpack.c.bf16 %v7349_v49, %v7346_v7  ;;  %v14412_v20 = vpop.f32.mrb[191].mxu1  ;;  %v15565_v49 = vld [vmem:[%s17663_s2 + $0xb8] sm:$0xff]  }
0x1092   : > { %v15567_v28 = vld [vmem:[%s17663_s2 + $0xc8] sm:$0xff]   ;;  %v15569_v20 = vld [vmem:[%s17663_s2 + $0xd8] sm:$0xff]  }
0x1093   : > { %14428 = vmatmul.mubr.msk.bf16.vlgmr.msra.gmra.mrb[192].mxu1 %vm2436_vm1, %v7414_v10  ;;  %v15566_v10 = vld [vmem:[%s17663_s2 + $0xc0] sm:$0xff]  }
0x1094   : > { %14432 = vmatpush3.bf16.msra.mxu1 %v15546_v52  ;;  %14439 = vmatprep.mubr.msk.bf16.mxu1 %vm15745_vm2, %v15744_v45 }
0x1095   : > { %14433 = vmatprep.subr.bf16.mxu1 %v15744_v45 }
0x1096   : > { %v7605_v3 = vpop.f32.mrb[224].mxu0 }
0x1097   : > { %v14447_v15 = vpop.f32.mrb[225].mxu0 }
0x1098   : > { %14434 = vmatpush3.bf16.msra.mxu1 %v15547_v30  ;;  %v7608_v33 = vpop.f32.mrb[226].mxu0  ;;  %v15570_v30 = vld [vmem:[%s17663_s2 + $0xe0] sm:$0xff]   ;;  %v15572_v15 = vld [vmem:[%s17663_s2 + $0xf0] sm:$0xff]  }
0x1099   : > { %14435 = vmatprep.subr.bf16.mxu1 %v15744_v45  ;;  %v7612_v36 = vpack.c.bf16 %v7608_v33, %v7605_v3  ;;  %v14448_v47 = vpop.f32.mrb[227].mxu0  ;;  %v15571_v3 = vld [vmem:[%s17663_s2 + $0xe8] sm:$0xff]   ;;  %v15574_v33 = vld [vmem:[%s17663_s2 + $0x100] sm:$0xff]  }
0x109a   : > { %v15576_v47 = vld [vmem:[%s17663_s2 + $0x110] sm:$0xff]  }
0x109c   : > { %14436 = vmatpush3.bf16.msra.mxu1 %v15548_v23  ;;  %v15573_v23 = vld [vmem:[%s17663_s2 + $0xf8] sm:$0xff]  }
0x109d   : > { %14437 = vmatprep.subr.bf16.mxu1 %v15744_v45 }
0x109e   : > { %v7737_v27 = vpop.f32.mrb[228].mxu0 }
0x109f   : > { %v14465_v48 = vpop.f32.mrb[229].mxu0 }
0x10a0   : > { %14438 = vmatpush3.bf16.msra.mxu1 %v15549_v1  ;;  %v7740_v35 = vpop.f32.mrb[230].mxu0  ;;  %v15577_v1 = vld [vmem:[%s17663_s2 + $0x118] sm:$0xff]   ;;  %v15579_v48 = vld [vmem:[%s17665_s10 + $0x8] sm:$0xff]  }
0x10a1   : > { %14449 = vmatprep.subr.bf16.mxu1 %v15744_v45  ;;  %v7744_v26 = vpack.c.bf16 %v7740_v35, %v7737_v27  ;;  %v14466_v17 = vpop.f32.mrb[231].mxu0  ;;  %v15578_v27 = vld [vmem:[%s17665_s10] sm:$0xff]  }
0x10a2   : > { %v12359_v35 = vld [vmem:[%s17667_s15] ss:$0 sm:$0xff]  ;;  %s17677_s15 = sld [smem:[#allocation16_spill]] }
0x10a3   : > { %14440 = vmatmul.mubr.msk.bf16.vlgmr.msra.gmra.mrb[192].mxu1 %vm2436_vm1, %v7353_v2  ;;  %v15568_v2 = vld [vmem:[%s17663_s2 + $0xd0] sm:$0xff]  }
0x10a4   : > { %14450 = vmatpush3.bf16.msra.mxu1 %v15550_v32  ;;  %14457 = vmatprep.mubr.msk.bf16.mxu1 %vm15745_vm2, %v15744_v45  ;;  %v12356_v32 = vld [vmem:[%s17666_s11] ss:$0 sm:$0xff]  ;;  %s17676_s11 = sld [smem:[#allocation13_spill]] }
0x10a5   : > { %14451 = vmatprep.subr.bf16.mxu1 %v15744_v45 }
0x10a6   : > { %v17071_v8 = vpop.f32.mrb[232].mxu0 }
0x10a7   : > { %v14483_v57 = vpop.f32.mrb[233].mxu0 }
0x10a8   : > { %14452 = vmatpush3.bf16.msra.mxu1 %v15551_v55  ;;  %v7872_v34 = vpop.f32.mrb[234].mxu0 }
0x10a9   : > { %14453 = vmatprep.subr.bf16.mxu1 %v15744_v45  ;;  %v7876_v29 = vpack.c.bf16 %v7872_v34, %v17071_v8  ;;  %v14484_v13 = vpop.f32.mrb[235].mxu0 }
0x10ac   : > { %14454 = vmatpush3.bf16.msra.mxu1 %v15552_v16 }
0x10ad   : > { %14455 = vmatprep.subr.bf16.mxu1 %v15744_v45 }
0x10ae   : > { %v17078_v43 = vpop.f32.mrb[236].mxu0 }
0x10af   : > { %v14501_v41 = vpop.f32.mrb[237].mxu0 }
0x10b0   : > { %14456 = vmatpush3.bf16.msra.mxu1 %v15553_v14  ;;  %v17081_v39 = vpop.f32.mrb[238].mxu0  ;;  %v12364_v41 = vld [vmem:[%s17668_s16 + $0x2] sm:$0x3] }
0x10b1   : > { %14467 = vmatprep.subr.bf16.mxu1 %v15744_v45  ;;  %v8008_v50 = vpack.c.bf16 %v17081_v39, %v17078_v43  ;;  %v14502_v44 = vpop.f32.mrb[239].mxu0  ;;  %v8617_v43 = vld [vmem:[%s17668_s16] sm:$0x3]  ;;  %v15581_v39 = vld [vmem:[%s17669_s18 + $0x28] sm:$0xff]  }
0x10b2   : > { %v15583_v44 = vld [vmem:[%s17669_s18 + $0x38] sm:$0xff]  }
0x10b3   : > { %14458 = vmatmul.mubr.msk.bf16.vlgmr.msra.gmra.mrb[192].mxu1 %vm2436_vm1, %v7612_v36  ;;  %v15575_v36 = vld [vmem:[%s17663_s2 + $0x108] sm:$0xff]  }
0x10b4   : > { %14468 = vmatpush3.bf16.msra.mxu1 %v15554_v18  ;;  %14475 = vmatprep.mubr.msk.bf16.mxu1 %vm15745_vm2, %v15744_v45  ;;  %v15580_v18 = vld [vmem:[%s17669_s18 + $0x20] sm:$0xff]  }
0x10b5   : > { %14469 = vmatprep.subr.bf16.mxu1 %v15744_v45 }
0x10b6   : > { %v17091_v56 = vpop.f32.mrb[240].mxu0 }
0x10b7   : > { %v14519_v51 = vpop.f32.mrb[241].mxu0 }
0x10b8   : > { %14470 = vmatpush3.bf16.msra.mxu1 %v15555_v46  ;;  %v17094_v54 = vpop.f32.mrb[242].mxu0 }
0x10b9   : > { %14471 = vmatprep.subr.bf16.mxu1 %v15744_v45  ;;  %v8140_v58 = vpack.c.bf16 %v17094_v54, %v17091_v56  ;;  %v14520_v59 = vpop.f32.mrb[243].mxu0 }
0x10bc   : > { %14472 = vmatpush3.bf16.msra.mxu1 %v15556_v40 }
0x10bd   : > { %14473 = vmatprep.subr.bf16.mxu1 %v15744_v45 }
0x10be   : > { %v17101_v60 = vpop.f32.mrb[244].mxu0 }
0x10bf   : > { %v14537_v61 = vpop.f32.mrb[245].mxu0 }
0x10c0   : > { %14474 = vmatpush3.bf16.msra.mxu1 %v15557_v6  ;;  %v17104_v0 = vpop.f32.mrb[246].mxu0 }
0x10c1   : > { %14485 = vmatprep.subr.bf16.mxu1 %v15744_v45  ;;  %v8272_v63 = vpack.c.bf16 %v17104_v0, %v17101_v60  ;;  %v14538_v5 = vpop.f32.mrb[247].mxu0  ;;  %v15586_v0 = vld [vmem:[%s17669_s18 + $0x10] sm:$0xff]  }
0x10c3   : > { %14476 = vmatmul.mubr.msk.bf16.vlgmr.msra.gmra.mrb[192].mxu1 %vm2436_vm1, %v7744_v26  ;;  %v15039_v26 = vadd.f32 %v12359_v35, %v12356_v32 }
0x10c4   : > { %14486 = vmatpush3.bf16.msra.mxu1 %v15558_v62  ;;  %14493 = vmatprep.mubr.msk.bf16.mxu1 %vm15745_vm2, %v15744_v45  ;;  %v15585_v62 = vld [vmem:[%s17669_s18 + $0x8] sm:$0xff]  }
0x10c5   : > { %14487 = vmatprep.subr.bf16.mxu1 %v15744_v45 }
0x10c6   : > { %v17114_v53 = vpop.f32.mrb[248].mxu0 }
0x10c7   : > { %v14555_v4 = vpop.f32.mrb[249].mxu0 }
0x10c8   : > { %14488 = vmatpush3.bf16.msra.mxu1 %v15559_v25  ;;  %v17117_v9 = vpop.f32.mrb[250].mxu0  ;;  %v12384_v25 = vld [vmem:[%s17668_s16 + $0x4] sm:$0x3]  ;;  %v15589_v4 = vld [vmem:[%s17669_s18 + $0x48] sm:$0xff]  }
0x10c9   : > { %14489 = vmatprep.subr.bf16.mxu1 %v15744_v45  ;;  %v8404_v42 = vpack.c.bf16 %v17117_v9, %v17114_v53  ;;  %v14556_v12 = vpop.f32.mrb[251].mxu0  ;;  %v15588_v53 = vld [vmem:[%s17669_s18 + $0x40] sm:$0xff]   ;;  %v15591_v9 = vld [vmem:[%s17669_s18 + $0x58] sm:$0xff]  }
0x10ca   : > { %v15593_v12 = vld [vmem:[%s17669_s18 + $0x68] sm:$0xff]  }
0x10cc   : > { %14490 = vmatpush3.bf16.msra.mxu1 %v15560_v31  ;;  %v15590_v31 = vld [vmem:[%s17669_s18 + $0x50] sm:$0xff]  }
0x10cd   : > { %14491 = vmatprep.subr.bf16.mxu1 %v15744_v45 }
0x10d0   : > { %14492 = vmatpush3.bf16.msra.mxu1 %v15561_v19 }
0x10d1   : > { %14503 = vmatprep.subr.bf16.mxu1 %v15744_v45 }
0x10d3   : > { %14494 = vmatmul.mubr.msk.bf16.vlgmr.msra.gmra.mrb[192].mxu1 %vm2436_vm1, %v7876_v29 }
0x10d4   : > { %14504 = vmatpush3.bf16.msra.mxu1 %v15562_v21  ;;  %14511 = vmatprep.mubr.msk.bf16.mxu1 %vm15745_vm2, %v15744_v45 }
0x10d5   : > { %14505 = vmatprep.subr.bf16.mxu1 %v15744_v45 }
0x10d6   : > { %v17131_v38 = vpop.f32.mrb[252].mxu0 }
0x10d7   : > { %v14579_v7 = vpop.f32.mrb[253].mxu0 }
0x10d8   : > { %14506 = vmatpush3.bf16.msra.mxu1 %v15563_v37  ;;  %v8540_v22 = vpop.f32.mrb[254].mxu0 }
0x10d9   : > { %14507 = vmatprep.subr.bf16.mxu1 %v15744_v45  ;;  %v8544_v24 = vpack.c.bf16 %v8540_v22, %v17131_v38  ;;  %v14580_v52 = vpop.f32.mrb[255].mxu0 }
0x10dc   : > { %14508 = vmatpush3.bf16.msra.mxu1 %v15564_v11 }
0x10dd   : > { %14509 = vmatprep.subr.bf16.mxu1 %v15744_v45 }
0x10e0   : > { %14510 = vmatpush3.bf16.msra.mxu1 %v15565_v49 }
0x10e1   : > { %14521 = vmatprep.subr.bf16.mxu1 %v15744_v45 }
0x10e3   : > { %14512 = vmatmul.mubr.msk.bf16.vlgmr.msra.gmra.mrb[192].mxu1 %vm2436_vm1, %v8008_v50  ;;  %v15582_v50 = vld [vmem:[%s17669_s18 + $0x30] sm:$0xff]  }
0x10e4   : > { %14522 = vmatpush3.bf16.msra.mxu1 %v15566_v10  ;;  %14529 = vmatprep.mubr.msk.bf16.mxu1 %vm15745_vm2, %v15744_v45 }
0x10e5   : > { %14523 = vmatprep.subr.bf16.mxu1 %v15744_v45 }
0x10e8   : > { %14524 = vmatpush3.bf16.msra.mxu1 %v15567_v28 }
0x10e9   : > { %14525 = vmatprep.subr.bf16.mxu1 %v15744_v45 }
0x10ec   : > { %14526 = vmatpush3.bf16.msra.mxu1 %v15568_v2 }
0x10ed   : > { %14527 = vmatprep.subr.bf16.mxu1 %v15744_v45 }
0x10f0   : > { %14528 = vmatpush3.bf16.msra.mxu1 %v15569_v20 }
0x10f1   : > { %14539 = vmatprep.subr.bf16.mxu1 %v15744_v45 }
0x10f3   : > { %14530 = vmatmul.mubr.msk.bf16.vlgmr.msra.gmra.mrb[192].mxu1 %vm2436_vm1, %v8140_v58  ;;  %v15584_v58 = vld [vmem:[%s17669_s18] sm:$0xff]  }
0x10f4   : > { %14540 = vmatpush3.bf16.msra.mxu1 %v15570_v30  ;;  %14547 = vmatprep.mubr.msk.bf16.mxu1 %vm15745_vm2, %v15744_v45  ;;  %v12399_v30 = vld [vmem:[%s17668_s16 + $0x6] sm:$0x3] }
0x10f5   : > { %14541 = vmatprep.subr.bf16.mxu1 %v15744_v45 }
0x10f8   : > { %14542 = vmatpush3.bf16.msra.mxu1 %v15571_v3  ;;  %v12414_v3 = vld [vmem:[%s17668_s16 + $0x8] sm:$0x3] }
0x10f9   : > { %14543 = vmatprep.subr.bf16.mxu1 %v15744_v45 }
0x10fc   : > { %14544 = vmatpush3.bf16.msra.mxu1 %v15572_v15  ;;  %v15594_v15 = vld [vmem:[%s17669_s18 + $0x70] sm:$0xff]  }
0x10fd   : > { %14545 = vmatprep.subr.bf16.mxu1 %v15744_v45 }
0x1100   : > { %14546 = vmatpush3.bf16.msra.mxu1 %v15573_v23  ;;  %v15595_v23 = vld [vmem:[%s17669_s18 + $0x80] sm:$0xff]  }
0x1101   : > { %14557 = vmatprep.subr.bf16.mxu1 %v15744_v45 }
0x1103   : > { %14548 = vmatmul.mubr.msk.bf16.vlgmr.msra.gmra.mrb[192].mxu1 %vm2436_vm1, %v8272_v63  ;;  %v15587_v63 = vld [vmem:[%s17669_s18 + $0x18] sm:$0xff]  }
0x1104   : > { %14558 = vmatpush3.bf16.msra.mxu1 %v15574_v33  ;;  %14565 = vmatprep.mubr.msk.bf16.mxu1 %vm15745_vm2, %v15744_v45  ;;  %v15596_v33 = vld [vmem:[%s17669_s18 + $0x78] sm:$0xff]  }
0x1105   : > { %14559 = vmatprep.subr.bf16.mxu1 %v15744_v45 }
0x1108   : > { %14560 = vmatpush3.bf16.msra.mxu1 %v15575_v36  ;;  %v15597_v36 = vld [vmem:[%s17669_s18 + $0x88] sm:$0xff]  }
0x1109   : > { %14561 = vmatprep.subr.bf16.mxu1 %v15744_v45 }
0x110c   : > { %14562 = vmatpush3.bf16.msra.mxu1 %v15576_v47  ;;  %v15598_v47 = vld [vmem:[%s17669_s18 + $0x90] sm:$0xff]  }
0x110d   : > { %14563 = vmatprep.subr.bf16.mxu1 %v15744_v45 }
0x1110   : > { %14564 = vmatpush3.bf16.msra.mxu1 %v15577_v1  ;;  %v15599_v1 = vld [vmem:[%s17669_s18 + $0x98] sm:$0xff]  }
0x1111   : > { %14581 = vmatprep.subr.bf16.mxu1 %v15744_v45 }
0x1113   : > { %14566 = vmatmul.mubr.msk.bf16.vlgmr.msra.gmra.mrb[192].mxu1 %vm2436_vm1, %v8404_v42  ;;  %v15592_v42 = vld [vmem:[%s17669_s18 + $0x60] sm:$0xff]  }
0x1114   : > { %14582 = vmatpush3.bf16.msra.mxu1 %v15578_v27  ;;  %14585 = vmatprep.mubr.msk.bf16.mxu1 %vm15745_vm2, %v15744_v45 }
0x1115   : > { %14583 = vmatprep.subr.bf16.mxu1 %v15744_v45 }
0x1118   : > { %14584 = vmatpush3.bf16.msra.mxu1 %v15579_v48 }
0x1119   : > { %14649 = vmatprep.subr.bf16.mxu1 %v15744_v45 }
0x111f   : > { %14586 = vmatmul.mubr.msk.bf16.vlgmr.msra.gmra.mrb[192].mxu1 %vm1057_vm0, %v8544_v24 }
0x1120   : > { %14657 = vmatprep.mubr.msk.bf16.mxu1 %vm15745_vm2, %v15744_v45  ;;  %14650 = vmatpush3.bf16.msra.mxu1 %v15592_v42 }
0x1121   : > { %14651 = vmatprep.subr.bf16.mxu1 %v15744_v45 }
0x1124   : > { %14652 = vmatpush3.bf16.msra.mxu1 %v15593_v12 }
0x1125   : > { %14653 = vmatprep.subr.bf16.mxu1 %v15744_v45 }
0x1128   : > { %14654 = vmatpush3.bf16.msra.mxu1 %v15594_v15 }
0x1129   : > { %14655 = vmatprep.subr.bf16.mxu1 %v15744_v45 }
0x112c   : > { %14656 = vmatpush3.bf16.msra.mxu1 %v15596_v33 }
0x112d   : > { %14679 = vmatprep.subr.bf16.mxu1 %v15744_v45 }
0x11f2   : > { %v8605_v17 = vpop.f32.mrb[192].mxu1 }
0x11f3   : > { %v15040_v55 = vadd.f32 %v15039_v26, %v8605_v17  ;;  %v14587_v8 = vpop.f32.mrb[193].mxu1 }
0x11f4   : > { %v8608_v57 = vpop.f32.mrb[194].mxu1 }
0x11f5   : > { %v15042_v16 = vadd.f32 %v15039_v26, %v8608_v57  ;;  %v14588_v34 = vpop.f32.mrb[195].mxu1  ;;  %v8614_v29 = vmax.f32 %v15040_v55, 0.0 }
0x11f7   : > { %v8615_v13 = vmax.f32 %v15042_v16, 0.0 }
0x11f9   : > { %v17196_v14 = vpack.c.bf16 %v8615_v13, %v8614_v29  ;;  %v12429_v29 = vld [vmem:[%s17668_s16 + $0xa] sm:$0x3] }
0x11fb   : > { %14590 = vmatpush3.bf16.msra.mxu0 %v17196_v14 }
0x11fc   : > { %14595 = vmatprep.subr.bf16.mxu0 %v15744_v45 }
0x11fe   : > { %14592 = vmatmul.mubr.msk.bf16.vlgmr.msra.gmra.mrb[0].mxu0 %vm7308_vm3, %v8617_v43 }
0x11ff   : > { %14596 = vmatpush3.bf16.msra.mxu0 %v17196_v14  ;;  %14597 = vmatprep.mubr.msk.bf16.mxu0 %vm15745_vm2, %v15744_v45 }
0x1200   : > { %14601 = vmatprep.subr.bf16.mxu0 %v15744_v45 }
0x1206   : > { %14598 = vmatmul.mubr.msk.bf16.vlgmr.msra.gmra.mrb[4].mxu0 %vm7308_vm3, %v12364_v41  ;;  %v15600_v41 = vld [vmem:[%s17669_s18 + $0xa0] sm:$0xff]  }
0x1207   : > { %14602 = vmatpush3.bf16.msra.mxu0 %v15580_v18  ;;  %14609 = vmatprep.mubr.msk.bf16.mxu0 %vm15745_vm2, %v15744_v45 }
0x1208   : > { %14603 = vmatprep.subr.bf16.mxu0 %v15744_v45 }
0x120b   : > { %14604 = vmatpush3.bf16.msra.mxu0 %v15581_v39 }
0x120c   : > { %14605 = vmatprep.subr.bf16.mxu0 %v15744_v45 }
0x120f   : > { %14606 = vmatpush3.bf16.msra.mxu0 %v15582_v50  ;;  %v15601_v50 = vld [vmem:[%s17669_s18 + $0xa8] sm:$0xff]  }
0x1210   : > { %14607 = vmatprep.subr.bf16.mxu0 %v15744_v45 }
0x1213   : > { %14608 = vmatpush3.bf16.msra.mxu0 %v15583_v44  ;;  %v12444_v44 = vld [vmem:[%s17668_s16 + $0xc] sm:$0x3] }
0x1214   : > { %14613 = vmatprep.subr.bf16.mxu0 %v15744_v45 }
0x12d1   : > { %v8655_v46 = vpop.f32.mrb[0].mxu0 }
0x12d2   : > { %v14593_v56 = vpop.f32.mrb[1].mxu0  ;;  %v8661_v5 = vpack.c.bf16 %v8655_v46, %v8655_v46  ;;  %v15602_v46 = vld [vmem:[%s17669_s18 + $0xb0] sm:$0xff]  }
0x12d3   : > { %v8658_v51 = vpop.f32.mrb[2].mxu0  ;;  %v15603_v56 = vld [vmem:[%s17669_s18 + $0xc0] sm:$0xff]  }
0x12d4   : > { %v14594_v40 = vpop.f32.mrb[3].mxu0  ;;  %v15604_v51 = vld [vmem:[%s17669_s18 + $0xb8] sm:$0xff]  }
0x12d5   : > { %v15605_v40 = vld [vmem:[%s17669_s18 + $0xc8] sm:$0xff]  }
0x12d9   : > { %v8709_v54 = vpop.f32.mrb[4].mxu0 }
0x12da   : > { %v8715_v59 = vpack.c.bf16 %v8709_v54, %v8709_v54  ;;  %v14599_v6 = vpop.f32.mrb[5].mxu0  ;;  %v15606_v54 = vld [vmem:[%s17669_s18 + $0xd0] sm:$0xff]  }
0x12db   : > { %v8712_v60 = vpop.f32.mrb[6].mxu0 }
0x12dc   : > { %v14600_v61 = vpop.f32.mrb[7].mxu0  ;;  %14610 = vmatmul.mubr.msk.bf16.vlgmr.msra.gmra.mrb[8].mxu0 %vm2436_vm1, %v8715_v59 }
0x12dd   : > { %14614 = vmatpush3.bf16.msra.mxu0 %v15584_v58  ;;  %14621 = vmatprep.mubr.msk.bf16.mxu0 %vm15745_vm2, %v15744_v45  ;;  %v15607_v58 = vld [vmem:[%s17669_s18 + $0xd8] sm:$0xff]  }
0x12de   : > { %14615 = vmatprep.subr.bf16.mxu0 %v15744_v45 }
0x12e1   : > { %14616 = vmatpush3.bf16.msra.mxu0 %v15585_v62 }
0x12e2   : > { %14617 = vmatprep.subr.bf16.mxu0 %v15744_v45 }
0x12e5   : > { %14618 = vmatpush3.bf16.msra.mxu0 %v15586_v0 }
0x12e6   : > { %14619 = vmatprep.subr.bf16.mxu0 %v15744_v45 }
0x12e9   : > { %14620 = vmatpush3.bf16.msra.mxu0 %v15587_v63 }
0x12ea   : > { %14625 = vmatprep.subr.bf16.mxu0 %v15744_v45 }
0x12ec   : > { %14622 = vmatmul.mubr.msk.bf16.vlgmr.msra.gmra.mrb[12].mxu0 %vm2436_vm1, %v8661_v5 }
0x12ed   : > { %14626 = vmatpush3.bf16.msra.mxu0 %v17196_v14  ;;  %14627 = vmatprep.mubr.msk.bf16.mxu0 %vm15745_vm2, %v15744_v45 }
0x12ee   : > { %14631 = vmatprep.subr.bf16.mxu0 %v15744_v45 }
0x12f4   : > { %14628 = vmatmul.mubr.msk.bf16.vlgmr.msra.gmra.mrb[16].mxu0 %vm7308_vm3, %v12384_v25 }
0x12f5   : > { %14639 = vmatprep.mubr.msk.bf16.mxu0 %vm15745_vm2, %v15744_v45  ;;  %14632 = vmatpush3.bf16.msra.mxu0 %v15588_v53 }
0x12f6   : > { %14633 = vmatprep.subr.bf16.mxu0 %v15744_v45 }
0x12f9   : > { %14634 = vmatpush3.bf16.msra.mxu0 %v15589_v4 }
0x12fa   : > { %14635 = vmatprep.subr.bf16.mxu0 %v15744_v45 }
0x12fd   : > { %14636 = vmatpush3.bf16.msra.mxu0 %v15590_v31 }
0x12fe   : > { %14637 = vmatprep.subr.bf16.mxu0 %v15744_v45 }
0x1301   : > { %14638 = vmatpush3.bf16.msra.mxu0 %v15591_v9 }
0x1302   : > { %14643 = vmatprep.subr.bf16.mxu0 %v15744_v45 }
0x13af   : > { %v8786_v19 = vpop.f32.mrb[8].mxu0 }
0x13b0   : > { %v14611_v21 = vpop.f32.mrb[9].mxu0 }
0x13b1   : > { %v8789_v37 = vpop.f32.mrb[10].mxu0  ;;  %v12459_v21 = vld [vmem:[%s17668_s16 + $0xe] sm:$0x3] }
0x13b2   : > { %v14612_v38 = vpop.f32.mrb[11].mxu0 }
0x13bf   : > { %v8853_v7 = vpop.f32.mrb[12].mxu0 }
0x13c0   : > { %v8854_v11 = vadd.f32 %v8853_v7, %v8786_v19  ;;  %v14623_v22 = vpop.f32.mrb[13].mxu0  ;;  %v15608_v7 = vld [vmem:[%s17669_s18 + $0xe0] sm:$0xff]  }
0x13c1   : > { %v8856_v24 = vpop.f32.mrb[14].mxu0 }
0x13c2   : > { %v14624_v52 = vpop.f32.mrb[15].mxu0  ;;  %v12474_v24 = vld [vmem:[%s17668_s16 + $0x10] sm:$0x3] }
0x13c3   : > { %v15609_v52 = vld [vmem:[%s17669_s18 + $0xe8] sm:$0xff]  }
0x13c7   : > { %v8898_v49 = vpop.f32.mrb[16].mxu0 }
0x13c8   : > { %v8904_v10 = vpack.c.bf16 %v8898_v49, %v8898_v49  ;;  %v14629_v28 = vpop.f32.mrb[17].mxu0  ;;  %v15610_v49 = vld [vmem:[%s17669_s18 + $0xf0] sm:$0xff]  }
0x13c9   : > { %v8901_v2 = vpop.f32.mrb[18].mxu0  ;;  %v15612_v28 = vld [vmem:[%s17669_s18 + $0xf8] sm:$0xff]  }
0x13ca   : > { %v14630_v20 = vpop.f32.mrb[19].mxu0  ;;  %14640 = vmatmul.mubr.msk.bf16.vlgmr.msra.gmra.mrb[20].mxu0 %vm2436_vm1, %v8904_v10  ;;  %v15611_v10 = vld [vmem:[%s17669_s18 + $0x100] sm:$0xff]   ;;  %v15613_v2 = vld [vmem:[%s17669_s18 + $0x108] sm:$0xff]  }
0x13cb   : > { %14644 = vmatpush3.bf16.msra.mxu0 %v17196_v14  ;;  %14645 = vmatprep.mubr.msk.bf16.mxu0 %vm15745_vm2, %v15744_v45  ;;  %v15614_v20 = vld [vmem:[%s17669_s18 + $0x110] sm:$0xff]  }
0x13cc   : > { %14661 = vmatprep.subr.bf16.mxu0 %v15744_v45 }
0x13d2   : > { %14646 = vmatmul.mubr.msk.bf16.vlgmr.msra.gmra.mrb[24].mxu0 %vm7308_vm3, %v12399_v30  ;;  %v15615_v30 = vld [vmem:[%s17669_s18 + $0x118] sm:$0xff]  }
0x13d3   : > { %14662 = vmatpush3.bf16.msra.mxu0 %v17196_v14  ;;  %14663 = vmatprep.mubr.msk.bf16.mxu0 %vm15745_vm2, %v15744_v45 }
0x13d4   : > { %14667 = vmatprep.subr.bf16.mxu0 %v15744_v45 }
0x13da   : > { %14664 = vmatmul.mubr.msk.bf16.vlgmr.msra.gmra.mrb[28].mxu0 %vm7308_vm3, %v12414_v3 }
0x13db   : > { %14675 = vmatprep.mubr.msk.bf16.mxu0 %vm15745_vm2, %v15744_v45  ;;  %14668 = vmatpush3.bf16.msra.mxu0 %v15595_v23 }
0x13dc   : > { %14669 = vmatprep.subr.bf16.mxu0 %v15744_v45 }
0x13df   : > { %14670 = vmatpush3.bf16.msra.mxu0 %v15597_v36 }
0x13e0   : > { %14671 = vmatprep.subr.bf16.mxu0 %v15744_v45 }
0x13e3   : > { %14672 = vmatpush3.bf16.msra.mxu0 %v15598_v47 }
0x13e4   : > { %14673 = vmatprep.subr.bf16.mxu0 %v15744_v45 }
0x13e7   : > { %14674 = vmatpush3.bf16.msra.mxu0 %v15599_v1 }
0x13e8   : > { %14697 = vmatprep.subr.bf16.mxu0 %v15744_v45 }
0x149d   : > { %v8975_v27 = vpop.f32.mrb[20].mxu0 }
0x149e   : > { %v8981_v48 = vadd.f32 %v8975_v27, %v8854_v11  ;;  %v14641_v32 = vpop.f32.mrb[21].mxu0 }
0x149f   : > { %v8978_v35 = vpop.f32.mrb[22].mxu0 }
0x14a0   : > { %v14642_v26 = vpop.f32.mrb[23].mxu0 }
0x14a5   : > { %v9021_v17 = vpop.f32.mrb[24].mxu0 }
0x14a6   : > { %v9027_v55 = vpack.c.bf16 %v9021_v17, %v9021_v17  ;;  %v14647_v8 = vpop.f32.mrb[25].mxu0 }
0x14a7   : > { %v9024_v57 = vpop.f32.mrb[26].mxu0 }
0x14a8   : > { %v14648_v16 = vpop.f32.mrb[27].mxu0  ;;  %14658 = vmatmul.mubr.msk.bf16.vlgmr.msra.gmra.mrb[196].mxu1 %vm2436_vm1, %v9027_v55 }
0x14a9   : > { %14680 = vmatpush3.bf16.msra.mxu1 %v17196_v14  ;;  %14681 = vmatprep.mubr.msk.bf16.mxu1 %vm15745_vm2, %v15744_v45 }
0x14aa   : > { %14685 = vmatprep.subr.bf16.mxu1 %v15744_v45 }
0x14ad   : > { %v9144_v34 = vpop.f32.mrb[28].mxu0 }
0x14ae   : > { %v9150_v13 = vpack.c.bf16 %v9144_v34, %v9144_v34  ;;  %v14665_v43 = vpop.f32.mrb[29].mxu0 }
0x14af   : > { %v9147_v18 = vpop.f32.mrb[30].mxu0  ;;  %v15616_v43 = vld [vmem:[%s17670_s23 + $0x40] sm:$0xff]  }
0x14b0   : > { %v14666_v39 = vpop.f32.mrb[31].mxu0  ;;  %14676 = vmatmul.mubr.msk.bf16.vlgmr.msra.gmra.mrb[32].mxu0 %vm2436_vm1, %v9150_v13  ;;  %14682 = vmatmul.mubr.msk.bf16.vlgmr.msra.gmra.mrb[200].mxu1 %vm7308_vm3, %v12429_v29  ;;  %v15618_v18 = vld [vmem:[%s17670_s23 + $0x50] sm:$0xff]  }
0x14b1   : > { %14698 = vmatpush3.bf16.msra.mxu0 %v17196_v14  ;;  %14699 = vmatprep.mubr.msk.bf16.mxu0 %vm15745_vm2, %v15744_v45  ;;  %v15619_v39 = vld [vmem:[%s17670_s23 + $0x58] sm:$0xff]  }
0x14b2   : > { %14686 = vmatpush3.bf16.msra.mxu1 %v15600_v41  ;;  %14703 = vmatprep.subr.bf16.mxu0 %v15744_v45  ;;  %v15617_v41 = vld [vmem:[%s17670_s23 + $0x48] sm:$0xff]  }
0x14b3   : > { %14687 = vmatprep.subr.bf16.mxu1 %v15744_v45  ;;  %14693 = vmatprep.mubr.msk.bf16.mxu1 %vm15745_vm2, %v15744_v45 }
0x14b6   : > { %14688 = vmatpush3.bf16.msra.mxu1 %v15601_v50  ;;  %v15620_v50 = vld [vmem:[%s17670_s23 + $0x60] sm:$0xff]  }
0x14b7   : > { %14689 = vmatprep.subr.bf16.mxu1 %v15744_v45 }
0x14b8   : > { %14700 = vmatmul.mubr.msk.bf16.vlgmr.msra.gmra.mrb[36].mxu0 %vm7308_vm3, %v12444_v44  ;;  %v15621_v44 = vld [vmem:[%s17670_s23 + $0x68] sm:$0xff]  }
0x14b9   : > { %14711 = vmatprep.mubr.msk.bf16.mxu0 %vm15745_vm2, %v15744_v45  ;;  %14704 = vmatpush3.bf16.msra.mxu0 %v15603_v56 }
0x14ba   : > { %14690 = vmatpush3.bf16.msra.mxu1 %v15602_v46  ;;  %14705 = vmatprep.subr.bf16.mxu0 %v15744_v45 }
0x14bb   : > { %14691 = vmatprep.subr.bf16.mxu1 %v15744_v45 }
0x14bd   : > { %14706 = vmatpush3.bf16.msra.mxu0 %v15605_v40 }
0x14be   : > { %14692 = vmatpush3.bf16.msra.mxu1 %v15604_v51  ;;  %14707 = vmatprep.subr.bf16.mxu0 %v15744_v45 }
0x14bf   : > { %14715 = vmatprep.subr.bf16.mxu1 %v15744_v45 }
0x14c1   : > { %14708 = vmatpush3.bf16.msra.mxu0 %v15606_v54 }
0x14c2   : > { %14709 = vmatprep.subr.bf16.mxu0 %v15744_v45 }
0x14c5   : > { %14710 = vmatpush3.bf16.msra.mxu0 %v15607_v58 }
0x14c6   : > { %14733 = vmatprep.subr.bf16.mxu0 %v15744_v45 }
0x157b   : > { %v9098_v59 = vpop.f32.mrb[196].mxu1 }
0x157c   : > { %v9104_v6 = vadd.f32 %v9098_v59, %v8981_v48  ;;  %v14659_v60 = vpop.f32.mrb[197].mxu1  ;;  %v12489_v59 = vld [vmem:[%s17671_s22] ss:$0 sm:$0xff]  ;;  %s984_s22 = scalar_lea.vmem %s15912_s27, %s17679_s1 }
0x157d   : > { %v9101_v61 = vpop.f32.mrb[198].mxu1 }
0x157e   : > { %v14660_v62 = vpop.f32.mrb[199].mxu1 }
0x1583   : > { %v9221_v0 = vpop.f32.mrb[32].mxu0  ;;  %v9267_v63 = vpop.f32.mrb[200].mxu1 }
0x1584   : > { %v9227_v5 = vadd.f32 %v9221_v0, %v9104_v6  ;;  %v9273_v25 = vpack.c.bf16 %v9267_v63, %v9267_v63  ;;  %v14677_v53 = vpop.f32.mrb[33].mxu0  ;;  %v14683_v4 = vpop.f32.mrb[201].mxu1 }
0x1585   : > { %v9224_v31 = vpop.f32.mrb[34].mxu0  ;;  %v9270_v9 = vpop.f32.mrb[202].mxu1  ;;  %v9730_v53 = vld [vmem:[%s17672_s26] sm:$0x3]  ;;  %v12491_v4 = vld [vmem:[%s17672_s26 + $0x2] sm:$0x3] }
0x1586   : > { %v14678_v42 = vpop.f32.mrb[35].mxu0  ;;  %14694 = vmatmul.mubr.msk.bf16.vlgmr.msra.gmra.mrb[204].mxu1 %vm2436_vm1, %v9273_v25  ;;  %v14684_v12 = vpop.f32.mrb[203].mxu1  ;;  %v12525_v31 = vld [vmem:[%s17672_s26 + $0x4] sm:$0x3]  ;;  %v12551_v9 = vld [vmem:[%s17672_s26 + $0x6] sm:$0x3] }
0x1587   : > { %14716 = vmatpush3.bf16.msra.mxu1 %v17196_v14  ;;  %14717 = vmatprep.mubr.msk.bf16.mxu1 %vm15745_vm2, %v15744_v45  ;;  %v12577_v42 = vld [vmem:[%s17672_s26 + $0x8] sm:$0x3]  ;;  %v12603_v12 = vld [vmem:[%s17672_s26 + $0xa] sm:$0x3] }
0x1588   : > { %14721 = vmatprep.subr.bf16.mxu1 %v15744_v45 }
0x158b   : > { %v9390_v19 = vpop.f32.mrb[36].mxu0 }
0x158c   : > { %v9396_v37 = vpack.c.bf16 %v9390_v19, %v9390_v19  ;;  %v14701_v38 = vpop.f32.mrb[37].mxu0  ;;  %v12629_v19 = vld [vmem:[%s17672_s26 + $0xc] sm:$0x3] }
0x158d   : > { %v9393_v11 = vpop.f32.mrb[38].mxu0  ;;  %v15622_v38 = vld [vmem:[%s17670_s23 + $0x70] sm:$0xff]  }
0x158e   : > { %v14702_v22 = vpop.f32.mrb[39].mxu0  ;;  %14712 = vmatmul.mubr.msk.bf16.vlgmr.msra.gmra.mrb[40].mxu0 %vm2436_vm1, %v9396_v37  ;;  %14718 = vmatmul.mubr.msk.bf16.vlgmr.msra.gmra.mrb[208].mxu1 %vm7308_vm3, %v12459_v21  ;;  %v12655_v21 = vld [vmem:[%s17672_s26 + $0xe] sm:$0x3]  ;;  %v12681_v37 = vld [vmem:[%s17672_s26 + $0x10] sm:$0x3] }
0x158f   : > { %14734 = vmatpush3.bf16.msra.mxu0 %v17196_v14  ;;  %14735 = vmatprep.mubr.msk.bf16.mxu0 %vm15745_vm2, %v15744_v45  ;;  %v11107_v11 = vld [vmem:[%s17673_s0] sm:$0x3] }
0x1590   : > { %14722 = vmatpush3.bf16.msra.mxu1 %v15608_v7  ;;  %14739 = vmatprep.subr.bf16.mxu0 %v15744_v45  ;;  %v15623_v7 = vld [vmem:[%s17670_s23 + $0x78] sm:$0xff]  }
0x1591   : > { %14723 = vmatprep.subr.bf16.mxu1 %v15744_v45  ;;  %14729 = vmatprep.mubr.msk.bf16.mxu1 %vm15745_vm2, %v15744_v45 }
0x1594   : > { %14724 = vmatpush3.bf16.msra.mxu1 %v15609_v52 }
0x1595   : > { %14725 = vmatprep.subr.bf16.mxu1 %v15744_v45 }
0x1596   : > { %14736 = vmatmul.mubr.msk.bf16.vlgmr.msra.gmra.mrb[44].mxu0 %vm7308_vm3, %v12474_v24 }
0x1597   : > { %14747 = vmatprep.mubr.msk.bf16.mxu0 %vm15745_vm2, %v15744_v45  ;;  %14740 = vmatpush3.bf16.msra.mxu0 %v15611_v10  ;;  %v15624_v10 = vld [vmem:[%s17670_s23] sm:$0xff]  }
0x1598   : > { %14741 = vmatprep.subr.bf16.mxu0 %v15744_v45  ;;  %14726 = vmatpush3.bf16.msra.mxu1 %v15610_v49 }
0x1599   : > { %14727 = vmatprep.subr.bf16.mxu1 %v15744_v45 }
0x159b   : > { %14742 = vmatpush3.bf16.msra.mxu0 %v15613_v2 }
0x159c   : > { %14728 = vmatpush3.bf16.msra.mxu1 %v15612_v28  ;;  %14743 = vmatprep.subr.bf16.mxu0 %v15744_v45 }
0x159d   : > { %14751 = vmatprep.subr.bf16.mxu1 %v15744_v45 }
0x159f   : > { %14744 = vmatpush3.bf16.msra.mxu0 %v15614_v20 }
0x15a0   : > { %14745 = vmatprep.subr.bf16.mxu0 %v15744_v45 }
0x15a3   : > { %14746 = vmatpush3.bf16.msra.mxu0 %v15615_v30 }
0x15a4   : > { %14763 = vmatprep.subr.bf16.mxu0 %v15744_v45 }
0x1659   : > { %v9344_v3 = vpop.f32.mrb[204].mxu1 }
0x165a   : > { %v9350_v15 = vadd.f32 %v9344_v3, %v9227_v5  ;;  %v14695_v23 = vpop.f32.mrb[205].mxu1  ;;  %v15625_v3 = vld [vmem:[%s17670_s23 + $0x8] sm:$0xff]  }
0x165b   : > { %v9347_v33 = vpop.f32.mrb[206].mxu1 }
0x165c   : > { %v14696_v36 = vpop.f32.mrb[207].mxu1 }
0x1661   : > { %v9467_v47 = vpop.f32.mrb[40].mxu0  ;;  %v9513_v1 = vpop.f32.mrb[208].mxu1 }
0x1662   : > { %v9473_v27 = vadd.f32 %v9467_v47, %v9350_v15  ;;  %v9519_v48 = vpack.c.bf16 %v9513_v1, %v9513_v1  ;;  %v14713_v32 = vpop.f32.mrb[41].mxu0  ;;  %v14719_v35 = vpop.f32.mrb[209].mxu1  ;;  %v15626_v15 = vld [vmem:[%s17670_s23 + $0x10] sm:$0xff]   ;;  %v15627_v1 = vld [vmem:[%s17670_s23 + $0x18] sm:$0xff]  }
0x1663   : > { %v9470_v26 = vpop.f32.mrb[42].mxu0  ;;  %v9516_v17 = vpop.f32.mrb[210].mxu1 }
0x1664   : > { %v14714_v55 = vpop.f32.mrb[43].mxu0  ;;  %14730 = vmatmul.mubr.msk.bf16.vlgmr.msra.gmra.mrb[212].mxu1 %vm2436_vm1, %v9519_v48  ;;  %v14720_v8 = vpop.f32.mrb[211].mxu1  ;;  %v15629_v17 = vld [vmem:[%s17670_s23 + $0x28] sm:$0xff]  }
0x1665   : > { %14753 = vmatprep.mubr.msk.bf16.mxu1 %vm15745_vm2, %v15744_v45  ;;  %v15630_v55 = vld [vmem:[%s17670_s23 + $0x30] sm:$0xff]  }
0x1669   : > { %v9636_v57 = vpop.f32.mrb[44].mxu0 }
0x166a   : > { %v9642_v16 = vpack.c.bf16 %v9636_v57, %v9636_v57  ;;  %v14737_v34 = vpop.f32.mrb[45].mxu0 }
0x166b   : > { %v9639_v29 = vpop.f32.mrb[46].mxu0 }
0x166c   : > { %v14738_v13 = vpop.f32.mrb[47].mxu0  ;;  %14748 = vmatmul.mubr.msk.bf16.vlgmr.msra.gmra.mrb[48].mxu0 %vm2436_vm1, %v9642_v16  ;;  %v15631_v29 = vld [vmem:[%s17670_s23 + $0x38] sm:$0xff]  }
0x166d   : > { %14779 = vmatprep.mubr.msk.bf16.mxu0 %vm15745_vm2, %v15744_v45  ;;  %14764 = vmatpush3.bf16.msra.mxu0 %v15616_v43  ;;  %v15632_v13 = vld [vmem:[%s17670_s23 + $0x80] sm:$0xff]  }
0x166e   : > { %14765 = vmatprep.subr.bf16.mxu0 %v15744_v45 }
0x1671   : > { %14766 = vmatpush3.bf16.msra.mxu0 %v15617_v41 }
0x1672   : > { %14767 = vmatprep.subr.bf16.mxu0 %v15744_v45 }
0x1675   : > { %14768 = vmatpush3.bf16.msra.mxu0 %v15618_v18 }
0x1676   : > { %14769 = vmatprep.subr.bf16.mxu0 %v15744_v45 }
0x1679   : > { %14770 = vmatpush3.bf16.msra.mxu0 %v15619_v39 }
0x167a   : > { %14771 = vmatprep.subr.bf16.mxu0 %v15744_v45 }
0x167d   : > { %14772 = vmatpush3.bf16.msra.mxu0 %v15620_v50 }
0x167e   : > { %14773 = vmatprep.subr.bf16.mxu0 %v15744_v45 }
0x1681   : > { %14774 = vmatpush3.bf16.msra.mxu0 %v15621_v44  ;;  %v15633_v44 = vld [vmem:[%s17670_s23 + $0x88] sm:$0xff]  }
0x1682   : > { %14775 = vmatprep.subr.bf16.mxu0 %v15744_v45 }
0x1685   : > { %14776 = vmatpush3.bf16.msra.mxu0 %v15622_v38 }
0x1686   : > { %14777 = vmatprep.subr.bf16.mxu0 %v15744_v45 }
0x1689   : > { %14778 = vmatpush3.bf16.msra.mxu0 %v15623_v7  ;;  %v15649_v7 = vld [vmem:[%s17670_s23 + $0x108] sm:$0xff]  }
0x168a   : > { %14783 = vmatprep.subr.bf16.mxu0 %v15744_v45 }
0x1737   : > { %v9590_v46 = vpop.f32.mrb[212].mxu1 }
0x1738   : > { %v9596_v56 = vadd.f32 %v9590_v46, %v9473_v27  ;;  %v14731_v51 = vpop.f32.mrb[213].mxu1  ;;  %v15628_v27 = vld [vmem:[%s17670_s23 + $0x20] sm:$0xff]   ;;  %v15634_v46 = vld [vmem:[%s17670_s23 + $0x90] sm:$0xff]  }
0x1739   : > { %v9593_v40 = vpop.f32.mrb[214].mxu1  ;;  %v15636_v51 = vld [vmem:[%s17670_s23 + $0xa0] sm:$0xff]  }
0x173a   : > { %v14732_v54 = vpop.f32.mrb[215].mxu1  ;;  %v15637_v40 = vld [vmem:[%s17670_s23 + $0xa8] sm:$0xff]  }
0x173b   : > { %v15638_v54 = vld [vmem:[%s17670_s23 + $0xb0] sm:$0xff]  }
0x173f   : > { %v9713_v58 = vpop.f32.mrb[48].mxu0 }
0x1740   : > { %v9719_v6 = vadd.f32 %v9713_v58, %v9596_v56  ;;  %v14749_v60 = vpop.f32.mrb[49].mxu0  ;;  %v15635_v56 = vld [vmem:[%s17670_s23 + $0x98] sm:$0xff]  }
0x1741   : > { %v9716_v61 = vpop.f32.mrb[50].mxu0  ;;  %v15639_v58 = vld [vmem:[%s17670_s23 + $0xb8] sm:$0xff]  }
0x1742   : > { %v9727_v62 = vadd.f32 %v12489_v59, %v9719_v6  ;;  %v14750_v0 = vpop.f32.mrb[51].mxu0  ;;  %v15640_v61 = vld [vmem:[%s17670_s23 + $0xc0] sm:$0xff]  }
0x1744   : > { %v9728_v63 = vmax.f32 %v9727_v62, 0.0 }
0x1746   : > { %v9729_v5 = vpack.c.bf16 %v9728_v63, %v9728_v63  ;;  %v15641_v63 = vld [vmem:[%s17670_s23 + $0xc8] sm:$0xff]  }
0x1748   : > { %v9737_v25 = vsel %vm9735_vm4, %v9729_v5, 0  ;;  %v15642_v5 = vld [vmem:[%s17670_s23 + $0xd0] sm:$0xff]  }
0x1749   : > { %14752 = vmatpush3.bf16.msra.mxu1 %v9737_v25 }
0x174a   : > { %14757 = vmatprep.subr.bf16.mxu1 %v15744_v45 }
0x174c   : > { %14754 = vmatmul.mubr.msk.bf16.vlgmr.msra.gmra.mrb[216].mxu1 %vm9731_vm5, %v9730_v53  ;;  %v15644_v53 = vld [vmem:[%s17670_s23 + $0xe0] sm:$0xff]  }
0x174d   : > { %14758 = vmatpush3.bf16.msra.mxu1 %v9737_v25  ;;  %14759 = vmatprep.mubr.msk.bf16.mxu1 %vm15745_vm2, %v15744_v45 }
0x174e   : > { %14803 = vmatprep.subr.bf16.mxu1 %v15744_v45 }
0x1754   : > { %14760 = vmatmul.mubr.msk.bf16.vlgmr.msra.gmra.mrb[220].mxu1 %vm9731_vm5, %v12491_v4  ;;  %v15645_v4 = vld [vmem:[%s17670_s23 + $0xe8] sm:$0xff]  }
0x1755   : > { %14804 = vmatpush3.bf16.msra.mxu1 %v9737_v25  ;;  %14805 = vmatprep.mubr.msk.bf16.mxu1 %vm15745_vm2, %v15744_v45 }
0x1756   : > { %14829 = vmatprep.subr.bf16.mxu1 %v15744_v45 }
0x175c   : > { %14806 = vmatmul.mubr.msk.bf16.vlgmr.msra.gmra.mrb[224].mxu1 %vm9731_vm5, %v12525_v31  ;;  %v15646_v31 = vld [vmem:[%s17670_s23 + $0xf0] sm:$0xff]  }
0x175d   : > { %14830 = vmatpush3.bf16.msra.mxu1 %v9737_v25  ;;  %14831 = vmatprep.mubr.msk.bf16.mxu1 %vm15745_vm2, %v15744_v45 }
0x175e   : > { %14855 = vmatprep.subr.bf16.mxu1 %v15744_v45 }
0x1764   : > { %14832 = vmatmul.mubr.msk.bf16.vlgmr.msra.gmra.mrb[228].mxu1 %vm9731_vm5, %v12551_v9  ;;  %v15647_v9 = vld [vmem:[%s17670_s23 + $0xf8] sm:$0xff]  }
0x1765   : > { %14856 = vmatpush3.bf16.msra.mxu1 %v9737_v25  ;;  %14857 = vmatprep.mubr.msk.bf16.mxu1 %vm15745_vm2, %v15744_v45 }
0x1766   : > { %14881 = vmatprep.subr.bf16.mxu1 %v15744_v45 }
0x176c   : > { %14858 = vmatmul.mubr.msk.bf16.vlgmr.msra.gmra.mrb[232].mxu1 %vm9731_vm5, %v12577_v42 }
0x176d   : > { %14882 = vmatpush3.bf16.msra.mxu1 %v9737_v25  ;;  %14883 = vmatprep.mubr.msk.bf16.mxu1 %vm15745_vm2, %v15744_v45 }
0x176e   : > { %14907 = vmatprep.subr.bf16.mxu1 %v15744_v45 }
0x1774   : > { %14884 = vmatmul.mubr.msk.bf16.vlgmr.msra.gmra.mrb[236].mxu1 %vm9731_vm5, %v12603_v12 }
0x1775   : > { %14908 = vmatpush3.bf16.msra.mxu1 %v9737_v25  ;;  %14909 = vmatprep.mubr.msk.bf16.mxu1 %vm15745_vm2, %v15744_v45 }
0x1776   : > { %14933 = vmatprep.subr.bf16.mxu1 %v15744_v45 }
0x177c   : > { %14910 = vmatmul.mubr.msk.bf16.vlgmr.msra.gmra.mrb[240].mxu1 %vm9731_vm5, %v12629_v19 }
0x177d   : > { %14934 = vmatpush3.bf16.msra.mxu1 %v9737_v25  ;;  %14935 = vmatprep.mubr.msk.bf16.mxu1 %vm15745_vm2, %v15744_v45 }
0x177e   : > { %14959 = vmatprep.subr.bf16.mxu1 %v15744_v45 }
0x1784   : > { %14936 = vmatmul.mubr.msk.bf16.vlgmr.msra.gmra.mrb[244].mxu1 %vm9731_vm5, %v12655_v21  ;;  %v15648_v21 = vld [vmem:[%s17670_s23 + $0x100] sm:$0xff]  }
0x1785   : > { %14960 = vmatpush3.bf16.msra.mxu1 %v9737_v25  ;;  %14961 = vmatprep.mubr.msk.bf16.mxu1 %vm15745_vm2, %v15744_v45  ;;  %v15643_v25 = vld [vmem:[%s17670_s23 + $0xd8] sm:$0xff]  }
0x1786   : > { %14985 = vmatprep.subr.bf16.mxu1 %v15744_v45 }
0x178c   : > { %14962 = vmatmul.mubr.msk.bf16.vlgmr.msra.gmra.mrb[248].mxu1 %vm9731_vm5, %v12681_v37 }
0x178d   : > { %14986 = vmatpush3.bf16.msra.mxu1 %v17196_v14  ;;  %14987 = vmatprep.mubr.msk.bf16.mxu1 %vm15745_vm2, %v15744_v45 }
0x178e   : > { %15003 = vmatprep.subr.bf16.mxu1 %v15744_v45 }
0x1794   : > { %14988 = vmatmul.mubr.msk.bf16.vlgmr.msra.gmra.mrb[252].mxu1 %vm7308_vm3, %v11107_v11  ;;  %v15650_v11 = vld [vmem:[%s17670_s23 + $0x110] sm:$0xff]  }
0x1795   : > { %15019 = vmatprep.mubr.msk.bf16.mxu1 %vm15745_vm2, %v15744_v45 }
0x181f   : > { %v9773_v14 = vpop.f32.mrb[216].mxu1 }
0x1820   : > { %v14755_v22 = vpop.f32.mrb[217].mxu1  ;;  %v9779_v41 = vpack.c.bf16 %v9773_v14, %v9773_v14  ;;  %v15651_v14 = vld [vmem:[%s17670_s23 + $0x118] sm:$0xff]  }
0x1821   : > { %v9776_v24 = vpop.f32.mrb[218].mxu1  ;;  %v15652_v22 = vld [vmem:[%s17670_s23 + $0x120] sm:$0xff]  }
0x1822   : > { %v14756_v52 = vpop.f32.mrb[219].mxu1  ;;  %v15653_v24 = vld [vmem:[%s17670_s23 + $0x128] sm:$0xff]  }
0x1823   : > { %v15654_v52 = vld [vmem:[%s17670_s23 + $0x130] sm:$0xff]  }
0x1827   : > { %v9835_v49 = vpop.f32.mrb[220].mxu1 }
0x1828   : > { %v9841_v28 = vpack.c.bf16 %v9835_v49, %v9835_v49  ;;  %v14761_v2 = vpop.f32.mrb[221].mxu1  ;;  %v15655_v49 = vld [vmem:[%s17670_s23 + $0x138] sm:$0xff]  }
0x1829   : > { %v9838_v20 = vpop.f32.mrb[222].mxu1 }
0x182a   : > { %14780 = vmatmul.mubr.bf16.vlgmr.msra.gmra.mrb[52].mxu0 %v9841_v28  ;;  %v14762_v30 = vpop.f32.mrb[223].mxu1  ;;  %v15656_v20 = vld [vmem:[%s17670_s23 + $0x140] sm:$0xff]  }
0x182b   : > { %14784 = vmatpush3.bf16.msra.mxu0 %v15624_v10  ;;  %14799 = vmatprep.mubr.msk.bf16.mxu0 %vm15745_vm2, %v15744_v45 }
0x182c   : > { %14785 = vmatprep.subr.bf16.mxu0 %v15744_v45 }
0x182f   : > { %14786 = vmatpush3.bf16.msra.mxu0 %v15625_v3  ;;  %v17425_v23 = vpop.f32.mrb[224].mxu1 }
0x1830   : > { %14787 = vmatprep.subr.bf16.mxu0 %v15744_v45  ;;  %v14807_v33 = vpop.f32.mrb[225].mxu1  ;;  %v10080_v6 = vpack.c.bf16 %v17425_v23, %v17425_v23  ;;  %v15658_v23 = vld [vmem:[%s17670_s23 + $0x150] sm:$0xff]  }
0x1831   : > { %v10077_v36 = vpop.f32.mrb[226].mxu1  ;;  %v15659_v33 = vld [vmem:[%s17670_s23 + $0x158] sm:$0xff]  }
0x1832   : > { %v14808_v47 = vpop.f32.mrb[227].mxu1 }
0x1833   : > { %14788 = vmatpush3.bf16.msra.mxu0 %v15626_v15  ;;  %v15657_v15 = vld [vmem:[%s17670_s23 + $0x148] sm:$0xff]  }
0x1834   : > { %14789 = vmatprep.subr.bf16.mxu0 %v15744_v45 }
0x1837   : > { %14790 = vmatpush3.bf16.msra.mxu0 %v15627_v1  ;;  %v17431_v48 = vpop.f32.mrb[228].mxu1 }
0x1838   : > { %14791 = vmatprep.subr.bf16.mxu0 %v15744_v45  ;;  %v14833_v32 = vpop.f32.mrb[229].mxu1  ;;  %v10232_v12 = vpack.c.bf16 %v17431_v48, %v17431_v48 }
0x1839   : > { %v10229_v35 = vpop.f32.mrb[230].mxu1  ;;  %v15692_v32 = vld [vmem:[%s17674_s20] sm:$0xff]  }
0x183a   : > { %v14834_v26 = vpop.f32.mrb[231].mxu1  ;;  %v15661_v35 = vld [vmem:[%s17670_s23 + $0x168] sm:$0xff]   ;;  %15004 = vmatpush3.bf16.msra.mxu1 %v15692_v32 }
0x183b   : > { %14792 = vmatpush3.bf16.msra.mxu0 %v15628_v27  ;;  %v15660_v27 = vld [vmem:[%s17670_s23 + $0x160] sm:$0xff]   ;;  %v15693_v26 = vld [vmem:[%s17674_s20 + $0x8] sm:$0xff]   ;;  %15005 = vmatprep.subr.bf16.mxu1 %v15744_v45 }
0x183c   : > { %14793 = vmatprep.subr.bf16.mxu0 %v15744_v45  ;;  %v15701_v32 = vld [vmem:[%s15904_s12 + $0x8] sm:$0xff]  }
0x183e   : > { %15006 = vmatpush3.bf16.msra.mxu1 %v15693_v26  ;;  %v15703_v26 = vld [vmem:[%s15904_s12 + $0x18] sm:$0xff]  }
0x183f   : > { %14794 = vmatpush3.bf16.msra.mxu0 %v15629_v17  ;;  %v17437_v8 = vpop.f32.mrb[232].mxu1  ;;  %v15662_v17 = vld [vmem:[%s17670_s23 + $0x170] sm:$0xff]   ;;  %15007 = vmatprep.subr.bf16.mxu1 %v15744_v45 }
0x1840   : > { %14795 = vmatprep.subr.bf16.mxu0 %v15744_v45  ;;  %v14859_v57 = vpop.f32.mrb[233].mxu1  ;;  %v10384_v28 = vpack.c.bf16 %v17437_v8, %v17437_v8  ;;  %v15663_v8 = vld [vmem:[%s17670_s23 + $0x178] sm:$0xff]  }
0x1841   : > { %v10381_v16 = vpop.f32.mrb[234].mxu1 }
0x1842   : > { %v14860_v34 = vpop.f32.mrb[235].mxu1  ;;  %v15664_v16 = vld [vmem:[%s17670_s23 + $0x180] sm:$0xff]  }
0x1843   : > { %14796 = vmatpush3.bf16.msra.mxu0 %v15630_v55  ;;  %v15694_v55 = vld [vmem:[%s17674_s20 + $0x10] sm:$0xff]   ;;  %v15665_v34 = vld [vmem:[%s17670_s23 + $0x188] sm:$0xff]  }
0x1844   : > { %14797 = vmatprep.subr.bf16.mxu0 %v15744_v45  ;;  %15008 = vmatpush3.bf16.msra.mxu1 %v15694_v55 }
0x1845   : > { %15009 = vmatprep.subr.bf16.mxu1 %v15744_v45 }
0x1847   : > { %14798 = vmatpush3.bf16.msra.mxu0 %v15631_v29  ;;  %v17443_v43 = vpop.f32.mrb[236].mxu1  ;;  %v15666_v29 = vld [vmem:[%s17670_s23 + $0x190] sm:$0xff]  }
0x1848   : > { %14809 = vmatprep.subr.bf16.mxu0 %v15744_v45  ;;  %v14885_v18 = vpop.f32.mrb[237].mxu1  ;;  %v10536_v57 = vpack.c.bf16 %v17443_v43, %v17443_v43  ;;  %v15668_v43 = vld [vmem:[%s17670_s23 + $0x1a0] sm:$0xff]  }
0x1849   : > { %v10533_v39 = vpop.f32.mrb[238].mxu1  ;;  %v15670_v18 = vld [vmem:[%s17670_s23 + $0x1b0] sm:$0xff]  }
0x184a   : > { %14800 = vmatmul.mubr.bf16.vlgmr.msra.gmra.mrb[52].mxu0 %v9779_v41  ;;  %v14886_v50 = vpop.f32.mrb[239].mxu1  ;;  %v15669_v41 = vld [vmem:[%s17670_s23 + $0x1a8] sm:$0xff]   ;;  %v15671_v39 = vld [vmem:[%s17670_s23 + $0x1b8] sm:$0xff]  }
0x184b   : > { %14810 = vmatpush3.bf16.msra.mxu0 %v15632_v13  ;;  %14825 = vmatprep.mubr.msk.bf16.mxu0 %vm15745_vm2, %v15744_v45  ;;  %v15667_v13 = vld [vmem:[%s17670_s23 + $0x198] sm:$0xff]  }
0x184c   : > { %14811 = vmatprep.subr.bf16.mxu0 %v15744_v45 }
0x184f   : > { %14812 = vmatpush3.bf16.msra.mxu0 %v15633_v44  ;;  %v17462_v59 = vpop.f32.mrb[240].mxu1  ;;  %v15672_v44 = vld [vmem:[%s17670_s23 + $0x1c0] sm:$0xff]  }
0x1850   : > { %14813 = vmatprep.subr.bf16.mxu0 %v15744_v45  ;;  %v14911_v60 = vpop.f32.mrb[241].mxu1  ;;  %v10688_v50 = vpack.c.bf16 %v17462_v59, %v17462_v59  ;;  %v15679_v59 = vld [vmem:[%s17670_s23 + $0x1f8] sm:$0xff]  }
0x1851   : > { %v10685_v62 = vpop.f32.mrb[242].mxu1  ;;  %v15680_v60 = vld [vmem:[%s17670_s23 + $0x200] sm:$0xff]  }
0x1852   : > { %v14912_v0 = vpop.f32.mrb[243].mxu1  ;;  %v15682_v62 = vld [vmem:[%s17670_s23 + $0x210] sm:$0xff]  }
0x1853   : > { %14814 = vmatpush3.bf16.msra.mxu0 %v15634_v46  ;;  %v15673_v46 = vld [vmem:[%s17670_s23 + $0x1c8] sm:$0xff]   ;;  %v15683_v0 = vld [vmem:[%s17670_s23 + $0x218] sm:$0xff]  }
0x1854   : > { %14815 = vmatprep.subr.bf16.mxu0 %v15744_v45 }
0x1857   : > { %14816 = vmatpush3.bf16.msra.mxu0 %v15635_v56  ;;  %v17484_v42 = vpop.f32.mrb[244].mxu1  ;;  %v15674_v56 = vld [vmem:[%s17670_s23 + $0x1d0] sm:$0xff]  }
0x1858   : > { %14817 = vmatprep.subr.bf16.mxu0 %v15744_v45  ;;  %v14937_v19 = vpop.f32.mrb[245].mxu1 }
0x1859   : > { %v10837_v37 = vpop.f32.mrb[246].mxu1 }
0x185a   : > { %v14938_v38 = vpop.f32.mrb[247].mxu1  ;;  %v15696_v37 = vld [vmem:[%s17674_s20 + $0x20] sm:$0xff]  }
0x185b   : > { %14818 = vmatpush3.bf16.msra.mxu0 %v15636_v51  ;;  %v15675_v51 = vld [vmem:[%s17670_s23 + $0x1d8] sm:$0xff]   ;;  %v15697_v38 = vld [vmem:[%s17674_s20 + $0x28] sm:$0xff]  }
0x185c   : > { %14819 = vmatprep.subr.bf16.mxu0 %v15744_v45 }
0x185f   : > { %14820 = vmatpush3.bf16.msra.mxu0 %v15637_v40  ;;  %v17506_v10 = vpop.f32.mrb[248].mxu1  ;;  %v15676_v40 = vld [vmem:[%s17670_s23 + $0x1e0] sm:$0xff]  }
0x1860   : > { %14821 = vmatprep.subr.bf16.mxu0 %v15744_v45  ;;  %v14963_v2 = vpop.f32.mrb[249].mxu1 }
0x1861   : > { %v10989_v30 = vpop.f32.mrb[250].mxu1 }
0x1862   : > { %v14964_v3 = vpop.f32.mrb[251].mxu1 }
0x1863   : > { %14822 = vmatpush3.bf16.msra.mxu0 %v15638_v54  ;;  %v15677_v54 = vld [vmem:[%s17670_s23 + $0x1e8] sm:$0xff]  }
0x1864   : > { %14823 = vmatprep.subr.bf16.mxu0 %v15744_v45 }
0x1867   : > { %14824 = vmatpush3.bf16.msra.mxu0 %v15639_v58  ;;  %v17520_v36 = vpop.f32.mrb[252].mxu1  ;;  %v15678_v58 = vld [vmem:[%s17670_s23 + $0x1f0] sm:$0xff]  }
0x1868   : > { %14835 = vmatprep.subr.bf16.mxu0 %v15744_v45  ;;  %v14989_v47 = vpop.f32.mrb[253].mxu1  ;;  %v11151_v19 = vpack.c.bf16 %v17520_v36, %v17520_v36 }
0x1869   : > { %v11148_v1 = vpop.f32.mrb[254].mxu1 }
0x186a   : > { %14826 = vmatmul.mubr.bf16.vlgmr.msra.gmra.mrb[52].mxu0 %v10080_v6  ;;  %v14990_v48 = vpop.f32.mrb[255].mxu1  ;;  %v10840_v6 = vpack.c.bf16 %v17484_v42, %v17484_v42  ;;  %v15690_v42 = vld [vmem:[%s17675_s7 + $0x10] sm:$0xff]  }
0x186b   : > { %14836 = vmatpush3.bf16.msra.mxu0 %v15640_v61  ;;  %14851 = vmatprep.mubr.msk.bf16.mxu0 %vm15745_vm2, %v15744_v45  ;;  %v15681_v61 = vld [vmem:[%s17670_s23 + $0x208] sm:$0xff]  }
0x186c   : > { %14837 = vmatprep.subr.bf16.mxu0 %v15744_v45 }
0x186f   : > { %14838 = vmatpush3.bf16.msra.mxu0 %v15641_v63  ;;  %v15684_v63 = vld [vmem:[%s17670_s23 + $0x220] sm:$0xff]  }
0x1870   : > { %14839 = vmatprep.subr.bf16.mxu0 %v15744_v45 }
0x1873   : > { %14840 = vmatpush3.bf16.msra.mxu0 %v15642_v5  ;;  %v15685_v5 = vld [vmem:[%s17670_s23 + $0x228] sm:$0xff]  }
0x1874   : > { %14841 = vmatprep.subr.bf16.mxu0 %v15744_v45 }
0x1877   : > { %14842 = vmatpush3.bf16.msra.mxu0 %v15643_v25  ;;  %v15686_v25 = vld [vmem:[%s17670_s23 + $0x230] sm:$0xff]  }
0x1878   : > { %14843 = vmatprep.subr.bf16.mxu0 %v15744_v45 }
0x187b   : > { %14844 = vmatpush3.bf16.msra.mxu0 %v15644_v53  ;;  %v15687_v53 = vld [vmem:[%s17670_s23 + $0x238] sm:$0xff]  }
0x187c   : > { %14845 = vmatprep.subr.bf16.mxu0 %v15744_v45 }
0x187f   : > { %14846 = vmatpush3.bf16.msra.mxu0 %v15645_v4  ;;  %v10992_v4 = vpack.c.bf16 %v17506_v10, %v17506_v10 }
0x1880   : > { %14847 = vmatprep.subr.bf16.mxu0 %v15744_v45 }
0x1883   : > { %14848 = vmatpush3.bf16.msra.mxu0 %v15646_v31  ;;  %v15688_v31 = vld [vmem:[%s17675_s7] sm:$0xff]  }
0x1884   : > { %14849 = vmatprep.subr.bf16.mxu0 %v15744_v45 }
0x1887   : > { %14850 = vmatpush3.bf16.msra.mxu0 %v15647_v9  ;;  %v15689_v9 = vld [vmem:[%s17675_s7 + $0x8] sm:$0xff]  }
0x1888   : > { %14861 = vmatprep.subr.bf16.mxu0 %v15744_v45 }
0x188a   : > { %14852 = vmatmul.mubr.bf16.vlgmr.msra.gmra.mrb[52].mxu0 %v10232_v12  ;;  %v15691_v12 = vld [vmem:[%s17675_s7 + $0x18] sm:$0xff]  }
0x188b   : > { %14862 = vmatpush3.bf16.msra.mxu0 %v15648_v21  ;;  %14877 = vmatprep.mubr.msk.bf16.mxu0 %vm15745_vm2, %v15744_v45  ;;  %v15695_v21 = vld [vmem:[%s17674_s20 + $0x18] sm:$0xff]  }
0x188c   : > { %14863 = vmatprep.subr.bf16.mxu0 %v15744_v45  ;;  %15010 = vmatpush3.bf16.msra.mxu1 %v15695_v21 }
0x188d   : > { %15011 = vmatprep.subr.bf16.mxu1 %v15744_v45 }
0x188f   : > { %14864 = vmatpush3.bf16.msra.mxu0 %v15649_v7  ;;  %v15698_v7 = vld [vmem:[%s17674_s20 + $0x30] sm:$0xff]  }
0x1890   : > { %14865 = vmatprep.subr.bf16.mxu0 %v15744_v45  ;;  %15012 = vmatpush3.bf16.msra.mxu1 %v15696_v37 }
0x1891   : > { %15013 = vmatprep.subr.bf16.mxu1 %v15744_v45 }
0x1893   : > { %14866 = vmatpush3.bf16.msra.mxu0 %v15650_v11  ;;  %v15699_v11 = vld [vmem:[%s17674_s20 + $0x38] sm:$0xff]  }
0x1894   : > { %14867 = vmatprep.subr.bf16.mxu0 %v15744_v45  ;;  %15014 = vmatpush3.bf16.msra.mxu1 %v15697_v38 }
0x1895   : > { %15015 = vmatprep.subr.bf16.mxu1 %v15744_v45 }
0x1897   : > { %14868 = vmatpush3.bf16.msra.mxu0 %v15651_v14  ;;  %v12707_v14 = vld [vmem:[%s17676_s11] ss:$0 sm:$0xff] }
0x1898   : > { %14869 = vmatprep.subr.bf16.mxu0 %v15744_v45  ;;  %15016 = vmatpush3.bf16.msra.mxu1 %v15698_v7 }
0x1899   : > { %15017 = vmatprep.subr.bf16.mxu1 %v15744_v45 }
0x189b   : > { %14870 = vmatpush3.bf16.msra.mxu0 %v15652_v22  ;;  %v12709_v22 = vld [vmem:[%s17677_s15] ss:$0 sm:$0xff] }
0x189c   : > { %14871 = vmatprep.subr.bf16.mxu0 %v15744_v45  ;;  %15018 = vmatpush3.bf16.msra.mxu1 %v15699_v11 }
0x189d   : > { %15023 = vmatprep.subr.bf16.mxu1 %v15744_v45 }
0x189f   : > { %14872 = vmatpush3.bf16.msra.mxu0 %v15653_v24  ;;  %v15043_v24 = vadd.f32 %v12709_v22, %v12707_v14 }
0x18a0   : > { %14873 = vmatprep.subr.bf16.mxu0 %v15744_v45 }
0x18a3   : > { %14874 = vmatpush3.bf16.msra.mxu0 %v15654_v52 }
0x18a4   : > { %14875 = vmatprep.subr.bf16.mxu0 %v15744_v45 }
0x18a7   : > { %14876 = vmatpush3.bf16.msra.mxu0 %v15655_v49 }
0x18a8   : > { %14887 = vmatprep.subr.bf16.mxu0 %v15744_v45 }
0x18aa   : > { %14878 = vmatmul.mubr.bf16.vlgmr.msra.gmra.mrb[52].mxu0 %v10384_v28 }
0x18ab   : > { %14888 = vmatpush3.bf16.msra.mxu0 %v15656_v20  ;;  %14903 = vmatprep.mubr.msk.bf16.mxu0 %vm15745_vm2, %v15744_v45 }
0x18ac   : > { %14889 = vmatprep.subr.bf16.mxu0 %v15744_v45 }
0x18af   : > { %14890 = vmatpush3.bf16.msra.mxu0 %v15657_v15 }
0x18b0   : > { %14891 = vmatprep.subr.bf16.mxu0 %v15744_v45 }
0x18b3   : > { %14892 = vmatpush3.bf16.msra.mxu0 %v15658_v23 }
0x18b4   : > { %14893 = vmatprep.subr.bf16.mxu0 %v15744_v45 }
0x18b7   : > { %14894 = vmatpush3.bf16.msra.mxu0 %v15659_v33 }
0x18b8   : > { %14895 = vmatprep.subr.bf16.mxu0 %v15744_v45 }
0x18bb   : > { %14896 = vmatpush3.bf16.msra.mxu0 %v15660_v27  ;;  %v15700_v27 = vld [vmem:[%s15904_s12] sm:$0xff]  }
0x18bc   : > { %14897 = vmatprep.subr.bf16.mxu0 %v15744_v45 }
0x18bf   : > { %14898 = vmatpush3.bf16.msra.mxu0 %v15661_v35  ;;  %v15702_v35 = vld [vmem:[%s15904_s12 + $0x10] sm:$0xff]  }
0x18c0   : > { %14899 = vmatprep.subr.bf16.mxu0 %v15744_v45 }
0x18c3   : > { %14900 = vmatpush3.bf16.msra.mxu0 %v15662_v17  ;;  %v11263_v17 = vld [vmem:[%s15899_s4] sm:$0x1] }
0x18c4   : > { %14901 = vmatprep.subr.bf16.mxu0 %v15744_v45 }
0x18c7   : > { %14902 = vmatpush3.bf16.msra.mxu0 %v15663_v8 }
0x18c8   : > { %14913 = vmatprep.subr.bf16.mxu0 %v15744_v45 }
0x18ca   : > { %14904 = vmatmul.mubr.bf16.vlgmr.msra.gmra.mrb[52].mxu0 %v10536_v57 }
0x18cb   : > { %14914 = vmatpush3.bf16.msra.mxu0 %v15664_v16  ;;  %14929 = vmatprep.mubr.msk.bf16.mxu0 %vm15745_vm2, %v15744_v45 }
0x18cc   : > { %14915 = vmatprep.subr.bf16.mxu0 %v15744_v45 }
0x18cf   : > { %14916 = vmatpush3.bf16.msra.mxu0 %v15665_v34 }
0x18d0   : > { %14917 = vmatprep.subr.bf16.mxu0 %v15744_v45 }
0x18d3   : > { %14918 = vmatpush3.bf16.msra.mxu0 %v15666_v29 }
0x18d4   : > { %14919 = vmatprep.subr.bf16.mxu0 %v15744_v45 }
0x18d7   : > { %14920 = vmatpush3.bf16.msra.mxu0 %v15667_v13 }
0x18d8   : > { %14921 = vmatprep.subr.bf16.mxu0 %v15744_v45 }
0x18db   : > { %14922 = vmatpush3.bf16.msra.mxu0 %v15668_v43  ;;  %v11362_v43 = vld [vmem:[#allocation2] sm:$0x1] }
0x18dc   : > { %14923 = vmatprep.subr.bf16.mxu0 %v15744_v45 }
0x18df   : > { %14924 = vmatpush3.bf16.msra.mxu0 %v15669_v41 }
0x18e0   : > { %14925 = vmatprep.subr.bf16.mxu0 %v15744_v45 }
0x18e3   : > { %14926 = vmatpush3.bf16.msra.mxu0 %v15670_v18 }
0x18e4   : > { %14927 = vmatprep.subr.bf16.mxu0 %v15744_v45 }
0x18e7   : > { %14928 = vmatpush3.bf16.msra.mxu0 %v15671_v39 }
0x18e8   : > { %14939 = vmatprep.subr.bf16.mxu0 %v15744_v45 }
0x18ea   : > { %14930 = vmatmul.mubr.bf16.vlgmr.msra.gmra.mrb[52].mxu0 %v10688_v50 }
0x18eb   : > { %14940 = vmatpush3.bf16.msra.mxu0 %v15672_v44  ;;  %14955 = vmatprep.mubr.msk.bf16.mxu0 %vm15745_vm2, %v15744_v45 }
0x18ec   : > { %14941 = vmatprep.subr.bf16.mxu0 %v15744_v45 }
0x18ef   : > { %14942 = vmatpush3.bf16.msra.mxu0 %v15673_v46 }
0x18f0   : > { %14943 = vmatprep.subr.bf16.mxu0 %v15744_v45 }
0x18f3   : > { %14944 = vmatpush3.bf16.msra.mxu0 %v15674_v56 }
0x18f4   : > { %14945 = vmatprep.subr.bf16.mxu0 %v15744_v45 }
0x18f7   : > { %14946 = vmatpush3.bf16.msra.mxu0 %v15675_v51 }
0x18f8   : > { %14947 = vmatprep.subr.bf16.mxu0 %v15744_v45 }
0x18fb   : > { %14948 = vmatpush3.bf16.msra.mxu0 %v15676_v40 }
0x18fc   : > { %14949 = vmatprep.subr.bf16.mxu0 %v15744_v45 }
0x18ff   : > { %14950 = vmatpush3.bf16.msra.mxu0 %v15677_v54 }
0x1900   : > { %14951 = vmatprep.subr.bf16.mxu0 %v15744_v45 }
0x1903   : > { %14952 = vmatpush3.bf16.msra.mxu0 %v15678_v58 }
0x1904   : > { %14953 = vmatprep.subr.bf16.mxu0 %v15744_v45 }
0x1907   : > { %14954 = vmatpush3.bf16.msra.mxu0 %v15679_v59 }
0x1908   : > { %14965 = vmatprep.subr.bf16.mxu0 %v15744_v45 }
0x190a   : > { %14956 = vmatmul.mubr.bf16.vlgmr.msra.gmra.mrb[52].mxu0 %v10840_v6 }
0x190b   : > { %14966 = vmatpush3.bf16.msra.mxu0 %v15680_v60  ;;  %14981 = vmatprep.mubr.msk.bf16.mxu0 %vm15745_vm2, %v15744_v45 }
0x190c   : > { %14967 = vmatprep.subr.bf16.mxu0 %v15744_v45 }
0x190f   : > { %14968 = vmatpush3.bf16.msra.mxu0 %v15681_v61 }
0x1910   : > { %14969 = vmatprep.subr.bf16.mxu0 %v15744_v45 }
0x1913   : > { %14970 = vmatpush3.bf16.msra.mxu0 %v15682_v62 }
0x1914   : > { %14971 = vmatprep.subr.bf16.mxu0 %v15744_v45 }
0x1917   : > { %14972 = vmatpush3.bf16.msra.mxu0 %v15683_v0 }
0x1918   : > { %14973 = vmatprep.subr.bf16.mxu0 %v15744_v45 }
0x191b   : > { %14974 = vmatpush3.bf16.msra.mxu0 %v15684_v63 }
0x191c   : > { %14975 = vmatprep.subr.bf16.mxu0 %v15744_v45 }
0x191f   : > { %14976 = vmatpush3.bf16.msra.mxu0 %v15685_v5 }
0x1920   : > { %14977 = vmatprep.subr.bf16.mxu0 %v15744_v45 }
0x1923   : > { %14978 = vmatpush3.bf16.msra.mxu0 %v15686_v25 }
0x1924   : > { %14979 = vmatprep.subr.bf16.mxu0 %v15744_v45 }
0x1927   : > { %14980 = vmatpush3.bf16.msra.mxu0 %v15687_v53 }
0x1928   : > { %14991 = vmatprep.subr.bf16.mxu0 %v15744_v45 }
0x192a   : > { %14982 = vmatmul.mubr.bf16.vlgmr.msra.gmra.mrb[52].mxu0 %v10992_v4 }
0x192b   : > { %14992 = vmatpush3.bf16.msra.mxu0 %v15688_v31  ;;  %14999 = vmatprep.mubr.msk.bf16.mxu0 %vm15745_vm2, %v15744_v45 }
0x192c   : > { %14993 = vmatprep.subr.bf16.mxu0 %v15744_v45 }
0x192f   : > { %14994 = vmatpush3.bf16.msra.mxu0 %v15689_v9 }
0x1930   : > { %14995 = vmatprep.subr.bf16.mxu0 %v15744_v45 }
0x1933   : > { %14996 = vmatpush3.bf16.msra.mxu0 %v15690_v42 }
0x1934   : > { %14997 = vmatprep.subr.bf16.mxu0 %v15744_v45 }
0x1937   : > { %14998 = vmatpush3.bf16.msra.mxu0 %v15691_v12 }
0x193a   : > { %15000 = vmatmul.mubr.msk.bf16.vlgmr.msra.gmra.mrb[52].mxu0 %vm2436_vm1, %v11151_v19 }
0x1a0d   : > { %v11228_v52 = vpop.f32.mrb[52].mxu0 }
0x1a0e   : > { %v15044_v49 = vadd.f32 %v15043_v24, %v11228_v52  ;;  %v15001_v10 = vpop.f32.mrb[53].mxu0 }
0x1a0f   : > { %v11231_v28 = vpop.f32.mrb[54].mxu0 }
0x1a10   : > { %v11235_v2 = vmax.f32 %v15044_v49, 0.0  ;;  %v15002_v20 = vpop.f32.mrb[55].mxu0 }
0x1a12   : > { %v11237_v30 = vsel %vm11236_vm6, %v11235_v2, 0.0 }
0x1a13   : > { %v11238_v3 = vrot.slane %v11237_v30, 4 }
0x1a15   : > { %v11239_v15 = vadd.f32 %v11238_v3, %v11237_v30 }
0x1a17   : > { %v11240_v23 = vrot.slane %v11239_v15, 2 }
0x1a19   : > { %v11241_v33 = vadd.f32 %v11240_v23, %v11239_v15 }
0x1a1b   : > { %v11242_v36 = vrot.slane %v11241_v33, 1 }
0x1a1d   : > { %v11243_v47 = vadd.f32 %v11242_v36, %v11241_v33 }
0x1a1f   : > { %v11245_v1 = vmul.f32 0.25, %v11243_v47 }
0x1a21   : > { %v11246_v48 = vpack.c.bf16 %v11245_v1, %v11245_v1 }
0x1a23   : > { %15020 = vmatmul.mubr.bf16.vlgmr.msra.gmra.mrb[0].mxu1 %v11246_v48 }
0x1a24   : > { %15024 = vmatpush3.bf16.msra.mxu1 %v15700_v27  ;;  %15031 = vmatprep.mubr.msk.bf16.mxu1 %vm15745_vm2, %v15744_v45 }
0x1a25   : > { %15025 = vmatprep.subr.bf16.mxu1 %v15744_v45 }
0x1a28   : > { %15026 = vmatpush3.bf16.msra.mxu1 %v15701_v32 }
0x1a29   : > { %15027 = vmatprep.subr.bf16.mxu1 %v15744_v45 }
0x1a2c   : > { %15028 = vmatpush3.bf16.msra.mxu1 %v15702_v35 }
0x1a2d   : > { %15029 = vmatprep.subr.bf16.mxu1 %v15744_v45 }
0x1a30   : > { %15030 = vmatpush3.bf16.msra.mxu1 %v15703_v26 }
0x1af6   : > { %v11346_v55 = vpop.f32.mrb[0].mxu1 }
0x1af7   : > { %v11347_v8 = vadd.f32 %v11346_v55, %v11263_v17  ;;  %v15021_v57 = vpop.f32.mrb[1].mxu1 }
0x1af8   : > { %v11349_v16 = vpop.f32.mrb[2].mxu1 }
0x1af9   : > { %v11352_v34 = vmax.f32 %v11347_v8, 0.0  ;;  %v15022_v29 = vpop.f32.mrb[3].mxu1 }
0x1afb   : > { %v11353_v13 = vpack.c.bf16 %v11352_v34, %v11352_v34 }
0x1afd   : > { %15032 = vmatmul.mubr.msk.bf16.vlgmr.msra.gmra.mrb[4].mxu1 %vm2436_vm1, %v11353_v13 }
0x1bd0   : > { %v11424_v41 = vpop.f32.mrb[4].mxu1 }
0x1bd1   : > { %v11425_v18 = vadd.f32 %v11424_v41, %v11362_v43  ;;  %v15033_v39 = vpop.f32.mrb[5].mxu1 }
0x1bd2   : > { %v11427_v50 = vpop.f32.mrb[6].mxu1 }
0x1bd3   : > { %11431 = vst.msk [vmem:[%s984_s22] sm:$0x1] %vm11430_vm7, %v11425_v18  ;;  %v15034_v45 = vpop.f32.mrb[7].mxu1 }
0x1bd4 PF: > { %s77_s28 = sadd.s32 1, %s15710_s28  }
0x1bd5   : > { %p74_p4 = scmp.ge.s32.totalorder %s77_s28, 4  }
0x1bd7   :  { %76 = sbr.rel (!%p74_p4) target bundleno = 63 (0x3f), region = 314 }

</bundles_post_ra>
